<compile_context>
chip_gen: v5e
topology: v5e:2x2
jax: 0.10.0
libtpu: 0.0.40
codegen_flags: <defaults>
</compile_context>

<pallas_src>
import math

import jax
import jax.numpy as jnp
from jax import lax
from jax.experimental import pallas as pl
from jax.experimental.pallas import tpu as pltpu

_INV_SQRT2 = 1.0 / math.sqrt(2.0)


def _round_up(n, m):
    return ((n + m - 1) // m) * m


def _make_kernel(approximate_gelu):
    def kernel(x_ref, w1_ref, b1_ref, w2_ref, b2_ref, o_ref):
        # In-kernel cast of the activation tile to bf16 for the MXU
        # (avoids a separate HBM read+write cast pass in the wrapper).
        x_bf16 = x_ref[...].astype(jnp.bfloat16)
        # reg = x @ W1 + b1   (bf16 MXU inputs, f32 accumulation, f32 bias add)
        reg = jnp.dot(x_bf16, w1_ref[...],
                      preferred_element_type=jnp.float32) + b1_ref[...]
        if approximate_gelu:
            # tanh GELU -> EUP slot (cheap filler); use only if erf parity is
            # not required.
            h = jax.nn.gelu(reg, approximate=True)
        else:
            # Exact erf GELU, matching torch.nn.GELU() default, in f32.
            h = 0.5 * reg * (1.0 + lax.erf(reg * _INV_SQRT2))
        # fc = gelu(reg) @ W2 ; fold the b2 bias and the residual into one add.
        out = jnp.dot(h.astype(w2_ref.dtype), w2_ref[...],
                      preferred_element_type=jnp.float32) + (reg + b2_ref[...])
        # TODO(synk): dropout is identity in eval/inference mode, so it is
        # omitted (training mode would need pltpu.prng_seed / prng_random_bits
        # masking).
        o_ref[...] = out.astype(o_ref.dtype)
    return kernel


def prepare_regressor_params(w1, b1, w2, b2):
    """One-time prep: zero-pad minor dims to multiples of 128 and pre-cast the
    MXU operands to bf16. Do this at model init, NOT per forward call."""
    D, G = w1.shape
    Dp = _round_up(D, 128)
    Gp = _round_up(G, 128)
    w1p = jnp.pad(w1, ((0, Dp - D), (0, Gp - G))).astype(jnp.bfloat16)
    w2p = jnp.pad(w2, ((0, Gp - G), (0, Gp - G))).astype(jnp.bfloat16)
    b1p = jnp.pad(b1, (0, Gp - G)).reshape(1, Gp).astype(jnp.float32)
    b2p = jnp.pad(b2, (0, Gp - G)).reshape(1, Gp).astype(jnp.float32)
    return dict(w1p=w1p, b1p=b1p, w2p=w2p, b2p=b2p, D=D, G=G, Dp=Dp, Gp=Gp)


def _build_pallas_fn(kernel, bb, Bp, Dp, Gp, out_dtype, single_buffer_resident):
    # Constant-index_map (resident) operands can be single-buffered: they are
    # fetched once and reused across all grid steps.
    resident_kw = dict(pipeline_mode=pl.Buffered(1)) if single_buffer_resident else {}
    return pl.pallas_call(
        kernel,
        out_shape=jax.ShapeDtypeStruct((Bp, Gp), out_dtype),
        grid_spec=pltpu.PrefetchScalarGridSpec(
            num_scalar_prefetch=0,
            grid=(Bp // bb,),
            in_specs=[
                pl.BlockSpec((bb, Dp), lambda i: (i, 0)),                 # x tile (pipelined)
                pl.BlockSpec((Dp, Gp), lambda i: (0, 0), **resident_kw),  # W1 (resident)
                pl.BlockSpec((1, Gp), lambda i: (0, 0), **resident_kw),   # b1 (resident)
                pl.BlockSpec((Gp, Gp), lambda i: (0, 0), **resident_kw),  # W2 (resident)
                pl.BlockSpec((1, Gp), lambda i: (0, 0), **resident_kw),   # b2 (resident)
            ],
            out_specs=pl.BlockSpec((bb, Gp), lambda i: (i, 0)),
        ),
        compiler_params=pltpu.CompilerParams(
            # v7x megacore splits batch tiles across the 2 TensorCores.
            dimension_semantics=("parallel",),
            # No vmem_limit_bytes: footprint is ~1-2 MiB, default limit is fine
            # on every generation (and 64 MiB would be all of v7x VMEM).
        ),
    )


def regressor_forward(x, params, *, block_b=128, out_dtype=None,
                      approximate_gelu=False, unpad_output=True):
    """x: [B, D] (any float dtype); params from prepare_regressor_params.

    Returns [B, G] if unpad_output else the lane-dense padded [Bp, Gp] slab
    (padded rows/cols are exactly zero), so downstream consumers can keep the
    128-aligned layout and avoid an extra HBM slicing pass.

    Tuning: block_b=128 keeps >=2 grid steps at B=256 (good for v7x megacore);
    on single-TC v5e/v6e prefer block_b=256-512 for larger B to amortize the
    ~0.35us/step grid overhead and fill the v6e 256-row MXU.
    """
    B, D = x.shape
    assert D == params["D"], "x feature dim does not match prepared params"
    Dp, Gp, G = params["Dp"], params["Gp"], params["G"]
    out_dtype = x.dtype if out_dtype is None else out_dtype

    bb = min(block_b, _round_up(B, 8))
    Bp = _round_up(B, bb)

    xp = x
    if (Bp, Dp) != (B, D):
        # Only emitted when B/D are not already tile-aligned (D=256 is).
        xp = jnp.pad(x, ((0, Bp - B), (0, Dp - D)))

    kernel = _make_kernel(approximate_gelu)
    args = (xp, params["w1p"], params["b1p"], params["w2p"], params["b2p"])
    try:
        out = _build_pallas_fn(kernel, bb, Bp, Dp, Gp, out_dtype,
                               single_buffer_resident=True)(*args)
    except Exception:
        # Fallback if this Pallas build rejects pl.Buffered(1) on resident ops.
        out = _build_pallas_fn(kernel, bb, Bp, Dp, Gp, out_dtype,
                               single_buffer_resident=False)(*args)

    if unpad_output:
        return out[:B, :G]
    return out


def reference_forward_f32(x, w1, b1, w2, b2):
    reg = x @ w1 + b1
    h = jax.nn.gelu(reg, approximate=False)
    fc = h @ w2 + b2
    return fc + reg


def reference_forward_bf16(x, w1, b1, w2, b2):
    # Same bf16-in / f32-accumulate math the kernel performs.
    reg = jnp.dot(x.astype(jnp.bfloat16), w1.astype(jnp.bfloat16),
                  preferred_element_type=jnp.float32) + b1
    h = jax.nn.gelu(reg, approximate=False)
    fc = jnp.dot(h.astype(jnp.bfloat16), w2.astype(jnp.bfloat16),
                 preferred_element_type=jnp.float32) + b2
    return fc + reg


if __name__ == "__main__":
    # Module-default feature shapes (embedding_dim=256, num_genes=280);
    # B=256 gives 2 parallel grid steps with block_b=128.
    B = 256          # batch
    D = 256          # embedding_dim (already lane-aligned -> no x padding)
    G = 280          # num_genes (pads to 384 lanes in the prepared params)

    key = jax.random.PRNGKey(0)
    kx, kw1, kb1, kw2, kb2 = jax.random.split(key, 5)

    # Deterministic parameter init (PyTorch-Linear-style uniform bounds).
    lim1 = 1.0 / math.sqrt(D)
    lim2 = 1.0 / math.sqrt(G)
    x = jax.random.normal(kx, (B, D), dtype=jnp.float32)
    w1 = jax.random.uniform(kw1, (D, G), minval=-lim1, maxval=lim1,
                            dtype=jnp.float32)
    b1 = jax.random.uniform(kb1, (G,), minval=-lim1, maxval=lim1,
                            dtype=jnp.float32)
    w2 = jax.random.uniform(kw2, (G, G), minval=-lim2, maxval=lim2,
                            dtype=jnp.float32)
    b2 = jax.random.uniform(kb2, (G,), minval=-lim2, maxval=lim2,
                            dtype=jnp.float32)

    # One-time weight prep (done at "model init", outside the hot path).
    params = prepare_regressor_params(w1, b1, w2, b2)

    # Hot path: padded output kept (no trailing [:B,:G] HBM slice in the op).
    out_padded = regressor_forward(x, params, unpad_output=False)
    out_padded = jax.block_until_ready(out_padded)
    assert out_padded.shape == (B, _round_up(G, 128))

    # Test harness only: slice the valid region for comparison.
    out = out_padded[:B, :G]
    assert out.shape == (B, G)

    # Tight check against a reference doing the identical bf16/f32-acc math.
    ref_bf16 = reference_forward_bf16(x, w1, b1, w2, b2)
    assert jnp.allclose(out, ref_bf16, atol=2e-3, rtol=2e-3), \
        "mismatch vs bf16-matmul reference"

    # Looser sanity check against the pure-f32 PyTorch-equivalent reference
    # (difference is only the bf16 rounding of the MXU inputs).
    ref_f32 = reference_forward_f32(x, w1, b1, w2, b2)
    assert jnp.allclose(out, ref_f32, atol=5e-2, rtol=5e-2), \
        "mismatch vs f32 reference"

    # Padded lanes/rows must be exactly zero (so padding can flow downstream).
    assert jnp.all(out_padded[:, G:] == 0.0), "padded output lanes not zero"

    print("KERNEL_OK")
</pallas_src>

<mosaic_0001>
module attributes {stable_mosaic.version = 11 : i64} {
  func.func @kernel(%arg0: i32, %arg1: memref<128x256xf32, #tpu.memory_space<vmem>>, %arg2: memref<256x384xbf16, #tpu.memory_space<vmem>>, %arg3: memref<1x384xf32, #tpu.memory_space<vmem>>, %arg4: memref<384x384xbf16, #tpu.memory_space<vmem>>, %arg5: memref<1x384xf32, #tpu.memory_space<vmem>>, %arg6: memref<128x384xf32, #tpu.memory_space<vmem>>) attributes {dimension_semantics = [#tpu.dimension_semantics<parallel>], iteration_bounds = array<i64: 2>, scalar_prefetch = 0 : i64, scratch_operands = 0 : i64, tpu.core_type = #tpu.core_type<tc>, window_params = [{transform_indices = @transform_0, window_bounds = array<i64: 128, 256>}, {pipeline_mode = #tpu.pipeline_mode<synchronous>, transform_indices = @transform_1, window_bounds = array<i64: 256, 384>}, {pipeline_mode = #tpu.pipeline_mode<synchronous>, transform_indices = @transform_2, window_bounds = array<i64: 1, 384>}, {pipeline_mode = #tpu.pipeline_mode<synchronous>, transform_indices = @transform_3, window_bounds = array<i64: 384, 384>}, {pipeline_mode = #tpu.pipeline_mode<synchronous>, transform_indices = @transform_4, window_bounds = array<i64: 1, 384>}, {transform_indices = @transform_5, window_bounds = array<i64: 128, 384>}]} {
    %c0 = arith.constant 0 : index
    %c0_0 = arith.constant 0 : index
    %0 = vector.load %arg1[%c0, %c0_0] : memref<128x256xf32, #tpu.memory_space<vmem>>, vector<128x256xf32>
    %1 = arith.truncf %0 : vector<128x256xf32> to vector<128x256xbf16>
    %c0_1 = arith.constant 0 : index
    %c0_2 = arith.constant 0 : index
    %2 = vector.load %arg2[%c0_1, %c0_2] : memref<256x384xbf16, #tpu.memory_space<vmem>>, vector<256x384xbf16>
    %cst = arith.constant dense<0.000000e+00> : vector<128x384xf32>
    %3 = tpu.matmul %1, %2, %cst {dimension_numbers = #tpu.dot_dimension_numbers<[1], [0], [0], [1], [0, 0, 1, 1], [], []>} : vector<128x256xbf16>, vector<256x384xbf16>, vector<128x384xf32> -> vector<128x384xf32>
    %c0_3 = arith.constant 0 : index
    %c0_4 = arith.constant 0 : index
    %4 = vector.load %arg3[%c0_3, %c0_4] : memref<1x384xf32, #tpu.memory_space<vmem>>, vector<1x384xf32>
    %5 = vector.broadcast %4 : vector<1x384xf32> to vector<128x384xf32>
    %6 = arith.addf %3, %5 : vector<128x384xf32>
    %cst_5 = arith.constant 5.000000e-01 : f32
    %7 = vector.broadcast %cst_5 : f32 to vector<128x384xf32>
    %8 = arith.mulf %7, %6 : vector<128x384xf32>
    %cst_6 = arith.constant 0.707106769 : f32
    %9 = vector.broadcast %cst_6 : f32 to vector<128x384xf32>
    %10 = arith.mulf %6, %9 : vector<128x384xf32>
    %11 = math.erf %10 : vector<128x384xf32>
    %cst_7 = arith.constant 1.000000e+00 : f32
    %12 = vector.broadcast %cst_7 : f32 to vector<128x384xf32>
    %13 = arith.addf %12, %11 : vector<128x384xf32>
    %14 = arith.mulf %8, %13 : vector<128x384xf32>
    %15 = arith.truncf %14 : vector<128x384xf32> to vector<128x384xbf16>
    %c0_8 = arith.constant 0 : index
    %c0_9 = arith.constant 0 : index
    %16 = vector.load %arg4[%c0_8, %c0_9] : memref<384x384xbf16, #tpu.memory_space<vmem>>, vector<384x384xbf16>
    %cst_10 = arith.constant dense<0.000000e+00> : vector<128x384xf32>
    %17 = tpu.matmul %15, %16, %cst_10 {dimension_numbers = #tpu.dot_dimension_numbers<[1], [0], [0], [1], [0, 0, 1, 1], [], []>} : vector<128x384xbf16>, vector<384x384xbf16>, vector<128x384xf32> -> vector<128x384xf32>
    %c0_11 = arith.constant 0 : index
    %c0_12 = arith.constant 0 : index
    %18 = vector.load %arg5[%c0_11, %c0_12] : memref<1x384xf32, #tpu.memory_space<vmem>>, vector<1x384xf32>
    %19 = vector.broadcast %18 : vector<1x384xf32> to vector<128x384xf32>
    %20 = arith.addf %6, %19 : vector<128x384xf32>
    %21 = arith.addf %17, %20 : vector<128x384xf32>
    %c0_13 = arith.constant 0 : index
    %c0_14 = arith.constant 0 : index
    %22 = vector.load %arg6[%c0_13, %c0_14] : memref<128x384xf32, #tpu.memory_space<vmem>>, vector<128x384xf32>
    tpu.vector_store %arg6[%c0_13, %c0_14], %21 {strides = array<i32>} : memref<128x384xf32, #tpu.memory_space<vmem>>, vector<128x384xf32>,
    return
  }
  func.func @transform_0(%arg0: i32) -> (i32, i32) {
    %c0_i32 = arith.constant 0 : i32
    %c0_i32_0 = arith.constant 0 : i32
    return %arg0, %c0_i32 : i32, i32
  }
  func.func @transform_1(%arg0: i32) -> (i32, i32) {
    %c0_i32 = arith.constant 0 : i32
    %c0_i32_0 = arith.constant 0 : i32
    %c0_i32_1 = arith.constant 0 : i32
    return %c0_i32, %c0_i32_0 : i32, i32
  }
  func.func @transform_2(%arg0: i32) -> (i32, i32) {
    %c0_i32 = arith.constant 0 : i32
    %c0_i32_0 = arith.constant 0 : i32
    %c0_i32_1 = arith.constant 0 : i32
    return %c0_i32, %c0_i32_0 : i32, i32
  }
  func.func @transform_3(%arg0: i32) -> (i32, i32) {
    %c0_i32 = arith.constant 0 : i32
    %c0_i32_0 = arith.constant 0 : i32
    %c0_i32_1 = arith.constant 0 : i32
    return %c0_i32, %c0_i32_0 : i32, i32
  }
  func.func @transform_4(%arg0: i32) -> (i32, i32) {
    %c0_i32 = arith.constant 0 : i32
    %c0_i32_0 = arith.constant 0 : i32
    %c0_i32_1 = arith.constant 0 : i32
    return %c0_i32, %c0_i32_0 : i32, i32
  }
  func.func @transform_5(%arg0: i32) -> (i32, i32) {
    %c0_i32 = arith.constant 0 : i32
    %c0_i32_0 = arith.constant 0 : i32
    return %arg0, %c0_i32 : i32, i32
  }
}

module attributes {stable_mosaic.version = 11 : i64} {
  func.func @kernel(%arg0: i32, %arg1: memref<128x256xf32, #tpu.memory_space<vmem>>, %arg2: memref<256x384xbf16, #tpu.memory_space<vmem>>, %arg3: memref<1x384xf32, #tpu.memory_space<vmem>>, %arg4: memref<384x384xbf16, #tpu.memory_space<vmem>>, %arg5: memref<1x384xf32, #tpu.memory_space<vmem>>, %arg6: memref<128x384xf32, #tpu.memory_space<vmem>>) attributes {dimension_semantics = [#tpu.dimension_semantics<parallel>], iteration_bounds = array<i64: 2>, scalar_prefetch = 0 : i64, scratch_operands = 0 : i64, tpu.core_type = #tpu.core_type<tc>, window_params = [{transform_indices = @transform_0, window_bounds = array<i64: 128, 256>}, {pipeline_mode = #tpu.pipeline_mode<synchronous>, transform_indices = @transform_1, window_bounds = array<i64: 256, 384>}, {pipeline_mode = #tpu.pipeline_mode<synchronous>, transform_indices = @transform_2, window_bounds = array<i64: 1, 384>}, {pipeline_mode = #tpu.pipeline_mode<synchronous>, transform_indices = @transform_3, window_bounds = array<i64: 384, 384>}, {pipeline_mode = #tpu.pipeline_mode<synchronous>, transform_indices = @transform_4, window_bounds = array<i64: 1, 384>}, {transform_indices = @transform_5, window_bounds = array<i64: 128, 384>}]} {
    %c0 = arith.constant 0 : index
    %c0_0 = arith.constant 0 : index
    %0 = vector.load %arg1[%c0, %c0_0] : memref<128x256xf32, #tpu.memory_space<vmem>>, vector<128x256xf32>
    %1 = arith.truncf %0 : vector<128x256xf32> to vector<128x256xbf16>
    %c0_1 = arith.constant 0 : index
    %c0_2 = arith.constant 0 : index
    %2 = vector.load %arg2[%c0_1, %c0_2] : memref<256x384xbf16, #tpu.memory_space<vmem>>, vector<256x384xbf16>
    %cst = arith.constant dense<0.000000e+00> : vector<128x384xf32>
    %3 = tpu.matmul %1, %2, %cst {dimension_numbers = #tpu.dot_dimension_numbers<[1], [0], [0], [1], [0, 0, 1, 1], [], []>} : vector<128x256xbf16>, vector<256x384xbf16>, vector<128x384xf32> -> vector<128x384xf32>
    %c0_3 = arith.constant 0 : index
    %c0_4 = arith.constant 0 : index
    %4 = vector.load %arg3[%c0_3, %c0_4] : memref<1x384xf32, #tpu.memory_space<vmem>>, vector<1x384xf32>
    %5 = vector.broadcast %4 : vector<1x384xf32> to vector<128x384xf32>
    %6 = arith.addf %3, %5 : vector<128x384xf32>
    %cst_5 = arith.constant 5.000000e-01 : f32
    %7 = vector.broadcast %cst_5 : f32 to vector<128x384xf32>
    %8 = arith.mulf %7, %6 : vector<128x384xf32>
    %cst_6 = arith.constant 0.707106769 : f32
    %9 = vector.broadcast %cst_6 : f32 to vector<128x384xf32>
    %10 = arith.mulf %6, %9 : vector<128x384xf32>
    %11 = math.erf %10 : vector<128x384xf32>
    %cst_7 = arith.constant 1.000000e+00 : f32
    %12 = vector.broadcast %cst_7 : f32 to vector<128x384xf32>
    %13 = arith.addf %12, %11 : vector<128x384xf32>
    %14 = arith.mulf %8, %13 : vector<128x384xf32>
    %15 = arith.truncf %14 : vector<128x384xf32> to vector<128x384xbf16>
    %c0_8 = arith.constant 0 : index
    %c0_9 = arith.constant 0 : index
    %16 = vector.load %arg4[%c0_8, %c0_9] : memref<384x384xbf16, #tpu.memory_space<vmem>>, vector<384x384xbf16>
    %cst_10 = arith.constant dense<0.000000e+00> : vector<128x384xf32>
    %17 = tpu.matmul %15, %16, %cst_10 {dimension_numbers = #tpu.dot_dimension_numbers<[1], [0], [0], [1], [0, 0, 1, 1], [], []>} : vector<128x384xbf16>, vector<384x384xbf16>, vector<128x384xf32> -> vector<128x384xf32>
    %c0_11 = arith.constant 0 : index
    %c0_12 = arith.constant 0 : index
    %18 = vector.load %arg5[%c0_11, %c0_12] : memref<1x384xf32, #tpu.memory_space<vmem>>, vector<1x384xf32>
    %19 = vector.broadcast %18 : vector<1x384xf32> to vector<128x384xf32>
    %20 = arith.addf %6, %19 : vector<128x384xf32>
    %21 = arith.addf %17, %20 : vector<128x384xf32>
    %c0_13 = arith.constant 0 : index
    %c0_14 = arith.constant 0 : index
    %22 = vector.load %arg6[%c0_13, %c0_14] : memref<128x384xf32, #tpu.memory_space<vmem>>, vector<128x384xf32>
    tpu.vector_store %arg6[%c0_13, %c0_14], %21 {strides = array<i32>} : memref<128x384xf32, #tpu.memory_space<vmem>>, vector<128x384xf32>,
    return
  }
  func.func @transform_0(%arg0: i32) -> (i32, i32) {
    %c0_i32 = arith.constant 0 : i32
    %c0_i32_0 = arith.constant 0 : i32
    return %arg0, %c0_i32 : i32, i32
  }
  func.func @transform_1(%arg0: i32) -> (i32, i32) {
    %c0_i32 = arith.constant 0 : i32
    %c0_i32_0 = arith.constant 0 : i32
    %c0_i32_1 = arith.constant 0 : i32
    return %c0_i32, %c0_i32_0 : i32, i32
  }
  func.func @transform_2(%arg0: i32) -> (i32, i32) {
    %c0_i32 = arith.constant 0 : i32
    %c0_i32_0 = arith.constant 0 : i32
    %c0_i32_1 = arith.constant 0 : i32
    return %c0_i32, %c0_i32_0 : i32, i32
  }
  func.func @transform_3(%arg0: i32) -> (i32, i32) {
    %c0_i32 = arith.constant 0 : i32
    %c0_i32_0 = arith.constant 0 : i32
    %c0_i32_1 = arith.constant 0 : i32
    return %c0_i32, %c0_i32_0 : i32, i32
  }
  func.func @transform_4(%arg0: i32) -> (i32, i32) {
    %c0_i32 = arith.constant 0 : i32
    %c0_i32_0 = arith.constant 0 : i32
    %c0_i32_1 = arith.constant 0 : i32
    return %c0_i32, %c0_i32_0 : i32, i32
  }
  func.func @transform_5(%arg0: i32) -> (i32, i32) {
    %c0_i32 = arith.constant 0 : i32
    %c0_i32_0 = arith.constant 0 : i32
    return %arg0, %c0_i32 : i32, i32
  }
}

</mosaic_0001>

<bundles_post_ra>
// kernel: tpu_custom_call.1
= control target key start
LH: loop header
LB: loop body
LE: loop exit
PB: predicated region body
PF: predicated region fallthrough
CT: control target
= control target key end

     0   :  { %10 = vsyncpa [#allocation3], 0  ;;  %s8370_s0 = inlined_call_operand.hbm [shape: f32[256,256], index: 0, kind: input, shape index: {}]   ;;  %s8371_s1 = inlined_call_operand.hbm [shape: bf16[256,384], index: 1, kind: input, shape index: {}]   ;;  %s8372_s2 = inlined_call_operand.hbm [shape: f32[1,384], index: 2, kind: input, shape index: {}]   ;;  %s8373_s3 = inlined_call_operand.hbm [shape: bf16[384,384], index: 3, kind: input, shape index: {}]   ;;  %s8374_s4 = inlined_call_operand.vmem [shape: f32[1,384], index: 4, kind: input, shape index: {}]   ;;  %s8375_s5 = inlined_call_operand.hbm [shape: f32[256,384], index: 5, kind: output, shape index: {}]  }
   0x1   :  { %12 = vsyncpa [#allocation3 + $0x1], 0 }
   0x2   :  { %13 = vsyncpa [#allocation6], 0 }
   0x3   :  { %14 = vsyncpa [#allocation9], 0 }
   0x4   :  { %15 = vsyncpa [#allocation4], 0 }
   0x5   :  { %17 = vsyncpa [#allocation4 + $0x1], 0  ;;  %s5356_s18 = smov 0   ;;  %s5358_s19 = smov 0  }
   0x6   :  { %s5360_s20 = smov 0   ;;  %s5362_s21 = smov 0  }
   0x7 LB: > { %s5377_s22 = sadd.s32 4294967295, %s5315_s21   ;;  %s4246_s23 = sadd.s32 4294967294, %s5315_s21   ;;  %s5315_s21 = sphi %s5362_s21, %s8877_s21   ;;  %s5311_s20 = sphi %s5360_s20, %s8876_s20   ;;  %s5307_s19 = sphi %s5358_s19, %s8875_s19   ;;  %s5303_s18 = sphi %s5356_s18, %s8874_s18  }
   0x8   : > { %p43_p0 = scmp.ne.s32.totalorder %s5307_s19, %s5303_s18  ;;  %p44_p1 = scmp.eq.s32.totalorder %s5377_s22, 0 }
   0x9   : > { %p151_p2 = scmp.eq.s32.totalorder %s5377_s22, 1  ;;  %p157_p3 = scmp.eq.s32.totalorder %s4246_s23, 1 }
   0xa   : > { %p5386_p4 = por %p44_p1, %p43_p0  ;;  %p4247_p5 = scmp.ge.s32.totalorder %s5315_s21, 1 }
   0xb   : > { %p5391_p6 = por %p157_p3, %p43_p0  ;;  %p164_p7 = scmp.lt.s32.totalorder %s5315_s21, 3 }
   0xc   : > { %s175_s28 = sshll.u32 %s8371_s1, 4  ;;  %s5317_s30 = smov [#allocation5]   ;;  %s176_s28 = int_to_ptr.hbm [resolvable:$true] %s175_s28 }
   0xd   : > { %p5399_p8 = pnand %p4247_p5, %p164_p7  ;;  %s177_s6 = sshll.u32 %s5317_s30, 4  ;;  %s178_s6 = int_to_ptr.vmem [resolvable:$true] %s177_s6 }
   0xe   : > { %s190_s10 = sshll.u32 %s8372_s2, 4  ;;  %s5318_s11 = smov 192   ;;  %s191_s10 = int_to_ptr.hbm [resolvable:$true] %s190_s10 }
   0xf   : > { %p4958_p9 = pneg %p5399_p8  ;;  %s5319_s12 = smov 12  }
  0x10   : > { %s5320_s13 = smov [#allocation7]   ;;  %s201_s17 = sshll.u32 %s8373_s3, 4  ;;  %s202_s17 = int_to_ptr.hbm [resolvable:$true] %s201_s17 }
  0x11   : > { %p5407_p10 = pnand %p4958_p9, %p44_p1  ;;  %s192_s14 = sshll.u32 %s5320_s13, 4  ;;  %s193_s14 = int_to_ptr.vmem [resolvable:$true] %s192_s14 }
  0x12   : > { %s5321_s23 = smov [#allocation8]   ;;  %s5423_s27 = sadd.s32 1, %s5315_s21  }
  0x13   : > { %4961 = dma.hbm_to_vmem [thread:$0]  (!%p5407_p10), %s176_s28, 6144, %s178_s6, [#allocation6], %s5318_s11, %s5318_s11, %s5319_s12  }
  0x14   : > { %4964 = dma.hbm_to_vmem [thread:$0]  (!%p5407_p10), %s191_s10, 48, %s193_s14, [#allocation6]  }
  0x15   : > { %s203_s26 = sshll.u32 %s5321_s23, 4  ;;  %s27_s28 = ssub.s32 %s5315_s21, %s5423_s27  ;;  %s204_s26 = int_to_ptr.vmem [resolvable:$true] %s203_s26 }
  0x16   : > { %4967 = dma.hbm_to_vmem [thread:$0]  (!%p5407_p10), %s202_s17, 9216, %s204_s26, [#allocation9], %s5318_s11, %s5318_s11, %s5319_s12  }
  0x17   : > { %s30_s30 = sadd.s32 1, %s5311_s20  ;;  %p28_p12 = scmp.eq.s32.totalorder %s27_s28, 0 }
  0x18   : > { %p37_p13 = scmp.ne.s32.totalorder %s5311_s20, %s5307_s19  ;;  %p38_p0 = scmp.eq.s32.totalorder %s5315_s21, 0 }
  0x19   : > { %p4979_p3 = scmp.lt.s32.totalorder %s5315_s21, 2  ;;  %s220_s9 = sand.u32 1, %s5311_s20  }
  0x1a   : > { %s5435_s6 = scalar_select %p28_p12, %s5311_s20, %s30_s30  }
  0x1b   : > { %p39_p5 = por %p38_p0, %p37_p13  ;;  %p5439_p7 = por %p151_p2, %p37_p13 }
  0x1c   : > { %s4795_s10 = sshll.u32 %s5315_s21, 8  ;;  %s4252_s7 = sshll.u32 %s220_s9, 8 }
  0x1d   : > { %s230_s12 = scalar_lea.hbm %s8370_s0, %s4795_s10  ;;  %s224_s15 = scalar_lea.vmem [#allocation2], %s4252_s7 }
  0x1e   : > { %s231_s14 = sshll.u32 %s230_s12, 4  ;;  %s233_s16 = sshll.u32 %s224_s15, 4  ;;  %s232_s14 = int_to_ptr.hbm [resolvable:$true] %s231_s14  ;;  %s234_s16 = int_to_ptr.vmem [resolvable:$true] %s233_s16 }
  0x1f   : > { %p5450_p9 = pnand %p4979_p3, %p39_p5  ;;  %s221_s23 = scalar_lea.sflag [#allocation3], %s220_s9 }
  0x20   : > { %s5211_s26 = sshra.s32 %s232_s14, 4  ;;  %s5218_s7 = scalar_lea.hbm %s8370_s0, 512  ;;  %s5212_s26 = int_to_ptr.hbm [resolvable:$true] %s5211_s26 }
  0x21   : > { %s5213_s28 = scalar_lea.hbm %s5212_s26, 256  ;;  %p5215_p10 = pneg %p5450_p9 }
  0x22   : > { %p5214_p2 = scmp.ne.s32.totalorder %s5212_s26, %s5213_s28  ;;  %p5219_p0 = scmp.lt.s32.totalorder %s5212_s26, %s8370_s0 }
  0x23   : > { %p5220_p3 = scmp.lt.s32.totalorder %s5218_s7, %s5213_s28 }
  0x24   : > { %p5216_p12 = pnand %p5215_p10, %p5214_p2 }
  0x25   : > { %p5221_p5 = por %p5220_p3, %p5219_p0 }
  0x26   : > { %p5217_p13 = pneg %p5216_p12 }
  0x28   : > { %p5222_p11 = pnand %p5221_p5, %p5217_p13 }
  0x2a   : > { %5225 = shalt.err (!%p5222_p11)
}
  0x2b   : > { %s5322_s9 = smov 256   ;;  %s5323_s12 = smov 16  }
  0x2c   : > { %4971 = dma.hbm_to_vmem [thread:$0]  (!%p5450_p9), %s232_s14, 4096, %s234_s16, %s221_s23, %s5322_s9, %s5322_s9, %s5323_s12  }
  0x2d   : > { %245 = sbr.rel (%p5399_p8) target bundleno = 1121 (0x461), region = 40 }
  0x32   : > { %s5467_s15 = sand.u32 1, %s5307_s19  }
  0x33   : > { %s4257_s30 = sshll.u32 %s5467_s15, 8  ;;  %s248_s26 = scalar_lea.sflag [#allocation3], %s5467_s15 }
  0x34   : > { %s5471_s28 = scalar_lea.vmem [#allocation2], %s4257_s30 }
  0x35   : > { %5286 = dma.done.wait (%p5386_p4), %s248_s26, 4096  }
  0x36   : > { %5288 = vsyncadd (%p5386_p4), %s248_s26, 4294963200 }
  0x37   : > { %5290 = dma.done.wait (%p44_p1), [#allocation6], 6192  }
  0x38   : > { %5292 = vsyncadd (%p44_p1), [#allocation6], 4294961104 }
  0x39   : > { %5294 = dma.done.wait (%p44_p1), [#allocation9], 9216  }
  0x3a   : > { %5296 = vsyncadd (%p44_p1), [#allocation9], 4294958080  ;;  %v4347_v0 = vld [vmem:[#allocation5 + $0xa8] sm:$0xf]  ;;  %v4818_v1 = vld [vmem:[#allocation5 + $0xb0] sm:$0xf0] }
  0x3b   : > { %v4443_v2 = vld [vmem:[#allocation5 + $0x168] sm:$0xf]  ;;  %v4348_v3 = vor.u32 %v4818_v1, %v4347_v0  ;;  %v4842_v4 = vld [vmem:[#allocation5 + $0x170] sm:$0xf0]  ;;  %v4335_v5 = vld [vmem:[#allocation5 + $0x90] sm:$0xf] }
  0x3c   : > { %v4815_v6 = vld [vmem:[#allocation5 + $0x98] sm:$0xf0]  ;;  %v5485_v7 = vor.u32 %v4842_v4, %v4443_v2  ;;  %v4431_v8 = vld [vmem:[#allocation5 + $0x150] sm:$0xf]  ;;  %v4323_v12 = vld [vmem:[#allocation5 + $0x78] sm:$0xf] }
  0x3d   : > { %v4839_v9 = vld [vmem:[#allocation5 + $0x158] sm:$0xf0]  ;;  %672 = vmatpush.bf16.msra.mxu0 %v4348_v3  ;;  %4916 = vmatpush.bf16.msra.mxu3 %v4348_v3  ;;  %v4336_v10 = vor.u32 %v4815_v6, %v4335_v5  ;;  %v4812_v13 = vld [vmem:[#allocation5 + $0x80] sm:$0xf0]  ;;  %v4419_v14 = vld [vmem:[#allocation5 + $0x138] sm:$0xf] }
  0x3e   : > { %4924 = vmatpush.bf16.msra.mxu1 %v5485_v7  ;;  %v5488_v11 = vor.u32 %v4839_v9, %v4431_v8  ;;  %v4836_v15 = vld [vmem:[#allocation5 + $0x140] sm:$0xf0]  ;;  %v4324_v16 = vor.u32 %v4812_v13, %v4323_v12  ;;  %v4311_v18 = vld [vmem:[#allocation5 + $0x60] sm:$0xf]  ;;  %v4809_v19 = vld [vmem:[#allocation5 + $0x68] sm:$0xf0] }
  0x3f   : > { %v5491_v17 = vor.u32 %v4836_v15, %v4419_v14  ;;  %v4407_v20 = vld [vmem:[#allocation5 + $0x120] sm:$0xf]  ;;  %v4833_v21 = vld [vmem:[#allocation5 + $0x128] sm:$0xf0]  ;;  %v4312_v22 = vor.u32 %v4809_v19, %v4311_v18  ;;  %v4299_v24 = vld [vmem:[#allocation5 + $0x48] sm:$0xf] }
  0x40   : > { %v5494_v23 = vor.u32 %v4833_v21, %v4407_v20  ;;  %v4806_v25 = vld [vmem:[#allocation5 + $0x50] sm:$0xf0]  ;;  %v4395_v26 = vld [vmem:[#allocation5 + $0x108] sm:$0xf]  ;;  %v4287_v30 = vld [vmem:[#allocation5 + $0x30] sm:$0xf] }
  0x41   : > { %673 = vmatpush.bf16.msra.mxu0 %v4336_v10  ;;  %4917 = vmatpush.bf16.msra.mxu3 %v4336_v10  ;;  %v4830_v27 = vld [vmem:[#allocation5 + $0x110] sm:$0xf0]  ;;  %v4300_v28 = vor.u32 %v4806_v25, %v4299_v24  ;;  %v4803_v31 = vld [vmem:[#allocation5 + $0x38] sm:$0xf0]  ;;  %v4383_v32 = vld [vmem:[#allocation5 + $0xf0] sm:$0xf] }
  0x42   : > { %4925 = vmatpush.bf16.msra.mxu1 %v5488_v11  ;;  %v5497_v29 = vor.u32 %v4830_v27, %v4395_v26  ;;  %v4827_v33 = vld [vmem:[#allocation5 + $0xf8] sm:$0xf0]  ;;  %v4288_v34 = vor.u32 %v4803_v31, %v4287_v30  ;;  %v4275_v36 = vld [vmem:[#allocation5 + $0x18] sm:$0xf]  ;;  %v4800_v37 = vld [vmem:[#allocation5 + $0x20] sm:$0xf0] }
  0x43   : > { %v5500_v35 = vor.u32 %v4827_v33, %v4383_v32  ;;  %v4371_v38 = vld [vmem:[#allocation5 + $0xd8] sm:$0xf]  ;;  %v4824_v39 = vld [vmem:[#allocation5 + $0xe0] sm:$0xf0]  ;;  %v4276_v40 = vor.u32 %v4800_v37, %v4275_v36  ;;  %v4263_v42 = vld [vmem:[#allocation5] sm:$0xf] }
  0x44   : > { %v5503_v41 = vor.u32 %v4824_v39, %v4371_v38  ;;  %v4797_v43 = vld [vmem:[#allocation5 + $0x8] sm:$0xf0]  ;;  %v4359_v44 = vld [vmem:[#allocation5 + $0xc0] sm:$0xf]  ;;  %v298_v48 = vld [vmem:[%s5471_s28 + $0x10] sm:$0xff]  ;;  %s4940_s14 = smul.u32 384, %s5467_s15 }
  0x45   : > { %674 = vmatpush.bf16.msra.mxu0 %v4324_v16  ;;  %4918 = vmatpush.bf16.msra.mxu3 %v4324_v16  ;;  %v4821_v45 = vld [vmem:[#allocation5 + $0xc8] sm:$0xf0]  ;;  %v296_v46 = vld [vmem:[%s5471_s28] sm:$0xff]  ;;  %v4264_v47 = vor.u32 %v4797_v43, %v4263_v42  ;;  %v306_v50 = vld [vmem:[%s5471_s28 + $0x50] sm:$0xff]  ;;  %s4941_s17 = smul.u32 384, %s5377_s22  ;;  %s4128_s22 = scalar_lea.sflag [#allocation4], %s5467_s15 }
  0x46   : > { %4926 = vmatpush.bf16.msra.mxu1 %v5491_v17  ;;  %v304_v49 = vld [vmem:[%s5471_s28 + $0x40] sm:$0xff]  ;;  %v5510_v51 = vor.u32 %v4821_v45, %v4359_v44  ;;  %v305_v52 = vld [vmem:[%s5471_s28 + $0x48] sm:$0xff]  ;;  %v307_v53 = vld [vmem:[%s5471_s28 + $0x58] sm:$0xff]  ;;  %v5514_v54 = vpack.c.bf16 %v298_v48, %v296_v46  ;;  %s8077_s16 = scalar_lea.vmem [#allocation10], %s4940_s14 }
  0x47   : > { %v5516_v55 = vpack.c.bf16 %v306_v50, %v304_v49  ;;  %v5518_v56 = vpack.c.bf16 %v307_v53, %v305_v52  ;;  %v4817_v57 = vld [vmem:[#allocation5 + $0xac] sm:$0xf]  ;;  %v4349_v58 = vld [vmem:[#allocation5 + $0xb4] sm:$0xf0]  ;;  %v4814_v60 = vld [vmem:[#allocation5 + $0x94] sm:$0xf]  ;;  %s4140_s7 = scalar_lea.hbm %s8375_s5, %s4941_s17 }
  0x48   : > { %v4352_v59 = vor.u32 %v4817_v57, %v4349_v58  ;;  %v4337_v61 = vld [vmem:[#allocation5 + $0x9c] sm:$0xf0]  ;;  %v4811_v63 = vld [vmem:[#allocation5 + $0x7c] sm:$0xf]  ;;  %v4325_v0 = vld [vmem:[#allocation5 + $0x84] sm:$0xf0] }
  0x49   : > { %675 = vmatpush.bf16.msra.mxu0 %v4312_v22  ;;  %4919 = vmatpush.bf16.msra.mxu3 %v4312_v22  ;;  %v4340_v62 = vor.u32 %v4814_v60, %v4337_v61  ;;  %v300_v1 = vld [vmem:[%s5471_s28 + $0x20] sm:$0xff]  ;;  %v302_v2 = vld [vmem:[%s5471_s28 + $0x30] sm:$0xff]  ;;  %v4328_v4 = vor.u32 %v4811_v63, %v4325_v0  ;;  %v309_v8 = vld [vmem:[%s5471_s28 + $0x68] sm:$0xff]  ;;  %s4141_s13 = sshll.u32 %s8077_s16, 4  ;;  %s4143_s11 = sshll.u32 %s4140_s7, 4  ;;  %s4142_s13 = int_to_ptr.vmem [resolvable:$true] %s4141_s13  ;;  %s4144_s11 = int_to_ptr.hbm [resolvable:$true] %s4143_s11 }
  0x4a   : > { %4927 = vmatpush.bf16.msra.mxu1 %v5494_v23  ;;  %4932 = vmatpush.bf16.msra.mxu2 %v4352_v59  ;;  %v308_v3 = vld [vmem:[%s5471_s28 + $0x60] sm:$0xff]  ;;  %v310_v5 = vld [vmem:[%s5471_s28 + $0x70] sm:$0xff]  ;;  %v311_v9 = vld [vmem:[%s5471_s28 + $0x78] sm:$0xff]  ;;  %v5534_v10 = vpack.c.bf16 %v302_v2, %v300_v1  ;;  %s5255_s9 = sshra.s32 %s4144_s11, 4  ;;  %s5256_s9 = int_to_ptr.hbm [resolvable:$true] %s5255_s9 }
  0x4b   : > { %v4808_v6 = vld [vmem:[#allocation5 + $0x64] sm:$0xf]  ;;  %v5540_v13 = vpack.c.bf16 %v311_v9, %v309_v8  ;;  %v4805_v14 = vld [vmem:[#allocation5 + $0x4c] sm:$0xf]  ;;  %v4301_v15 = vld [vmem:[#allocation5 + $0x54] sm:$0xf0]  ;;  %p5262_p11 = scmp.lt.s32.totalorder %s5256_s9, %s8375_s5 }
  0x4c   : > { %v5546_v16 = vor.u32 %v4805_v14, %v4301_v15  ;;  %v4289_v18 = vld [vmem:[#allocation5 + $0x3c] sm:$0xf0]  ;;  %v4841_v19 = vld [vmem:[#allocation5 + $0x16c] sm:$0xf]  ;;  %v4445_v20 = vld [vmem:[#allocation5 + $0x174] sm:$0xf0] }
  0x4d   : > { %676 = vmatpush.bf16.msra.mxu0 %v4300_v28  ;;  %4920 = vmatpush.bf16.msra.mxu3 %v4300_v28  ;;  %v4448_v21 = vor.u32 %v4841_v19, %v4445_v20  ;;  %v4277_v24 = vld [vmem:[#allocation5 + $0x24] sm:$0xf0]  ;;  %v312_v25 = vld [vmem:[%s5471_s28 + $0x80] sm:$0xff]  ;;  %v314_v26 = vld [vmem:[%s5471_s28 + $0x90] sm:$0xff]  ;;  %s5257_s12 = scalar_lea.hbm %s5256_s9, 384 }
  0x4e   : > { %4928 = vmatpush.bf16.msra.mxu1 %v5497_v29  ;;  %4933 = vmatpush.bf16.msra.mxu2 %v4340_v62  ;;  %v297_v27 = vld [vmem:[%s5471_s28 + $0x8] sm:$0xff]  ;;  %v299_v28 = vld [vmem:[%s5471_s28 + $0x18] sm:$0xff]  ;;  %v4796_v32 = vld [vmem:[#allocation5 + $0x4] sm:$0xf]  ;;  %p5258_p1 = scmp.ne.s32.totalorder %s5256_s9, %s5257_s12 }
  0x4f   : > { %v315_v31 = vld [vmem:[%s5471_s28 + $0x98] sm:$0xff]  ;;  %v4265_v33 = vld [vmem:[#allocation5 + $0xc] sm:$0xf0]  ;;  %v4433_v42 = vld [vmem:[#allocation5 + $0x15c] sm:$0xf0] }
  0x50   : > { %v5571_v37 = vor.u32 %v4796_v32, %v4265_v33  ;;  %v4451_v38 = vld [vmem:[#allocation5 + $0x170] sm:$0xf]  ;;  %v4843_v39 = vld [vmem:[#allocation5 + $0x178] sm:$0xf0]  ;;  %v4439_v44 = vld [vmem:[#allocation5 + $0x158] sm:$0xf]  ;;  %p5259_p4 = pnand %p5258_p1, %p5439_p7 }
  0x51   : > { %677 = vmatpush.bf16.msra.mxu0 %v4288_v34  ;;  %4921 = vmatpush.bf16.msra.mxu3 %v4288_v34  ;;  %v5565_v34 = vpack.c.bf16 %v314_v26, %v312_v25  ;;  %v4840_v45 = vld [vmem:[#allocation5 + $0x160] sm:$0xf0]  ;;  %v4421_v48 = vld [vmem:[#allocation5 + $0x144] sm:$0xf0]  ;;  %v4427_v50 = vld [vmem:[#allocation5 + $0x140] sm:$0xf] }
  0x52   : > { %4929 = vmatpush.bf16.msra.mxu1 %v5500_v35  ;;  %4934 = vmatpush.bf16.msra.mxu2 %v4328_v4  ;;  %v4440_v46 = vor.u32 %v4840_v45, %v4439_v44  ;;  %v4832_v52 = vld [vmem:[#allocation5 + $0x124] sm:$0xf]  ;;  %v4409_v53 = vld [vmem:[#allocation5 + $0x12c] sm:$0xf0]  ;;  %v4415_v60 = vld [vmem:[#allocation5 + $0x128] sm:$0xf]  ;;  %p5260_p8 = pneg %p5259_p4 }
  0x53   : > { %v316_v58 = vld [vmem:[%s5471_s28 + $0xa0] sm:$0xff]  ;;  %v4834_v61 = vld [vmem:[#allocation5 + $0x130] sm:$0xf0]  ;;  %v301_v63 = vld [vmem:[%s5471_s28 + $0x28] sm:$0xff] }
  0x54   : > { %v303_v0 = vld [vmem:[%s5471_s28 + $0x38] sm:$0xff]  ;;  %v317_v1 = vld [vmem:[%s5471_s28 + $0xa8] sm:$0xff]  ;;  %v4355_v9 = vld [vmem:[#allocation5 + $0xb0] sm:$0xf] }
  0x55   : > { %678 = vmatpush.bf16.msra.mxu0 %v4276_v40  ;;  %4922 = vmatpush.bf16.msra.mxu3 %v4276_v40  ;;  %v4452_v40 = vor.u32 %v4843_v39, %v4451_v38  ;;  %v319_v2 = vld [vmem:[%s5471_s28 + $0xb8] sm:$0xff]  ;;  %v4403_v14 = vld [vmem:[#allocation5 + $0x110] sm:$0xf]  ;;  %v4385_v19 = vld [vmem:[#allocation5 + $0xfc] sm:$0xf0] }
  0x56   : > { %4930 = vmatpush.bf16.msra.mxu1 %v5503_v41  ;;  %v4397_v8 = vld [vmem:[#allocation5 + $0x114] sm:$0xf0]  ;;  %v4831_v15 = vld [vmem:[#allocation5 + $0x118] sm:$0xf0]  ;;  %v4373_v25 = vld [vmem:[#allocation5 + $0xe4] sm:$0xf0] }
  0x57   : > { %v4361_v38 = vld [vmem:[#allocation5 + $0xcc] sm:$0xf0]  ;;  %v321_v44 = vld [vmem:[%s5471_s28 + $0xc8] sm:$0xff]  ;;  %v323_v45 = vld [vmem:[%s5471_s28 + $0xd8] sm:$0xff] }
  0x59   : > { %679 = vmatpush.bf16.msra.mxu0 %v4264_v47  ;;  %4923 = vmatpush.bf16.msra.mxu3 %v4264_v47  ;;  %v4835_v47 = vld [vmem:[#allocation5 + $0x13c] sm:$0xf] }
  0x5a   : > { %4931 = vmatpush.bf16.msra.mxu1 %v5510_v51  ;;  %v4424_v49 = vor.u32 %v4835_v47, %v4421_v48  ;;  %v4813_v47 = vld [vmem:[#allocation5 + $0x88] sm:$0xf0] }
  0x5c   : > { %680 = vmatmul.bf16.vlgmr.msra.gmra.mxu0 %v5514_v54  ;;  %690 = vmatmul.bf16.vlgmr.msra.gmra.mxu3 %v5516_v55 }
  0x5d   : > { %721 = vmatpush.bf16.msrb.mxu0 %v5485_v7  ;;  %739 = vmatmul.bf16.vlgmr.msra.gmra.mxu1 %v5518_v56  ;;  %v4313_v7 = vld [vmem:[#allocation5 + $0x6c] sm:$0xf0] }
  0x5e   : > { %v5538_v12 = vor.u32 %v4808_v6, %v4313_v7  ;;  %819 = vmatpush.bf16.msrb.mxu3 %v4448_v21  ;;  %917 = vmatpush.bf16.msrb.mxu1 %v4452_v40  ;;  %v5590_v6 = vpack.c.bf16 %v319_v2, %v317_v1  ;;  %v4829_v7 = vld [vmem:[#allocation5 + $0x10c] sm:$0xf]  ;;  %v4391_v21 = vld [vmem:[#allocation5 + $0xf8] sm:$0xf]  ;;  %v4367_v40 = vld [vmem:[#allocation5 + $0xc8] sm:$0xf] }
  0x5f   : > { %v325_v1 = vld [vmem:[%s5471_s28 + $0xe8] sm:$0xff] }
  0x60   : > { %4935 = vmatpush.bf16.msra.mxu2 %v5538_v12 }
  0x61   : > { %722 = vmatpush.bf16.msrb.mxu0 %v5488_v11  ;;  %v5536_v11 = vpack.c.bf16 %v310_v5, %v308_v3  ;;  %v4416_v3 = vor.u32 %v4834_v61, %v4415_v60  ;;  %v5588_v5 = vpack.c.bf16 %v303_v0, %v301_v63  ;;  %v4295_v61 = vld [vmem:[#allocation5 + $0x38] sm:$0xf]  ;;  %v324_v63 = vld [vmem:[%s5471_s28 + $0xe0] sm:$0xff]  ;;  %v326_v0 = vld [vmem:[%s5471_s28 + $0xf0] sm:$0xff] }
  0x62   : > { %918 = vmatpush.bf16.msrb.mxu1 %v4440_v46  ;;  %v4331_v46 = vld [vmem:[#allocation5 + $0x80] sm:$0xf] }
  0x64   : > { %4936 = vmatpush.bf16.msra.mxu2 %v5546_v16 }
  0x65   : > { %723 = vmatpush.bf16.msrb.mxu0 %v5491_v17  ;;  %v4802_v17 = vld [vmem:[#allocation5 + $0x34] sm:$0xf] }
  0x66   : > { %v5551_v22 = vor.u32 %v4802_v17, %v4289_v18  ;;  %v4404_v17 = vor.u32 %v4831_v15, %v4403_v14  ;;  %v4826_v18 = vld [vmem:[#allocation5 + $0xf4] sm:$0xf]  ;;  %v4271_v15 = vld [vmem:[#allocation5 + $0x8] sm:$0xf] }
  0x67   : > { %v4388_v20 = vor.u32 %v4826_v18, %v4385_v19  ;;  %v4587_v18 = vld [vmem:[#allocation8 + $0xa8] sm:$0xf]  ;;  %v4866_v19 = vld [vmem:[#allocation8 + $0xb0] sm:$0xf0] }
  0x68   : > { %4937 = vmatpush.bf16.msra.mxu2 %v5551_v22 }
  0x69   : > { %724 = vmatpush.bf16.msrb.mxu0 %v5494_v23  ;;  %v4799_v23 = vld [vmem:[#allocation5 + $0x1c] sm:$0xf] }
  0x6a   : > { %v5560_v30 = vor.u32 %v4799_v23, %v4277_v24  ;;  %v4823_v24 = vld [vmem:[#allocation5 + $0xdc] sm:$0xf] }
  0x6b   : > { %v4376_v32 = vor.u32 %v4823_v24, %v4373_v25  ;;  %v4863_v24 = vld [vmem:[#allocation8 + $0x98] sm:$0xf0] }
  0x6c   : > { %685 = vmatmul.bf16.gmra.mxu0 %v5534_v10  ;;  %695 = vmatmul.bf16.gmra.mxu3 %v5536_v11 }
  0x6d   : > { %725 = vmatpush.bf16.msrb.mxu0 %v5497_v29  ;;  %744 = vmatmul.bf16.gmra.mxu1 %v5540_v13  ;;  %v313_v29 = vld [vmem:[%s5471_s28 + $0x88] sm:$0xff] }
  0x6e   : > { %4938 = vmatpush.bf16.msra.mxu2 %v5560_v30  ;;  %v5569_v36 = vpack.c.bf16 %v315_v31, %v313_v29  ;;  %v4343_v29 = vld [vmem:[#allocation5 + $0x98] sm:$0xf]  ;;  %v4816_v31 = vld [vmem:[#allocation5 + $0xa0] sm:$0xf0] }
  0x6f   : > { %v4344_v39 = vor.u32 %v4816_v31, %v4343_v29 }
  0x71   : > { %726 = vmatpush.bf16.msrb.mxu0 %v5500_v35  ;;  %v5567_v35 = vpack.c.bf16 %v299_v28, %v297_v27  ;;  %v4379_v27 = vld [vmem:[#allocation5 + $0xe0] sm:$0xf]  ;;  %v4825_v28 = vld [vmem:[#allocation5 + $0xe8] sm:$0xf0] }
  0x72   : > { %4939 = vmatpush.bf16.msra.mxu2 %v5571_v37  ;;  %v4380_v33 = vor.u32 %v4825_v28, %v4379_v27 }
  0x75   : > { %727 = vmatpush.bf16.msrb.mxu0 %v5503_v41  ;;  %v4838_v41 = vld [vmem:[#allocation5 + $0x154] sm:$0xf]  ;;  %788 = vmatmul.bf16.vlgmr.msra.gmra.mxu2 %v5516_v55 }
  0x76   : > { %v4436_v43 = vor.u32 %v4838_v41, %v4433_v42  ;;  %v4822_v41 = vld [vmem:[#allocation5 + $0xd0] sm:$0xf0]  ;;  %v320_v42 = vld [vmem:[%s5471_s28 + $0xc0] sm:$0xff] }
  0x78   : > { %820 = vmatpush.bf16.msrb.mxu3 %v4436_v43  ;;  %v322_v43 = vld [vmem:[%s5471_s28 + $0xd0] sm:$0xff] }
  0x79   : > { %728 = vmatpush.bf16.msrb.mxu0 %v5510_v51  ;;  %v4837_v51 = vld [vmem:[#allocation5 + $0x148] sm:$0xf0] }
  0x7a   : > { %v4428_v57 = vor.u32 %v4837_v51, %v4427_v50  ;;  %v5603_v50 = vpack.c.bf16 %v322_v43, %v320_v42  ;;  %v4332_v51 = vor.u32 %v4813_v47, %v4331_v46  ;;  %v4551_v46 = vld [vmem:[#allocation8 + $0x60] sm:$0xf] }
  0x7c   : > { %700 = vmatmul.bf16.gmra.mxu3 %v5565_v34  ;;  %729 = vmatmul.bf16.vlgmr.msrb.gmra.mxu0 %v5567_v35 }
  0x7d   : > { %770 = vmatpush.bf16.msra.mxu0 %v4352_v59  ;;  %749 = vmatmul.bf16.gmra.mxu1 %v5569_v36  ;;  %v4412_v59 = vor.u32 %v4832_v52, %v4409_v53  ;;  %v4319_v52 = vld [vmem:[#allocation5 + $0x68] sm:$0xf]  ;;  %v4810_v53 = vld [vmem:[#allocation5 + $0x70] sm:$0xf0] }
  0x7e   : > { %821 = vmatpush.bf16.msrb.mxu3 %v4424_v49  ;;  %919 = vmatpush.bf16.msrb.mxu1 %v4428_v57  ;;  %v4368_v49 = vor.u32 %v4822_v41, %v4367_v40  ;;  %v4320_v57 = vor.u32 %v4810_v53, %v4319_v52  ;;  %v4865_v53 = vld [vmem:[#allocation8 + $0xac] sm:$0xf] }
  0x81   : > { %771 = vmatpush.bf16.msra.mxu0 %v4340_v62  ;;  %v318_v62 = vld [vmem:[%s5471_s28 + $0xb0] sm:$0xff] }
  0x82   : > { %822 = vmatpush.bf16.msrb.mxu3 %v4412_v59  ;;  %920 = vmatpush.bf16.msrb.mxu1 %v4416_v3  ;;  %v4807_v59 = vld [vmem:[#allocation5 + $0x58] sm:$0xf0] }
  0x83   : > { %v327_v3 = vld [vmem:[%s5471_s28 + $0xf8] sm:$0xff]  ;;  %s5261_s28 = scalar_lea.hbm %s8375_s5, 768 }
  0x84   : > { %p5263_p9 = scmp.lt.s32.totalorder %s5261_s28, %s5257_s12 }
  0x85   : > { %772 = vmatpush.bf16.msra.mxu0 %v4328_v4  ;;  %v5586_v4 = vpack.c.bf16 %v318_v62, %v316_v58  ;;  %793 = vmatmul.bf16.gmra.mxu2 %v5536_v11  ;;  %v4307_v58 = vld [vmem:[#allocation5 + $0x50] sm:$0xf]  ;;  %v4804_v62 = vld [vmem:[#allocation5 + $0x40] sm:$0xf0] }
  0x86   : > { %921 = vmatpush.bf16.msrb.mxu1 %v4404_v17  ;;  %v4308_v60 = vor.u32 %v4807_v59, %v4307_v58  ;;  %v4296_v2 = vor.u32 %v4804_v62, %v4295_v61  ;;  %p5264_p2 = por %p5263_p9, %p5262_p11 }
  0x88   : > { %p5265_p10 = pnand %p5264_p2, %p5260_p8 }
  0x89   : > { %773 = vmatpush.bf16.msra.mxu0 %v5538_v12  ;;  %v4400_v12 = vor.u32 %v4829_v7, %v4397_v8  ;;  %v4283_v7 = vld [vmem:[#allocation5 + $0x20] sm:$0xf]  ;;  %v4801_v8 = vld [vmem:[#allocation5 + $0x28] sm:$0xf0] }
  0x8a   : > { %v4284_v14 = vor.u32 %v4801_v8, %v4283_v7  ;;  %v4577_v7 = vld [vmem:[#allocation8 + $0x9c] sm:$0xf0] }
  0x8b   : > { %823 = vmatpush.bf16.msrb.mxu3 %v4400_v12  ;;  %v5617_v12 = vpack.c.bf16 %v327_v3, %v325_v1  ;;  %v4862_v3 = vld [vmem:[#allocation8 + $0x94] sm:$0xf] }
  0x8c   : > { %705 = vmatmul.bf16.gmra.mxu3 %v5586_v4  ;;  %734 = vmatmul.bf16.gmra.mxu0 %v5588_v5 }
  0x8d   : > { %774 = vmatpush.bf16.msra.mxu0 %v5546_v16  ;;  %754 = vmatmul.bf16.gmra.mxu1 %v5590_v6  ;;  %v4819_v16 = vld [vmem:[#allocation5 + $0xb8] sm:$0xf0] }
  0x8e   : > { %v4356_v26 = vor.u32 %v4819_v16, %v4355_v9  ;;  %v5615_v9 = vpack.c.bf16 %v326_v0, %v324_v63  ;;  %v4798_v16 = vld [vmem:[#allocation5 + $0x10] sm:$0xf0] }
  0x8f   : > { %824 = vmatpush.bf16.msrb.mxu3 %v4388_v20  ;;  %v4272_v17 = vor.u32 %v4798_v16, %v4271_v15  ;;  %v4588_v20 = vor.u32 %v4866_v19, %v4587_v18  ;;  %v4580_v15 = vor.u32 %v4862_v3, %v4577_v7  ;;  %v4859_v18 = vld [vmem:[#allocation8 + $0x7c] sm:$0xf]  ;;  %v4565_v19 = vld [vmem:[#allocation8 + $0x84] sm:$0xf0]  ;;  %v4515_v7 = vld [vmem:[#allocation8 + $0x18] sm:$0xf] }
  0x91   : > { %775 = vmatpush.bf16.msra.mxu0 %v5551_v22  ;;  %v4828_v22 = vld [vmem:[#allocation5 + $0x100] sm:$0xf0]  ;;  %3638 = vmatpush.bf16.msrb.mxu2 %v4588_v20 }
  0x92   : > { %v4392_v23 = vor.u32 %v4828_v22, %v4391_v21 }
  0x93   : > { %825 = vmatpush.bf16.msrb.mxu3 %v4376_v32 }
  0x94   : > { %922 = vmatpush.bf16.msrb.mxu1 %v4392_v23  ;;  %v5631_v23 = vld [vmem:[#allocation7] sm:$0x7] }
  0x95   : > { %776 = vmatpush.bf16.msra.mxu0 %v5560_v30  ;;  %v4820_v30 = vld [vmem:[#allocation5 + $0xc4] sm:$0xf]  ;;  %798 = vmatmul.bf16.gmra.mxu2 %v5565_v34 }
  0x96   : > { %v4364_v48 = vor.u32 %v4820_v30, %v4361_v38  ;;  %v4563_v30 = vld [vmem:[#allocation8 + $0x78] sm:$0xf]  ;;  %v4860_v38 = vld [vmem:[#allocation8 + $0x80] sm:$0xf0] }
  0x97   : > { %v4564_v40 = vor.u32 %v4860_v38, %v4563_v30 }
  0x98   : > { %923 = vmatpush.bf16.msrb.mxu1 %v4380_v33  ;;  %826 = vmatpush.bf16.msrb.mxu3 %v4364_v48 }
  0x99   : > { %777 = vmatpush.bf16.msra.mxu0 %v5571_v37  ;;  %v5605_v37 = vpack.c.bf16 %v323_v45, %v321_v44 }
  0x9c   : > { %924 = vmatpush.bf16.msrb.mxu1 %v4368_v49  ;;  %710 = vmatmul.bf16.gmra.mxu3 %v5603_v50 }
  0x9d   : > { %868 = vmatpush.bf16.msrb.mxu0 %v4356_v26  ;;  %759 = vmatmul.bf16.gmra.mxu1 %v5605_v37 }
  0x9e   : > { %778 = vmatmul.bf16.vlgmr.msra.gmra.mxu0 %v5514_v54 }
  0xa1   : > { %869 = vmatpush.bf16.msrb.mxu0 %v4344_v39 }
  0xa5   : > { %870 = vmatpush.bf16.msrb.mxu0 %v4332_v51  ;;  %803 = vmatmul.bf16.gmra.mxu2 %v5586_v4 }
  0xa9   : > { %871 = vmatpush.bf16.msrb.mxu0 %v4320_v57  ;;  %v4589_v57 = vld [vmem:[#allocation8 + $0xb4] sm:$0xf0] }
  0xaa   : > { %v4592_v61 = vor.u32 %v4865_v53, %v4589_v57 }
  0xac   : > { %715 = vmatmul.bf16.gmra.mxu3 %v5615_v9  ;;  %3785 = vmatpush.bf16.msra.mxu1 %v4592_v61 }
  0xad   : > { %872 = vmatpush.bf16.msrb.mxu0 %v4308_v60  ;;  %764 = vmatmul.bf16.gmra.mxu1 %v5617_v12 }
  0xae   : > { %783 = vmatmul.bf16.gmra.mxu0 %v5534_v10 }
  0xb0   : > { %3786 = vmatpush.bf16.msra.mxu1 %v4580_v15 }
  0xb1   : > { %873 = vmatpush.bf16.msrb.mxu0 %v4296_v2 }
  0xb5   : > { %874 = vmatpush.bf16.msrb.mxu0 %v4284_v14  ;;  %808 = vmatmul.bf16.gmra.mxu2 %v5603_v50 }
  0xb9   : > { %875 = vmatpush.bf16.msrb.mxu0 %v4272_v17 }
  0xbc   : > { %827 = vmatmul.bf16.vlgmr.msrb.gmra.mxu3 %v5567_v35 }
  0xbd   : > { %925 = vmatmul.bf16.vlgmr.msrb.gmra.mxu1 %v5567_v35  ;;  %v4575_v35 = vld [vmem:[#allocation8 + $0x90] sm:$0xf] }
  0xbe   : > { %876 = vmatmul.bf16.vlgmr.msrb.gmra.mxu0 %v5514_v54  ;;  %v5637_v54 = vperm.slane %v5631_v23, 0  ;;  %v4576_v25 = vor.u32 %v4863_v24, %v4575_v35  ;;  %v4568_v35 = vor.u32 %v4859_v18, %v4565_v19 }
  0xc0   : > { %3639 = vmatpush.bf16.msrb.mxu2 %v4576_v25  ;;  %3787 = vmatpush.bf16.msra.mxu1 %v4568_v35 }
  0xc4   : > { %3640 = vmatpush.bf16.msrb.mxu2 %v4564_v40  ;;  %v4553_v40 = vld [vmem:[#allocation8 + $0x6c] sm:$0xf0] }
  0xc5   : > { %813 = vmatmul.bf16.gmra.mxu2 %v5615_v9 }
  0xcc   : > { %832 = vmatmul.bf16.gmra.mxu3 %v5588_v5 }
  0xcd   : > { %930 = vmatmul.bf16.gmra.mxu1 %v5588_v5 }
  0xce   : > { %881 = vmatmul.bf16.gmra.mxu0 %v5534_v10 }
  0xd9   : > { %v681_v21 = vpop.f32.mrf.mxu0 }
  0xda   : > { %v740_v22 = vpop.f32.mrf.mxu1  ;;  %v682_v63 = vadd.f32 %v681_v21, %v5637_v54 }
  0xdc   : > { %837 = vmatmul.bf16.gmra.mxu3 %v5518_v56 }
  0xdd   : > { %935 = vmatmul.bf16.gmra.mxu1 %v5518_v56 }
  0xde   : > { %886 = vmatmul.bf16.gmra.mxu0 %v5516_v55 }
  0xdf   : > { %v691_v10 = vpop.f32.mrf.mxu3 }
  0xe0   : > { %v692_v5 = vadd.f32 %v691_v10, %v5637_v54 }
  0xe1   : > { %v5640_v26 = vpop.f32.mrf.mxu0 }
  0xe2   : > { %v5642_v27 = vadd.f32 %v740_v22, %v692_v5  ;;  %v742_v28 = vpop.f32.mrf.mxu1 }
  0xe4   : > { %8500 = vst [vmem:[#allocation15_spill] sm:$0xff] %v5642_v27  ;;  %v5658_v44 = vmul.f32 0.70710677, %v5642_v27 }
  0xe6   : > { %v1542_v52 = vmul.f32 %v5658_v44, %v5658_v44 }
  0xe7   : > { %v693_v29 = vpop.f32.mrf.mxu3 }
  0xe8   : > { %v694_v55 = vadd.f32 %v693_v29, %v5637_v54  ;;  %v5668_v58 = vmin.f32 %v1542_v52, 16.0  ;;  %v4851_v52 = vld [vmem:[#allocation8 + $0x38] sm:$0xf0] }
  0xe9   : > { %v5645_v31 = vpop.f32.mrf.mxu0 }
  0xea   : > { %v5647_v56 = vadd.f32 %v742_v28, %v694_v55  ;;  %v745_v32 = vpop.f32.mrf.mxu1  ;;  %v1544_v0 = vmul.f32 2.1237322e-06, %v5668_v58  ;;  %v684_v28 = vadd.f32 %v5640_v26, %v5637_v54 }
  0xec   : > { %8501 = vst [vmem:[#allocation16_spill] sm:$0xff] %v5647_v56  ;;  %842 = vmatmul.bf16.gmra.mxu3 %v5540_v13  ;;  %v5671_v59 = vmul.f32 0.70710677, %v5647_v56  ;;  %v1545_v16 = vadd.f32 0.00028619796, %v1544_v0 }
  0xed   : > { %940 = vmatmul.bf16.gmra.mxu1 %v5540_v13 }
  0xee   : > { %891 = vmatmul.bf16.gmra.mxu0 %v5536_v11  ;;  %v4857_v11 = vld [vmem:[#allocation8 + $0x68] sm:$0xf0]  ;;  %v1662_v8 = vmul.f32 %v5671_v59, %v5671_v59  ;;  %v1546_v10 = vmul.f32 %v1545_v16, %v5668_v58 }
  0xef   : > { %v696_v33 = vpop.f32.mrf.mxu3  ;;  %v4552_v47 = vor.u32 %v4857_v11, %v4551_v46 }
  0xf0   : > { %v697_v39 = vadd.f32 %v696_v33, %v5637_v54  ;;  %v5689_v20 = vmin.f32 %v1662_v8, 16.0  ;;  %v4854_v33 = vld [vmem:[#allocation8 + $0x50] sm:$0xf0]  ;;  %v1547_v11 = vadd.f32 0.0036580483, %v1546_v10 }
  0xf1   : > { %v5653_v41 = vpop.f32.mrf.mxu0  ;;  %3641 = vmatpush.bf16.msrb.mxu2 %v4552_v47  ;;  %v4848_v8 = vld [vmem:[#allocation8 + $0x20] sm:$0xf0] }
  0xf2   : > { %v5655_v42 = vadd.f32 %v745_v32, %v697_v39  ;;  %v747_v43 = vpop.f32.mrf.mxu1  ;;  %v1664_v25 = vmul.f32 2.1237322e-06, %v5689_v20  ;;  %v4539_v32 = vld [vmem:[#allocation8 + $0x48] sm:$0xf]  ;;  %v4856_v39 = vld [vmem:[#allocation8 + $0x64] sm:$0xf]  ;;  %v1548_v61 = vmul.f32 %v1547_v11, %v5668_v58  ;;  %v4516_v19 = vor.u32 %v4848_v8, %v4515_v7 }
  0xf3   : > { %v4540_v38 = vor.u32 %v4854_v33, %v4539_v32  ;;  %v4556_v26 = vor.u32 %v4856_v39, %v4553_v40  ;;  %v687_v11 = vadd.f32 %v5645_v31, %v5637_v54  ;;  %v4850_v7 = vld [vmem:[#allocation8 + $0x34] sm:$0xf]  ;;  %v4529_v8 = vld [vmem:[#allocation8 + $0x3c] sm:$0xf0] }
  0xf4   : > { %8502 = vst [vmem:[#allocation17_spill] sm:$0xff] %v5655_v42  ;;  %v1549_v18 = vadd.f32 0.05243302, %v1548_v61  ;;  %v4541_v61 = vld [vmem:[#allocation8 + $0x54] sm:$0xf0] }
  0xf5   : > { %3642 = vmatpush.bf16.msrb.mxu2 %v4540_v38  ;;  %3788 = vmatpush.bf16.msra.mxu1 %v4556_v26 }
  0xf7   : > { %v698_v45 = vpop.f32.mrf.mxu3 }
  0xf8   : > { %v699_v13 = vadd.f32 %v698_v45, %v5637_v54 }
  0xf9   : > { %v730_v48 = vpop.f32.mrf.mxu0 }
  0xfa   : > { %v5661_v49 = vadd.f32 %v747_v43, %v699_v13  ;;  %v750_v51 = vpop.f32.mrf.mxu1  ;;  %v5685_v14 = vadd.f32 %v730_v48, %v682_v63  ;;  %v1665_v13 = vadd.f32 0.00028619796, %v1664_v25 }
  0xfc   : > { %8503 = vst [vmem:[#allocation18_spill] sm:$0xff] %v5661_v49  ;;  %847 = vmatmul.bf16.gmra.mxu3 %v5569_v36  ;;  %v5692_v21 = vmul.f32 0.70710677, %v5685_v14  ;;  %v5695_v24 = vmul.f32 0.70710677, %v5661_v49  ;;  %v1666_v15 = vmul.f32 %v1665_v13, %v5689_v20 }
  0xfd   : > { %945 = vmatmul.bf16.gmra.mxu1 %v5569_v36  ;;  %8505 = vst [vmem:[#allocation20_spill] sm:$0xff] %v5685_v14 }
  0xfe   : > { %896 = vmatmul.bf16.gmra.mxu0 %v5565_v34  ;;  %v5677_v34 = vmul.f32 0.70710677, %v5655_v42  ;;  %v1062_v30 = vmul.f32 %v5692_v21, %v5692_v21  ;;  %v1902_v45 = vmul.f32 %v5695_v24, %v5695_v24 }
  0xff   : > { %v701_v60 = vpop.f32.mrf.mxu3 }
 0x100   : > { %v702_v62 = vadd.f32 %v701_v60, %v5637_v54  ;;  %v1782_v17 = vmul.f32 %v5677_v34, %v5677_v34  ;;  %v5715_v47 = vmin.f32 %v1062_v30, 16.0  ;;  %v5717_v57 = vmin.f32 %v1902_v45, 16.0  ;;  %v4845_v45 = vld [vmem:[#allocation8 + $0x8] sm:$0xf0] }
 0x101   : > { %v732_v1 = vpop.f32.mrf.mxu0  ;;  %v1550_v30 = vmul.f32 %v1549_v18, %v5668_v58 }
 0x102   : > { %v5679_v36 = vadd.f32 %v750_v51, %v702_v62  ;;  %v5681_v2 = vpop.f32.mrf.mxu1  ;;  %v5703_v29 = vmin.f32 %v1782_v17, 16.0  ;;  %v5710_v46 = vadd.f32 %v732_v1, %v684_v28  ;;  %v4527_v51 = vld [vmem:[#allocation8 + $0x30] sm:$0xf]  ;;  %8508 = vst [vmem:[#allocation23_spill] sm:$0xff] %v5717_v57  ;;  %v1904_v63 = vmul.f32 2.1237322e-06, %v5717_v57 }
 0x103   : > { %v1064_v3 = vmul.f32 2.1237322e-06, %v5715_v47  ;;  %v1075_v26 = vmul.f32 3.8918573e-05, %v5715_v47  ;;  %v1551_v31 = vadd.f32 0.18741608, %v1550_v30  ;;  %v4532_v30 = vor.u32 %v4850_v7, %v4529_v8 }
 0x104   : > { %8504 = vst [vmem:[#allocation19_spill] sm:$0xff] %v5679_v36  ;;  %v1784_v43 = vmul.f32 2.1237322e-06, %v5703_v29  ;;  %v5720_v60 = vmul.f32 0.70710677, %v5710_v46 }
 0x105   : > { %8506 = vst [vmem:[#allocation21_spill] sm:$0xff] %v5703_v29  ;;  %v1905_v35 = vadd.f32 0.00028619796, %v1904_v63  ;;  %v1065_v10 = vadd.f32 0.00028619796, %v1064_v3 }
 0x106   : > { %8507 = vst [vmem:[#allocation22_spill] sm:$0xff] %v5710_v46  ;;  %v1785_v53 = vadd.f32 0.00028619796, %v1784_v43  ;;  %v1182_v17 = vmul.f32 %v5720_v60, %v5720_v60  ;;  %v5737_v25 = vmul.f32 0.70710677, %v5679_v36 }
 0x107   : > { %v703_v22 = vpop.f32.mrf.mxu3  ;;  %v4503_v43 = vld [vmem:[#allocation8] sm:$0xf]  ;;  %v1906_v13 = vmul.f32 %v1905_v35, %v5717_v57 }
 0x108   : > { %v1786_v16 = vmul.f32 %v1785_v53, %v5703_v29  ;;  %v5741_v33 = vmin.f32 %v1182_v17, 16.0  ;;  %v704_v39 = vadd.f32 %v703_v22, %v5637_v54  ;;  %v4504_v63 = vor.u32 %v4845_v45, %v4503_v43  ;;  %v4847_v45 = vld [vmem:[#allocation8 + $0x1c] sm:$0xf] }
 0x109   : > { %v5699_v5 = vpop.f32.mrf.mxu0 }
 0x10a   : > { %v755_v55 = vpop.f32.mrf.mxu1  ;;  %v1787_v32 = vadd.f32 0.0036580483, %v1786_v16  ;;  %v1184_v22 = vmul.f32 2.1237322e-06, %v5741_v33  ;;  %v5764_v3 = vadd.f32 %v5681_v2, %v704_v39  ;;  %v1907_v16 = vadd.f32 0.0036580483, %v1906_v13 }
 0x10c   : > { %852 = vmatmul.bf16.gmra.mxu3 %v5590_v6  ;;  %v1788_v53 = vmul.f32 %v1787_v32, %v5703_v29  ;;  %8511 = vst [vmem:[#allocation26_spill] sm:$0xff] %v5764_v3  ;;  %v5776_v39 = vmul.f32 0.70710677, %v5764_v3  ;;  %v1908_v13 = vmul.f32 %v1907_v16, %v5717_v57 }
 0x10d   : > { %950 = vmatmul.bf16.gmra.mxu1 %v5590_v6  ;;  %v4528_v6 = vor.u32 %v4851_v52, %v4527_v51  ;;  %v2022_v51 = vmul.f32 %v5737_v25, %v5737_v25 }
 0x10e   : > { %901 = vmatmul.bf16.gmra.mxu0 %v5586_v4  ;;  %v2142_v8 = vmul.f32 %v5776_v39, %v5776_v39 }
 0x10f   : > { %v706_v48 = vpop.f32.mrf.mxu3  ;;  %3643 = vmatpush.bf16.msrb.mxu2 %v4528_v6  ;;  %v5760_v6 = vadd.f32 %v5699_v5, %v687_v11  ;;  %v5766_v18 = vmin.f32 %v2022_v51, 16.0  ;;  %v1185_v5 = vadd.f32 0.00028619796, %v1184_v22 }
 0x110   : > { %v707_v4 = vadd.f32 %v706_v48, %v5637_v54  ;;  %v1066_v48 = vmul.f32 %v1065_v10, %v5715_v47  ;;  %v1789_v10 = vadd.f32 0.05243302, %v1788_v53  ;;  %v1552_v53 = vmul.f32 %v1551_v31, %v5668_v58 }
 0x111   : > { %v5724_v62 = vpop.f32.mrf.mxu0  ;;  %8510 = vst [vmem:[#allocation25_spill] sm:$0xff] %v5760_v6  ;;  %v1195_v31 = vmul.f32 3.8918573e-05, %v5741_v33 }
 0x112   : > { %v5727_v0 = vadd.f32 %v755_v55, %v707_v4  ;;  %v5729_v1 = vpop.f32.mrf.mxu1  ;;  %v1667_v55 = vadd.f32 0.0036580483, %v1666_v15  ;;  %v4853_v4 = vld [vmem:[#allocation8 + $0x4c] sm:$0xf]  ;;  %v1076_v15 = vadd.f32 0.001143296, %v1075_v26  ;;  %v1790_v7 = vmul.f32 %v1789_v10, %v5703_v29 }
 0x113   : > { %3644 = vmatpush.bf16.msrb.mxu2 %v4516_v19  ;;  %v1067_v17 = vadd.f32 0.0036580483, %v1066_v48  ;;  %8512 = vst [vmem:[#allocation27_spill] sm:$0xff] %v5766_v18  ;;  %v4544_v19 = vor.u32 %v4853_v4, %v4541_v61  ;;  %v4517_v26 = vld [vmem:[#allocation8 + $0x24] sm:$0xf0] }
 0x114   : > { %8509 = vst [vmem:[#allocation24_spill] sm:$0xff] %v5727_v0  ;;  %v1668_v52 = vmul.f32 %v1667_v55, %v5689_v20  ;;  %v2024_v55 = vmul.f32 2.1237322e-06, %v5766_v18  ;;  %v1077_v11 = vmul.f32 %v1076_v15, %v5715_v47  ;;  %v4520_v61 = vor.u32 %v4847_v45, %v4517_v26 }
 0x115   : > { %3789 = vmatpush.bf16.msra.mxu1 %v4544_v19  ;;  %v1068_v48 = vmul.f32 %v1067_v17, %v5715_v47  ;;  %v1791_v26 = vadd.f32 0.18741608, %v1790_v7 }
 0x116   : > { %v1669_v35 = vadd.f32 0.05243302, %v1668_v52  ;;  %v1186_v52 = vmul.f32 %v1185_v5, %v5741_v33  ;;  %v2025_v22 = vadd.f32 0.00028619796, %v2024_v55  ;;  %v1078_v15 = vadd.f32 0.014752088, %v1077_v11 }
 0x117   : > { %v5739_v28 = vpop.f32.mrf.mxu3  ;;  %3645 = vmatpush.bf16.msrb.mxu2 %v4504_v63  ;;  %v1069_v16 = vadd.f32 0.05243302, %v1068_v48  ;;  %v1553_v55 = vadd.f32 1.1283791, %v1552_v53  ;;  %v689_v11 = vadd.f32 %v5653_v41, %v5637_v54 }
 0x118   : > { %v1670_v63 = vmul.f32 %v1669_v35, %v5689_v20  ;;  %v1187_v19 = vadd.f32 0.0036580483, %v1186_v52  ;;  %v1079_v5 = vmul.f32 %v1078_v15, %v5715_v47  ;;  %v2026_v35 = vmul.f32 %v2025_v22, %v5766_v18 }
 0x119   : > { %3790 = vmatpush.bf16.msra.mxu1 %v4532_v30  ;;  %v1196_v30 = vadd.f32 0.001143296, %v1195_v31  ;;  %v1070_v53 = vmul.f32 %v1069_v16, %v5715_v47  ;;  %v5826_v31 = vmul.f32 %v1553_v55, %v5658_v44 }
 0x11a   : > { %v760_v40 = vpop.f32.mrf.mxu1  ;;  %v1671_v45 = vadd.f32 0.18741608, %v1670_v63  ;;  %v1080_v15 = vadd.f32 0.112945676, %v1079_v5  ;;  %v1188_v63 = vmul.f32 %v1187_v19, %v5741_v33  ;;  %v2027_v7 = vadd.f32 0.0036580483, %v2026_v35 }
 0x11b   : > { %v5744_v38 = vpop.f32.mrf.mxu0  ;;  %v1197_v22 = vmul.f32 %v1196_v30, %v5741_v33  ;;  %8516 = vst [vmem:[#allocation31_spill] sm:$0xff] %v5826_v31  ;;  %v1792_v19 = vmul.f32 %v1791_v26, %v5703_v29  ;;  %v5831_v30 = vadd.f32 %v5724_v62, %v689_v11 }
 0x11c   : > { %857 = vmatmul.bf16.gmra.mxu3 %v5605_v37  ;;  %v1672_v5 = vmul.f32 %v1671_v45, %v5689_v20  ;;  %v2028_v55 = vmul.f32 %v2027_v7, %v5766_v18 }
 0x11d   : > { %955 = vmatmul.bf16.gmra.mxu1 %v5605_v37  ;;  %v5770_v37 = vmul.f32 0.70710677, %v5760_v6  ;;  %v1198_v16 = vadd.f32 0.014752088, %v1197_v22  ;;  %8517 = vst [vmem:[#allocation32_spill] sm:$0xff] %v5831_v30 }
 0x11e   : > { %906 = vmatmul.bf16.gmra.mxu0 %v5603_v50  ;;  %3791 = vmatpush.bf16.msra.mxu1 %v4520_v61  ;;  %v5816_v61 = vmul.f32 0.5, %v5685_v14  ;;  %v5846_v22 = vmul.f32 0.70710677, %v5831_v30 }
 0x11f   : > { %v711_v50 = vpop.f32.mrf.mxu3  ;;  %v1302_v4 = vmul.f32 %v5770_v37, %v5770_v37  ;;  %v1199_v14 = vmul.f32 %v1198_v16, %v5741_v33 }
 0x120   : > { %v712_v2 = vadd.f32 %v711_v50, %v5637_v54  ;;  %v5797_v50 = vmul.f32 0.5, %v5642_v27 }
 0x121   : > { %v5801_v10 = vmin.f32 %v1302_v4, 16.0  ;;  %v5813_v4 = vmul.f32 0.5, %v5655_v42  ;;  %v1200_v11 = vadd.f32 0.112945676, %v1199_v14 }
 0x122   : > { %v5778_v43 = vpop.f32.mrf.mxu1  ;;  %v5783_v51 = vadd.f32 %v760_v40, %v712_v2  ;;  %v1909_v40 = vadd.f32 0.05243302, %v1908_v13  ;;  %8514 = vst [vmem:[#allocation29_spill] sm:$0xff] %v5797_v50  ;;  %v5807_v13 = vmin.f32 %v2142_v8, 16.0 }
 0x123   : > { %v5773_v32 = vpop.f32.mrf.mxu0  ;;  %8515 = vst [vmem:[#allocation30_spill] sm:$0xff] %v5813_v4  ;;  %v1304_v8 = vmul.f32 2.1237322e-06, %v5801_v10  ;;  %v1201_v16 = vmul.f32 %v1200_v11, %v5741_v33  ;;  %v4844_v4 = vld [vmem:[#allocation8 + $0x4] sm:$0xf] }
 0x124   : > { %8513 = vst [vmem:[#allocation28_spill] sm:$0xff] %v5783_v51  ;;  %v1910_v52 = vmul.f32 %v1909_v40, %v5717_v57  ;;  %v2144_v41 = vmul.f32 2.1237322e-06, %v5807_v13  ;;  %v1081_v40 = vmul.f32 %v1080_v15, %v5715_v47  ;;  %v5835_v15 = vmul.f32 0.70710677, %v5727_v0 }
 0x125   : > { %v1305_v45 = vadd.f32 0.00028619796, %v1304_v8 }
 0x126   : > { %v1911_v42 = vadd.f32 0.18741608, %v1910_v52  ;;  %v1082_v27 = vadd.f32 0.4994258, %v1081_v40  ;;  %v2145_v3 = vadd.f32 0.00028619796, %v2144_v41 }
 0x127   : > { %v5793_v17 = vpop.f32.mrf.mxu3  ;;  %v1673_v52 = vadd.f32 1.1283791, %v1672_v5  ;;  %v1793_v40 = vadd.f32 1.1283791, %v1792_v19  ;;  %v2262_v5 = vmul.f32 %v5835_v15, %v5835_v15  ;;  %v1306_v19 = vmul.f32 %v1305_v45, %v5801_v10 }
 0x128   : > { %v1083_v62 = vmul.f32 %v1082_v27, %v5715_v47  ;;  %v1912_v7 = vmul.f32 %v1911_v42, %v5717_v57  ;;  %v2146_v14 = vmul.f32 %v2145_v3, %v5807_v13  ;;  %v1422_v3 = vmul.f32 %v5846_v22, %v5846_v22 }
 0x129   : > { %v5866_v42 = vmul.f32 %v1673_v52, %v5671_v59  ;;  %v5884_v11 = vmin.f32 %v2262_v5, 16.0 }
 0x12a   : > { %v765_v48 = vpop.f32.mrf.mxu1  ;;  %v5853_v8 = vadd.f32 1.0, %v1083_v62  ;;  %v5874_v62 = vperm.slane %v5631_v23, 2  ;;  %v2147_v45 = vadd.f32 0.0036580483, %v2146_v14  ;;  %v4505_v14 = vld [vmem:[#allocation8 + $0xc] sm:$0xf0] }
 0x12b   : > { %v5803_v2 = vpop.f32.mrf.mxu0  ;;  %8520 = vst [vmem:[#allocation35_spill] sm:$0xff] %v5866_v42 }
 0x12c   : > { %862 = vmatmul.bf16.gmra.mxu3 %v5617_v12  ;;  %5025 = vrcp.f32 %v5853_v8  ;;  %vm1090_vm1 = vweird.f32 %v5853_v8 }
 0x12d   : > { %960 = vmatmul.bf16.gmra.mxu1 %v5617_v12  ;;  %v1189_v12 = vadd.f32 0.05243302, %v1188_v63 }
 0x12e   : > { %911 = vmatmul.bf16.gmra.mxu0 %v5615_v9  ;;  %v1071_v9 = vadd.f32 0.18741608, %v1070_v53  ;;  %v5843_v53 = vmul.f32 0.5, %v5679_v36 }
 0x12f   : > { %v716_v35 = vpop.f32.mrf.mxu3  ;;  %v1190_v27 = vmul.f32 %v1189_v12, %v5741_v33  ;;  %v5869_v12 = vmul.f32 0.5, %v5710_v46 }
 0x130   : > { %v717_v44 = vadd.f32 %v716_v35, %v5637_v54  ;;  %8518 = vst [vmem:[#allocation33_spill] sm:$0xff] %v5843_v53  ;;  %v1072_v35 = vmul.f32 %v1071_v9, %v5715_v47  ;;  %v5879_v47 = vadd.f32 1.1283791, %v1912_v7  ;;  %v5882_v9 = vmul.f32 0.5, %v5760_v6 }
 0x131   : > { %v1191_v59 = vadd.f32 0.18741608, %v1190_v27  ;;  %v5894_v6 = vmul.f32 0.5, %v5727_v0  ;;  %v5897_v27 = vmin.f32 %v1422_v3, 16.0 }
 0x132   : > { %v5848_v63 = vadd.f32 %v765_v48, %v717_v44  ;;  %v5850_v41 = vpop.f32.mrf.mxu1  ;;  %v709_v48 = vadd.f32 %v5739_v28, %v5637_v54  ;;  %v2029_v44 = vadd.f32 0.05243302, %v2028_v55  ;;  %v5877_v28 = vmul.f32 %v1793_v40, %v5677_v34  ;;  %8522 = vst [vmem:[#allocation37_spill] sm:$0xff] %v5882_v9  ;;  %v5026_v5 = vpop.eup %5025 }
 0x133   : > { %v5839_v26 = vpop.f32.mrf.mxu0  ;;  %v1202_v55 = vadd.f32 0.4994258, %v1201_v16  ;;  %v1073_v46 = vadd.f32 1.1283791, %v1072_v35  ;;  %v1307_v34 = vadd.f32 0.0036580483, %v1306_v19  ;;  %v714_v35 = vadd.f32 %v5793_v17, %v5637_v54 }
 0x134   : > { %8519 = vst [vmem:[#allocation34_spill] sm:$0xff] %v5848_v63  ;;  %v5887_v52 = vadd.f32 %v5729_v1, %v709_v48  ;;  %v2030_v53 = vmul.f32 %v2029_v44, %v5766_v18  ;;  %v2264_v16 = vmul.f32 2.1237322e-06, %v5884_v11  ;;  %v5901_v48 = vperm.slane %v5631_v23, 1 }
 0x135   : > { %8521 = vst [vmem:[#allocation36_spill] sm:$0xff] %v5877_v28  ;;  %v1203_v7 = vmul.f32 %v1202_v55, %v5741_v33  ;;  %v4508_v55 = vor.u32 %v4844_v4, %v4505_v14  ;;  %v1192_v0 = vmul.f32 %v1191_v59, %v5741_v33  ;;  %v1074_v49 = vmul.f32 %v1073_v46, %v5692_v21 }
 0x136   : > { %8523 = vst [vmem:[#allocation38_spill] sm:$0xff] %v5887_v52  ;;  %v5910_v3 = vmul.f32 0.70710677, %v5887_v52  ;;  %v5915_v23 = vadd.f32 0.18741608, %v2030_v53  ;;  %v1086_v28 = vmul.f32 %v5026_v5, %v5853_v8  ;;  %v1308_v17 = vmul.f32 %v1307_v34, %v5801_v10 }
 0x137   : > { %v5889_v36 = vpop.f32.mrf.mxu3  ;;  %8524 = vst [vmem:[#allocation39_spill] sm:$0xff] %v5894_v6  ;;  %v5905_v19 = vadd.f32 1.0, %v1203_v7  ;;  %v2148_v6 = vmul.f32 %v2147_v45, %v5807_v13  ;;  %3792 = vmatpush.bf16.msra.mxu1 %v4508_v55  ;;  %v2265_v4 = vadd.f32 0.00028619796, %v2264_v16  ;;  %v1424_v33 = vmul.f32 2.1237322e-06, %v5897_v27 }
 0x138   : > { %v5922_v59 = vmul.f32 0.70710677, %v5783_v51  ;;  %v780_v45 = vadd.f32 %v5744_v38, %v5901_v48  ;;  %v5927_v21 = vadd.f32 %v5778_v43, %v714_v35  ;;  %v1087_v53 = vsub.f32 1.0, %v1086_v28 }
 0x139   : > { %5027 = vrcp.f32 %v5905_v19  ;;  %v1193_v7 = vadd.f32 1.1283791, %v1192_v0  ;;  %v2382_v34 = vmul.f32 %v5910_v3, %v5910_v3  ;;  %v1096_v16 = vand.u32 2147483648, %v5853_v8 }
 0x13a   : > { %v926_v44 = vpop.f32.mrf.mxu1  ;;  %8526 = vst [vmem:[#allocation41_spill] sm:$0xff] %v5927_v21  ;;  %vm1091_vm0 = vweird.f32 %v5026_v5  ;;  %v1094_v38 = vand.u32 2147483647, %v5853_v8  ;;  %v5940_v43 = vadd.f32 0.05243302, %v1308_v17  ;;  %v2266_v35 = vmul.f32 %v2265_v4, %v5884_v11 }
 0x13b   : > { %v877_v40 = vpop.f32.mrf.mxu0  ;;  %v1425_v28 = vadd.f32 0.00028619796, %v1424_v33  ;;  %v2502_v0 = vmul.f32 %v5922_v59, %v5922_v59  ;;  %v5946_v52 = vmul.f32 0.70710677, %v5927_v21  ;;  %v5954_v17 = vmul.f32 0.70710677, %v5848_v63  ;;  %vm1092_vm2 = vmor %vm1090_vm1, %vm1091_vm0 }
 0x13c   : > { %v878_v1 = vadd.f32 %v877_v40, %v5874_v62  ;;  %v1097_v4 = vor.u32 1.1754944e-38, %v1096_v16  ;;  %vm1095_vm3 = vcmp.eq.f32.partialorder %v1094_v38, 8.507059e+37  ;;  %v719_v16 = vadd.f32 %v5889_v36, %v5637_v54 }
 0x13d   : > { %8527 = vst [vmem:[#allocation42_spill] sm:$0xff] %v5946_v52  ;;  %v5962_v8 = vmin.f32 %v2502_v0, 16.0  ;;  %v2622_v9 = vmul.f32 %v5946_v52, %v5946_v52  ;;  %v1216_v38 = vand.u32 2147483648, %v5905_v19  ;;  %v2267_v54 = vadd.f32 0.0036580483, %v2266_v35 }
 0x13e   : > { %v5912_v40 = vadd.f32 %v926_v44, %v878_v1  ;;  %v5932_v1 = vadd.f32 0.05243302, %v2148_v6  ;;  %v1088_v44 = vmul.f32 %v5026_v5, %v1087_v53  ;;  %v5951_v53 = vmin.f32 %v2382_v34, 16.0  ;;  %8528 = vst [vmem:[#allocation43_spill] sm:$0xff] %v5954_v17 }
 0x13f   : > { %v828_v6 = vpop.f32.mrf.mxu3  ;;  %v5028_v55 = vpop.eup %5027  ;;  %vm1210_vm5 = vweird.f32 %v5905_v19 }
 0x140   : > { %8525 = vst [vmem:[#allocation40_spill] sm:$0xff] %v5912_v40  ;;  %v5930_v46 = vmul.f32 0.70710677, %v5912_v40  ;;  %v1089_v57 = vadd.f32 %v5026_v5, %v1088_v44  ;;  %v1206_v33 = vmul.f32 %v5028_v55, %v5905_v19  ;;  %v5958_v21 = vadd.f32 %v828_v6, %v780_v45 }
 0x141   : > { %v2384_v44 = vmul.f32 2.1237322e-06, %v5951_v53  ;;  %v1214_v45 = vand.u32 2147483647, %v5905_v19  ;;  %vm1211_vm4 = vweird.f32 %v5028_v55  ;;  %v1194_v6 = vmul.f32 %v1193_v7, %v5720_v60 }
 0x142   : > { %v1142_v14 = vmul.f32 %v5930_v46, %v5930_v46  ;;  %v1093_v31 = vsel %vm1092_vm2, %v5026_v5, %v1089_v57  ;;  %8529 = vst [vmem:[#allocation44_spill] sm:$0xff] %v5958_v21  ;;  %v1207_v56 = vsub.f32 1.0, %v1206_v33  ;;  %v2742_v57 = vmul.f32 %v5954_v17, %v5954_v17  ;;  %vm1212_vm6 = vmor %vm1210_vm5, %vm1211_vm4 }
 0x143   : > { %v1098_v34 = vsel %vm1095_vm3, %v1097_v4, %v1093_v31  ;;  %v5974_v31 = vmul.f32 0.70710677, %v5958_v21  ;;  %v5979_v4 = vadd.f32 %v5850_v41, %v719_v16  ;;  %v1217_v17 = vor.u32 1.1754944e-38, %v1216_v38  ;;  %v4683_v38 = vld [vmem:[#allocation8 + $0x168] sm:$0xf] }
 0x144   : > { %v5948_v50 = vmin.f32 %v1142_v14, 16.0  ;;  %v1426_v14 = vmul.f32 %v1425_v28, %v5897_v27  ;;  %v1099_v5 = vmul.f32 %v1098_v34, %v1074_v49  ;;  %v1208_v0 = vmul.f32 %v5028_v55, %v1207_v56 }
 0x145   : > { %8530 = vst [vmem:[#allocation45_spill] sm:$0xff] %v5979_v4  ;;  %v2385_v34 = vadd.f32 0.00028619796, %v2384_v44  ;;  %v5984_v52 = vmin.f32 %v2742_v57, 16.0  ;;  %vm1215_vm7 = vcmp.eq.f32.partialorder %v1214_v45, 8.507059e+37  ;;  %v1102_v7 = vmul.f32 %v5974_v31, %v5974_v31 }
 0x146   : > { %v1155_v42 = vmul.f32 3.8918573e-05, %v5948_v50  ;;  %v1427_v36 = vadd.f32 0.0036580483, %v1426_v14  ;;  %v1209_v33 = vadd.f32 %v5028_v55, %v1208_v0  ;;  %v4453_v56 = vclamps-f32 %v1099_v5, 1.0 }
 0x147   : > { %8532 = vst [vmem:[#allocation47_spill] sm:$0xff] %v5984_v52  ;;  %v1315_v16 = vmul.f32 3.8918573e-05, %v5801_v10  ;;  %v2744_v19 = vmul.f32 2.1237322e-06, %v5984_v52  ;;  %v2032_v5 = vmul.f32 %v5915_v23, %v5766_v18  ;;  %v6002_v45 = vmul.f32 0.5, %v5831_v30 }
 0x148   : > { %v1156_v29 = vadd.f32 0.001143296, %v1155_v42  ;;  %v2504_v42 = vmul.f32 2.1237322e-06, %v5962_v8  ;;  %v1213_v60 = vsel %vm1212_vm6, %v5028_v55, %v1209_v33  ;;  %v5997_v55 = vmul.f32 %v5879_v47, %v5695_v24  ;;  %v4914_v30 = vld [vmem:[#allocation8 + $0x230] sm:$0xf0] }
 0x149   : > { %v1218_v14 = vsel %vm1215_vm7, %v1217_v17, %v1213_v60  ;;  %8534 = vst [vmem:[#allocation49_spill] sm:$0xff] %v6002_v45  ;;  %v2982_v17 = vadd.f32 1.0, %v4453_v56  ;;  %v2150_v0 = vmul.f32 %v5932_v1, %v5807_v13  ;;  %v6006_v60 = vmin.f32 %v1102_v7, 16.0 }
 0x14a   : > { %v1157_v28 = vmul.f32 %v1156_v29, %v5948_v50  ;;  %v5982_v29 = vmin.f32 %v2622_v9, 16.0  ;;  %v2505_v35 = vadd.f32 0.00028619796, %v2504_v42  ;;  %v5992_v9 = vmul.f32 0.70710677, %v5979_v4  ;;  %8533 = vst [vmem:[#allocation48_spill] sm:$0xff] %v5997_v55  ;;  %v879_v4 = vpop.f32.mrf.mxu0 }
 0x14b   : > { %v1219_v57 = vmul.f32 %v1218_v14, %v1194_v6  ;;  %v4685_v6 = vld [vmem:[#allocation8 + $0x174] sm:$0xf0]  ;;  %v2268_v24 = vmul.f32 %v2267_v54, %v5884_v11  ;;  %v2386_v47 = vmul.f32 %v2385_v34, %v5951_v53  ;;  %v4779_v14 = vld [vmem:[#allocation8 + $0x228] sm:$0xf]  ;;  %v1316_v56 = vadd.f32 0.001143296, %v1315_v16 }
 0x14c   : > { %v1158_v49 = vadd.f32 0.014752088, %v1157_v28  ;;  %8531 = vst [vmem:[#allocation46_spill] sm:$0xff] %v5982_v29  ;;  %v2624_v41 = vmul.f32 2.1237322e-06, %v5982_v29  ;;  %v1428_v55 = vmul.f32 %v1427_v36, %v5897_v27  ;;  %v4780_v1 = vor.u32 %v4914_v30, %v4779_v14 }
 0x14d   : > { %v4890_v28 = vld [vmem:[#allocation8 + $0x170] sm:$0xf0]  ;;  %v4456_v42 = vclamps-f32 %v1219_v57, 1.0  ;;  %v2506_v57 = vmul.f32 %v2505_v35, %v5962_v8  ;;  %v2745_v7 = vadd.f32 0.00028619796, %v2744_v19  ;;  %v2862_v54 = vmul.f32 %v5992_v9, %v5992_v9 }
 0x14e   : > { %v1159_v44 = vmul.f32 %v1158_v49, %v5948_v50  ;;  %v4684_v33 = vor.u32 %v4890_v28, %v4683_v38  ;;  %v4889_v49 = vld [vmem:[#allocation8 + $0x16c] sm:$0xf]  ;;  %v2625_v38 = vadd.f32 0.00028619796, %v2624_v41  ;;  %v3030_v34 = vmul.f32 %v2982_v17, %v5816_v61  ;;  %3736 = vmatpush.bf16.msra.mxu0 %v4780_v1 }
 0x14f   : > { %v4688_v23 = vor.u32 %v4889_v49, %v4685_v6  ;;  %v2985_v45 = vadd.f32 1.0, %v4456_v42  ;;  %v1115_v16 = vmul.f32 3.8918573e-05, %v6006_v60  ;;  %v880_v36 = vadd.f32 %v879_v4, %v5874_v62  ;;  %v928_v49 = vpop.f32.mrf.mxu1 }
 0x150   : > { %v1160_v18 = vadd.f32 0.112945676, %v1159_v44  ;;  %3687 = vmatpush.bf16.msra.mxu3 %v4684_v33  ;;  %v2151_v44 = vadd.f32 0.18741608, %v2150_v0  ;;  %v2387_v42 = vadd.f32 0.0036580483, %v2386_v47  ;;  %v782_v30 = vadd.f32 %v5773_v32, %v5901_v48 }
 0x151   : > { %3834 = vmatpush.bf16.msra.mxu2 %v4688_v23  ;;  %v3033_v28 = vmul.f32 %v2985_v45, %v5869_v12  ;;  %v1317_v35 = vmul.f32 %v1316_v56, %v5801_v10  ;;  %v1310_v41 = vmul.f32 %v5940_v43, %v5801_v10  ;;  %v1144_v19 = vmul.f32 2.1237322e-06, %v5948_v50  ;;  %v830_v45 = vpop.f32.mrf.mxu3 }
 0x152   : > { %v1161_v61 = vmul.f32 %v1160_v18, %v5948_v50  ;;  %v2269_v17 = vadd.f32 0.05243302, %v2268_v24  ;;  %v1429_v33 = vadd.f32 0.05243302, %v1428_v55  ;;  %v2507_v4 = vadd.f32 0.0036580483, %v2506_v57 }
 0x153   : > { %v6025_v12 = vpack.c.bf16 %v3033_v28, %v3030_v34  ;;  %v2626_v0 = vmul.f32 %v2625_v38, %v5982_v29  ;;  %v2746_v32 = vmul.f32 %v2745_v7, %v5984_v52  ;;  %v6029_v6 = vmin.f32 %v2862_v54, 16.0 }
 0x154   : > { %v1116_v43 = vadd.f32 0.001143296, %v1115_v16  ;;  %v6033_v47 = vadd.f32 %v928_v49, %v880_v36  ;;  %v2033_v18 = vadd.f32 1.1283791, %v2032_v5  ;;  %v2388_v23 = vmul.f32 %v2387_v42, %v5951_v53 }
 0x155   : > { %8535 = vst [vmem:[#allocation50_spill] sm:$0xff] %v6025_v12  ;;  %3646 = vmatmul.bf16.vlgmr.msrb.gmra.mxu2 %v6025_v12  ;;  %3793 = vmatmul.bf16.vlgmr.msra.gmra.mxu1 %v6025_v12  ;;  %v6036_v24 = vadd.f32 %v830_v45, %v782_v30  ;;  %v1318_v55 = vadd.f32 0.014752088, %v1317_v35  ;;  %v2152_v14 = vmul.f32 %v2151_v44, %v5807_v13  ;;  %v2864_v56 = vmul.f32 2.1237322e-06, %v6029_v6 }
 0x156   : > { %8536 = vst [vmem:[#allocation51_spill] sm:$0xff] %v6029_v6  ;;  %v1145_v1 = vadd.f32 0.00028619796, %v1144_v19  ;;  %v1162_v57 = vadd.f32 0.4994258, %v1161_v61  ;;  %v2270_v7 = vmul.f32 %v2269_v17, %v5884_v11  ;;  %v1430_v54 = vmul.f32 %v1429_v33, %v5897_v27 }
 0x157   : > { %8537 = vst [vmem:[#allocation52_spill] sm:$0xff] %v6033_v47  ;;  %v1311_v38 = vadd.f32 0.18741608, %v1310_v41  ;;  %v2508_v34 = vmul.f32 %v2507_v4, %v5962_v8  ;;  %v2627_v28 = vadd.f32 0.0036580483, %v2626_v0  ;;  %v1117_v16 = vmul.f32 %v1116_v43, %v6006_v60 }
 0x158   : > { %8538 = vst [vmem:[#allocation53_spill] sm:$0xff] %v6036_v24  ;;  %v2747_v5 = vadd.f32 0.0036580483, %v2746_v32  ;;  %v6045_v36 = vmul.f32 0.70710677, %v6033_v47  ;;  %v1319_v35 = vmul.f32 %v1318_v55, %v5801_v10  ;;  %v1146_v61 = vmul.f32 %v1145_v1, %v5948_v50 }
 0x159   : > { %v2389_v42 = vadd.f32 0.05243302, %v2388_v23  ;;  %v1104_v44 = vmul.f32 2.1237322e-06, %v6006_v60  ;;  %v6049_v30 = vmul.f32 0.70710677, %v6036_v24  ;;  %v1163_v45 = vmul.f32 %v1162_v57, %v5948_v50 }
 0x15a   : > { %v2153_v41 = vadd.f32 1.1283791, %v2152_v14  ;;  %v2865_v19 = vadd.f32 0.00028619796, %v2864_v56  ;;  %v6055_v17 = vmul.f32 %v2033_v18, %v5737_v25  ;;  %v2271_v33 = vadd.f32 0.18741608, %v2270_v7 }
 0x15b   : > { %v1431_v4 = vadd.f32 0.18741608, %v1430_v54  ;;  %v2509_v0 = vadd.f32 0.05243302, %v2508_v34  ;;  %v2628_v49 = vmul.f32 %v2627_v28, %v5982_v29  ;;  %v2748_v32 = vmul.f32 %v2747_v5, %v5984_v52 }
 0x15c   : > { %v1118_v43 = vadd.f32 0.014752088, %v1117_v16  ;;  %v1262_v23 = vmul.f32 %v6045_v36, %v6045_v36  ;;  %v2390_v55 = vmul.f32 %v2389_v42, %v5951_v53  ;;  %v1105_v14 = vadd.f32 0.00028619796, %v1104_v44 }
 0x15d   : > { %v1222_v56 = vmul.f32 %v6049_v30, %v6049_v30  ;;  %v1320_v1 = vadd.f32 0.112945676, %v1319_v35  ;;  %v1312_v25 = vmul.f32 %v1311_v38, %v5801_v10  ;;  %v2866_v18 = vmul.f32 %v2865_v19, %v6029_v6 }
 0x15e   : > { %v1147_v57 = vadd.f32 0.0036580483, %v1146_v61  ;;  %v6066_v7 = vadd.f32 1.0, %v1163_v45  ;;  %v2272_v54 = vmul.f32 %v2271_v33, %v5884_v11  ;;  %v1432_v34 = vmul.f32 %v1431_v4, %v5897_v27 }
 0x15f   : > { %v6071_v28 = vmul.f32 0.5, %v5783_v51  ;;  %v2510_v5 = vmul.f32 %v2509_v0, %v5962_v8  ;;  %v2629_v16 = vadd.f32 0.05243302, %v2628_v49  ;;  %v2749_v42 = vadd.f32 0.05243302, %v2748_v32 }
 0x160   : > { %v1119_v44 = vmul.f32 %v1118_v43, %v6006_v60  ;;  %v6075_v35 = vmin.f32 %v1262_v23, 16.0  ;;  %v2391_v38 = vadd.f32 0.18741608, %v2390_v55  ;;  %v1106_v19 = vmul.f32 %v1105_v14, %v6006_v60 }
 0x161   : > { %8539 = vst [vmem:[#allocation54_spill] sm:$0xff] %v6071_v28  ;;  %v6078_v61 = vmin.f32 %v1222_v56, 16.0  ;;  %v1321_v45 = vmul.f32 %v1320_v1, %v5801_v10  ;;  %v1313_v33 = vadd.f32 1.1283791, %v1312_v25  ;;  %v2867_v4 = vadd.f32 0.0036580483, %v2866_v18 }
 0x162   : > { %v1148_v51 = vmul.f32 %v1147_v57, %v5948_v50  ;;  %5029 = vrcp.f32 %v6066_v7  ;;  %v6084_v0 = vmul.f32 %v2153_v41, %v5776_v39  ;;  %v2273_v49 = vadd.f32 1.1283791, %v2272_v54 }
 0x163   : > { %v1433_v32 = vadd.f32 1.1283791, %v1432_v34  ;;  %v2511_v43 = vadd.f32 0.18741608, %v2510_v5  ;;  %v2630_v23 = vmul.f32 %v2629_v16, %v5982_v29  ;;  %v2750_v55 = vmul.f32 %v2749_v42, %v5984_v52 }
 0x164   : > { %v1120_v14 = vadd.f32 0.112945676, %v1119_v44  ;;  %v1275_v56 = vmul.f32 3.8918573e-05, %v6075_v35  ;;  %v2392_v1 = vmul.f32 %v2391_v38, %v5951_v53  ;;  %v1107_v25 = vadd.f32 0.0036580483, %v1106_v19 }
 0x165   : > { %v1235_v18 = vmul.f32 3.8918573e-05, %v6078_v61  ;;  %v1322_v57 = vadd.f32 0.4994258, %v1321_v45  ;;  %v6092_v12 = vmul.f32 %v1313_v33, %v5770_v37  ;;  %v6096_v39 = vadd.f32 %v5803_v2, %v5901_v48 }
 0x166   : > { %v2868_v41 = vmul.f32 %v2867_v4, %v6029_v6  ;;  %v1149_v54 = vadd.f32 0.05243302, %v1148_v51  ;;  %v6100_v34 = vmul.f32 %v2273_v49, %v5835_v15  ;;  %v6103_v5 = vmul.f32 %v1433_v32, %v5846_v22 }
 0x167   : > { %v2512_v16 = vmul.f32 %v2511_v43, %v5962_v8  ;;  %v1264_v42 = vmul.f32 2.1237322e-06, %v6075_v35  ;;  %v2631_v37 = vadd.f32 0.18741608, %v2630_v23  ;;  %v2751_v38 = vadd.f32 0.18741608, %v2750_v55 }
 0x168   : > { %8540 = vst [vmem:[#allocation55_spill] sm:$0xff] %v6100_v34  ;;  %v6107_v44 = vpop.eup %5029  ;;  %v1121_v2 = vmul.f32 %v1120_v14, %v6006_v60  ;;  %v1276_v19 = vadd.f32 0.001143296, %v1275_v56  ;;  %v2393_v45 = vadd.f32 1.1283791, %v2392_v1  ;;  %v1108_v51 = vmul.f32 %v1107_v25, %v6006_v60 }
 0x169   : > { %v1236_v33 = vadd.f32 0.001143296, %v1235_v18  ;;  %v1323_v15 = vmul.f32 %v1322_v57, %v5801_v10  ;;  %v6113_v22 = vmul.f32 0.5, %v5848_v63  ;;  %v6117_v4 = vadd.f32 %v5839_v26, %v5901_v48 }
 0x16a   : > { %v2869_v49 = vadd.f32 0.05243302, %v2868_v41  ;;  %v1150_v32 = vmul.f32 %v1149_v54, %v5948_v50  ;;  %v2513_v43 = vadd.f32 1.1283791, %v2512_v16  ;;  %v1166_v23 = vmul.f32 %v6107_v44, %v6066_v7  ;;  %v882_v41 = vpop.f32.mrf.mxu0 }
 0x16b   : > { %8541 = vst [vmem:[#allocation56_spill] sm:$0xff] %v6113_v22  ;;  %v1265_v55 = vadd.f32 0.00028619796, %v1264_v42  ;;  %v1224_v14 = vmul.f32 2.1237322e-06, %v6078_v61  ;;  %v2632_v56 = vmul.f32 %v2631_v37, %v5982_v29  ;;  %v2752_v10 = vmul.f32 %v2751_v38, %v5984_v52 }
 0x16c   : > { %v1122_v1 = vadd.f32 0.4994258, %v1121_v2  ;;  %v1277_v25 = vmul.f32 %v1276_v19, %v6075_v35  ;;  %v6127_v26 = vmul.f32 %v2393_v45, %v5910_v3  ;;  %v1109_v18 = vadd.f32 0.05243302, %v1108_v51 }
 0x16d   : > { %v1237_v57 = vmul.f32 %v1236_v33, %v6078_v61  ;;  %v6130_v54 = vadd.f32 1.0, %v1323_v15  ;;  %v2870_v16 = vmul.f32 %v2869_v49, %v6029_v6  ;;  %v6134_v42 = vmul.f32 0.5, %v5912_v40 }
 0x16e   : > { %8542 = vst [vmem:[#allocation57_spill] sm:$0xff] %v6127_v26  ;;  %v1151_v37 = vadd.f32 0.18741608, %v1150_v32  ;;  %v883_v38 = vadd.f32 %v882_v41, %v5874_v62  ;;  %v6138_v2 = vmul.f32 %v2513_v43, %v5922_v59  ;;  %v1167_v19 = vsub.f32 1.0, %v1166_v23  ;;  %v931_v32 = vpop.f32.mrf.mxu1 }
 0x16f   : > { %v1266_v3 = vmul.f32 %v1265_v55, %v6075_v35  ;;  %v1225_v45 = vadd.f32 0.00028619796, %v1224_v14  ;;  %v6141_v51 = vadd.f32 1.1283791, %v2632_v56  ;;  %v6143_v33 = vadd.f32 1.1283791, %v2752_v10 }
 0x170   : > { %8543 = vst [vmem:[#allocation58_spill] sm:$0xff] %v6138_v2  ;;  %v1123_v15 = vmul.f32 %v1122_v1, %v6006_v60  ;;  %v1278_v49 = vadd.f32 0.014752088, %v1277_v25  ;;  %v1110_v40 = vmul.f32 %v1109_v18, %v6006_v60  ;;  %v1238_v63 = vadd.f32 0.014752088, %v1237_v57 }
 0x171   : > { %5031 = vrcp.f32 %v6130_v54  ;;  %v1435_v59 = vmul.f32 3.8918573e-05, %v5897_v27  ;;  %v2871_v43 = vadd.f32 0.18741608, %v2870_v16  ;;  %v1152_v23 = vmul.f32 %v1151_v37, %v5948_v50 }
 0x172   : > { %vm1170_vm8 = vweird.f32 %v6066_v7  ;;  %v6151_v55 = vadd.f32 %v931_v32, %v883_v38  ;;  %v1168_v14 = vmul.f32 %v6107_v44, %v1167_v19  ;;  %v1267_v56 = vadd.f32 0.0036580483, %v1266_v3 }
 0x173   : > { %v1226_v10 = vmul.f32 %v1225_v45, %v6078_v61  ;;  %v1436_v1 = vadd.f32 0.001143296, %v1435_v59  ;;  %v1174_v25 = vand.u32 2147483647, %v6066_v7  ;;  %v1176_v18 = vand.u32 2147483648, %v6066_v7 }
 0x174   : > { %8544 = vst [vmem:[#allocation59_spill] sm:$0xff] %v6151_v55  ;;  %v6157_v57 = vadd.f32 1.0, %v1123_v15  ;;  %v1279_v41 = vmul.f32 %v1278_v49, %v6075_v35  ;;  %vm1171_vm9 = vweird.f32 %v6107_v44  ;;  %v1111_v50 = vadd.f32 0.18741608, %v1110_v40 }
 0x175   : > { %v1239_v16 = vmul.f32 %v1238_v63, %v6078_v61  ;;  %v1437_v37 = vmul.f32 %v1436_v1, %v5897_v27  ;;  %v2872_v38 = vmul.f32 %v2871_v43, %v6029_v6  ;;  %v6165_v19 = vmul.f32 0.70710677, %v6151_v55  ;;  %vm6175_vm10 = vmor %vm1170_vm8, %vm1171_vm9 }
 0x176   : > { %v1555_v3 = vmul.f32 3.8918573e-05, %v5668_v58  ;;  %v1675_v45 = vmul.f32 3.8918573e-05, %v5689_v20  ;;  %v1169_v49 = vadd.f32 %v6107_v44, %v1168_v14  ;;  %v1268_v32 = vmul.f32 %v1267_v56, %v6075_v35 }
 0x177   : > { %v6169_v15 = vpop.eup %5031  ;;  %v1227_v40 = vadd.f32 0.0036580483, %v1226_v10  ;;  %v1438_v59 = vadd.f32 0.014752088, %v1437_v37  ;;  %v1153_v63 = vadd.f32 1.1283791, %v1152_v23  ;;  %5033 = vrcp.f32 %v6157_v57 }
 0x178   : > { %v1280_v1 = vadd.f32 0.112945676, %v1279_v41  ;;  %v1556_v22 = vadd.f32 0.001143296, %v1555_v3  ;;  %vm6180_vm11 = vcmp.eq.f32.partialorder %v1174_v25, 8.507059e+37  ;;  %v1177_v14 = vor.u32 1.1754944e-38, %v1176_v18 }
 0x179   : > { %v1112_v56 = vmul.f32 %v1111_v50, %v6006_v60  ;;  %v1240_v10 = vadd.f32 0.112945676, %v1239_v16  ;;  %v1326_v23 = vmul.f32 %v6169_v15, %v6130_v54  ;;  %v1439_v7 = vmul.f32 %v1438_v59, %v5897_v27 }
 0x17a   : > { %v1557_v37 = vmul.f32 %v1556_v22, %v5668_v58  ;;  %v1676_v28 = vadd.f32 0.001143296, %v1675_v45  ;;  %v1173_v41 = vsel %vm6175_vm10, %v6107_v44, %v1169_v49  ;;  %v1269_v25 = vadd.f32 0.05243302, %v1268_v32 }
 0x17b   : > { %v1228_v3 = vmul.f32 %v1227_v40, %v6078_v61  ;;  %v1382_v18 = vmul.f32 %v6165_v19, %v6165_v19  ;;  %v1281_v60 = vmul.f32 %v1280_v1, %v6075_v35  ;;  %v1440_v50 = vadd.f32 0.112945676, %v1439_v7  ;;  %v8549_v1 = vld [vmem:[#allocation16_spill] sm:$0xff] }
 0x17c   : > { %v1558_v16 = vadd.f32 0.014752088, %v1557_v37  ;;  %v1677_v52 = vmul.f32 %v1676_v28, %v5689_v20  ;;  %v6197_v59 = vadd.f32 1.1283791, %v2872_v38  ;;  %v1154_v22 = vmul.f32 %v1153_v63, %v5930_v46 }
 0x17d   : > { %v6201_v45 = vmul.f32 0.5, %v5958_v21  ;;  %v1113_v44 = vadd.f32 1.1283791, %v1112_v56  ;;  %v6203_v49 = vpop.eup %5033  ;;  %v1241_v32 = vmul.f32 %v1240_v10, %v6078_v61  ;;  %v1327_v40 = vsub.f32 1.0, %v1326_v23  ;;  %v8550_v10 = vld [vmem:[#allocation42_spill] sm:$0xff] }
 0x17e   : > { %v1441_v43 = vmul.f32 %v1440_v50, %v5897_v27  ;;  %v6208_v7 = vmul.f32 0.5, %v8549_v1  ;;  %v1178_v28 = vsel %vm6180_vm11, %v1177_v14, %v1173_v41  ;;  %v1270_v38 = vmul.f32 %v1269_v25, %v6075_v35  ;;  %v8552_v50 = vld [vmem:[#allocation43_spill] sm:$0xff]  ;;  %v4671_v41 = vld [vmem:[#allocation8 + $0x150] sm:$0xf]  ;;  %v4887_v25 = vld [vmem:[#allocation8 + $0x158] sm:$0xf0] }
 0x17f   : > { %v1229_v46 = vadd.f32 0.05243302, %v1228_v3  ;;  %v6213_v63 = vmin.f32 %v1382_v18, 16.0  ;;  %v1282_v37 = vadd.f32 0.4994258, %v1281_v60  ;;  %v1559_v21 = vmul.f32 %v1558_v16, %v5668_v58 }
 0x180   : > { %v1442_v56 = vadd.f32 0.4994258, %v1441_v43  ;;  %v1678_v2 = vadd.f32 0.014752088, %v1677_v52  ;;  %v6218_v23 = vmul.f32 %v6141_v51, %v8550_v10  ;;  %v6222_v1 = vmul.f32 %v6143_v33, %v8552_v50  ;;  %v4886_v3 = vld [vmem:[#allocation8 + $0x154] sm:$0xf] }
 0x181   : > { %v6225_v6 = vmul.f32 %v1113_v44, %v5974_v31  ;;  %v1126_v14 = vmul.f32 %v6203_v49, %v6157_v57  ;;  %v1242_v18 = vadd.f32 0.4994258, %v1241_v32  ;;  %v1328_v52 = vmul.f32 %v6169_v15, %v1327_v40  ;;  %v4673_v16 = vld [vmem:[#allocation8 + $0x15c] sm:$0xf0]  ;;  %v4767_v43 = vld [vmem:[#allocation8 + $0x210] sm:$0xf] }
 0x182   : > { %8551 = vst [vmem:[#allocation42_spill] sm:$0xff] %v6218_v23  ;;  %v1443_v60 = vmul.f32 %v1442_v56, %v5897_v27  ;;  %v4672_v51 = vor.u32 %v4887_v25, %v4671_v41  ;;  %v1179_v10 = vmul.f32 %v1178_v28, %v1154_v22  ;;  %v1271_v33 = vadd.f32 0.18741608, %v1270_v38  ;;  %v4911_v44 = vld [vmem:[#allocation8 + $0x218] sm:$0xf0] }
 0x183   : > { %8553 = vst [vmem:[#allocation43_spill] sm:$0xff] %v6222_v1  ;;  %v1230_v50 = vmul.f32 %v1229_v46, %v6078_v61  ;;  %v4676_v31 = vor.u32 %v4886_v3, %v4673_v16  ;;  %v4768_v23 = vor.u32 %v4911_v44, %v4767_v43  ;;  %v1560_v29 = vadd.f32 0.112945676, %v1559_v21  ;;  %v833_v43 = vpop.f32.mrf.mxu3  ;;  %v8556_v44 = vld [vmem:[#allocation21_spill] sm:$0xff] }
 0x184   : > { %v6232_v1 = vadd.f32 1.0, %v1443_v60  ;;  %3688 = vmatpush.bf16.msra.mxu3 %v4672_v51  ;;  %v1679_v32 = vmul.f32 %v1678_v2, %v5689_v20  ;;  %v1127_v26 = vsub.f32 1.0, %v1126_v14  ;;  %v1136_v40 = vand.u32 2147483648, %v6157_v57 }
 0x185   : > { %v1283_v27 = vmul.f32 %v1282_v37, %v6075_v35  ;;  %vm1330_vm12 = vweird.f32 %v6130_v54  ;;  %3835 = vmatpush.bf16.msra.mxu2 %v4676_v31  ;;  %vm1130_vm13 = vweird.f32 %v6157_v57  ;;  %v1243_v22 = vmul.f32 %v1242_v18, %v6078_v61  ;;  %3737 = vmatpush.bf16.msra.mxu0 %v4768_v23 }
 0x186   : > { %v1329_v28 = vadd.f32 %v6169_v15, %v1328_v52  ;;  %vm1331_vm14 = vweird.f32 %v6169_v15  ;;  %5035 = vrcp.f32 %v6232_v1  ;;  %v4455_v21 = vclamps-f32 %v1179_v10, 1.0 }
 0x187   : > { %v1272_v2 = vmul.f32 %v1271_v33, %v6075_v35  ;;  %v1334_v38 = vand.u32 2147483647, %v6130_v54  ;;  %v1336_v46 = vand.u32 2147483648, %v6130_v54  ;;  %v1231_v37 = vadd.f32 0.18741608, %v1230_v50  ;;  %vm6258_vm0 = vmor %vm1330_vm12, %vm1331_vm14 }
 0x188   : > { %v1384_v56 = vmul.f32 2.1237322e-06, %v6213_v63  ;;  %v1561_v14 = vmul.f32 %v1560_v29, %v5668_v58  ;;  %v1680_v41 = vadd.f32 0.112945676, %v1679_v32  ;;  %vm1131_vm15 = vweird.f32 %v6203_v49 }
 0x189   : > { %v1134_v25 = vand.u32 2147483647, %v6157_v57  ;;  %v6250_v3 = vor.u32 1.1754944e-38, %v1136_v40  ;;  %v6252_v23 = vadd.f32 1.0, %v1283_v27  ;;  %v1128_v18 = vmul.f32 %v6203_v49, %v1127_v26  ;;  %v884_v26 = vpop.f32.mrf.mxu0  ;;  %vm6295_vm3 = vmor %vm1130_vm13, %vm1131_vm15  ;;  %v933_v57 = vpop.f32.mrf.mxu1 }
 0x18a   : > { %v6263_v29 = vadd.f32 1.0, %v1243_v22  ;;  %v1333_v52 = vsel %vm6258_vm0, %v6169_v15, %v1329_v28  ;;  %v1562_v60 = vadd.f32 0.4994258, %v1561_v14  ;;  %v6268_v51 = vadd.f32 1.0, %v4455_v21 }
 0x18b   : > { %vm1335_vm1 = vcmp.eq.f32.partialorder %v1334_v38, 8.507059e+37  ;;  %v1337_v16 = vor.u32 1.1754944e-38, %v1336_v46  ;;  %v1681_v54 = vmul.f32 %v1680_v41, %v5689_v20  ;;  %v1273_v33 = vadd.f32 1.1283791, %v1272_v2 }
 0x18c   : > { %v5036_v10 = vpop.eup %5035  ;;  %v1232_v50 = vmul.f32 %v1231_v37, %v6078_v61  ;;  %v1385_v31 = vadd.f32 0.00028619796, %v1384_v56  ;;  %v1795_v32 = vmul.f32 3.8918573e-05, %v8556_v44  ;;  %vm6273_vm2 = vcmp.eq.f32.partialorder %v1134_v25, 8.507059e+37 }
 0x18d   : > { %5037 = vrcp.f32 %v6252_v23  ;;  %v1338_v15 = vsel %vm1335_vm1, %v1337_v16, %v1333_v52  ;;  %v1446_v27 = vmul.f32 %v5036_v10, %v6232_v1  ;;  %v1563_v22 = vmul.f32 %v1562_v60, %v5668_v58 }
 0x18e   : > { %v1129_v28 = vadd.f32 %v6203_v49, %v1128_v18  ;;  %v1296_v21 = vand.u32 2147483648, %v6252_v23  ;;  %5039 = vrcp.f32 %v6263_v29  ;;  %v6284_v61 = vadd.f32 %v833_v43, %v6096_v39 }
 0x18f   : > { %v1447_v2 = vsub.f32 1.0, %v1446_v27  ;;  %v885_v38 = vadd.f32 %v884_v26, %v5874_v62  ;;  %v6287_v46 = vadd.f32 1.0, %v1563_v22  ;;  %v1682_v37 = vadd.f32 0.4994258, %v1681_v54  ;;  %v4659_v27 = vld [vmem:[#allocation8 + $0x138] sm:$0xf] }
 0x190   : > { %8559 = vst [vmem:[#allocation21_spill] sm:$0xff] %v6284_v61  ;;  %v1233_v56 = vadd.f32 1.1283791, %v1232_v50  ;;  %v1339_v14 = vmul.f32 %v1338_v15, %v6092_v12  ;;  %v1456_v58 = vand.u32 2147483648, %v6232_v1  ;;  %v1796_v41 = vadd.f32 0.001143296, %v1795_v32 }
 0x191   : > { %v1448_v39 = vmul.f32 %v5036_v10, %v1447_v2  ;;  %vm1451_vm4 = vweird.f32 %v5036_v10  ;;  %v1454_v35 = vand.u32 2147483647, %v6232_v1  ;;  %5041 = vrcp.f32 %v6287_v46  ;;  %v936_v34 = vpop.f32.mrf.mxu1 }
 0x192   : > { %v6302_v18 = vmul.f32 %v1273_v33, %v6045_v36  ;;  %v1386_v52 = vmul.f32 %v1385_v31, %v6213_v63  ;;  %v6307_v60 = vmul.f32 0.70710677, %v6284_v61  ;;  %vm1450_vm5 = vweird.f32 %v6232_v1 }
 0x193   : > { %v6309_v16 = vpop.eup %5037  ;;  %v1449_v43 = vadd.f32 %v5036_v10, %v1448_v39  ;;  %v6312_v54 = vadd.f32 %v933_v57, %v885_v38  ;;  %v1683_v50 = vmul.f32 %v1682_v37, %v5689_v20  ;;  %v1133_v36 = vsel %vm6295_vm3, %v6203_v49, %v1129_v28  ;;  %vm1452_vm6 = vmor %vm1450_vm5, %vm1451_vm4  ;;  %v4884_v28 = vld [vmem:[#allocation8 + $0x140] sm:$0xf0] }
 0x194   : > { %v6315_v26 = vpop.eup %5039  ;;  %v6320_v33 = vor.u32 1.1754944e-38, %v1296_v21  ;;  %v4459_v31 = vclamps-f32 %v1339_v14, 1.0  ;;  %v1457_v32 = vor.u32 1.1754944e-38, %v1456_v58  ;;  %v6324_v15 = vmul.f32 %v1233_v56, %v6049_v30 }
 0x195   : > { %8562 = vst [vmem:[#allocation60_spill] sm:$0xff] %v6312_v54  ;;  %v1453_v1 = vsel %vm1452_vm6, %v5036_v10, %v1449_v43  ;;  %vm1455_vm7 = vcmp.eq.f32.partialorder %v1454_v35, 8.507059e+37  ;;  %v1797_v20 = vmul.f32 %v1796_v41, %v8556_v44  ;;  %v1286_v22 = vmul.f32 %v6309_v16, %v6252_v23  ;;  %v835_v35 = vpop.f32.mrf.mxu3 }
 0x196   : > { %v1387_v2 = vadd.f32 0.0036580483, %v1386_v52  ;;  %v1458_v38 = vsel %vm1455_vm7, %v1457_v32, %v1453_v1  ;;  %v1342_v49 = vmul.f32 %v6307_v60, %v6307_v60  ;;  %v6333_v30 = vmul.f32 0.70710677, %v6312_v54 }
 0x197   : > { %v5042_v21 = vpop.eup %5041  ;;  %v1459_v37 = vmul.f32 %v1458_v38, %v6103_v5  ;;  %v6335_v10 = vadd.f32 1.0, %v1683_v50  ;;  %v4660_v56 = vor.u32 %v4884_v28, %v4659_v27  ;;  %v6340_v14 = vsel %vm6273_vm2, %v6250_v3, %v1133_v36  ;;  %v4883_v38 = vld [vmem:[#allocation8 + $0x13c] sm:$0xf]  ;;  %v4661_v28 = vld [vmem:[#allocation8 + $0x144] sm:$0xf0] }
 0x198   : > { %8563 = vst [vmem:[#allocation61_spill] sm:$0xff] %v6333_v30  ;;  %v1246_v58 = vmul.f32 %v6315_v26, %v6263_v29  ;;  %v2988_v41 = vadd.f32 1.0, %v4459_v31  ;;  %v1566_v25 = vmul.f32 %v5042_v21, %v6287_v46  ;;  %v1576_v5 = vand.u32 2147483648, %v6287_v46  ;;  %v887_v31 = vpop.f32.mrf.mxu0 }
 0x199   : > { %v4462_v39 = vclamps-f32 %v1459_v37, 1.0  ;;  %5043 = vrcp.f32 %v6335_v10  ;;  %3689 = vmatpush.bf16.msra.mxu3 %v4660_v56  ;;  %v1798_v52 = vadd.f32 0.014752088, %v1797_v20  ;;  %vm1570_vm8 = vweird.f32 %v6287_v46  ;;  %v8565_v37 = vld [vmem:[#allocation37_spill] sm:$0xff] }
 0x19a   : > { %v1567_v57 = vsub.f32 1.0, %v1566_v25  ;;  %vm1571_vm9 = vweird.f32 %v5042_v21  ;;  %v1574_v3 = vand.u32 2147483647, %v6287_v46  ;;  %v1287_v40 = vsub.f32 1.0, %v1286_v22  ;;  %v8566_v56 = vld [vmem:[#allocation49_spill] sm:$0xff] }
 0x19b   : > { %v2991_v43 = vadd.f32 1.0, %v4462_v39  ;;  %v6349_v50 = vmin.f32 %v1342_v49, 16.0  ;;  %v1502_v36 = vmul.f32 %v6333_v30, %v6333_v30  ;;  %vm1290_vm10 = vweird.f32 %v6252_v23  ;;  %vm6364_vm11 = vmor %vm1570_vm8, %vm1571_vm9 }
 0x19c   : > { %v1247_v32 = vsub.f32 1.0, %v1246_v58  ;;  %v6355_v1 = vadd.f32 %v835_v35, %v6117_v4  ;;  %v888_v27 = vadd.f32 %v887_v31, %v5874_v62  ;;  %v1568_v20 = vmul.f32 %v5042_v21, %v1567_v57  ;;  %v4908_v31 = vld [vmem:[#allocation8 + $0x200] sm:$0xf0] }
 0x19d   : > { %v3036_v22 = vmul.f32 %v2988_v41, %v8565_v37  ;;  %v3039_v49 = vmul.f32 %v2991_v43, %v8566_v56  ;;  %v1344_v25 = vmul.f32 2.1237322e-06, %v6349_v50  ;;  %v1577_v4 = vor.u32 1.1754944e-38, %v1576_v5  ;;  %v4755_v41 = vld [vmem:[#allocation8 + $0x1f8] sm:$0xf] }
 0x19e   : > { %8564 = vst [vmem:[#allocation62_spill] sm:$0xff] %v6355_v1  ;;  %v1388_v58 = vmul.f32 %v1387_v2, %v6213_v63  ;;  %v1569_v35 = vadd.f32 %v5042_v21, %v1568_v20  ;;  %vm6369_vm12 = vcmp.eq.f32.partialorder %v1574_v3, 8.507059e+37  ;;  %v1799_v43 = vmul.f32 %v1798_v52, %v8556_v44 }
 0x19f   : > { %v5044_v37 = vpop.eup %5043  ;;  %v1288_v56 = vmul.f32 %v6309_v16, %v1287_v40  ;;  %v6375_v46 = vpack.c.bf16 %v3039_v49, %v3036_v22  ;;  %v6377_v12 = vmin.f32 %v1502_v36, 16.0  ;;  %v4664_v5 = vor.u32 %v4883_v38, %v4661_v28  ;;  %v8577_v22 = vld [vmem:[#allocation31_spill] sm:$0xff] }
 0x1a0   : > { %v1248_v2 = vmul.f32 %v6315_v26, %v1247_v32  ;;  %v6381_v3 = vmul.f32 0.70710677, %v6355_v1  ;;  %v6383_v20 = vadd.f32 %v936_v34, %v888_v27  ;;  %v1573_v30 = vsel %vm6364_vm11, %v5042_v21, %v1569_v35 }
 0x1a1   : > { %8571 = vst [vmem:[#allocation37_spill] sm:$0xff] %v6375_v46  ;;  %3651 = vmatmul.bf16.gmra.mxu2 %v6375_v46  ;;  %3798 = vmatmul.bf16.gmra.mxu1 %v6375_v46  ;;  %v1504_v52 = vmul.f32 2.1237322e-06, %v6377_v12  ;;  %v1578_v40 = vsel %vm6369_vm12, %v1577_v4, %v1573_v30  ;;  %v1686_v36 = vmul.f32 %v5044_v37, %v6335_v10  ;;  %v1345_v38 = vadd.f32 0.00028619796, %v1344_v25  ;;  %v8584_v46 = vld [vmem:[#allocation35_spill] sm:$0xff] }
 0x1a2   : > { %8572 = vst [vmem:[#allocation49_spill] sm:$0xff] %v6381_v3  ;;  %v4756_v32 = vor.u32 %v4908_v31, %v4755_v41  ;;  %vm1690_vm13 = vweird.f32 %v6335_v10  ;;  %v1696_v34 = vand.u32 2147483648, %v6335_v10  ;;  %3836 = vmatpush.bf16.msra.mxu2 %v4664_v5  ;;  %v1800_v27 = vadd.f32 0.112945676, %v1799_v43 }
 0x1a3   : > { %8573 = vst [vmem:[#allocation63_spill] sm:$0xff] %v6383_v20  ;;  %v8574_v21 = vand.u32 2147483647, %v6252_v23  ;;  %v1579_v49 = vmul.f32 %v1578_v40, %v8577_v22  ;;  %v1687_v39 = vsub.f32 1.0, %v1686_v36  ;;  %vm1691_vm15 = vweird.f32 %v5044_v37  ;;  %v4743_v40 = vld [vmem:[#allocation8 + $0x1e0] sm:$0xf] }
 0x1a4   : > { %v1694_v30 = vand.u32 2147483647, %v6335_v10  ;;  %3738 = vmatpush.bf16.msra.mxu0 %v4756_v32  ;;  %v6405_v25 = vmul.f32 %v6340_v14, %v6225_v6  ;;  %vm1291_vm0 = vweird.f32 %v6309_v16  ;;  %v1389_v4 = vadd.f32 0.05243302, %v1388_v58  ;;  %vm6419_vm2 = vmor %vm1690_vm13, %vm1691_vm15  ;;  %v4905_v36 = vld [vmem:[#allocation8 + $0x1e8] sm:$0xf0] }
 0x1a5   : > { %vm6397_vm14 = vcmp.eq.f32.partialorder %v8574_v21, 8.507059e+37  ;;  %v1462_v35 = vmul.f32 %v6381_v3, %v6381_v3  ;;  %vm1251_vm1 = vweird.f32 %v6315_v26  ;;  %v1505_v57 = vadd.f32 0.00028619796, %v1504_v52  ;;  %vm6425_vm3 = vmor %vm1290_vm10, %vm1291_vm0  ;;  %v8588_v23 = vld [vmem:[#allocation29_spill] sm:$0xff] }
 0x1a6   : > { %v6412_v41 = vmul.f32 0.70710677, %v6383_v20  ;;  %v1688_v31 = vmul.f32 %v5044_v37, %v1687_v39  ;;  %v1289_v43 = vadd.f32 %v6309_v16, %v1288_v56  ;;  %v1249_v5 = vadd.f32 %v6315_v26, %v1248_v2 }
 0x1a7   : > { %v1346_v6 = vmul.f32 %v1345_v38, %v6349_v50  ;;  %v1697_v58 = vor.u32 1.1754944e-38, %v1696_v34  ;;  %v4465_v56 = vclamps-f32 %v1579_v49, 1.0  ;;  %vm1695_vm4 = vcmp.eq.f32.partialorder %v1694_v30, 8.507059e+37 }
 0x1a8   : > { %v1689_v32 = vadd.f32 %v5044_v37, %v1688_v31  ;;  %v1801_v2 = vmul.f32 %v1800_v27, %v8556_v44  ;;  %vm1250_vm5 = vweird.f32 %v6263_v29  ;;  %v1254_v10 = vand.u32 2147483647, %v6263_v29 }
 0x1a9   : > { %v1256_v38 = vand.u32 2147483648, %v6263_v29  ;;  %v6433_v34 = vmin.f32 %v1462_v35, 16.0  ;;  %vm6437_vm6 = vmor %vm1250_vm5, %vm1251_vm1  ;;  %v1390_v21 = vmul.f32 %v1389_v4, %v6213_v63  ;;  %v1506_v22 = vmul.f32 %v1505_v57, %v6377_v12  ;;  %v789_v4 = vpop.f32.mrf.mxu2 }
 0x1aa   : > { %v1693_v27 = vsel %vm6419_vm2, %v5044_v37, %v1689_v32  ;;  %v4744_v49 = vor.u32 %v4905_v36, %v4743_v40  ;;  %v1293_v29 = vsel %vm6425_vm3, %v6309_v16, %v1289_v43  ;;  %v1253_v39 = vsel %vm6437_vm6, %v6315_v26, %v1249_v5  ;;  %v8585_v16 = vld [vmem:[#allocation23_spill] sm:$0xff]  ;;  %v838_v26 = vpop.f32.mrf.mxu3 }
 0x1ab   : > { %v1622_v30 = vmul.f32 %v6412_v41, %v6412_v41  ;;  %v1698_v35 = vsel %vm1695_vm4, %v1697_v58, %v1693_v27  ;;  %v1347_v31 = vadd.f32 0.0036580483, %v1346_v6  ;;  %v2994_v3 = vadd.f32 1.0, %v4465_v56  ;;  %v8586_v32 = vld [vmem:[#allocation27_spill] sm:$0xff] }
 0x1ac   : > { %v1699_v57 = vmul.f32 %v1698_v35, %v8584_v46  ;;  %3739 = vmatpush.bf16.msra.mxu0 %v4744_v49  ;;  %v1802_v37 = vadd.f32 0.4994258, %v1801_v2  ;;  %vm1255_vm7 = vcmp.eq.f32.partialorder %v1254_v10, 8.507059e+37  ;;  %v1257_v14 = vor.u32 1.1754944e-38, %v1256_v38 }
 0x1ad   : > { %v1464_v40 = vmul.f32 2.1237322e-06, %v6433_v34  ;;  %v1915_v43 = vmul.f32 3.8918573e-05, %v8585_v16  ;;  %v1507_v36 = vadd.f32 0.0036580483, %v1506_v22  ;;  %v1298_v46 = vsel %vm6397_vm14, %v6320_v33, %v1293_v29 }
 0x1ae   : > { %v4468_v52 = vclamps-f32 %v1699_v57, 1.0  ;;  %v1803_v5 = vmul.f32 %v1802_v37, %v8556_v44  ;;  %v2035_v58 = vmul.f32 3.8918573e-05, %v8586_v32  ;;  %v1258_v6 = vsel %vm1255_vm7, %v1257_v14, %v1253_v39  ;;  %v889_v14 = vpop.f32.mrf.mxu0 }
 0x1af   : > { %v1391_v56 = vadd.f32 0.18741608, %v1390_v21  ;;  %v6461_v2 = vmin.f32 %v1622_v30, 16.0  ;;  %v1348_v10 = vmul.f32 %v1347_v31, %v6349_v50  ;;  %v3042_v27 = vmul.f32 %v2994_v3, %v8588_v23 }
 0x1b0   : > { %v2997_v38 = vadd.f32 1.0, %v4468_v52  ;;  %v6465_v22 = vadd.f32 1.0, %v1803_v5  ;;  %v790_v49 = vadd.f32 %v789_v4, %v5901_v48  ;;  %v1465_v44 = vadd.f32 0.00028619796, %v1464_v40 }
 0x1b1   : > { %8587 = vst [vmem:[#allocation31_spill] sm:$0xff] %v6461_v2  ;;  %v1624_v35 = vmul.f32 2.1237322e-06, %v6461_v2  ;;  %v1916_v57 = vadd.f32 0.001143296, %v1915_v43  ;;  %v1508_v28 = vmul.f32 %v1507_v36, %v6377_v12  ;;  %v6474_v29 = vmul.f32 %v6197_v59, %v5992_v9 }
 0x1b2   : > { %v3045_v33 = vmul.f32 %v2997_v38, %v6208_v7  ;;  %5045 = vrcp.f32 %v6465_v22  ;;  %v2036_v21 = vadd.f32 0.001143296, %v2035_v58  ;;  %v4454_v3 = vclamps-f32 %v6405_v25, 1.0  ;;  %v840_v38 = vpop.f32.mrf.mxu3 }
 0x1b3   : > { %8589 = vst [vmem:[#allocation35_spill] sm:$0xff] %v6474_v29  ;;  %v6478_v39 = vmul.f32 0.5, %v6033_v47  ;;  %v6481_v30 = vmul.f32 0.5, %v6036_v24  ;;  %v1299_v31 = vmul.f32 %v1298_v46, %v6302_v18  ;;  %v1259_v4 = vmul.f32 %v1258_v6, %v6324_v15  ;;  %v791_v18 = vpop.f32.mrf.mxu2  ;;  %v4649_v24 = vld [vmem:[#allocation8 + $0x12c] sm:$0xf0] }
 0x1b4   : > { %v1349_v7 = vadd.f32 0.05243302, %v1348_v10  ;;  %v6485_v37 = vpack.c.bf16 %v3045_v33, %v3042_v27  ;;  %v6489_v9 = vmul.f32 %v6268_v51, %v6134_v42  ;;  %v1466_v59 = vmul.f32 %v1465_v44, %v6433_v34  ;;  %v938_v33 = vpop.f32.mrf.mxu1 }
 0x1b5   : > { %v1625_v25 = vadd.f32 0.00028619796, %v1624_v35  ;;  %v1917_v40 = vmul.f32 %v1916_v57, %v8585_v16  ;;  %v1392_v43 = vmul.f32 %v1391_v56, %v6213_v63  ;;  %v1509_v36 = vadd.f32 0.05243302, %v1508_v28 }
 0x1b6   : > { %8590 = vst [vmem:[#allocation23_spill] sm:$0xff] %v6485_v37  ;;  %3656 = vmatmul.bf16.gmra.mxu2 %v6485_v37  ;;  %3803 = vmatmul.bf16.gmra.mxu1 %v6485_v37  ;;  %v6496_v15 = vadd.f32 %v838_v26, %v790_v49  ;;  %v2037_v52 = vmul.f32 %v2036_v21, %v8586_v32  ;;  %v2983_v5 = vadd.f32 1.0, %v4454_v3  ;;  %v6500_v42 = vmul.f32 0.5, %v6151_v55  ;;  %v4881_v55 = vld [vmem:[#allocation8 + $0x128] sm:$0xf0] }
 0x1b7   : > { %v890_v51 = vadd.f32 %v889_v14, %v5874_v62  ;;  %v1918_v58 = vadd.f32 0.014752088, %v1917_v40  ;;  %v4458_v6 = vclamps-f32 %v1299_v31, 1.0  ;;  %v4457_v56 = vclamps-f32 %v1259_v4, 1.0  ;;  %v4878_v37 = vld [vmem:[#allocation8 + $0x110] sm:$0xf0] }
 0x1b8   : > { %8591 = vst [vmem:[#allocation27_spill] sm:$0xff] %v6496_v15  ;;  %v6503_v46 = vpop.eup %5045  ;;  %v1350_v10 = vmul.f32 %v1349_v7, %v6349_v50  ;;  %v2038_v23 = vadd.f32 0.014752088, %v2037_v52  ;;  %v1467_v27 = vadd.f32 0.0036580483, %v1466_v59  ;;  %v1626_v26 = vmul.f32 %v1625_v25, %v6461_v2 }
 0x1b9   : > { %8592 = vst [vmem:[#allocation29_spill] sm:$0xff] %v6500_v42  ;;  %v792_v49 = vadd.f32 %v791_v18, %v5901_v48  ;;  %v1806_v44 = vmul.f32 %v6503_v46, %v6465_v22  ;;  %v6510_v35 = vadd.f32 1.1283791, %v1392_v43  ;;  %v1510_v57 = vmul.f32 %v1509_v36, %v6377_v12  ;;  %v4899_v42 = vld [vmem:[#allocation8 + $0x1b8] sm:$0xf0] }
 0x1ba   : > { %v6514_v28 = vmul.f32 0.70710677, %v6496_v15  ;;  %v1919_v21 = vmul.f32 %v1918_v58, %v8585_v16  ;;  %v6517_v3 = vadd.f32 %v938_v33, %v890_v51  ;;  %v2155_v7 = vmul.f32 3.8918573e-05, %v5807_v13 }
 0x1bb   : > { %v6519_v31 = vadd.f32 %v840_v38, %v792_v49  ;;  %v1807_v4 = vsub.f32 1.0, %v1806_v44  ;;  %v2987_v14 = vadd.f32 1.0, %v4458_v6  ;;  %v6523_v59 = vmul.f32 0.5, %v6284_v61 }
 0x1bc   : > { %8593 = vst [vmem:[#allocation64_spill] sm:$0xff] %v6517_v3  ;;  %v1920_v25 = vadd.f32 0.112945676, %v1919_v21  ;;  %v2039_v40 = vmul.f32 %v2038_v23, %v8586_v32  ;;  %v6526_v43 = vadd.f32 1.0, %v4457_v56  ;;  %v1351_v36 = vadd.f32 0.18741608, %v1350_v10  ;;  %v892_v23 = vpop.f32.mrf.mxu0 }
 0x1bd   : > { %8594 = vst [vmem:[#allocation65_spill] sm:$0xff] %v6519_v31  ;;  %v1468_v18 = vmul.f32 %v1467_v27, %v6433_v34  ;;  %v6529_v52 = vadd.f32 0.0036580483, %v1626_v26  ;;  %v6531_v51 = vadd.f32 0.18741608, %v1510_v57  ;;  %v1582_v58 = vmul.f32 %v6514_v28, %v6514_v28 }
 0x1be   : > { %8595 = vst [vmem:[#allocation66_spill] sm:$0xff] %v6523_v59  ;;  %v1808_v6 = vmul.f32 %v6503_v46, %v1807_v4  ;;  %v1921_v38 = vmul.f32 %v1920_v25, %v8585_v16  ;;  %v6538_v49 = vmul.f32 0.70710677, %v6517_v3  ;;  %v6541_v56 = vmul.f32 0.70710677, %v6519_v31 }
 0x1bf   : > { %vm1810_vm8 = vweird.f32 %v6465_v22  ;;  %v2156_v10 = vadd.f32 0.001143296, %v2155_v7  ;;  %vm1811_vm9 = vweird.f32 %v6503_v46  ;;  %v1814_v27 = vand.u32 2147483647, %v6465_v22  ;;  %v4647_v25 = vld [vmem:[#allocation8 + $0x120] sm:$0xf] }
 0x1c0   : > { %v1922_v26 = vadd.f32 0.4994258, %v1921_v38  ;;  %v2040_v44 = vadd.f32 0.112945676, %v2039_v40  ;;  %v6547_v57 = vmul.f32 %v2983_v5, %v6201_v45  ;;  %v6550_v33 = vmul.f32 0.5, %v6312_v54  ;;  %vm6565_vm10 = vmor %vm1810_vm8, %vm1811_vm9 }
 0x1c1   : > { %v893_v21 = vadd.f32 %v892_v23, %v5874_v62  ;;  %v1816_v4 = vand.u32 2147483648, %v6465_v22  ;;  %v3035_v7 = vmul.f32 %v2987_v14, %v6478_v39  ;;  %v1809_v47 = vadd.f32 %v6503_v46, %v1808_v6  ;;  %v4880_v40 = vld [vmem:[#allocation8 + $0x124] sm:$0xf]  ;;  %v4731_v45 = vld [vmem:[#allocation8 + $0x1c8] sm:$0xf] }
 0x1c2   : > { %8596 = vst [vmem:[#allocation67_spill] sm:$0xff] %v6550_v33  ;;  %v1923_v61 = vmul.f32 %v1922_v26, %v8585_v16  ;;  %v4648_v38 = vor.u32 %v4881_v55, %v4647_v25  ;;  %v6557_v5 = vmin.f32 %v1582_v58, 16.0  ;;  %v1702_v54 = vmul.f32 %v6541_v56, %v6541_v56  ;;  %v4902_v14 = vld [vmem:[#allocation8 + $0x1d0] sm:$0xf0]  ;;  %v4635_v16 = vld [vmem:[#allocation8 + $0x108] sm:$0xf]  ;;  %v941_v26 = vpop.f32.mrf.mxu1 }
 0x1c3   : > { %v4652_v39 = vor.u32 %v4880_v40, %v4649_v24  ;;  %v2157_v55 = vmul.f32 %v2156_v10, %v5807_v13  ;;  %v1469_v6 = vadd.f32 0.05243302, %v1468_v18  ;;  %v4732_v25 = vor.u32 %v4902_v14, %v4731_v45  ;;  %v4719_v40 = vld [vmem:[#allocation8 + $0x1b0] sm:$0xf]  ;;  %v794_v10 = vpop.f32.mrf.mxu2  ;;  %v4896_v14 = vld [vmem:[#allocation8 + $0x1a0] sm:$0xf0] }
 0x1c4   : > { %v6570_v58 = vadd.f32 1.0, %v1923_v61  ;;  %3690 = vmatpush.bf16.msra.mxu3 %v4648_v38  ;;  %v2041_v29 = vmul.f32 %v2040_v44, %v8586_v32  ;;  %v6574_v22 = vmul.f32 0.5, %v6355_v1  ;;  %v6576_v59 = vadd.f32 %v941_v26, %v893_v21  ;;  %v4623_v44 = vld [vmem:[#allocation8 + $0xf0] sm:$0xf]  ;;  %v4875_v21 = vld [vmem:[#allocation8 + $0xf8] sm:$0xf0] }
 0x1c5   : > { %v1817_v33 = vor.u32 1.1754944e-38, %v1816_v4  ;;  %3837 = vmatpush.bf16.msra.mxu2 %v4652_v39  ;;  %v4636_v24 = vor.u32 %v4878_v37, %v4635_v16  ;;  %v1352_v18 = vmul.f32 %v1351_v36, %v6349_v50  ;;  %v1813_v61 = vsel %vm6565_vm10, %v6503_v46, %v1809_v47  ;;  %3740 = vmatpush.bf16.msra.mxu0 %v4732_v25  ;;  %v843_v46 = vpop.f32.mrf.mxu3  ;;  %v4707_v39 = vld [vmem:[#allocation8 + $0x198] sm:$0xf] }
 0x1c6   : > { %8599 = vst [vmem:[#allocation68_spill] sm:$0xff] %v6574_v22  ;;  %vm6582_vm11 = vcmp.eq.f32.partialorder %v1814_v27, 8.507059e+37  ;;  %5047 = vrcp.f32 %v6570_v58  ;;  %v1584_v37 = vmul.f32 2.1237322e-06, %v6557_v5  ;;  %v1742_v4 = vmul.f32 %v6538_v49, %v6538_v49 }
 0x1c7   : > { %8600 = vst [vmem:[#allocation69_spill] sm:$0xff] %v6576_v59  ;;  %v6590_v36 = vmin.f32 %v1702_v54, 16.0  ;;  %v2158_v45 = vadd.f32 0.014752088, %v2157_v55  ;;  %v6593_v23 = vpack.c.bf16 %v3035_v7, %v6489_v9  ;;  %v6597_v47 = vmul.f32 %v6510_v35, %v6165_v19  ;;  %v4611_v55 = vld [vmem:[#allocation8 + $0xd8] sm:$0xf] }
 0x1c8   : > { %3691 = vmatpush.bf16.msra.mxu3 %v4636_v24  ;;  %v4720_v27 = vor.u32 %v4899_v42, %v4719_v40  ;;  %v2042_v16 = vadd.f32 0.4994258, %v2041_v29  ;;  %v6601_v26 = vmul.f32 %v6526_v43, %v6481_v30  ;;  %v6604_v54 = vmul.f32 0.70710677, %v6576_v59  ;;  %v4872_v19 = vld [vmem:[#allocation8 + $0xe0] sm:$0xf0] }
 0x1c9   : > { %8603 = vst [vmem:[#allocation70_spill] sm:$0xff] %v6593_v23  ;;  %v1818_v9 = vsel %vm6582_vm11, %v1817_v33, %v1813_v61  ;;  %v4624_v7 = vor.u32 %v4875_v21, %v4623_v44  ;;  %v6608_v35 = vadd.f32 1.1283791, %v1352_v18  ;;  %v1512_v42 = vmul.f32 %v6531_v51, %v6377_v12  ;;  %v4695_v33 = vld [vmem:[#allocation8 + $0x180] sm:$0xf]  ;;  %v8605_v44 = vld [vmem:[#allocation36_spill] sm:$0xff] }
 0x1ca   : > { %8604 = vst [vmem:[#allocation71_spill] sm:$0xff] %v6597_v47  ;;  %v1628_v29 = vmul.f32 %v6529_v52, %v6461_v2  ;;  %3741 = vmatpush.bf16.msra.mxu0 %v4720_v27  ;;  %v4708_v30 = vor.u32 %v4896_v14, %v4707_v39  ;;  %v1470_v43 = vmul.f32 %v1469_v6, %v6433_v34  ;;  %v6615_v25 = vmin.f32 %v1742_v4, 16.0  ;;  %v4893_v40 = vld [vmem:[#allocation8 + $0x188] sm:$0xf0] }
 0x1cb   : > { %v795_v24 = vadd.f32 %v794_v10, %v5901_v48  ;;  %v2159_v61 = vmul.f32 %v2158_v45, %v5807_v13  ;;  %v1585_v38 = vadd.f32 0.00028619796, %v1584_v37  ;;  %v1819_v21 = vmul.f32 %v1818_v9, %v8605_v44  ;;  %v894_v37 = vpop.f32.mrf.mxu0  ;;  %v796_v44 = vpop.f32.mrf.mxu2 }
 0x1cc   : > { %v5048_v18 = vpop.eup %5047  ;;  %3692 = vmatpush.bf16.msra.mxu3 %v4624_v7  ;;  %v4612_v51 = vor.u32 %v4872_v19, %v4611_v55  ;;  %v2043_v52 = vmul.f32 %v2042_v16, %v8586_v32  ;;  %v1744_v27 = vmul.f32 2.1237322e-06, %v6615_v25  ;;  %v1704_v6 = vmul.f32 2.1237322e-06, %v6590_v36 }
 0x1cd   : > { %v1862_v4 = vmul.f32 %v6604_v54, %v6604_v54  ;;  %v1926_v10 = vmul.f32 %v5048_v18, %v6570_v58  ;;  %vm1930_vm12 = vweird.f32 %v6570_v58  ;;  %v1936_v45 = vand.u32 2147483648, %v6570_v58 }
 0x1ce   : > { %3742 = vmatpush.bf16.msra.mxu0 %v4708_v30  ;;  %v4696_v39 = vor.u32 %v4893_v40, %v4695_v33  ;;  %v6628_v14 = vadd.f32 1.0, %v2043_v52  ;;  %vm1931_vm13 = vweird.f32 %v5048_v18  ;;  %v1934_v32 = vand.u32 2147483647, %v6570_v58 }
 0x1cf   : > { %v1927_v9 = vsub.f32 1.0, %v1926_v10  ;;  %v2160_v16 = vadd.f32 0.112945676, %v2159_v61  ;;  %v6631_v7 = vadd.f32 1.1283791, %v1512_v42  ;;  %v4471_v19 = vclamps-f32 %v1819_v21, 1.0  ;;  %vm6643_vm14 = vmor %vm1930_vm12, %vm1931_vm13 }
 0x1d0   : > { %v1629_v55 = vadd.f32 0.05243302, %v1628_v29  ;;  %v6633_v1 = vadd.f32 %v843_v46, %v795_v24  ;;  %3693 = vmatpush.bf16.msra.mxu3 %v4612_v51  ;;  %v1586_v22 = vmul.f32 %v1585_v38, %v6557_v5  ;;  %v895_v30 = vadd.f32 %v894_v37, %v5874_v62  ;;  %v845_v29 = vpop.f32.mrf.mxu3 }
 0x1d1   : > { %v1928_v47 = vmul.f32 %v5048_v18, %v1927_v9  ;;  %5049 = vrcp.f32 %v6628_v14  ;;  %v1745_v33 = vadd.f32 0.00028619796, %v1744_v27  ;;  %v1705_v40 = vadd.f32 0.00028619796, %v1704_v6 }
 0x1d2   : > { %8606 = vst [vmem:[#allocation36_spill] sm:$0xff] %v6633_v1  ;;  %v6638_v52 = vmin.f32 %v1862_v4, 16.0  ;;  %v1937_v46 = vor.u32 1.1754944e-38, %v1936_v45  ;;  %3743 = vmatpush.bf16.msra.mxu0 %v4696_v39  ;;  %vm6647_vm15 = vcmp.eq.f32.partialorder %v1934_v32, 8.507059e+37  ;;  %v797_v38 = vadd.f32 %v796_v44, %v5901_v48  ;;  %v943_v4 = vpop.f32.mrf.mxu1  ;;  %v8614_v32 = vld [vmem:[#allocation18_spill] sm:$0xff] }
 0x1d3   : > { %v1929_v24 = vadd.f32 %v5048_v18, %v1928_v47  ;;  %v2161_v21 = vmul.f32 %v2160_v16, %v5807_v13  ;;  %v6654_v51 = vmul.f32 0.5, %v6383_v20  ;;  %v3000_v27 = vadd.f32 1.0, %v4471_v19  ;;  %v897_v61 = vpop.f32.mrf.mxu0 }
 0x1d4   : > { %v1864_v58 = vmul.f32 2.1237322e-06, %v6638_v52  ;;  %v6658_v6 = vmul.f32 0.70710677, %v6633_v1  ;;  %v6662_v10 = vadd.f32 %v943_v4, %v895_v30  ;;  %v6664_v45 = vadd.f32 %v845_v29, %v797_v38  ;;  %v8616_v38 = vld [vmem:[#allocation30_spill] sm:$0xff] }
 0x1d5   : > { %8611 = vst [vmem:[#allocation72_spill] sm:$0xff] %v6654_v51  ;;  %v1933_v47 = vsel %vm6643_vm14, %v5048_v18, %v1929_v24  ;;  %v2162_v37 = vadd.f32 0.4994258, %v2161_v21  ;;  %3744 = vmatmul.bf16.vlgmr.msra.gmra.mxu0 %v6593_v23  ;;  %v1471_v39 = vadd.f32 0.18741608, %v1470_v43  ;;  %v987_v16 = vmul.f32 0.5, %v8614_v32 }
 0x1d6   : > { %8612 = vst [vmem:[#allocation73_spill] sm:$0xff] %v6662_v10  ;;  %v1587_v9 = vadd.f32 0.0036580483, %v1586_v22  ;;  %v1938_v19 = vsel %vm6647_vm15, %v1937_v46, %v1933_v47  ;;  %v1746_v20 = vmul.f32 %v1745_v33, %v6615_v25  ;;  %v1706_v42 = vmul.f32 %v1705_v40, %v6590_v36  ;;  %v8615_v18 = vld [vmem:[#allocation48_spill] sm:$0xff] }
 0x1d7   : > { %8613 = vst [vmem:[#allocation74_spill] sm:$0xff] %v6664_v45  ;;  %v5050_v44 = vpop.eup %5049  ;;  %v1939_v30 = vmul.f32 %v1938_v19, %v8615_v18  ;;  %v2163_v29 = vmul.f32 %v2162_v37, %v5807_v13  ;;  %v1865_v24 = vadd.f32 0.00028619796, %v1864_v58  ;;  %v3048_v21 = vmul.f32 %v3000_v27, %v8616_v38 }
 0x1d8   : > { %v1822_v22 = vmul.f32 %v6658_v6, %v6658_v6  ;;  %v2046_v43 = vmul.f32 %v5050_v44, %v6628_v14  ;;  %v6679_v46 = vmul.f32 0.70710677, %v6662_v10  ;;  %v6682_v33 = vmul.f32 0.70710677, %v6664_v45 }
 0x1d9   : > { %v4474_v4 = vclamps-f32 %v1939_v30, 1.0  ;;  %v6684_v40 = vadd.f32 1.0, %v2163_v29  ;;  %vm2050_vm0 = vweird.f32 %v6628_v14  ;;  %vm2051_vm1 = vweird.f32 %v5050_v44 }
 0x1da   : > { %8617 = vst [vmem:[#allocation48_spill] sm:$0xff] %v6679_v46  ;;  %v2047_v47 = vsub.f32 1.0, %v2046_v43  ;;  %v2056_v13 = vand.u32 2147483648, %v6628_v14  ;;  %v898_v27 = vadd.f32 %v897_v61, %v5874_v62  ;;  %v2054_v37 = vand.u32 2147483647, %v6628_v14  ;;  %vm6698_vm2 = vmor %vm2050_vm0, %vm2051_vm1 }
 0x1db   : > { %8618 = vst [vmem:[#allocation30_spill] sm:$0xff] %v6682_v33  ;;  %v3003_v58 = vadd.f32 1.0, %v4474_v4  ;;  %5051 = vrcp.f32 %v6684_v40  ;;  %v1472_v19 = vmul.f32 %v1471_v39, %v6433_v34  ;;  %v1630_v18 = vmul.f32 %v1629_v55, %v6461_v2 }
 0x1dc   : > { %v1747_v30 = vadd.f32 0.0036580483, %v1746_v20  ;;  %v2048_v29 = vmul.f32 %v5050_v44, %v2047_v47  ;;  %v1588_v38 = vmul.f32 %v1587_v9, %v6557_v5  ;;  %v1707_v43 = vadd.f32 0.0036580483, %v1706_v42  ;;  %v946_v20 = vpop.f32.mrf.mxu1  ;;  %v4877_v9 = vld [vmem:[#allocation8 + $0x10c] sm:$0xf] }
 0x1dd   : > { %v3051_v32 = vmul.f32 %v3003_v58, %v987_v16  ;;  %v6694_v23 = vmin.f32 %v1822_v22, 16.0  ;;  %v1982_v61 = vmul.f32 %v6679_v46, %v6679_v46  ;;  %v1942_v55 = vmul.f32 %v6682_v33, %v6682_v33  ;;  %v4637_v42 = vld [vmem:[#allocation8 + $0x114] sm:$0xf0]  ;;  %v4599_v46 = vld [vmem:[#allocation8 + $0xc0] sm:$0xf] }
 0x1de   : > { %v2049_v39 = vadd.f32 %v5050_v44, %v2048_v29  ;;  %v2057_v47 = vor.u32 1.1754944e-38, %v2056_v13  ;;  %v1866_v16 = vmul.f32 %v1865_v24, %v6638_v52  ;;  %v6709_v14 = vadd.f32 %v946_v20, %v898_v27  ;;  %v4869_v24 = vld [vmem:[#allocation8 + $0xc8] sm:$0xf0] }
 0x1df   : > { %8619 = vst [vmem:[#allocation75_spill] sm:$0xff] %v6694_v23  ;;  %v6707_v22 = vpack.c.bf16 %v3051_v32, %v3048_v21  ;;  %vm6711_vm3 = vcmp.eq.f32.partialorder %v2054_v37, 8.507059e+37  ;;  %v6717_v51 = vpack.c.bf16 %v6601_v26, %v6547_v57  ;;  %v1631_v33 = vadd.f32 0.18741608, %v1630_v18 }
 0x1e0   : > { %8623 = vst [vmem:[#allocation77_spill] sm:$0xff] %v6709_v14  ;;  %v1748_v29 = vmul.f32 %v1747_v30, %v6615_v25  ;;  %v2053_v13 = vsel %vm6698_vm2, %v5050_v44, %v2049_v39  ;;  %v6722_v21 = vadd.f32 1.1283791, %v1472_v19  ;;  %v1589_v27 = vadd.f32 0.05243302, %v1588_v38 }
 0x1e1   : > { %8622 = vst [vmem:[#allocation76_spill] sm:$0xff] %v6707_v22  ;;  %v5052_v32 = vpop.eup %5051  ;;  %v1708_v37 = vmul.f32 %v1707_v43, %v6590_v36  ;;  %3661 = vmatmul.bf16.gmra.mxu2 %v6707_v22  ;;  %3808 = vmatmul.bf16.gmra.mxu1 %v6707_v22  ;;  %v4640_v57 = vor.u32 %v4877_v9, %v4637_v42  ;;  %v1824_v26 = vmul.f32 2.1237322e-06, %v6694_v23  ;;  %v6728_v18 = vmin.f32 %v1982_v61, 16.0 }
 0x1e2   : > { %8626 = vst [vmem:[#allocation78_spill] sm:$0xff] %v6717_v51  ;;  %v6730_v30 = vmin.f32 %v1942_v55, 16.0  ;;  %v2058_v44 = vsel %vm6711_vm3, %v2057_v47, %v2053_v13  ;;  %v1867_v4 = vadd.f32 0.0036580483, %v1866_v16  ;;  %v6735_v19 = vmul.f32 0.70710677, %v6709_v14 }
 0x1e3   : > { %8627 = vst [vmem:[#allocation79_spill] sm:$0xff] %v6728_v18  ;;  %v2166_v38 = vmul.f32 %v5052_v32, %v6684_v40  ;;  %3838 = vmatpush.bf16.msra.mxu2 %v4640_v57  ;;  %v4600_v43 = vor.u32 %v4869_v24, %v4599_v46  ;;  %v1749_v20 = vadd.f32 0.05243302, %v1748_v29  ;;  %v1984_v39 = vmul.f32 2.1237322e-06, %v6728_v18 }
 0x1e4   : > { %8628 = vst [vmem:[#allocation80_spill] sm:$0xff] %v6730_v30  ;;  %vm2170_vm4 = vweird.f32 %v6684_v40  ;;  %v2176_v61 = vand.u32 2147483648, %v6684_v40  ;;  %v2059_v55 = vmul.f32 %v2058_v44, %v6055_v17  ;;  %vm2171_vm5 = vweird.f32 %v5052_v32 }
 0x1e5   : > { %8629 = vst [vmem:[#allocation81_spill] sm:$0xff] %v6735_v19  ;;  %v2167_v9 = vsub.f32 1.0, %v2166_v38  ;;  %v2174_v47 = vand.u32 2147483647, %v6684_v40  ;;  %3694 = vmatpush.bf16.msra.mxu3 %v4600_v43  ;;  %v6745_v42 = vmul.f32 %v6608_v35, %v6307_v60  ;;  %v1825_v16 = vadd.f32 0.00028619796, %v1824_v26  ;;  %vm6758_vm6 = vmor %vm2170_vm4, %vm2171_vm5 }
 0x1e6   : > { %v1944_v46 = vmul.f32 2.1237322e-06, %v6730_v30  ;;  %v2275_v58 = vmul.f32 3.8918573e-05, %v5884_v11  ;;  %v1632_v29 = vmul.f32 %v1631_v33, %v6461_v2  ;;  %v1868_v13 = vmul.f32 %v1867_v4, %v6638_v52 }
 0x1e7   : > { %v2102_v17 = vmul.f32 %v6735_v19, %v6735_v19  ;;  %v2168_v24 = vmul.f32 %v5052_v32, %v2167_v9  ;;  %v6754_v57 = vmul.f32 0.5, %v6496_v15  ;;  %v1709_v44 = vadd.f32 0.05243302, %v1708_v37 }
 0x1e8   : > { %v1985_v38 = vadd.f32 0.00028619796, %v1984_v39  ;;  %v2177_v35 = vor.u32 1.1754944e-38, %v2176_v61  ;;  %3695 = vmatmul.bf16.vlgmr.msra.gmra.mxu3 %v6717_v51  ;;  %v1590_v33 = vmul.f32 %v1589_v27, %v6557_v5  ;;  %v4477_v26 = vclamps-f32 %v2059_v55, 1.0 }
 0x1e9   : > { %8630 = vst [vmem:[#allocation82_spill] sm:$0xff] %v6754_v57  ;;  %v2169_v4 = vadd.f32 %v5052_v32, %v2168_v24  ;;  %vm2175_vm7 = vcmp.eq.f32.partialorder %v2174_v47, 8.507059e+37  ;;  %v1750_v43 = vmul.f32 %v1749_v20, %v6615_v25  ;;  %v1826_v9 = vmul.f32 %v1825_v16, %v6694_v23 }
 0x1ea   : > { %v1945_v37 = vadd.f32 0.00028619796, %v1944_v46  ;;  %v2276_v39 = vadd.f32 0.001143296, %v2275_v58  ;;  %v1869_v15 = vadd.f32 0.05243302, %v1868_v13  ;;  %v1710_v51 = vmul.f32 %v1709_v44, %v6590_v36 }
 0x1eb   : > { %v6766_v40 = vmin.f32 %v2102_v17, 16.0  ;;  %v2173_v22 = vsel %vm6758_vm6, %v5052_v32, %v2169_v4  ;;  %v2395_v61 = vmul.f32 3.8918573e-05, %v5951_v53  ;;  %v1986_v27 = vmul.f32 %v1985_v38, %v6728_v18  ;;  %v8634_v4 = vld [vmem:[#allocation26_spill] sm:$0xff] }
 0x1ec   : > { %v2178_v55 = vsel %vm2175_vm7, %v2177_v35, %v2173_v22  ;;  %v2277_v47 = vmul.f32 %v2276_v39, %v5884_v11  ;;  %v3006_v46 = vadd.f32 1.0, %v4477_v26  ;;  %v1591_v13 = vadd.f32 0.18741608, %v1590_v33 }
 0x1ed   : > { %8633 = vst [vmem:[#allocation83_spill] sm:$0xff] %v6766_v40  ;;  %v2104_v20 = vmul.f32 2.1237322e-06, %v6766_v40  ;;  %v2179_v16 = vmul.f32 %v2178_v55, %v6084_v0  ;;  %v2396_v58 = vadd.f32 0.001143296, %v2395_v61  ;;  %v1946_v24 = vmul.f32 %v1945_v37, %v6730_v30  ;;  %v8635_v61 = vld [vmem:[#allocation33_spill] sm:$0xff] }
 0x1ee   : > { %v1827_v17 = vadd.f32 0.0036580483, %v1826_v9  ;;  %v2278_v32 = vadd.f32 0.014752088, %v2277_v47  ;;  %v1870_v60 = vmul.f32 %v1869_v15, %v6638_v52  ;;  %v993_v44 = vmul.f32 0.5, %v8634_v4 }
 0x1ef   : > { %v4480_v57 = vclamps-f32 %v2179_v16, 1.0  ;;  %v2397_v22 = vmul.f32 %v2396_v58, %v5951_v53  ;;  %v1751_v38 = vadd.f32 0.18741608, %v1750_v43  ;;  %v1711_v35 = vadd.f32 0.18741608, %v1710_v51 }
 0x1f0   : > { %v1987_v39 = vadd.f32 0.0036580483, %v1986_v27  ;;  %v2279_v19 = vmul.f32 %v2278_v32, %v5884_v11  ;;  %v2105_v0 = vadd.f32 0.00028619796, %v2104_v20  ;;  %v3054_v33 = vmul.f32 %v3006_v46, %v8635_v61  ;;  %v799_v20 = vpop.f32.mrf.mxu2 }
 0x1f1   : > { %v3009_v26 = vadd.f32 1.0, %v4480_v57  ;;  %v2398_v9 = vadd.f32 0.014752088, %v2397_v22  ;;  %v1633_v55 = vadd.f32 1.1283791, %v1632_v29  ;;  %v1828_v37 = vmul.f32 %v1827_v17, %v6694_v23 }
 0x1f2   : > { %v1947_v47 = vadd.f32 0.0036580483, %v1946_v24  ;;  %v2280_v15 = vadd.f32 0.112945676, %v2279_v19  ;;  %v1592_v4 = vmul.f32 %v1591_v13, %v6557_v5  ;;  %v1871_v16 = vadd.f32 0.18741608, %v1870_v60  ;;  %v848_v60 = vpop.f32.mrf.mxu3 }
 0x1f3   : > { %v3057_v2 = vmul.f32 %v3009_v26, %v993_v44  ;;  %v2399_v43 = vmul.f32 %v2398_v9, %v5951_v53  ;;  %v1752_v51 = vmul.f32 %v1751_v38, %v6615_v25  ;;  %v1712_v27 = vmul.f32 %v1711_v35, %v6590_v36 }
 0x1f4   : > { %v2281_v57 = vmul.f32 %v2280_v15, %v5884_v11  ;;  %v2515_v46 = vmul.f32 3.8918573e-05, %v5962_v8  ;;  %v1988_v29 = vmul.f32 %v1987_v39, %v6728_v18  ;;  %v2106_v58 = vmul.f32 %v2105_v0, %v6766_v40 }
 0x1f5   : > { %v6791_v19 = vpack.c.bf16 %v3057_v2, %v3054_v33  ;;  %v2400_v13 = vadd.f32 0.112945676, %v2399_v43  ;;  %v6794_v17 = vmul.f32 0.5, %v6517_v3  ;;  %v1829_v24 = vadd.f32 0.05243302, %v1828_v37  ;;  %v8637_v33 = vld [vmem:[#allocation61_spill] sm:$0xff] }
 0x1f6   : > { %v1948_v32 = vmul.f32 %v1947_v47, %v6730_v30  ;;  %v2282_v44 = vadd.f32 0.4994258, %v2281_v57  ;;  %v1593_v22 = vadd.f32 1.1283791, %v1592_v4  ;;  %v6798_v38 = vmul.f32 0.5, %v6519_v31 }
 0x1f7   : > { %8636 = vst [vmem:[#allocation33_spill] sm:$0xff] %v6791_v19  ;;  %v1872_v35 = vmul.f32 %v1871_v16, %v6638_v52  ;;  %3666 = vmatmul.bf16.gmra.mxu2 %v6791_v19  ;;  %3813 = vmatmul.bf16.gmra.mxu1 %v6791_v19  ;;  %v2401_v2 = vmul.f32 %v2400_v13, %v5951_v53  ;;  %v1753_v39 = vadd.f32 1.1283791, %v1752_v51  ;;  %v1713_v0 = vadd.f32 1.1283791, %v1712_v27  ;;  %v8639_v13 = vld [vmem:[#allocation49_spill] sm:$0xff] }
 0x1f8   : > { %v2283_v26 = vmul.f32 %v2282_v44, %v5884_v11  ;;  %v2516_v61 = vadd.f32 0.001143296, %v2515_v46  ;;  %v6807_v9 = vmul.f32 %v6631_v7, %v8637_v33  ;;  %v1989_v4 = vadd.f32 0.05243302, %v1988_v29  ;;  %v4874_v46 = vld [vmem:[#allocation8 + $0xf4] sm:$0xf] }
 0x1f9   : > { %v2107_v37 = vadd.f32 0.0036580483, %v2106_v58  ;;  %v2402_v47 = vadd.f32 0.4994258, %v2401_v2  ;;  %v6810_v15 = vmul.f32 0.5, %v6576_v59  ;;  %v1830_v16 = vmul.f32 %v1829_v24, %v6694_v23 }
 0x1fa   : > { %v1949_v43 = vadd.f32 0.05243302, %v1948_v32  ;;  %v2284_v57 = vadd.f32 1.0, %v2283_v26  ;;  %v6815_v51 = vmul.f32 %v6722_v21, %v8639_v13  ;;  %v6818_v11 = vmul.f32 %v1633_v55, %v6412_v41  ;;  %v4625_v29 = vld [vmem:[#allocation8 + $0xfc] sm:$0xf0]  ;;  %v850_v33 = vpop.f32.mrf.mxu3 }
 0x1fb   : > { %8638 = vst [vmem:[#allocation61_spill] sm:$0xff] %v6810_v15  ;;  %v1873_v27 = vadd.f32 1.1283791, %v1872_v35  ;;  %v2403_v7 = vmul.f32 %v2402_v47, %v5951_v53  ;;  %v6822_v58 = vmul.f32 %v1593_v22, %v6514_v28  ;;  %v800_v44 = vadd.f32 %v799_v20, %v5901_v48  ;;  %v801_v28 = vpop.f32.mrf.mxu2 }
 0x1fc   : > { %5053 = vrcp.f32 %v2284_v57  ;;  %v2517_v24 = vmul.f32 %v2516_v61, %v5962_v8  ;;  %v6827_v32 = vmul.f32 %v1753_v39, %v6538_v49  ;;  %v6830_v21 = vmul.f32 %v1713_v0, %v6541_v56  ;;  %v899_v61 = vpop.f32.mrf.mxu0 }
 0x1fd   : > { %v1990_v41 = vmul.f32 %v1989_v4, %v6728_v18  ;;  %v2108_v53 = vmul.f32 %v2107_v37, %v6766_v40  ;;  %v1831_v55 = vadd.f32 0.18741608, %v1830_v16  ;;  %v1950_v35 = vmul.f32 %v1949_v43, %v6730_v30  ;;  %v8646_v16 = vld [vmem:[#allocation38_spill] sm:$0xff] }
 0x1fe   : > { %v2404_v22 = vadd.f32 1.0, %v2403_v7  ;;  %v4628_v2 = vor.u32 %v4874_v46, %v4625_v29  ;;  %v6836_v20 = vmul.f32 %v1873_v27, %v6604_v54  ;;  %v6839_v26 = vmul.f32 0.5, %v6633_v1 }
 0x1ff   : > { %v6842_v49 = vmul.f32 0.5, %v6662_v10  ;;  %v6845_v56 = vmul.f32 0.5, %v6664_v45  ;;  %v6848_v39 = vmul.f32 0.5, %v6709_v14  ;;  %v6850_v0 = vadd.f32 %v848_v60, %v800_v44 }
 0x200   : > { %8640 = vst [vmem:[#allocation49_spill] sm:$0xff] %v6836_v20  ;;  %5055 = vrcp.f32 %v2404_v22  ;;  %3839 = vmatpush.bf16.msra.mxu2 %v4628_v2  ;;  %v2518_v54 = vadd.f32 0.014752088, %v2517_v24  ;;  %v6852_v4 = vadd.f32 0.18741608, %v1990_v41  ;;  %v802_v47 = vadd.f32 %v801_v28, %v5901_v48 }
 0x201   : > { %8641 = vst [vmem:[#allocation84_spill] sm:$0xff] %v6839_v26  ;;  %v6854_v37 = vadd.f32 0.05243302, %v2108_v53  ;;  %v6858_v43 = vmul.f32 0.5, %v8646_v16  ;;  %v6861_v27 = vmul.f32 %v1831_v55, %v6694_v23  ;;  %v6863_v60 = vadd.f32 0.18741608, %v1950_v35 }
 0x202   : > { %8642 = vst [vmem:[#allocation85_spill] sm:$0xff] %v6842_v49  ;;  %v5054_v13 = vpop.eup %5053  ;;  %v2294_v7 = vand.u32 2147483647, %v2284_v57  ;;  %v1395_v46 = vmul.f32 3.8918573e-05, %v6213_v63  ;;  %v900_v29 = vadd.f32 %v899_v61, %v5874_v62  ;;  %v6867_v44 = vadd.f32 %v850_v33, %v802_v47 }
 0x203   : > { %8643 = vst [vmem:[#allocation86_spill] sm:$0xff] %v6845_v56  ;;  %v2286_v24 = vmul.f32 %v5054_v13, %v2284_v57  ;;  %v2296_v41 = vand.u32 2147483648, %v2284_v57  ;;  %v6870_v53 = vmul.f32 0.70710677, %v6850_v0  ;;  %vm2290_vm8 = vweird.f32 %v2284_v57  ;;  %v948_v56 = vpop.f32.mrf.mxu1 }
 0x204   : > { %8644 = vst [vmem:[#allocation87_spill] sm:$0xff] %v6848_v39  ;;  %v1396_v28 = vadd.f32 0.001143296, %v1395_v46  ;;  %v2519_v2 = vmul.f32 %v2518_v54, %v5962_v8  ;;  %vm2291_vm9 = vweird.f32 %v5054_v13  ;;  %v1515_v35 = vmul.f32 3.8918573e-05, %v6377_v12 }
 0x205   : > { %8645 = vst [vmem:[#allocation88_spill] sm:$0xff] %v6850_v0  ;;  %v2287_v55 = vsub.f32 1.0, %v2286_v24  ;;  %v1355_v14 = vmul.f32 3.8918573e-05, %v6349_v50  ;;  %vm6875_vm10 = vcmp.eq.f32.partialorder %v2294_v7, 8.507059e+37  ;;  %v2416_v47 = vand.u32 2147483648, %v2404_v22  ;;  %vm6881_vm11 = vmor %vm2290_vm8, %vm2291_vm9 }
 0x206   : > { %8647 = vst [vmem:[#allocation89_spill] sm:$0xff] %v6867_v44  ;;  %v5056_v10 = vpop.eup %5055  ;;  %v2414_v33 = vand.u32 2147483647, %v2404_v22  ;;  %v1397_v59 = vmul.f32 %v1396_v28, %v6213_v63  ;;  %v2297_v45 = vor.u32 1.1754944e-38, %v2296_v41  ;;  %v1516_v1 = vadd.f32 0.001143296, %v1515_v35 }
 0x207   : > { %v2288_v3 = vmul.f32 %v5054_v13, %v2287_v55  ;;  %v2406_v46 = vmul.f32 %v5056_v10, %v2404_v22  ;;  %vm2410_vm12 = vweird.f32 %v2404_v22  ;;  %vm2411_vm13 = vweird.f32 %v5056_v10 }
 0x208   : > { %v1398_v24 = vadd.f32 0.014752088, %v1397_v59  ;;  %v1356_v7 = vadd.f32 0.001143296, %v1355_v14  ;;  %v1517_v19 = vmul.f32 %v1516_v1, %v6377_v12  ;;  %v1475_v39 = vmul.f32 3.8918573e-05, %v6433_v34  ;;  %vm6899_vm15 = vmor %vm2410_vm12, %vm2411_vm13 }
 0x209   : > { %v2289_v31 = vadd.f32 %v5054_v13, %v2288_v3  ;;  %v2407_v16 = vsub.f32 1.0, %v2406_v46  ;;  %vm6887_vm14 = vcmp.eq.f32.partialorder %v2414_v33, 8.507059e+37  ;;  %v2417_v41 = vor.u32 1.1754944e-38, %v2416_v47  ;;  %v902_v33 = vpop.f32.mrf.mxu0 }
 0x20a   : > { %v1399_v57 = vmul.f32 %v1398_v24, %v6213_v63  ;;  %v1357_v55 = vmul.f32 %v1356_v7, %v6349_v50  ;;  %v1518_v14 = vadd.f32 0.014752088, %v1517_v19  ;;  %v1476_v3 = vadd.f32 0.001143296, %v1475_v39  ;;  %v8656_v7 = vld [vmem:[#allocation55_spill] sm:$0xff] }
 0x20b   : > { %v2293_v35 = vsel %vm6881_vm11, %v5054_v13, %v2289_v31  ;;  %v2408_v59 = vmul.f32 %v5056_v10, %v2407_v16  ;;  %v2520_v24 = vadd.f32 0.112945676, %v2519_v2  ;;  %v6908_v39 = vadd.f32 %v948_v56, %v900_v29 }
 0x20c   : > { %v2298_v1 = vsel %vm6875_vm10, %v2297_v45, %v2293_v35  ;;  %v1400_v47 = vadd.f32 0.112945676, %v1399_v57  ;;  %v1358_v46 = vadd.f32 0.014752088, %v1357_v55  ;;  %v1519_v31 = vmul.f32 %v1518_v14, %v6377_v12 }
 0x20d   : > { %v2299_v26 = vmul.f32 %v2298_v1, %v8656_v7  ;;  %v2409_v54 = vadd.f32 %v5056_v10, %v2408_v59  ;;  %v1477_v19 = vmul.f32 %v1476_v3, %v6433_v34  ;;  %v2062_v45 = vmul.f32 %v6870_v53, %v6870_v53  ;;  %8657 = vst [vmem:[#allocation55_spill] sm:$0xff] %v6908_v39  ;;  %v8658_v3 = vld [vmem:[#allocation57_spill] sm:$0xff] }
 0x20e   : > { %v1401_v22 = vmul.f32 %v1400_v47, %v6213_v63  ;;  %v1359_v16 = vmul.f32 %v1358_v46, %v6349_v50  ;;  %v1520_v61 = vadd.f32 0.112945676, %v1519_v31  ;;  %v2521_v14 = vmul.f32 %v2520_v24, %v5962_v8 }
 0x20f   : > { %v4483_v13 = vclamps-f32 %v2299_v26, 1.0  ;;  %v2413_v2 = vsel %vm6899_vm15, %v5056_v10, %v2409_v54  ;;  %v1478_v57 = vadd.f32 0.014752088, %v1477_v19  ;;  %v2110_v26 = vmul.f32 %v6854_v37, %v6766_v40 }
 0x210   : > { %v2418_v55 = vsel %vm6887_vm14, %v2417_v41, %v2413_v2  ;;  %v1402_v35 = vadd.f32 0.4994258, %v1401_v22  ;;  %v1360_v59 = vadd.f32 0.112945676, %v1359_v16  ;;  %v1521_v1 = vmul.f32 %v1520_v61, %v6377_v12 }
 0x211   : > { %v2419_v56 = vmul.f32 %v2418_v55, %v8658_v3  ;;  %v3012_v29 = vadd.f32 1.0, %v4483_v13  ;;  %v1479_v47 = vmul.f32 %v1478_v57, %v6433_v34  ;;  %v6923_v10 = vmul.f32 0.70710677, %v6867_v44  ;;  %v8660_v13 = vld [vmem:[#allocation39_spill] sm:$0xff] }
 0x212   : > { %v1403_v28 = vmul.f32 %v1402_v35, %v6213_v63  ;;  %v1361_v41 = vmul.f32 %v1360_v59, %v6349_v50  ;;  %v6928_v46 = vmul.f32 0.70710677, %v6908_v39  ;;  %v903_v24 = vadd.f32 %v902_v33, %v5874_v62 }
 0x213   : > { %v4486_v7 = vclamps-f32 %v2419_v56, 1.0  ;;  %v1522_v54 = vadd.f32 0.4994258, %v1521_v1  ;;  %v6931_v31 = vmin.f32 %v2062_v45, 16.0  ;;  %v1480_v22 = vadd.f32 0.112945676, %v1479_v47  ;;  %v951_v56 = vpop.f32.mrf.mxu1 }
 0x214   : > { %v6933_v19 = vadd.f32 1.0, %v1403_v28  ;;  %v1362_v37 = vadd.f32 0.4994258, %v1361_v41  ;;  %v3060_v2 = vmul.f32 %v3012_v29, %v8660_v13  ;;  %v2522_v61 = vadd.f32 0.4994258, %v2521_v14  ;;  %v8661_v45 = vld [vmem:[#allocation46_spill] sm:$0xff] }
 0x215   : > { %8659 = vst [vmem:[#allocation57_spill] sm:$0xff] %v6931_v31  ;;  %v3015_v16 = vadd.f32 1.0, %v4486_v7  ;;  %v1523_v63 = vmul.f32 %v1522_v54, %v6377_v12  ;;  %v1992_v57 = vmul.f32 %v6852_v4, %v6728_v18  ;;  %v2182_v55 = vmul.f32 %v6923_v10, %v6923_v10 }
 0x216   : > { %5057 = vrcp.f32 %v6933_v19  ;;  %v2635_v35 = vmul.f32 3.8918573e-05, %v8661_v45  ;;  %v1952_v59 = vmul.f32 %v6863_v60, %v6730_v30  ;;  %v2111_v3 = vadd.f32 0.18741608, %v2110_v26 }
 0x217   : > { %v3063_v29 = vmul.f32 %v3015_v16, %v6858_v43  ;;  %v6946_v1 = vadd.f32 1.0, %v1523_v63  ;;  %v2222_v12 = vmul.f32 %v6928_v46, %v6928_v46  ;;  %v6950_v4 = vadd.f32 %v951_v56, %v903_v24  ;;  %v804_v43 = vpop.f32.mrf.mxu2 }
 0x218   : > { %v1363_v14 = vmul.f32 %v1362_v37, %v6349_v50  ;;  %v1481_v47 = vmul.f32 %v1480_v22, %v6433_v34  ;;  %v2064_v33 = vmul.f32 2.1237322e-06, %v6931_v31  ;;  %v2523_v60 = vmul.f32 %v2522_v61, %v5962_v8 }
 0x219   : > { %8662 = vst [vmem:[#allocation39_spill] sm:$0xff] %v6950_v4  ;;  %v6955_v28 = vpack.c.bf16 %v3063_v29, %v3060_v2  ;;  %5059 = vrcp.f32 %v6946_v1  ;;  %v6959_v26 = vmin.f32 %v2182_v55, 16.0  ;;  %v2636_v24 = vadd.f32 0.001143296, %v2635_v35 }
 0x21a   : > { %v6961_v41 = vadd.f32 1.0, %v1363_v14  ;;  %v1482_v7 = vadd.f32 0.4994258, %v1481_v47  ;;  %v6964_v54 = vadd.f32 1.1283791, %v6861_v27  ;;  %v6971_v22 = vadd.f32 %v804_v43, %v5901_v48 }
 0x21b   : > { %8663 = vst [vmem:[#allocation46_spill] sm:$0xff] %v6955_v28  ;;  %v6966_v50 = vadd.f32 1.1283791, %v1992_v57  ;;  %v6968_v37 = vadd.f32 1.1283791, %v1952_v59  ;;  %3671 = vmatmul.bf16.gmra.mxu2 %v6955_v28  ;;  %3818 = vmatmul.bf16.gmra.mxu1 %v6955_v28  ;;  %v6976_v16 = vmul.f32 %v2111_v3, %v6766_v40  ;;  %v6978_v13 = vmin.f32 %v2222_v12, 16.0 }
 0x21c   : > { %v5058_v8 = vpop.eup %5057  ;;  %v6981_v27 = vmul.f32 0.70710677, %v6950_v4  ;;  %5061 = vrcp.f32 %v6961_v41  ;;  %v2065_v2 = vadd.f32 0.00028619796, %v2064_v33  ;;  %v1416_v61 = vand.u32 2147483648, %v6933_v19 }
 0x21d   : > { %8664 = vst [vmem:[#allocation90_spill] sm:$0xff] %v6978_v13  ;;  %v1406_v63 = vmul.f32 %v5058_v8, %v6933_v19  ;;  %v6986_v57 = vadd.f32 1.0, %v2523_v60  ;;  %v2224_v55 = vmul.f32 2.1237322e-06, %v6978_v13  ;;  %v2184_v35 = vmul.f32 2.1237322e-06, %v6959_v26 }
 0x21e   : > { %v1483_v59 = vmul.f32 %v1482_v7, %v6433_v34  ;;  %v2637_v3 = vmul.f32 %v2636_v24, %v8661_v45  ;;  %vm1410_vm0 = vweird.f32 %v6933_v19  ;;  %vm1411_vm1 = vweird.f32 %v5058_v8  ;;  %v8669_v24 = vld [vmem:[#allocation71_spill] sm:$0xff] }
 0x21f   : > { %v5060_v56 = vpop.eup %5059  ;;  %v1407_v29 = vsub.f32 1.0, %v1406_v63  ;;  %v1414_v12 = vand.u32 2147483647, %v6933_v19  ;;  %v2342_v14 = vmul.f32 %v6981_v27, %v6981_v27  ;;  %v1536_v33 = vand.u32 2147483648, %v6946_v1  ;;  %vm7002_vm3 = vmor %vm1410_vm0, %vm1411_vm1 }
 0x220   : > { %v1526_v47 = vmul.f32 %v5060_v56, %v6946_v1  ;;  %v6998_v60 = vadd.f32 1.0, %v1483_v59  ;;  %v1417_v34 = vor.u32 1.1754944e-38, %v1416_v61  ;;  %vm1530_vm2 = vweird.f32 %v6946_v1 }
 0x221   : > { %v1408_v43 = vmul.f32 %v5058_v8, %v1407_v29  ;;  %5063 = vrcp.f32 %v6986_v57  ;;  %vm1531_vm4 = vweird.f32 %v5060_v56  ;;  %v1534_v63 = vand.u32 2147483647, %v6946_v1 }
 0x222   : > { %v5062_v7 = vpop.eup %5061  ;;  %v1527_v19 = vsub.f32 1.0, %v1526_v47  ;;  %5065 = vrcp.f32 %v6998_v60  ;;  %vm1415_vm5 = vcmp.eq.f32.partialorder %v1414_v12, 8.507059e+37  ;;  %v2638_v61 = vadd.f32 0.014752088, %v2637_v3  ;;  %vm7015_vm6 = vmor %vm1530_vm2, %vm1531_vm4 }
 0x223   : > { %v1409_v28 = vadd.f32 %v5058_v8, %v1408_v43  ;;  %v1366_v59 = vmul.f32 %v5062_v7, %v6961_v41  ;;  %v1537_v49 = vor.u32 1.1754944e-38, %v1536_v33  ;;  %v1374_v15 = vand.u32 2147483647, %v6961_v41 }
 0x224   : > { %v1528_v29 = vmul.f32 %v5060_v56, %v1527_v19  ;;  %v1376_v40 = vand.u32 2147483648, %v6961_v41  ;;  %vm1370_vm7 = vweird.f32 %v6961_v41  ;;  %vm1371_vm8 = vweird.f32 %v5062_v7  ;;  %v8675_v41 = vld [vmem:[#allocation29_spill] sm:$0xff] }
 0x225   : > { %v1413_v20 = vsel %vm7002_vm3, %v5058_v8, %v1409_v28  ;;  %v1367_v43 = vsub.f32 1.0, %v1366_v59  ;;  %v2066_v3 = vmul.f32 %v2065_v2, %v6931_v31  ;;  %vm1535_vm9 = vcmp.eq.f32.partialorder %v1534_v63, 8.507059e+37  ;;  %vm7027_vm10 = vmor %vm1370_vm7, %vm1371_vm8  ;;  %v853_v63 = vpop.f32.mrf.mxu3 }
 0x226   : > { %v1418_v12 = vsel %vm1415_vm5, %v1417_v34, %v1413_v20  ;;  %v1529_v33 = vadd.f32 %v5060_v56, %v1528_v29  ;;  %v2225_v30 = vadd.f32 0.00028619796, %v2224_v55  ;;  %v2639_v1 = vmul.f32 %v2638_v61, %v8661_v45 }
 0x227   : > { %v7021_v19 = vpop.eup %5063  ;;  %v1419_v28 = vmul.f32 %v1418_v12, %v8669_v24  ;;  %v1368_v8 = vmul.f32 %v5062_v7, %v1367_v43  ;;  %v2185_v23 = vadd.f32 0.00028619796, %v2184_v35  ;;  %vm7031_vm11 = vcmp.eq.f32.partialorder %v1374_v15, 8.507059e+37 }
 0x228   : > { %v5066_v18 = vpop.eup %5065  ;;  %v1533_v59 = vsel %vm7015_vm6, %v5060_v56, %v1529_v33  ;;  %v1377_v2 = vor.u32 1.1754944e-38, %v1376_v40  ;;  %v2067_v43 = vadd.f32 0.0036580483, %v2066_v3  ;;  %v7036_v35 = vmin.f32 %v2342_v14, 16.0 }
 0x229   : > { %v4461_v55 = vclamps-f32 %v1419_v28, 1.0  ;;  %v1538_v34 = vsel %vm1535_vm9, %v1537_v49, %v1533_v59  ;;  %v1369_v29 = vadd.f32 %v5062_v7, %v1368_v8  ;;  %v1486_v61 = vmul.f32 %v5066_v18, %v6998_v60 }
 0x22a   : > { %v1539_v56 = vmul.f32 %v1538_v34, %v6807_v9  ;;  %v2526_v47 = vmul.f32 %v7021_v19, %v6986_v57  ;;  %v2640_v40 = vadd.f32 0.112945676, %v2639_v1  ;;  %v7044_v49 = vadd.f32 %v853_v63, %v6971_v22 }
 0x22b   : > { %v2990_v12 = vadd.f32 1.0, %v4461_v55  ;;  %v1373_v15 = vsel %vm7027_vm10, %v5062_v7, %v1369_v29  ;;  %v1487_v33 = vsub.f32 1.0, %v1486_v61  ;;  %v1496_v14 = vand.u32 2147483648, %v6998_v60 }
 0x22c   : > { %v4464_v24 = vclamps-f32 %v1539_v56, 1.0  ;;  %8674 = vst [vmem:[#allocation71_spill] sm:$0xff] %v7044_v49  ;;  %v1378_v3 = vsel %vm7031_vm11, %v1377_v2, %v1373_v15  ;;  %vm1491_vm12 = vweird.f32 %v5066_v18  ;;  %v1494_v8 = vand.u32 2147483647, %v6998_v60  ;;  %v8676_v2 = vld [vmem:[#allocation67_spill] sm:$0xff] }
 0x22d   : > { %v1379_v9 = vmul.f32 %v1378_v3, %v6745_v42  ;;  %v1488_v28 = vmul.f32 %v5066_v18, %v1487_v33  ;;  %v2226_v59 = vmul.f32 %v2225_v30, %v6978_v13  ;;  %v3038_v1 = vmul.f32 %v2990_v12, %v8675_v41 }
 0x22e   : > { %v2993_v7 = vadd.f32 1.0, %v4464_v24  ;;  %v2527_v55 = vsub.f32 1.0, %v2526_v47  ;;  %v2186_v22 = vmul.f32 %v2185_v23, %v6959_v26  ;;  %v2344_v34 = vmul.f32 2.1237322e-06, %v7036_v35 }
 0x22f   : > { %v1489_v20 = vadd.f32 %v5066_v18, %v1488_v28  ;;  %vm1490_vm13 = vweird.f32 %v6998_v60  ;;  %v7058_v42 = vmul.f32 0.70710677, %v7044_v49  ;;  %v1497_v29 = vor.u32 1.1754944e-38, %v1496_v14 }
 0x230   : > { %v3041_v63 = vmul.f32 %v2993_v7, %v8676_v2  ;;  %vm1492_vm14 = vmor %vm1490_vm13, %vm1491_vm12  ;;  %v2641_v30 = vmul.f32 %v2640_v40, %v8661_v45  ;;  %v2113_v61 = vadd.f32 1.1283791, %v6976_v16  ;;  %v4460_v56 = vclamps-f32 %v1379_v9, 1.0  ;;  %v904_v9 = vpop.f32.mrf.mxu0 }
 0x231   : > { %v1493_v47 = vsel %vm1492_vm14, %v5066_v18, %v1489_v20  ;;  %vm1495_vm15 = vcmp.eq.f32.partialorder %v1494_v8, 8.507059e+37  ;;  %v2068_v23 = vmul.f32 %v2067_v43, %v6931_v31  ;;  %v2528_v60 = vmul.f32 %v7021_v19, %v2527_v55  ;;  %v8679_v55 = vld [vmem:[#allocation31_spill] sm:$0xff] }
 0x232   : > { %v7063_v12 = vpack.c.bf16 %v3041_v63, %v3038_v1  ;;  %v1498_v15 = vsel %vm1495_vm15, %v1497_v29, %v1493_v47  ;;  %v2227_v33 = vadd.f32 0.0036580483, %v2226_v59  ;;  %v2187_v24 = vadd.f32 0.0036580483, %v2186_v22  ;;  %v4613_v1 = vld [vmem:[#allocation8 + $0xe4] sm:$0xf0] }
 0x233   : > { %v2345_v3 = vadd.f32 0.00028619796, %v2344_v34  ;;  %v1499_v28 = vmul.f32 %v1498_v15, %v6815_v51  ;;  %v2302_v16 = vmul.f32 %v7058_v42, %v7058_v42  ;;  %vm2530_vm0 = vweird.f32 %v6986_v57  ;;  %v4871_v51 = vld [vmem:[#allocation8 + $0xdc] sm:$0xf] }
 0x234   : > { %8677 = vst [vmem:[#allocation29_spill] sm:$0xff] %v7063_v12  ;;  %3749 = vmatmul.bf16.gmra.mxu0 %v7063_v12  ;;  %vm2531_vm1 = vweird.f32 %v7021_v19  ;;  %v2642_v18 = vadd.f32 0.4994258, %v2641_v30  ;;  %v7074_v43 = vmul.f32 %v6964_v54, %v6658_v6  ;;  %v2989_v14 = vadd.f32 1.0, %v4460_v56  ;;  %v8682_v56 = vld [vmem:[#allocation66_spill] sm:$0xff] }
 0x235   : > { %v4463_v40 = vclamps-f32 %v1499_v28, 1.0  ;;  %v2536_v8 = vand.u32 2147483648, %v6986_v57  ;;  %v2529_v59 = vadd.f32 %v7021_v19, %v2528_v60  ;;  %v2534_v7 = vand.u32 2147483647, %v6986_v57  ;;  %vm7087_vm2 = vmor %vm2530_vm0, %vm2531_vm1 }
 0x236   : > { %8678 = vst [vmem:[#allocation67_spill] sm:$0xff] %v7074_v43  ;;  %v2643_v41 = vmul.f32 %v2642_v18, %v8661_v45  ;;  %v1635_v22 = vmul.f32 3.8918573e-05, %v8679_v55  ;;  %v2069_v34 = vadd.f32 0.05243302, %v2068_v23  ;;  %v2228_v20 = vmul.f32 %v2227_v33, %v6978_v13  ;;  %v8683_v23 = vld [vmem:[#allocation68_spill] sm:$0xff] }
 0x237   : > { %v2346_v6 = vmul.f32 %v2345_v3, %v7036_v35  ;;  %v2992_v54 = vadd.f32 1.0, %v4463_v40  ;;  %v7091_v63 = vmin.f32 %v2302_v16, 16.0  ;;  %v905_v45 = vadd.f32 %v904_v9, %v5874_v62  ;;  %v8686_v16 = vld [vmem:[#allocation48_spill] sm:$0xff] }
 0x238   : > { %v7094_v29 = vadd.f32 1.0, %v2643_v41  ;;  %v4616_v30 = vor.u32 %v4871_v51, %v4613_v1  ;;  %v3037_v47 = vmul.f32 %v2989_v14, %v8682_v56  ;;  %v2537_v60 = vor.u32 1.1754944e-38, %v2536_v8  ;;  %v806_v1 = vpop.f32.mrf.mxu2 }
 0x239   : > { %v3040_v15 = vmul.f32 %v2992_v54, %v8683_v23  ;;  %v1636_v33 = vadd.f32 0.001143296, %v1635_v22  ;;  %v2188_v3 = vmul.f32 %v2187_v24, %v6959_v26  ;;  %v2533_v57 = vsel %vm7087_vm2, %v7021_v19, %v2529_v59  ;;  %v8689_v24 = vld [vmem:[#allocation30_spill] sm:$0xff]  ;;  %v953_v59 = vpop.f32.mrf.mxu1 }
 0x23a   : > { %vm7102_vm3 = vcmp.eq.f32.partialorder %v2534_v7, 8.507059e+37  ;;  %5067 = vrcp.f32 %v7094_v29  ;;  %3840 = vmatpush.bf16.msra.mxu2 %v4616_v30  ;;  %v7109_v18 = vmul.f32 %v6966_v50, %v8686_v16  ;;  %v2070_v40 = vmul.f32 %v2069_v34, %v6931_v31  ;;  %v8695_v34 = vld [vmem:[#allocation81_spill] sm:$0xff] }
 0x23b   : > { %v2347_v14 = vadd.f32 0.0036580483, %v2346_v6  ;;  %v7112_v9 = vpack.c.bf16 %v3040_v15, %v3037_v47  ;;  %v7116_v8 = vmul.f32 %v6968_v37, %v8689_v24  ;;  %v7119_v19 = vmul.f32 0.5, %v6850_v0 }
 0x23c   : > { %8687 = vst [vmem:[#allocation31_spill] sm:$0xff] %v7109_v18  ;;  %v2304_v51 = vmul.f32 2.1237322e-06, %v7091_v63  ;;  %v1637_v7 = vmul.f32 %v1636_v33, %v8679_v55  ;;  %v7124_v50 = vmul.f32 0.5, %v6908_v39  ;;  %v7127_v41 = vmul.f32 0.5, %v6867_v44 }
 0x23d   : > { %8688 = vst [vmem:[#allocation66_spill] sm:$0xff] %v7112_v9  ;;  %3700 = vmatmul.bf16.gmra.mxu3 %v7112_v9  ;;  %v7130_v22 = vadd.f32 %v953_v59, %v905_v45  ;;  %v2538_v37 = vsel %vm7102_vm3, %v2537_v60, %v2533_v57  ;;  %v7135_v6 = vmul.f32 %v2113_v61, %v8695_v34  ;;  %v2229_v54 = vadd.f32 0.05243302, %v2228_v20  ;;  %v8697_v60 = vld [vmem:[#allocation58_spill] sm:$0xff] }
 0x23e   : > { %8690 = vst [vmem:[#allocation68_spill] sm:$0xff] %v7116_v8  ;;  %v7137_v2 = vadd.f32 0.05243302, %v2188_v3  ;;  %v1638_v30 = vadd.f32 0.014752088, %v1637_v7  ;;  %v2348_v47 = vmul.f32 %v2347_v14, %v7036_v35  ;;  %v807_v33 = vadd.f32 %v806_v1, %v5901_v48  ;;  %v855_v1 = vpop.f32.mrf.mxu3 }
 0x23f   : > { %8691 = vst [vmem:[#allocation48_spill] sm:$0xff] %v7119_v19  ;;  %v7139_v56 = vadd.f32 0.18741608, %v2070_v40  ;;  %v1755_v23 = vmul.f32 3.8918573e-05, %v6615_v25  ;;  %v2539_v57 = vmul.f32 %v2538_v37, %v8697_v60  ;;  %v2656_v16 = vand.u32 2147483648, %v7094_v29 }
 0x240   : > { %8692 = vst [vmem:[#allocation30_spill] sm:$0xff] %v7124_v50  ;;  %v1595_v15 = vmul.f32 3.8918573e-05, %v6557_v5  ;;  %v5068_v45 = vpop.eup %5067  ;;  %v2305_v28 = vadd.f32 0.00028619796, %v2304_v51  ;;  %v1639_v61 = vmul.f32 %v1638_v30, %v8679_v55  ;;  %v8699_v40 = vld [vmem:[#allocation47_spill] sm:$0xff]  ;;  %vm2650_vm4 = vweird.f32 %v7094_v29 }
 0x241   : > { %8693 = vst [vmem:[#allocation91_spill] sm:$0xff] %v7127_v41  ;;  %v7148_v20 = vmul.f32 0.70710677, %v7130_v22  ;;  %v2646_v3 = vmul.f32 %v5068_v45, %v7094_v29  ;;  %v2755_v14 = vmul.f32 3.8918573e-05, %v8699_v40  ;;  %vm2651_vm5 = vweird.f32 %v5068_v45 }
 0x242   : > { %8694 = vst [vmem:[#allocation92_spill] sm:$0xff] %v7130_v22  ;;  %v1640_v24 = vadd.f32 0.112945676, %v1639_v61  ;;  %v1756_v59 = vadd.f32 0.001143296, %v1755_v23  ;;  %v4489_v30 = vclamps-f32 %v2539_v57, 1.0  ;;  %v7159_v23 = vadd.f32 %v855_v1, %v807_v33  ;;  %vm7163_vm6 = vmor %vm2650_vm4, %vm2651_vm5 }
 0x243   : > { %8696 = vst [vmem:[#allocation81_spill] sm:$0xff] %v7135_v6  ;;  %v1596_v7 = vadd.f32 0.001143296, %v1595_v15  ;;  %v2647_v51 = vsub.f32 1.0, %v2646_v3  ;;  %v2654_v37 = vand.u32 2147483647, %v7094_v29 }
 0x244   : > { %8698 = vst [vmem:[#allocation58_spill] sm:$0xff] %v7148_v20  ;;  %v1715_v34 = vmul.f32 3.8918573e-05, %v6590_v36  ;;  %v1641_v60 = vmul.f32 %v1640_v24, %v8679_v55  ;;  %v1757_v39 = vmul.f32 %v1756_v59, %v6615_v25  ;;  %v2657_v12 = vor.u32 1.1754944e-38, %v2656_v16  ;;  %v907_v59 = vpop.f32.mrf.mxu0 }
 0x245   : > { %v1597_v44 = vmul.f32 %v1596_v7, %v6557_v5  ;;  %v2648_v0 = vmul.f32 %v5068_v45, %v2647_v51  ;;  %v2756_v61 = vadd.f32 0.001143296, %v2755_v14  ;;  %8700 = vst [vmem:[#allocation47_spill] sm:$0xff] %v7159_v23  ;;  %v2462_v24 = vmul.f32 %v7148_v20, %v7148_v20 }
 0x246   : > { %v1716_v41 = vadd.f32 0.001143296, %v1715_v34  ;;  %v1642_v3 = vadd.f32 0.4994258, %v1641_v60  ;;  %v1758_v57 = vadd.f32 0.014752088, %v1757_v39  ;;  %v908_v33 = vadd.f32 %v907_v59, %v5874_v62  ;;  %v858_v9 = vpop.f32.mrf.mxu3 }
 0x247   : > { %v1598_v19 = vadd.f32 0.014752088, %v1597_v44  ;;  %v2649_v7 = vadd.f32 %v5068_v45, %v2648_v0  ;;  %vm2655_vm7 = vcmp.eq.f32.partialorder %v2654_v37, 8.507059e+37  ;;  %v3018_v44 = vadd.f32 1.0, %v4489_v30  ;;  %v8705_v30 = vld [vmem:[#allocation41_spill] sm:$0xff] }
 0x248   : > { %v1717_v16 = vmul.f32 %v1716_v41, %v6590_v36  ;;  %v1643_v14 = vmul.f32 %v1642_v3, %v8679_v55  ;;  %v1759_v29 = vmul.f32 %v1758_v57, %v6615_v25  ;;  %v2757_v34 = vmul.f32 %v2756_v61, %v8699_v40  ;;  %v8703_v55 = vld [vmem:[#allocation42_spill] sm:$0xff] }
 0x249   : > { %v1599_v1 = vmul.f32 %v1598_v19, %v6557_v5  ;;  %v2653_v39 = vsel %vm7163_vm6, %v5068_v45, %v2649_v7  ;;  %v2230_v59 = vmul.f32 %v2229_v54, %v6978_v13  ;;  %v2349_v50 = vadd.f32 0.05243302, %v2348_v47 }
 0x24a   : > { %v1718_v51 = vadd.f32 0.014752088, %v1717_v16  ;;  %v2658_v60 = vsel %vm2655_vm7, %v2657_v12, %v2653_v39  ;;  %v7177_v0 = vadd.f32 1.0, %v1643_v14  ;;  %v1760_v37 = vadd.f32 0.112945676, %v1759_v29  ;;  %v956_v12 = vpop.f32.mrf.mxu1  ;;  %v8707_v29 = vld [vmem:[#allocation54_spill] sm:$0xff] }
 0x24b   : > { %v1600_v41 = vadd.f32 0.112945676, %v1599_v1  ;;  %v2659_v3 = vmul.f32 %v2658_v60, %v8703_v55  ;;  %v2306_v19 = vmul.f32 %v2305_v28, %v7091_v63  ;;  %v7184_v45 = vmul.f32 0.70710677, %v7159_v23 }
 0x24c   : > { %v1719_v57 = vmul.f32 %v1718_v51, %v6590_v36  ;;  %v1005_v15 = vmul.f32 0.5, %v8705_v30  ;;  %5069 = vrcp.f32 %v7177_v0  ;;  %v1761_v7 = vmul.f32 %v1760_v37, %v6615_v25 }
 0x24d   : > { %8704 = vst [vmem:[#allocation42_spill] sm:$0xff] %v7184_v45  ;;  %v4492_v61 = vclamps-f32 %v2659_v3, 1.0  ;;  %v1601_v54 = vmul.f32 %v1600_v41, %v6557_v5  ;;  %v7190_v16 = vmin.f32 %v2462_v24, 16.0  ;;  %v7192_v14 = vadd.f32 %v956_v12, %v908_v33  ;;  %v4691_v33 = vld [vmem:[#allocation8 + $0x170] sm:$0xf] }
 0x24e   : > { %v1720_v47 = vadd.f32 0.112945676, %v1719_v57  ;;  %v3066_v28 = vmul.f32 %v3018_v44, %v8707_v29  ;;  %v2758_v1 = vadd.f32 0.014752088, %v2757_v34  ;;  %v1762_v51 = vadd.f32 0.4994258, %v1761_v7 }
 0x24f   : > { %8706 = vst [vmem:[#allocation93_spill] sm:$0xff] %v7192_v14  ;;  %v3021_v39 = vadd.f32 1.0, %v4492_v61  ;;  %v1602_v60 = vadd.f32 0.4994258, %v1601_v54  ;;  %v2072_v3 = vmul.f32 %v7139_v56, %v6931_v31  ;;  %v2190_v37 = vmul.f32 %v7137_v2, %v6959_v26  ;;  %v4891_v57 = vld [vmem:[#allocation8 + $0x178] sm:$0xf0] }
 0x250   : > { %v1721_v55 = vmul.f32 %v1720_v47, %v6590_v36  ;;  %v2307_v41 = vadd.f32 0.0036580483, %v2306_v19  ;;  %v2422_v24 = vmul.f32 %v7184_v45, %v7184_v45  ;;  %v2464_v44 = vmul.f32 2.1237322e-06, %v7190_v16  ;;  %v8709_v2 = vld [vmem:[#allocation51_spill] sm:$0xff] }
 0x251   : > { %v3069_v34 = vmul.f32 %v3021_v39, %v1005_v15  ;;  %v1763_v12 = vmul.f32 %v1762_v51, %v6615_v25  ;;  %v4692_v61 = vor.u32 %v4891_v57, %v4691_v33  ;;  %v7205_v54 = vmul.f32 0.70710677, %v7192_v14 }
 0x252   : > { %v5070_v7 = vpop.eup %5069  ;;  %v1603_v56 = vmul.f32 %v1602_v60, %v6557_v5  ;;  %v1722_v47 = vadd.f32 0.4994258, %v1721_v55  ;;  %v2875_v19 = vmul.f32 3.8918573e-05, %v8709_v2  ;;  %v2759_v15 = vmul.f32 %v2758_v1, %v8699_v40 }
 0x253   : > { %8708 = vst [vmem:[#allocation54_spill] sm:$0xff] %v7205_v54  ;;  %v7209_v29 = vpack.c.bf16 %v3069_v34, %v3066_v28  ;;  %v1646_v30 = vmul.f32 %v5070_v7, %v7177_v0  ;;  %v7212_v6 = vadd.f32 1.0, %v1763_v12  ;;  %3981 = vmatpush.bf16.msrb.mxu1 %v4692_v61  ;;  %vm1650_vm8 = vweird.f32 %v7177_v0  ;;  %v809_v61 = vpop.f32.mrf.mxu2 }
 0x254   : > { %v1656_v25 = vand.u32 2147483648, %v7177_v0  ;;  %v7217_v39 = vadd.f32 1.0, %v1603_v56  ;;  %v1723_v5 = vmul.f32 %v1722_v47, %v6590_v36  ;;  %vm1651_vm9 = vweird.f32 %v5070_v7 }
 0x255   : > { %8710 = vst [vmem:[#allocation51_spill] sm:$0xff] %v7209_v29  ;;  %3676 = vmatmul.bf16.gmra.mxu2 %v7209_v29  ;;  %v1647_v51 = vsub.f32 1.0, %v1646_v30  ;;  %v1654_v28 = vand.u32 2147483647, %v7177_v0  ;;  %5071 = vrcp.f32 %v7212_v6  ;;  %3823 = vmatmul.bf16.gmra.mxu1 %v7209_v29  ;;  %v2231_v60 = vadd.f32 0.18741608, %v2230_v59  ;;  %vm7235_vm10 = vmor %vm1650_vm8, %vm1651_vm9 }
 0x256   : > { %v7224_v1 = vadd.f32 0.18741608, %v2190_v37  ;;  %v2350_v55 = vmul.f32 %v2349_v50, %v7036_v35  ;;  %5073 = vrcp.f32 %v7217_v39  ;;  %v2308_v33 = vmul.f32 %v2307_v41, %v7091_v63 }
 0x257   : > { %v2465_v36 = vadd.f32 0.00028619796, %v2464_v44  ;;  %v7229_v57 = vmin.f32 %v2422_v24, 16.0  ;;  %v1648_v30 = vmul.f32 %v5070_v7, %v1647_v51  ;;  %v7231_v34 = vadd.f32 1.1283791, %v2072_v3 }
 0x258   : > { %v1657_v59 = vor.u32 1.1754944e-38, %v1656_v25  ;;  %v7239_v37 = vadd.f32 1.0, %v1723_v5  ;;  %v2760_v50 = vadd.f32 0.112945676, %v2759_v15  ;;  %v2582_v41 = vmul.f32 %v7205_v54, %v7205_v54 }
 0x259   : > { %v1649_v44 = vadd.f32 %v5070_v7, %v1648_v30  ;;  %vm1655_vm11 = vcmp.eq.f32.partialorder %v1654_v28, 8.507059e+37  ;;  %v2876_v24 = vadd.f32 0.001143296, %v2875_v19  ;;  %v7244_v3 = vmul.f32 %v2231_v60, %v6978_v13  ;;  %v4679_v30 = vld [vmem:[#allocation8 + $0x158] sm:$0xf] }
 0x25a   : > { %v7246_v56 = vadd.f32 0.18741608, %v2350_v55  ;;  %v810_v0 = vadd.f32 %v809_v61, %v5901_v48  ;;  %5075 = vrcp.f32 %v7239_v37  ;;  %v7250_v25 = vadd.f32 0.05243302, %v2308_v33  ;;  %v4888_v61 = vld [vmem:[#allocation8 + $0x160] sm:$0xf0] }
 0x25b   : > { %v5072_v47 = vpop.eup %5071  ;;  %v7253_v15 = vmul.f32 %v2465_v36, %v7190_v16  ;;  %v7256_v5 = vmul.f32 2.1237322e-06, %v7229_v57  ;;  %v1653_v19 = vsel %vm7235_vm10, %v5070_v7, %v1649_v44  ;;  %v1776_v55 = vand.u32 2147483648, %v7212_v6  ;;  %v4667_v44 = vld [vmem:[#allocation8 + $0x140] sm:$0xf] }
 0x25c   : > { %v5074_v51 = vpop.eup %5073  ;;  %v1658_v28 = vsel %vm1655_vm11, %v1657_v59, %v1653_v19  ;;  %v1766_v60 = vmul.f32 %v5072_v47, %v7212_v6  ;;  %v2761_v33 = vmul.f32 %v2760_v50, %v8699_v40  ;;  %v7263_v29 = vmin.f32 %v2582_v41, 16.0  ;;  %v4885_v19 = vld [vmem:[#allocation8 + $0x148] sm:$0xf0] }
 0x25d   : > { %v1774_v36 = vand.u32 2147483647, %v7212_v6  ;;  %v1606_v31 = vmul.f32 %v5074_v51, %v7217_v39  ;;  %v2877_v12 = vmul.f32 %v2876_v24, %v8709_v2  ;;  %v1659_v7 = vmul.f32 %v1658_v28, %v6818_v11 }
 0x25e   : > { %v1767_v59 = vsub.f32 1.0, %v1766_v60  ;;  %vm1770_vm12 = vweird.f32 %v7212_v6  ;;  %vm1771_vm13 = vweird.f32 %v5072_v47  ;;  %v1614_v50 = vand.u32 2147483647, %v7217_v39 }
 0x25f   : > { %v1607_v8 = vsub.f32 1.0, %v1606_v31  ;;  %v1616_v41 = vand.u32 2147483648, %v7217_v39  ;;  %v4680_v43 = vor.u32 %v4888_v61, %v4679_v30  ;;  %v1777_v54 = vor.u32 1.1754944e-38, %v1776_v55  ;;  %vm7274_vm14 = vmor %vm1770_vm12, %vm1771_vm13 }
 0x260   : > { %v5076_v18 = vpop.eup %5075  ;;  %v1768_v13 = vmul.f32 %v5072_v47, %v1767_v59  ;;  %v7272_v45 = vadd.f32 %v858_v9, %v810_v0  ;;  %v2762_v24 = vadd.f32 0.4994258, %v2761_v33  ;;  %vm1611_vm15 = vweird.f32 %v5074_v51 }
 0x261   : > { %v1608_v6 = vmul.f32 %v5074_v51, %v1607_v8  ;;  %v1726_v28 = vmul.f32 %v5076_v18, %v7239_v37  ;;  %3982 = vmatpush.bf16.msrb.mxu1 %v4680_v43  ;;  %v4668_v31 = vor.u32 %v4885_v19, %v4667_v44  ;;  %v4467_v60 = vclamps-f32 %v1659_v7, 1.0 }
 0x262   : > { %8713 = vst [vmem:[#allocation94_spill] sm:$0xff] %v7272_v45  ;;  %v1769_v20 = vadd.f32 %v5072_v47, %v1768_v13  ;;  %vm1775_vm0 = vcmp.eq.f32.partialorder %v1774_v36, 8.507059e+37  ;;  %vm1610_vm1 = vweird.f32 %v7217_v39  ;;  %vm7280_vm2 = vcmp.eq.f32.partialorder %v1614_v50, 8.507059e+37 }
 0x263   : > { %v1609_v30 = vadd.f32 %v5074_v51, %v1608_v6  ;;  %v1617_v0 = vor.u32 1.1754944e-38, %v1616_v41  ;;  %v1727_v55 = vsub.f32 1.0, %v1726_v28  ;;  %vm1612_vm3 = vmor %vm1610_vm1, %vm1611_vm15  ;;  %v1734_v61 = vand.u32 2147483647, %v7239_v37  ;;  %v909_v6 = vpop.f32.mrf.mxu0 }
 0x264   : > { %v1773_v8 = vsel %vm7274_vm14, %v5072_v47, %v1769_v20  ;;  %v1736_v43 = vand.u32 2147483648, %v7239_v37  ;;  %v2763_v13 = vmul.f32 %v2762_v24, %v8699_v40  ;;  %vm1731_vm4 = vweird.f32 %v5076_v18 }
 0x265   : > { %v1778_v33 = vsel %vm1775_vm0, %v1777_v54, %v1773_v8  ;;  %v1613_v36 = vsel %vm1612_vm3, %v5074_v51, %v1609_v30  ;;  %v1728_v39 = vmul.f32 %v5076_v18, %v1727_v55  ;;  %3983 = vmatpush.bf16.msrb.mxu1 %v4668_v31  ;;  %v2584_v7 = vmul.f32 2.1237322e-06, %v7263_v29  ;;  %v8718_v31 = vld [vmem:[#allocation72_spill] sm:$0xff] }
 0x266   : > { %v1779_v59 = vmul.f32 %v1778_v33, %v6827_v32  ;;  %v2996_v44 = vadd.f32 1.0, %v4467_v60  ;;  %v1618_v20 = vsel %vm7280_vm2, %v1617_v0, %v1613_v36  ;;  %vm1730_vm5 = vweird.f32 %v7239_v37 }
 0x267   : > { %v1619_v47 = vmul.f32 %v1618_v20, %v6822_v58  ;;  %v1729_v19 = vadd.f32 %v5076_v18, %v1728_v39  ;;  %v2878_v50 = vadd.f32 0.014752088, %v2877_v12  ;;  %v7296_v54 = vmul.f32 0.70710677, %v7272_v45  ;;  %vm1732_vm6 = vmor %vm1730_vm5, %vm1731_vm4 }
 0x268   : > { %v4470_v40 = vclamps-f32 %v1779_v59, 1.0  ;;  %v1737_v51 = vor.u32 1.1754944e-38, %v1736_v43  ;;  %v7298_v41 = vadd.f32 1.0, %v2763_v13  ;;  %v2425_v32 = vadd.f32 0.00028619796, %v7256_v5 }
 0x269   : > { %v4466_v24 = vclamps-f32 %v1619_v47, 1.0  ;;  %v1733_v11 = vsel %vm1732_vm6, %v5076_v18, %v1729_v19  ;;  %vm1735_vm7 = vcmp.eq.f32.partialorder %v1734_v61, 8.507059e+37  ;;  %v2467_v58 = vadd.f32 0.0036580483, %v7253_v15 }
 0x26a   : > { %v2999_v28 = vadd.f32 1.0, %v4470_v40  ;;  %v3044_v37 = vmul.f32 %v2996_v44, %v8718_v31  ;;  %v1738_v12 = vsel %vm1735_vm7, %v1737_v51, %v1733_v11  ;;  %v2192_v60 = vmul.f32 %v7224_v1, %v6959_v26  ;;  %v860_v11 = vpop.f32.mrf.mxu3 }
 0x26b   : > { %v2585_v30 = vadd.f32 0.00028619796, %v2584_v7  ;;  %v1739_v9 = vmul.f32 %v1738_v12, %v6830_v21  ;;  %v2879_v0 = vmul.f32 %v2878_v50, %v8709_v2  ;;  %v2542_v18 = vmul.f32 %v7296_v54, %v7296_v54  ;;  %v958_v7 = vpop.f32.mrf.mxu1 }
 0x26c   : > { %v3047_v5 = vmul.f32 %v2999_v28, %v6794_v17  ;;  %v910_v55 = vadd.f32 %v909_v6, %v5874_v62  ;;  %5077 = vrcp.f32 %v7298_v41  ;;  %v2352_v15 = vmul.f32 %v7246_v56, %v7036_v35 }
 0x26d   : > { %v2426_v8 = vmul.f32 %v2425_v32, %v7229_v57  ;;  %v4469_v1 = vclamps-f32 %v1739_v9, 1.0  ;;  %v2995_v61 = vadd.f32 1.0, %v4466_v24  ;;  %v2233_v21 = vadd.f32 1.1283791, %v7244_v3  ;;  %v811_v3 = vpop.f32.mrf.mxu2 }
 0x26e   : > { %v2310_v43 = vmul.f32 %v7250_v25, %v7091_v63  ;;  %v2468_v17 = vmul.f32 %v2467_v58, %v7190_v16  ;;  %v7319_v13 = vpack.c.bf16 %v3047_v5, %v3044_v37  ;;  %v7323_v33 = vmul.f32 %v7231_v34, %v6870_v53  ;;  %v8721_v53 = vld [vmem:[#allocation82_spill] sm:$0xff] }
 0x26f   : > { %v7326_v36 = vmul.f32 0.5, %v6950_v4  ;;  %v2586_v56 = vmul.f32 %v2585_v30, %v7263_v29  ;;  %v2998_v39 = vadd.f32 1.0, %v4469_v1  ;;  %v2193_v59 = vadd.f32 1.1283791, %v2192_v60  ;;  %v4655_v1 = vld [vmem:[#allocation8 + $0x128] sm:$0xf] }
 0x270   : > { %8719 = vst [vmem:[#allocation72_spill] sm:$0xff] %v7319_v13  ;;  %3754 = vmatmul.bf16.gmra.mxu0 %v7319_v13  ;;  %v7330_v25 = vmin.f32 %v2542_v18, 16.0  ;;  %v7332_v44 = vadd.f32 %v958_v7, %v910_v55  ;;  %v2880_v20 = vadd.f32 0.112945676, %v2879_v0  ;;  %v2353_v47 = vadd.f32 1.1283791, %v2352_v15 }
 0x271   : > { %v2427_v19 = vadd.f32 0.0036580483, %v2426_v8  ;;  %v3043_v34 = vmul.f32 %v2995_v61, %v8721_v53  ;;  %v3046_v50 = vmul.f32 %v2998_v39, %v6798_v38  ;;  %v7339_v51 = vmul.f32 %v2233_v21, %v6928_v46  ;;  %v4868_v18 = vld [vmem:[#allocation8 + $0xc4] sm:$0xf]  ;;  %v4601_v55 = vld [vmem:[#allocation8 + $0xcc] sm:$0xf0] }
 0x272   : > { %8720 = vst [vmem:[#allocation95_spill] sm:$0xff] %v7332_v44  ;;  %v7336_v40 = vpop.eup %5077  ;;  %v2311_v32 = vadd.f32 0.18741608, %v2310_v43  ;;  %v2469_v24 = vadd.f32 0.05243302, %v2468_v17  ;;  %v2881_v6 = vmul.f32 %v2880_v20, %v8709_v2  ;;  %v812_v28 = vadd.f32 %v811_v3, %v5901_v48 }
 0x273   : > { %v2587_v58 = vadd.f32 0.0036580483, %v2586_v56  ;;  %v7343_v31 = vpack.c.bf16 %v3046_v50, %v3043_v34  ;;  %v2766_v37 = vmul.f32 %v7336_v40, %v7298_v41  ;;  %v7348_v38 = vmul.f32 %v2193_v59, %v6923_v10  ;;  %v4882_v61 = vld [vmem:[#allocation8 + $0x130] sm:$0xf0] }
 0x274   : > { %v2544_v12 = vmul.f32 2.1237322e-06, %v7330_v25  ;;  %v7352_v46 = vmul.f32 0.70710677, %v7332_v44  ;;  %v2882_v60 = vadd.f32 0.4994258, %v2881_v6  ;;  %v7355_v30 = vmul.f32 %v2353_v47, %v6981_v27 }
 0x275   : > { %v2428_v9 = vmul.f32 %v2427_v19, %v7229_v57  ;;  %3705 = vmatmul.bf16.gmra.mxu3 %v7343_v31  ;;  %v7359_v0 = vadd.f32 %v860_v11, %v812_v28  ;;  %v2767_v5 = vsub.f32 1.0, %v2766_v37  ;;  %v2470_v10 = vmul.f32 %v2469_v24, %v7190_v16  ;;  %v8727_v37 = vld [vmem:[#allocation75_spill] sm:$0xff] }
 0x276   : > { %v2883_v15 = vmul.f32 %v2882_v60, %v8709_v2  ;;  %v4604_v8 = vor.u32 %v4868_v18, %v4601_v55  ;;  %v1875_v21 = vmul.f32 3.8918573e-05, %v6638_v52  ;;  %vm2770_vm8 = vweird.f32 %v7298_v41  ;;  %v912_v55 = vpop.f32.mrf.mxu0 }
 0x277   : > { %8722 = vst [vmem:[#allocation82_spill] sm:$0xff] %v7359_v0  ;;  %v2768_v27 = vmul.f32 %v7336_v40, %v2767_v5  ;;  %vm2771_vm9 = vweird.f32 %v7336_v40  ;;  %v4656_v43 = vor.u32 %v4882_v61, %v4655_v1  ;;  %v2312_v17 = vmul.f32 %v2311_v32, %v7091_v63 }
 0x278   : > { %v2776_v56 = vand.u32 2147483648, %v7298_v41  ;;  %v7369_v39 = vadd.f32 1.0, %v2883_v15  ;;  %3841 = vmatpush.bf16.msra.mxu2 %v4604_v8  ;;  %v1876_v2 = vadd.f32 0.001143296, %v1875_v21  ;;  %v2429_v7 = vadd.f32 0.05243302, %v2428_v9  ;;  %vm7385_vm10 = vmor %vm2770_vm8, %vm2771_vm9 }
 0x279   : > { %v7372_v59 = vmul.f32 0.70710677, %v7359_v0  ;;  %v2769_v3 = vadd.f32 %v7336_v40, %v2768_v27  ;;  %v2774_v20 = vand.u32 2147483647, %v7298_v41  ;;  %3984 = vmatpush.bf16.msrb.mxu1 %v4656_v43  ;;  %v7377_v47 = vmul.f32 0.5, %v7044_v49  ;;  %v8728_v21 = vld [vmem:[#allocation79_spill] sm:$0xff] }
 0x27a   : > { %v2471_v19 = vadd.f32 0.18741608, %v2470_v10  ;;  %v2702_v53 = vmul.f32 %v7352_v46, %v7352_v46  ;;  %5079 = vrcp.f32 %v7369_v39  ;;  %v7391_v50 = vmul.f32 0.5, %v7130_v22  ;;  %v8735_v49 = vld [vmem:[#allocation35_spill] sm:$0xff] }
 0x27b   : > { %8723 = vst [vmem:[#allocation96_spill] sm:$0xff] %v7372_v59  ;;  %v7394_v32 = vmul.f32 0.5, %v7159_v23  ;;  %v2588_v24 = vmul.f32 %v2587_v58, %v7263_v29  ;;  %v2545_v11 = vadd.f32 0.00028619796, %v2544_v12  ;;  %v7397_v6 = vadd.f32 1.1283791, %v2312_v17 }
 0x27c   : > { %v2777_v28 = vor.u32 1.1754944e-38, %v2776_v56  ;;  %v1877_v41 = vmul.f32 %v1876_v2, %v6638_v52  ;;  %v1835_v60 = vmul.f32 3.8918573e-05, %v8727_v37  ;;  %v2430_v9 = vmul.f32 %v2429_v7, %v7229_v57  ;;  %v8761_v0 = vld [vmem:[#allocation67_spill] sm:$0xff] }
 0x27d   : > { %8726 = vst [vmem:[#allocation97_spill] sm:$0xff] %v7394_v32  ;;  %v2662_v5 = vmul.f32 %v7372_v59, %v7372_v59  ;;  %v2773_v18 = vsel %vm7385_vm10, %v7336_v40, %v2769_v3  ;;  %vm2775_vm11 = vcmp.eq.f32.partialorder %v2774_v20, 8.507059e+37  ;;  %v7408_v58 = vmul.f32 %v2471_v19, %v7190_v16 }
 0x27e   : > { %v7410_v12 = vmin.f32 %v2702_v53, 16.0  ;;  %v1878_v10 = vadd.f32 0.014752088, %v1877_v41  ;;  %v1836_v15 = vadd.f32 0.001143296, %v1835_v60  ;;  %v2546_v1 = vmul.f32 %v2545_v11, %v7330_v25  ;;  %v961_v11 = vpop.f32.mrf.mxu1  ;;  %v8729_v41 = vld [vmem:[#allocation43_spill] sm:$0xff] }
 0x27f   : > { %v2589_v8 = vadd.f32 0.05243302, %v2588_v24  ;;  %v913_v61 = vadd.f32 %v912_v55, %v5874_v62  ;;  %v1995_v27 = vmul.f32 3.8918573e-05, %v8728_v21  ;;  %v2778_v40 = vsel %vm2775_vm11, %v2777_v28, %v2773_v18  ;;  %v8730_v18 = vld [vmem:[#allocation80_spill] sm:$0xff] }
 0x280   : > { %v5080_v43 = vpop.eup %5079  ;;  %v2704_v17 = vmul.f32 2.1237322e-06, %v7410_v12  ;;  %v1879_v56 = vmul.f32 %v1878_v10, %v6638_v52  ;;  %v1837_v2 = vmul.f32 %v1836_v15, %v8727_v37  ;;  %v7418_v7 = vmin.f32 %v2662_v5, 16.0 }
 0x281   : > { %v2886_v3 = vmul.f32 %v5080_v43, %v7369_v39  ;;  %v2894_v20 = vand.u32 2147483647, %v7369_v39  ;;  %v2896_v19 = vand.u32 2147483648, %v7369_v39  ;;  %vm2890_vm12 = vweird.f32 %v7369_v39 }
 0x282   : > { %v1880_v53 = vadd.f32 0.112945676, %v1879_v56  ;;  %v1996_v34 = vadd.f32 0.001143296, %v1995_v27  ;;  %v1838_v24 = vadd.f32 0.014752088, %v1837_v2  ;;  %v2779_v28 = vmul.f32 %v2778_v40, %v8729_v41 }
 0x283   : > { %v2887_v60 = vsub.f32 1.0, %v2886_v3  ;;  %vm2891_vm13 = vweird.f32 %v5080_v43  ;;  %v1955_v55 = vmul.f32 3.8918573e-05, %v8730_v18  ;;  %v7426_v5 = vadd.f32 %v961_v11, %v913_v61 }
 0x284   : > { %v1881_v10 = vmul.f32 %v1880_v53, %v6638_v52  ;;  %v1997_v15 = vmul.f32 %v1996_v34, %v8728_v21  ;;  %v1839_v22 = vmul.f32 %v1838_v24, %v8727_v37  ;;  %v2664_v4 = vmul.f32 2.1237322e-06, %v7418_v7  ;;  %vm7435_vm14 = vmor %vm2890_vm12, %vm2891_vm13 }
 0x285   : > { %8731 = vst [vmem:[#allocation75_spill] sm:$0xff] %v7426_v5  ;;  %v2888_v56 = vmul.f32 %v5080_v43, %v2887_v60  ;;  %v2897_v27 = vor.u32 1.1754944e-38, %v2896_v19  ;;  %v1956_v2 = vadd.f32 0.001143296, %v1955_v55  ;;  %v2590_v23 = vmul.f32 %v2589_v8, %v7263_v29 }
 0x286   : > { %v1882_v61 = vadd.f32 0.4994258, %v1881_v10  ;;  %v1998_v3 = vadd.f32 0.014752088, %v1997_v15  ;;  %v1840_v53 = vadd.f32 0.112945676, %v1839_v22 }
 0x287   : > { %v4495_v11 = vclamps-f32 %v2779_v28, 1.0  ;;  %v2889_v34 = vadd.f32 %v5080_v43, %v2888_v56  ;;  %vm2895_vm15 = vcmp.eq.f32.partialorder %v2894_v20, 8.507059e+37  ;;  %v1957_v24 = vmul.f32 %v1956_v2, %v8730_v18 }
 0x288   : > { %v7441_v41 = vmul.f32 0.70710677, %v7426_v5  ;;  %v1883_v19 = vmul.f32 %v1882_v61, %v6638_v52  ;;  %v1999_v8 = vmul.f32 %v1998_v3, %v8728_v21  ;;  %v1841_v39 = vmul.f32 %v1840_v53, %v8727_v37 }
 0x289   : > { %v2547_v60 = vadd.f32 0.0036580483, %v2546_v1  ;;  %v2705_v55 = vadd.f32 0.00028619796, %v2704_v17  ;;  %v2893_v10 = vsel %vm7435_vm14, %v5080_v43, %v2889_v34  ;;  %v1958_v22 = vadd.f32 0.014752088, %v1957_v24 }
 0x28a   : > { %8734 = vst [vmem:[#allocation79_spill] sm:$0xff] %v7441_v41  ;;  %v2898_v28 = vsel %vm2895_vm15, %v2897_v27, %v2893_v10  ;;  %v7448_v15 = vadd.f32 1.0, %v1883_v19  ;;  %v2000_v20 = vadd.f32 0.112945676, %v1999_v8  ;;  %v1842_v56 = vadd.f32 0.4994258, %v1841_v39  ;;  %v814_v10 = vpop.f32.mrf.mxu2 }
 0x28b   : > { %v2431_v2 = vadd.f32 0.18741608, %v2430_v9  ;;  %v2899_v13 = vmul.f32 %v2898_v28, %v8735_v49  ;;  %v3024_v5 = vadd.f32 1.0, %v4495_v11  ;;  %v1959_v52 = vmul.f32 %v1958_v22, %v8730_v18  ;;  %v8736_v43 = vld [vmem:[#allocation45_spill] sm:$0xff]  ;;  %v8737_v34 = vld [vmem:[#allocation56_spill] sm:$0xff] }
 0x28c   : > { %v2591_v61 = vadd.f32 0.18741608, %v2590_v23  ;;  %v2665_v3 = vadd.f32 0.00028619796, %v2664_v4  ;;  %v2822_v1 = vmul.f32 %v7441_v41, %v7441_v41  ;;  %5081 = vrcp.f32 %v7448_v15 }
 0x28d   : > { %v1011_v17 = vmul.f32 0.5, %v8736_v43  ;;  %v4498_v27 = vclamps-f32 %v2899_v13, 1.0  ;;  %v2001_v40 = vmul.f32 %v2000_v20, %v8728_v21  ;;  %v1843_v53 = vmul.f32 %v1842_v56, %v8727_v37 }
 0x28e   : > { %v2473_v9 = vadd.f32 1.1283791, %v7408_v58  ;;  %v2548_v49 = vmul.f32 %v2547_v60, %v7330_v25  ;;  %v2706_v11 = vmul.f32 %v2705_v55, %v7410_v12  ;;  %v1960_v23 = vadd.f32 0.112945676, %v1959_v52  ;;  %v4643_v58 = vld [vmem:[#allocation8 + $0x110] sm:$0xf] }
 0x28f   : > { %v3027_v4 = vadd.f32 1.0, %v4498_v27  ;;  %v3072_v24 = vmul.f32 %v3024_v5, %v8737_v34  ;;  %v2002_v19 = vadd.f32 0.4994258, %v2001_v40  ;;  %v7462_v8 = vadd.f32 1.0, %v1843_v53  ;;  %v4879_v60 = vld [vmem:[#allocation8 + $0x118] sm:$0xf0] }
 0x290   : > { %v2432_v39 = vmul.f32 %v2431_v2, %v7229_v57  ;;  %v2592_v13 = vmul.f32 %v2591_v61, %v7263_v29  ;;  %v2666_v37 = vmul.f32 %v2665_v3, %v7418_v7  ;;  %v7467_v22 = vmin.f32 %v2822_v1, 16.0  ;;  %v8740_v34 = vld [vmem:[#allocation58_spill] sm:$0xff] }
 0x291   : > { %v815_v55 = vadd.f32 %v814_v10, %v5901_v48  ;;  %v3075_v28 = vmul.f32 %v3027_v4, %v1011_v17  ;;  %v2003_v20 = vmul.f32 %v2002_v19, %v8728_v21  ;;  %v4644_v5 = vor.u32 %v4879_v60, %v4643_v58  ;;  %v863_v4 = vpop.f32.mrf.mxu3 }
 0x292   : > { %v5082_v56 = vpop.eup %5081  ;;  %v2549_v52 = vadd.f32 0.05243302, %v2548_v49  ;;  %v2824_v27 = vmul.f32 2.1237322e-06, %v7467_v22  ;;  %5083 = vrcp.f32 %v7462_v8  ;;  %v1961_v2 = vmul.f32 %v1960_v23, %v8730_v18 }
 0x293   : > { %v2707_v61 = vadd.f32 0.0036580483, %v2706_v11  ;;  %v7474_v3 = vpack.c.bf16 %v3075_v28, %v3072_v24  ;;  %v1886_v1 = vmul.f32 %v5082_v56, %v7448_v15  ;;  %v7477_v40 = vadd.f32 1.0, %v2003_v20  ;;  %3985 = vmatpush.bf16.msrb.mxu1 %v4644_v5 }
 0x294   : > { %v7480_v17 = vmul.f32 0.5, %v7192_v14  ;;  %v2667_v21 = vadd.f32 0.0036580483, %v2666_v37  ;;  %v1894_v53 = vand.u32 2147483647, %v7448_v15  ;;  %v1896_v49 = vand.u32 2147483648, %v7448_v15 }
 0x295   : > { %8738 = vst [vmem:[#allocation43_spill] sm:$0xff] %v7474_v3  ;;  %3681 = vmatmul.bf16.gmra.mxu2 %v7474_v3  ;;  %v1887_v23 = vsub.f32 1.0, %v1886_v1  ;;  %vm1890_vm0 = vweird.f32 %v7448_v15  ;;  %vm1891_vm1 = vweird.f32 %v5082_v56  ;;  %5085 = vrcp.f32 %v7477_v40  ;;  %3828 = vmatmul.bf16.gmra.mxu1 %v7474_v3  ;;  %v4619_v1 = vld [vmem:[#allocation8 + $0xe0] sm:$0xf]  ;;  %v4781_v3 = vld [vmem:[#allocation8 + $0x234] sm:$0xf0] }
 0x296   : > { %8739 = vst [vmem:[#allocation80_spill] sm:$0xff] %v7480_v17  ;;  %v7490_v11 = vmul.f32 %v7397_v6, %v7058_v42  ;;  %v7493_v24 = vmul.f32 %v2473_v9, %v8740_v34  ;;  %v2825_v19 = vadd.f32 0.00028619796, %v2824_v27  ;;  %v1962_v10 = vadd.f32 0.4994258, %v1961_v2  ;;  %vm7500_vm2 = vmor %vm1890_vm0, %vm1891_vm1 }
 0x297   : > { %v2433_v37 = vadd.f32 1.1283791, %v2432_v39  ;;  %v2593_v58 = vadd.f32 1.1283791, %v2592_v13  ;;  %v1888_v60 = vmul.f32 %v5082_v56, %v1887_v23  ;;  %v7495_v28 = vadd.f32 %v863_v4, %v815_v55  ;;  %v4876_v2 = vld [vmem:[#allocation8 + $0x100] sm:$0xf0] }
 0x298   : > { %v7497_v15 = vpop.eup %5083  ;;  %v2550_v20 = vmul.f32 %v2549_v52, %v7330_v25  ;;  %vm7504_vm3 = vcmp.eq.f32.partialorder %v1894_v53, 8.507059e+37  ;;  %v1897_v6 = vor.u32 1.1754944e-38, %v1896_v49  ;;  %v1963_v9 = vmul.f32 %v1962_v10, %v8730_v18  ;;  %v4631_v52 = vld [vmem:[#allocation8 + $0xf8] sm:$0xf]  ;;  %v4873_v34 = vld [vmem:[#allocation8 + $0xe8] sm:$0xf0] }
 0x299   : > { %8741 = vst [vmem:[#allocation35_spill] sm:$0xff] %v7495_v28  ;;  %v2708_v39 = vmul.f32 %v2707_v61, %v7410_v12  ;;  %v2668_v13 = vmul.f32 %v2667_v21, %v7418_v7  ;;  %v1889_v55 = vadd.f32 %v5082_v56, %v1888_v60  ;;  %v1846_v27 = vmul.f32 %v7497_v15, %v7462_v8 }
 0x29a   : > { %v2826_v4 = vmul.f32 %v2825_v19, %v7467_v22  ;;  %v1854_v53 = vand.u32 2147483647, %v7462_v8  ;;  %v7515_v23 = vadd.f32 1.0, %v1963_v9  ;;  %v4632_v49 = vor.u32 %v4876_v2, %v4631_v52 }
 0x29b   : > { %v5086_v18 = vpop.eup %5085  ;;  %v1893_v61 = vsel %vm7500_vm2, %v5082_v56, %v1889_v55  ;;  %v7520_v21 = vmul.f32 0.70710677, %v7495_v28  ;;  %v1847_v10 = vsub.f32 1.0, %v1846_v27  ;;  %v1856_v60 = vand.u32 2147483648, %v7462_v8  ;;  %v8747_v56 = vld [vmem:[#allocation49_spill] sm:$0xff] }
 0x29c   : > { %v1898_v14 = vsel %vm7504_vm3, %v1897_v6, %v1893_v61  ;;  %v2006_v19 = vmul.f32 %v5086_v18, %v7477_v40  ;;  %vm2010_vm4 = vweird.f32 %v7477_v40  ;;  %3986 = vmatpush.bf16.msrb.mxu1 %v4632_v49  ;;  %v4620_v9 = vor.u32 %v4873_v34, %v4619_v1  ;;  %v8748_v1 = vld [vmem:[#allocation83_spill] sm:$0xff] }
 0x29d   : > { %8746 = vst [vmem:[#allocation56_spill] sm:$0xff] %v7520_v21  ;;  %v2016_v52 = vand.u32 2147483648, %v7477_v40  ;;  %v1848_v5 = vmul.f32 %v7497_v15, %v1847_v10  ;;  %vm1851_vm5 = vweird.f32 %v7497_v15  ;;  %5087 = vrcp.f32 %v7515_v23 }
 0x29e   : > { %v1899_v55 = vmul.f32 %v1898_v14, %v8747_v56  ;;  %v2007_v27 = vsub.f32 1.0, %v2006_v19  ;;  %vm2011_vm6 = vweird.f32 %v5086_v18  ;;  %v2014_v42 = vand.u32 2147483647, %v7477_v40  ;;  %v4787_v14 = vld [vmem:[#allocation8 + $0x230] sm:$0xf] }
 0x29f   : > { %v2551_v6 = vadd.f32 0.18741608, %v2550_v20  ;;  %v1849_v2 = vadd.f32 %v7497_v15, %v1848_v5  ;;  %vm1850_vm7 = vweird.f32 %v7462_v8  ;;  %v2115_v49 = vmul.f32 3.8918573e-05, %v8748_v1  ;;  %vm7544_vm9 = vmor %vm2010_vm4, %vm2011_vm6  ;;  %v8755_v5 = vld [vmem:[#allocation42_spill] sm:$0xff] }
 0x2a0   : > { %v2709_v34 = vadd.f32 0.05243302, %v2708_v39  ;;  %v7536_v61 = vadd.f32 0.05243302, %v2668_v13  ;;  %v2827_v10 = vadd.f32 0.0036580483, %v2826_v4  ;;  %v2008_v43 = vmul.f32 %v5086_v18, %v2007_v27  ;;  %vm7538_vm8 = vmor %vm1850_vm7, %vm1851_vm5  ;;  %3987 = vmatpush.bf16.msrb.mxu1 %v4620_v9 }
 0x2a1   : > { %v2017_v20 = vor.u32 1.1754944e-38, %v2016_v52  ;;  %v2782_v8 = vmul.f32 %v7520_v21, %v7520_v21  ;;  %v1853_v39 = vsel %vm7538_vm8, %v7497_v15, %v1849_v2  ;;  %vm1855_vm10 = vcmp.eq.f32.partialorder %v1854_v53, 8.507059e+37  ;;  %v8756_v52 = vld [vmem:[#allocation54_spill] sm:$0xff]  ;;  %v4913_v21 = vld [vmem:[#allocation8 + $0x22c] sm:$0xf] }
 0x2a2   : > { %v4473_v13 = vclamps-f32 %v1899_v55, 1.0  ;;  %v2009_v4 = vadd.f32 %v5086_v18, %v2008_v43  ;;  %vm7553_vm11 = vcmp.eq.f32.partialorder %v2014_v42, 8.507059e+37  ;;  %v1857_v40 = vor.u32 1.1754944e-38, %v1856_v60  ;;  %v4607_v42 = vld [vmem:[#allocation8 + $0xc8] sm:$0xf]  ;;  %v8758_v2 = vld [vmem:[#allocation90_spill] sm:$0xff] }
 0x2a3   : > { %v5088_v9 = vpop.eup %5087  ;;  %v7558_v56 = vmul.f32 %v2433_v37, %v8755_v5  ;;  %v7561_v27 = vmul.f32 %v2593_v58, %v8756_v52  ;;  %v2552_v28 = vmul.f32 %v2551_v6, %v7330_v25  ;;  %v2116_v15 = vadd.f32 0.001143296, %v2115_v49  ;;  %v4870_v60 = vld [vmem:[#allocation8 + $0xd0] sm:$0xf0]  ;;  %v8759_v49 = vld [vmem:[#allocation78_spill] sm:$0xff] }
 0x2a4   : > { %v2013_v43 = vsel %vm7544_vm9, %v5086_v18, %v2009_v4  ;;  %v1858_v53 = vsel %vm1855_vm10, %v1857_v40, %v1853_v39  ;;  %v1966_v55 = vmul.f32 %v5088_v9, %v7515_v23  ;;  %v2235_v41 = vmul.f32 3.8918573e-05, %v8758_v2  ;;  %v4915_v18 = vld [vmem:[#allocation8 + $0x238] sm:$0xf0]  ;;  %v8760_v39 = vld [vmem:[#allocation31_spill] sm:$0xff] }
 0x2a5   : > { %8757 = vst [vmem:[#allocation58_spill] sm:$0xff] %v7561_v27  ;;  %v2710_v37 = vmul.f32 %v2709_v34, %v7410_v12  ;;  %v2828_v58 = vmul.f32 %v2827_v10, %v7467_v22  ;;  %v2018_v6 = vsel %vm7553_vm11, %v2017_v20, %v2013_v43  ;;  %v7572_v5 = vmin.f32 %v2782_v8, 16.0  ;;  %3842 = vmatmul.bf16.vlgmr.msra.gmra.mxu2 %v8759_v49 }
 0x2a6   : > { %v2019_v4 = vmul.f32 %v2018_v6, %v8760_v39  ;;  %v3002_v40 = vadd.f32 1.0, %v4473_v13  ;;  %v1967_v52 = vsub.f32 1.0, %v1966_v55  ;;  %v4784_v59 = vor.u32 %v4913_v21, %v4781_v3  ;;  %v8762_v3 = vld [vmem:[#allocation61_spill] sm:$0xff]  ;;  %v914_v55 = vpop.f32.mrf.mxu0 }
 0x2a7   : > { %v1859_v17 = vmul.f32 %v1858_v53, %v8761_v0  ;;  %v1974_v34 = vand.u32 2147483647, %v7515_v23  ;;  %v1976_v10 = vand.u32 2147483648, %v7515_v23  ;;  %v4608_v27 = vor.u32 %v4870_v60, %v4607_v42 }
 0x2a8   : > { %v4476_v19 = vclamps-f32 %v2019_v4, 1.0  ;;  %v1968_v20 = vmul.f32 %v5088_v9, %v1967_v52  ;;  %vm1971_vm12 = vweird.f32 %v5088_v9  ;;  %3883 = vmatpush.bf16.msrb.mxu3 %v4784_v59  ;;  %v4788_v8 = vor.u32 %v4915_v18, %v4787_v14 }
 0x2a9   : > { %v2711_v43 = vadd.f32 0.18741608, %v2710_v37  ;;  %v2829_v32 = vadd.f32 0.05243302, %v2828_v58  ;;  %vm1970_vm13 = vweird.f32 %v7515_v23  ;;  %3988 = vmatpush.bf16.msrb.mxu1 %v4608_v27  ;;  %v2117_v13 = vmul.f32 %v2116_v15, %v8748_v1  ;;  %v8763_v58 = vld [vmem:[#allocation85_spill] sm:$0xff] }
 0x2aa   : > { %v3005_v21 = vadd.f32 1.0, %v4476_v19  ;;  %v3050_v0 = vmul.f32 %v3002_v40, %v8762_v3  ;;  %v1969_v53 = vadd.f32 %v5088_v9, %v1968_v20  ;;  %4030 = vmatpush.bf16.msrb.mxu2 %v4788_v8  ;;  %v2236_v6 = vadd.f32 0.001143296, %v2235_v41  ;;  %vm1972_vm14 = vmor %vm1970_vm13, %vm1971_vm12  ;;  %v8765_v40 = vld [vmem:[#allocation68_spill] sm:$0xff] }
 0x2ab   : > { %v2784_v42 = vmul.f32 2.1237322e-06, %v7572_v5  ;;  %v4472_v60 = vclamps-f32 %v1859_v17, 1.0  ;;  %v1977_v59 = vor.u32 1.1754944e-38, %v1976_v10  ;;  %v2118_v37 = vadd.f32 0.014752088, %v2117_v13 }
 0x2ac   : > { %v3053_v14 = vmul.f32 %v3005_v21, %v8763_v58  ;;  %v1973_v23 = vsel %vm1972_vm14, %v5088_v9, %v1969_v53  ;;  %vm1975_vm15 = vcmp.eq.f32.partialorder %v1974_v34, 8.507059e+37  ;;  %v2237_v27 = vmul.f32 %v2236_v6, %v8758_v2  ;;  %3989 = vmatmul.bf16.vlgmr.msrb.gmra.mxu1 %v8759_v49 }
 0x2ad   : > { %v2670_v15 = vmul.f32 %v7536_v61, %v7418_v7  ;;  %v1978_v18 = vsel %vm1975_vm15, %v1977_v59, %v1973_v23  ;;  %v915_v41 = vadd.f32 %v914_v55, %v5874_v62  ;;  %v2119_v17 = vmul.f32 %v2118_v37, %v8748_v1  ;;  %v963_v61 = vpop.f32.mrf.mxu1  ;;  %v8766_v62 = vld [vmem:[#allocation57_spill] sm:$0xff]  ;;  %v8768_v37 = vld [vmem:[#allocation84_spill] sm:$0xff]  ;;  %v8769_v23 = vld [vmem:[#allocation86_spill] sm:$0xff] }
 0x2ae   : > { %v2553_v39 = vadd.f32 1.1283791, %v2552_v28  ;;  %v7591_v4 = vpack.c.bf16 %v3053_v14, %v3050_v0  ;;  %v1979_v52 = vmul.f32 %v1978_v18, %v8765_v40  ;;  %v2238_v10 = vadd.f32 0.014752088, %v2237_v27  ;;  %v816_v40 = vpop.f32.mrf.mxu2 }
 0x2af   : > { %v2830_v9 = vmul.f32 %v2829_v32, %v7467_v22  ;;  %v2785_v34 = vadd.f32 0.00028619796, %v2784_v42  ;;  %v3001_v19 = vadd.f32 1.0, %v4472_v60  ;;  %v2120_v20 = vadd.f32 0.112945676, %v2119_v17 }
 0x2b0   : > { %8764 = vst [vmem:[#allocation49_spill] sm:$0xff] %v7591_v4  ;;  %3759 = vmatmul.bf16.gmra.mxu0 %v7591_v4  ;;  %v4475_v49 = vclamps-f32 %v1979_v52, 1.0  ;;  %v2239_v8 = vmul.f32 %v2238_v10, %v8758_v2  ;;  %v2075_v13 = vmul.f32 3.8918573e-05, %v8766_v62  ;;  %v2195_v28 = vmul.f32 3.8918573e-05, %v6959_v26 }
 0x2b1   : > { %v2712_v21 = vmul.f32 %v2711_v43, %v7410_v12  ;;  %v2671_v3 = vadd.f32 0.18741608, %v2670_v15  ;;  %v7600_v0 = vadd.f32 %v963_v61, %v915_v41  ;;  %v2121_v32 = vmul.f32 %v2120_v20, %v8748_v1 }
 0x2b2   : > { %v7604_v53 = vmul.f32 0.5, %v7272_v45  ;;  %v3004_v55 = vadd.f32 1.0, %v4475_v49  ;;  %v2240_v6 = vadd.f32 0.112945676, %v2239_v8  ;;  %v2076_v42 = vadd.f32 0.001143296, %v2075_v13  ;;  %v865_v13 = vpop.f32.mrf.mxu3 }
 0x2b3   : > { %8767 = vst [vmem:[#allocation83_spill] sm:$0xff] %v7600_v0  ;;  %v2831_v60 = vadd.f32 0.18741608, %v2830_v9  ;;  %v2786_v59 = vmul.f32 %v2785_v34, %v7572_v5  ;;  %v3049_v58 = vmul.f32 %v3001_v19, %v8768_v37  ;;  %v2122_v14 = vadd.f32 0.4994258, %v2121_v32  ;;  %v8770_v9 = vld [vmem:[#allocation66_spill] sm:$0xff] }
 0x2b4   : > { %v3052_v27 = vmul.f32 %v3004_v55, %v8769_v23  ;;  %v2241_v43 = vmul.f32 %v2240_v6, %v8758_v2  ;;  %v2077_v15 = vmul.f32 %v2076_v42, %v8766_v62  ;;  %v2196_v18 = vadd.f32 0.001143296, %v2195_v28  ;;  %v4595_v32 = vld [vmem:[#allocation8 + $0xb0] sm:$0xf]  ;;  %v4867_v55 = vld [vmem:[#allocation8 + $0xb8] sm:$0xf0] }
 0x2b5   : > { %v2713_v41 = vadd.f32 1.1283791, %v2712_v21  ;;  %v2672_v17 = vmul.f32 %v2671_v3, %v7418_v7  ;;  %v7613_v52 = vmul.f32 0.70710677, %v7600_v0  ;;  %v2123_v10 = vmul.f32 %v2122_v14, %v8748_v1  ;;  %3847 = vmatmul.bf16.gmra.mxu2 %v8770_v9 }
 0x2b6   : > { %v7617_v34 = vpack.c.bf16 %v3052_v27, %v3049_v58  ;;  %v2242_v19 = vadd.f32 0.4994258, %v2241_v43  ;;  %v2078_v20 = vadd.f32 0.014752088, %v2077_v15  ;;  %v2197_v49 = vmul.f32 %v2196_v18, %v6959_v26 }
 0x2b7   : > { %v2832_v61 = vmul.f32 %v2831_v60, %v7467_v22  ;;  %v2787_v8 = vadd.f32 0.0036580483, %v2786_v59  ;;  %v7621_v28 = vadd.f32 1.0, %v2123_v10  ;;  %v2355_v21 = vmul.f32 3.8918573e-05, %v7036_v35 }
 0x2b8   : > { %v817_v3 = vadd.f32 %v816_v40, %v5901_v48  ;;  %3710 = vmatmul.bf16.gmra.mxu3 %v7617_v34  ;;  %v2243_v1 = vmul.f32 %v2242_v19, %v8758_v2  ;;  %v2079_v6 = vmul.f32 %v2078_v20, %v8766_v62  ;;  %v2198_v42 = vadd.f32 0.014752088, %v2197_v49 }
 0x2b9   : > { %v7629_v37 = vmul.f32 %v2553_v39, %v7296_v54  ;;  %v7632_v60 = vmul.f32 0.5, %v7332_v44  ;;  %v2942_v59 = vmul.f32 %v7613_v52, %v7613_v52  ;;  %5089 = vrcp.f32 %v7621_v28  ;;  %v4910_v44 = vld [vmem:[#allocation8 + $0x214] sm:$0xf] }
 0x2ba   : > { %v7638_v48 = vmul.f32 %v2713_v41, %v7352_v46  ;;  %v7640_v2 = vadd.f32 %v865_v13, %v817_v3  ;;  %v7642_v58 = vadd.f32 1.0, %v2243_v1  ;;  %v4596_v14 = vor.u32 %v4867_v55, %v4595_v32 }
 0x2bb   : > { %v2788_v23 = vmul.f32 %v2787_v8, %v7572_v5  ;;  %v2080_v54 = vadd.f32 0.112945676, %v2079_v6  ;;  %v2199_v39 = vmul.f32 %v2198_v42, %v6959_v26  ;;  %v2356_v27 = vadd.f32 0.001143296, %v2355_v21 }
 0x2bc   : > { %8771 = vst [vmem:[#allocation42_spill] sm:$0xff] %v7640_v2  ;;  %v7646_v43 = vadd.f32 1.1283791, %v2672_v17  ;;  %v7648_v15 = vadd.f32 1.1283791, %v2832_v61  ;;  %5091 = vrcp.f32 %v7642_v58  ;;  %3932 = vmatpush.bf16.msrb.mxu0 %v4596_v14  ;;  %3994 = vmatmul.bf16.gmra.mxu1 %v8770_v9  ;;  %v7653_v46 = vmin.f32 %v2942_v59, 16.0 }
 0x2bd   : > { %v2134_v18 = vand.u32 2147483647, %v7621_v28  ;;  %v2136_v41 = vand.u32 2147483648, %v7621_v28  ;;  %v2081_v40 = vmul.f32 %v2080_v54, %v8766_v62  ;;  %v2315_v10 = vmul.f32 3.8918573e-05, %v7091_v63 }
 0x2be   : > { %v7659_v17 = vmul.f32 0.70710677, %v7640_v2  ;;  %v2200_v19 = vadd.f32 0.112945676, %v2199_v39  ;;  %v2357_v20 = vmul.f32 %v2356_v27, %v7036_v35  ;;  %v2475_v49 = vmul.f32 3.8918573e-05, %v7190_v16 }
 0x2bf   : > { %v5090_v61 = vpop.eup %5089  ;;  %v7663_v8 = vadd.f32 0.05243302, %v2788_v23  ;;  %v2944_v9 = vmul.f32 2.1237322e-06, %v7653_v46  ;;  %vm2130_vm0 = vweird.f32 %v7621_v28  ;;  %v2082_v13 = vadd.f32 0.4994258, %v2081_v40 }
 0x2c0   : > { %v2126_v21 = vmul.f32 %v5090_v61, %v7621_v28  ;;  %vm7668_vm1 = vcmp.eq.f32.partialorder %v2134_v18, 8.507059e+37  ;;  %v2201_v1 = vmul.f32 %v2200_v19, %v6959_v26  ;;  %v2358_v32 = vadd.f32 0.014752088, %v2357_v20  ;;  %v4769_v19 = vld [vmem:[#allocation8 + $0x21c] sm:$0xf0] }
 0x2c1   : > { %v2137_v55 = vor.u32 1.1754944e-38, %v2136_v41  ;;  %v2254_v6 = vand.u32 2147483647, %v7642_v58  ;;  %v2083_v42 = vmul.f32 %v2082_v13, %v8766_v62  ;;  %v2316_v59 = vadd.f32 0.001143296, %v2315_v10 }
 0x2c2   : > { %v5092_v14 = vpop.eup %5091  ;;  %v2127_v23 = vsub.f32 1.0, %v2126_v21  ;;  %vm2131_vm2 = vweird.f32 %v5090_v61  ;;  %v2202_v54 = vadd.f32 0.4994258, %v2201_v1  ;;  %v2476_v39 = vadd.f32 0.001143296, %v2475_v49 }
 0x2c3   : > { %v2246_v27 = vmul.f32 %v5092_v14, %v7642_v58  ;;  %v2256_v18 = vand.u32 2147483648, %v7642_v58  ;;  %v7677_v40 = vadd.f32 1.0, %v2083_v42  ;;  %v2359_v41 = vmul.f32 %v2358_v32, %v7036_v35  ;;  %v4775_v10 = vld [vmem:[#allocation8 + $0x218] sm:$0xf]  ;;  %v4912_v13 = vld [vmem:[#allocation8 + $0x220] sm:$0xf0]  ;;  %vm7686_vm4 = vmor %vm2130_vm0, %vm2131_vm2 }
 0x2c4   : > { %v2128_v20 = vmul.f32 %v5090_v61, %v2127_v23  ;;  %vm2250_vm3 = vweird.f32 %v7642_v58  ;;  %v2203_v62 = vmul.f32 %v2202_v54, %v6959_v26  ;;  %v2435_v21 = vmul.f32 3.8918573e-05, %v7229_v57 }
 0x2c5   : > { %v2247_v1 = vsub.f32 1.0, %v2246_v27  ;;  %vm2251_vm5 = vweird.f32 %v5092_v14  ;;  %5093 = vrcp.f32 %v7677_v40  ;;  %v2317_v32 = vmul.f32 %v2316_v59, %v7091_v63  ;;  %3852 = vmatmul.bf16.gmra.mxu2 %v7343_v31 }
 0x2c6   : > { %v2129_v26 = vadd.f32 %v5090_v61, %v2128_v20  ;;  %v7693_v42 = vadd.f32 1.0, %v2203_v62  ;;  %v4772_v23 = vor.u32 %v4910_v44, %v4769_v19  ;;  %v2477_v54 = vmul.f32 %v2476_v39, %v7190_v16  ;;  %vm7700_vm6 = vmor %vm2250_vm3, %vm2251_vm5 }
 0x2c7   : > { %v2248_v45 = vmul.f32 %v5092_v14, %v2247_v1  ;;  %v2257_v28 = vor.u32 1.1754944e-38, %v2256_v18  ;;  %v4776_v4 = vor.u32 %v4912_v13, %v4775_v10  ;;  %v2360_v2 = vadd.f32 0.112945676, %v2359_v41  ;;  %v8778_v18 = vld [vmem:[#allocation81_spill] sm:$0xff] }
 0x2c8   : > { %v2133_v27 = vsel %vm7686_vm4, %v5090_v61, %v2129_v26  ;;  %v2094_v59 = vand.u32 2147483647, %v7677_v40  ;;  %v2096_v20 = vand.u32 2147483648, %v7677_v40  ;;  %5095 = vrcp.f32 %v7693_v42  ;;  %3884 = vmatpush.bf16.msrb.mxu3 %v4772_v23 }
 0x2c9   : > { %v2138_v44 = vsel %vm7668_vm1, %v2137_v55, %v2133_v27  ;;  %v2249_v39 = vadd.f32 %v5092_v14, %v2248_v45  ;;  %vm2255_vm7 = vcmp.eq.f32.partialorder %v2254_v6, 8.507059e+37  ;;  %4031 = vmatpush.bf16.msrb.mxu2 %v4776_v4  ;;  %v2436_v61 = vadd.f32 0.001143296, %v2435_v21 }
 0x2ca   : > { %v2139_v58 = vmul.f32 %v2138_v44, %v8778_v18  ;;  %v2361_v19 = vmul.f32 %v2360_v2, %v7036_v35  ;;  %v2478_v41 = vadd.f32 0.014752088, %v2477_v54  ;;  %v2318_v62 = vadd.f32 0.014752088, %v2317_v32  ;;  %v8781_v18 = vld [vmem:[#allocation87_spill] sm:$0xff] }
 0x2cb   : > { %v5094_v10 = vpop.eup %5093  ;;  %v7711_v13 = vadd.f32 0.00028619796, %v2944_v9  ;;  %v2902_v49 = vmul.f32 %v7659_v17, %v7659_v17  ;;  %v2253_v3 = vsel %vm7700_vm6, %v5092_v14, %v2249_v39  ;;  %vm2090_vm8 = vweird.f32 %v7677_v40 }
 0x2cc   : > { %v4479_v45 = vclamps-f32 %v2139_v58, 1.0  ;;  %v2258_v4 = vsel %vm2255_vm7, %v2257_v28, %v2253_v3  ;;  %v2086_v55 = vmul.f32 %v5094_v10, %v7677_v40  ;;  %vm7719_vm9 = vcmp.eq.f32.partialorder %v2094_v59, 8.507059e+37  ;;  %3999 = vmatmul.bf16.gmra.mxu1 %v7343_v31 }
 0x2cd   : > { %v2097_v2 = vor.u32 1.1754944e-38, %v2096_v20  ;;  %v2259_v9 = vmul.f32 %v2258_v4, %v7339_v51  ;;  %v2214_v21 = vand.u32 2147483647, %v7693_v42  ;;  %v2362_v1 = vadd.f32 0.4994258, %v2361_v19  ;;  %v8782_v4 = vld [vmem:[#allocation30_spill] sm:$0xff] }
 0x2ce   : > { %v2479_v0 = vmul.f32 %v2478_v41, %v7190_v16  ;;  %v5096_v14 = vpop.eup %5095  ;;  %v3008_v32 = vadd.f32 1.0, %v4479_v45  ;;  %v2087_v26 = vsub.f32 1.0, %v2086_v55  ;;  %v2319_v23 = vmul.f32 %v2318_v62, %v7091_v63 }
 0x2cf   : > { %v2437_v54 = vmul.f32 %v2436_v61, %v7229_v57  ;;  %v4482_v28 = vclamps-f32 %v2259_v9, 1.0  ;;  %v2206_v27 = vmul.f32 %v5096_v14, %v7693_v42  ;;  %v2216_v59 = vand.u32 2147483648, %v7693_v42 }
 0x2d0   : > { %v2363_v31 = vmul.f32 %v2362_v1, %v7036_v35  ;;  %v2088_v51 = vmul.f32 %v5094_v10, %v2087_v26  ;;  %vm2091_vm10 = vweird.f32 %v5094_v10  ;;  %v2480_v20 = vadd.f32 0.112945676, %v2479_v0 }
 0x2d1   : > { %v2320_v44 = vadd.f32 0.112945676, %v2319_v23  ;;  %v3011_v39 = vadd.f32 1.0, %v4482_v28  ;;  %v3056_v58 = vmul.f32 %v3008_v32, %v8781_v18  ;;  %v2207_v19 = vsub.f32 1.0, %v2206_v27  ;;  %vm2092_vm11 = vmor %vm2090_vm8, %vm2091_vm10  ;;  %v4864_v28 = vld [vmem:[#allocation8 + $0xa0] sm:$0xf0] }
 0x2d2   : > { %v7733_v41 = vadd.f32 1.0, %v2363_v31  ;;  %v2089_v62 = vadd.f32 %v5094_v10, %v2088_v51  ;;  %v2481_v61 = vmul.f32 %v2480_v20, %v7190_v16  ;;  %v2438_v45 = vadd.f32 0.014752088, %v2437_v54  ;;  %v4583_v54 = vld [vmem:[#allocation8 + $0x98] sm:$0xf]  ;;  %v7755_v20 = vpop.f32.mrf.mxu2 }
 0x2d3   : > { %v2321_v3 = vmul.f32 %v2320_v44, %v7091_v63  ;;  %v3059_v55 = vmul.f32 %v3011_v39, %v8782_v4  ;;  %v2208_v35 = vmul.f32 %v5096_v14, %v2207_v19  ;;  %vm2211_vm12 = vweird.f32 %v5096_v14 }
 0x2d4   : > { %5097 = vrcp.f32 %v7733_v41  ;;  %v2093_v9 = vsel %vm2092_vm11, %v5094_v10, %v2089_v62  ;;  %vm2210_vm13 = vweird.f32 %v7693_v42  ;;  %v2217_v1 = vor.u32 1.1754944e-38, %v2216_v59 }
 0x2d5   : > { %v2482_v0 = vadd.f32 0.4994258, %v2481_v61  ;;  %v7742_v32 = vpack.c.bf16 %v3059_v55, %v3056_v58  ;;  %v2098_v26 = vsel %vm7719_vm9, %v2097_v2, %v2093_v9  ;;  %v2209_v23 = vadd.f32 %v5096_v14, %v2208_v35  ;;  %3857 = vmatmul.bf16.gmra.mxu2 %v7617_v34  ;;  %vm2212_vm14 = vmor %vm2210_vm13, %vm2211_vm12 }
 0x2d6   : > { %v2322_v27 = vadd.f32 0.4994258, %v2321_v3  ;;  %v2099_v40 = vmul.f32 %v2098_v26, %v7323_v33  ;;  %v2439_v42 = vmul.f32 %v2438_v45, %v7229_v57  ;;  %v2595_v59 = vmul.f32 3.8918573e-05, %v7263_v29 }
 0x2d7   : > { %v2483_v10 = vmul.f32 %v2482_v0, %v7190_v16  ;;  %3764 = vmatmul.bf16.gmra.mxu0 %v7742_v32  ;;  %v2213_v31 = vsel %vm2212_vm14, %v5096_v14, %v2209_v23  ;;  %vm2215_vm15 = vcmp.eq.f32.partialorder %v2214_v21, 8.507059e+37  ;;  %v4584_v6 = vor.u32 %v4864_v28, %v4583_v54  ;;  %v8785_v54 = vld [vmem:[#allocation48_spill] sm:$0xff] }
 0x2d8   : > { %v2323_v2 = vmul.f32 %v2322_v27, %v7091_v63  ;;  %v7753_v51 = vmin.f32 %v2902_v49, 16.0  ;;  %v4478_v44 = vclamps-f32 %v2099_v40, 1.0  ;;  %v2218_v33 = vsel %vm2215_vm15, %v2217_v1, %v2213_v31 }
 0x2d9   : > { %v7757_v39 = vadd.f32 1.0, %v2483_v10  ;;  %v2219_v18 = vmul.f32 %v2218_v33, %v7348_v38  ;;  %v2374_v58 = vand.u32 2147483647, %v7733_v41  ;;  %v2376_v19 = vand.u32 2147483648, %v7733_v41  ;;  %3933 = vmatpush.bf16.msrb.mxu0 %v4584_v6 }
 0x2da   : > { %v5098_v16 = vpop.eup %5097  ;;  %v7762_v21 = vadd.f32 1.0, %v2323_v2  ;;  %v2440_v49 = vadd.f32 0.112945676, %v2439_v42  ;;  %v2596_v14 = vadd.f32 0.001143296, %v2595_v59  ;;  %v3007_v61 = vadd.f32 1.0, %v4478_v44 }
 0x2db   : > { %v2366_v63 = vmul.f32 %v5098_v16, %v7733_v41  ;;  %5099 = vrcp.f32 %v7757_v39  ;;  %v4481_v62 = vclamps-f32 %v2219_v18, 1.0  ;;  %vm2370_vm0 = vweird.f32 %v7733_v41  ;;  %v4907_v41 = vld [vmem:[#allocation8 + $0x1fc] sm:$0xf]  ;;  %v4757_v18 = vld [vmem:[#allocation8 + $0x204] sm:$0xf0] }
 0x2dc   : > { %v2715_v3 = vmul.f32 3.8918573e-05, %v7410_v12  ;;  %vm2371_vm1 = vweird.f32 %v5098_v16  ;;  %v2494_v45 = vand.u32 2147483647, %v7757_v39  ;;  %5101 = vrcp.f32 %v7762_v21  ;;  %4004 = vmatmul.bf16.gmra.mxu1 %v7617_v34  ;;  %v8786_v34 = vld [vmem:[#allocation91_spill] sm:$0xff] }
 0x2dd   : > { %v2367_v38 = vsub.f32 1.0, %v2366_v63  ;;  %v2946_v4 = vmul.f32 %v7711_v13, %v7653_v46  ;;  %v7774_v55 = vmul.f32 2.1237322e-06, %v7753_v51  ;;  %v3010_v35 = vadd.f32 1.0, %v4481_v62  ;;  %vm7786_vm3 = vmor %vm2370_vm0, %vm2371_vm1 }
 0x2de   : > { %vm7776_vm2 = vcmp.eq.f32.partialorder %v2374_v58, 8.507059e+37  ;;  %v2377_v0 = vor.u32 1.1754944e-38, %v2376_v19  ;;  %v2441_v26 = vmul.f32 %v2440_v49, %v7229_v57  ;;  %v2597_v23 = vmul.f32 %v2596_v14, %v7263_v29  ;;  %v4763_v58 = vld [vmem:[#allocation8 + $0x200] sm:$0xf]  ;;  %v7800_v49 = vpop.f32.mrf.mxu1  ;;  %v7802_v14 = vpop.f32.mrf.mxu2 }
 0x2df   : > { %v2368_v1 = vmul.f32 %v5098_v16, %v2367_v38  ;;  %v3055_v28 = vmul.f32 %v3007_v61, %v8785_v54  ;;  %v3058_v27 = vmul.f32 %v3010_v35, %v8786_v34  ;;  %v2496_v40 = vand.u32 2147483648, %v7757_v39  ;;  %v4909_v38 = vld [vmem:[#allocation8 + $0x208] sm:$0xf0] }
 0x2e0   : > { %v2716_v10 = vadd.f32 0.001143296, %v2715_v3  ;;  %vm7791_vm4 = vcmp.eq.f32.partialorder %v2494_v45, 8.507059e+37  ;;  %v2442_v6 = vadd.f32 0.4994258, %v2441_v26  ;;  %vm2490_vm5 = vweird.f32 %v7757_v39 }
 0x2e1   : > { %v5100_v42 = vpop.eup %5099  ;;  %v2369_v59 = vadd.f32 %v5098_v16, %v2368_v1  ;;  %v2598_v2 = vadd.f32 0.014752088, %v2597_v23  ;;  %v7795_v44 = vpack.c.bf16 %v3058_v27, %v3055_v28  ;;  %v2334_v61 = vand.u32 2147483647, %v7762_v21 }
 0x2e2   : > { %v2486_v33 = vmul.f32 %v5100_v42, %v7757_v39  ;;  %v2717_v19 = vmul.f32 %v2716_v10, %v7410_v12  ;;  %v5102_v63 = vpop.eup %5101  ;;  %v2443_v3 = vmul.f32 %v2442_v6, %v7229_v57  ;;  %v2555_v45 = vmul.f32 3.8918573e-05, %v7330_v25 }
 0x2e3   : > { %v2373_v62 = vsel %vm7786_vm3, %v5098_v16, %v2369_v59  ;;  %3715 = vmatmul.bf16.gmra.mxu3 %v7795_v44  ;;  %vm2491_vm6 = vweird.f32 %v5100_v42  ;;  %v2326_v26 = vmul.f32 %v5102_v63, %v7762_v21  ;;  %v4760_v16 = vor.u32 %v4907_v41, %v4757_v18 }
 0x2e4   : > { %v2378_v35 = vsel %vm7776_vm2, %v2377_v0, %v2373_v62  ;;  %v2487_v1 = vsub.f32 1.0, %v2486_v33  ;;  %v7814_v54 = vadd.f32 1.0, %v2443_v3  ;;  %v4764_v28 = vor.u32 %v4909_v38, %v4763_v58  ;;  %vm7820_vm7 = vmor %vm2490_vm5, %vm2491_vm6 }
 0x2e5   : > { %v2379_v23 = vmul.f32 %v2378_v35, %v7355_v30  ;;  %v2327_v57 = vsub.f32 1.0, %v2326_v26  ;;  %v2599_v27 = vmul.f32 %v2598_v2, %v7263_v29  ;;  %v2718_v13 = vadd.f32 0.014752088, %v2717_v19  ;;  %3862 = vmatmul.bf16.gmra.mxu2 %v7795_v44  ;;  %3885 = vmatpush.bf16.msrb.mxu3 %v4760_v16 }
 0x2e6   : > { %v2488_v34 = vmul.f32 %v5100_v42, %v2487_v1  ;;  %v2497_v0 = vor.u32 1.1754944e-38, %v2496_v40  ;;  %v2336_v30 = vand.u32 2147483648, %v7762_v21  ;;  %5103 = vrcp.f32 %v7814_v54  ;;  %4032 = vmatpush.bf16.msrb.mxu2 %v4764_v28  ;;  %v7836_v26 = vpop.f32.mrf.mxu1 }
 0x2e7   : > { %v4485_v10 = vclamps-f32 %v2379_v23, 1.0  ;;  %v2328_v6 = vmul.f32 %v5102_v63, %v2327_v57  ;;  %vm2331_vm8 = vweird.f32 %v5102_v63  ;;  %v2600_v2 = vadd.f32 0.112945676, %v2599_v27 }
 0x2e8   : > { %v2489_v59 = vadd.f32 %v5100_v42, %v2488_v34  ;;  %v2947_v33 = vadd.f32 0.0036580483, %v2946_v4  ;;  %vm2330_vm9 = vweird.f32 %v7762_v21  ;;  %v2719_v39 = vmul.f32 %v2718_v13, %v7410_v12 }
 0x2e9   : > { %v2556_v41 = vadd.f32 0.001143296, %v2555_v45  ;;  %v2329_v40 = vadd.f32 %v5102_v63, %v2328_v6  ;;  %vm2335_vm10 = vcmp.eq.f32.partialorder %v2334_v61, 8.507059e+37  ;;  %v2601_v58 = vmul.f32 %v2600_v2, %v7263_v29  ;;  %vm2332_vm11 = vmor %vm2330_vm9, %vm2331_vm8  ;;  %v7838_v61 = vpop.f32.mrf.mxu2  ;;  %v4571_v2 = vld [vmem:[#allocation8 + $0x80] sm:$0xf] }
 0x2ea   : > { %v2493_v18 = vsel %vm7820_vm7, %v5100_v42, %v2489_v59  ;;  %v3014_v62 = vadd.f32 1.0, %v4485_v10  ;;  %v2337_v3 = vor.u32 1.1754944e-38, %v2336_v30  ;;  %v2720_v38 = vadd.f32 0.112945676, %v2719_v39 }
 0x2eb   : > { %v2498_v19 = vsel %vm7791_vm4, %v2497_v0, %v2493_v18  ;;  %v2333_v21 = vsel %vm2332_vm11, %v5102_v63, %v2329_v40  ;;  %v2602_v35 = vadd.f32 0.4994258, %v2601_v58  ;;  %v2557_v45 = vmul.f32 %v2556_v41, %v7330_v25 }
 0x2ec   : > { %v2499_v4 = vmul.f32 %v2498_v19, %v7493_v24  ;;  %v5104_v1 = vpop.eup %5103  ;;  %v2948_v42 = vmul.f32 %v2947_v33, %v7653_v46  ;;  %v2338_v23 = vsel %vm2335_vm10, %v2337_v3, %v2333_v21  ;;  %v2721_v31 = vmul.f32 %v2720_v38, %v7410_v12  ;;  %4009 = vmatmul.bf16.gmra.mxu1 %v7795_v44  ;;  %v4861_v33 = vld [vmem:[#allocation8 + $0x88] sm:$0xf0] }
 0x2ed   : > { %v2675_v16 = vmul.f32 3.8918573e-05, %v7418_v7  ;;  %v2339_v24 = vmul.f32 %v2338_v23, %v7490_v11  ;;  %v2446_v63 = vmul.f32 %v5104_v1, %v7814_v54  ;;  %v2454_v34 = vand.u32 2147483647, %v7814_v54 }
 0x2ee   : > { %v4488_v28 = vclamps-f32 %v2499_v4, 1.0  ;;  %v2603_v57 = vmul.f32 %v2602_v35, %v7263_v29  ;;  %v2722_v27 = vadd.f32 0.4994258, %v2721_v31  ;;  %v2558_v13 = vadd.f32 0.014752088, %v2557_v45 }
 0x2ef   : > { %v2676_v10 = vadd.f32 0.001143296, %v2675_v16  ;;  %v3062_v0 = vmul.f32 %v3014_v62, %v7326_v36  ;;  %v4484_v30 = vclamps-f32 %v2339_v24, 1.0  ;;  %v2447_v59 = vsub.f32 1.0, %v2446_v63  ;;  %v7878_v24 = vpop.f32.mrf.mxu1 }
 0x2f0   : > { %v3017_v9 = vadd.f32 1.0, %v4488_v28  ;;  %v2456_v6 = vand.u32 2147483648, %v7814_v54  ;;  %v7849_v44 = vadd.f32 1.0, %v2603_v57  ;;  %v2723_v11 = vmul.f32 %v2722_v27, %v7410_v12 }
 0x2f1   : > { %v2559_v39 = vmul.f32 %v2558_v13, %v7330_v25  ;;  %v2448_v41 = vmul.f32 %v5104_v1, %v2447_v59  ;;  %vm2451_vm12 = vweird.f32 %v5104_v1  ;;  %v4572_v18 = vor.u32 %v4861_v33, %v4571_v2  ;;  %v7870_v21 = vpop.f32.mrf.mxu2 }
 0x2f2   : > { %v3065_v29 = vmul.f32 %v3017_v9, %v7391_v50  ;;  %v7855_v40 = vadd.f32 0.00028619796, %v7774_v55  ;;  %vm2450_vm13 = vweird.f32 %v7814_v54  ;;  %5105 = vrcp.f32 %v7849_v44 }
 0x2f3   : > { %v2677_v36 = vmul.f32 %v2676_v10, %v7418_v7  ;;  %v2449_v12 = vadd.f32 %v5104_v1, %v2448_v41  ;;  %v3013_v19 = vadd.f32 1.0, %v4484_v30  ;;  %v7862_v62 = vadd.f32 1.0, %v2723_v11  ;;  %3934 = vmatpush.bf16.msrb.mxu0 %v4572_v18  ;;  %vm2452_vm14 = vmor %vm2450_vm13, %vm2451_vm12  ;;  %v8793_v18 = vld [vmem:[#allocation97_spill] sm:$0xff] }
 0x2f4   : > { %v7860_v58 = vpack.c.bf16 %v3065_v29, %v3062_v0  ;;  %v7864_v50 = vadd.f32 0.05243302, %v2948_v42  ;;  %v2457_v3 = vor.u32 1.1754944e-38, %v2456_v6  ;;  %v2616_v55 = vand.u32 2147483648, %v7849_v44 }
 0x2f5   : > { %v2560_v38 = vadd.f32 0.112945676, %v2559_v39  ;;  %v2453_v54 = vsel %vm2452_vm14, %v5104_v1, %v2449_v12  ;;  %vm2455_vm15 = vcmp.eq.f32.partialorder %v2454_v34, 8.507059e+37  ;;  %vm2610_vm0 = vweird.f32 %v7849_v44 }
 0x2f6   : > { %3769 = vmatmul.bf16.gmra.mxu0 %v7860_v58  ;;  %5107 = vrcp.f32 %v7862_v62  ;;  %v2458_v4 = vsel %vm2455_vm15, %v2457_v3, %v2453_v54  ;;  %v2614_v35 = vand.u32 2147483647, %v7849_v44  ;;  %v2678_v42 = vadd.f32 0.014752088, %v2677_v36 }
 0x2f7   : > { %v2561_v45 = vmul.f32 %v2560_v38, %v7330_v25  ;;  %v2459_v23 = vmul.f32 %v2458_v4, %v7558_v56  ;;  %v3061_v31 = vmul.f32 %v3013_v19, %v7377_v47  ;;  %v2835_v16 = vmul.f32 3.8918573e-05, %v7467_v22 }
 0x2f8   : > { %v2955_v1 = vmul.f32 3.8918573e-05, %v7653_v46  ;;  %v5106_v28 = vpop.eup %5105  ;;  %v2617_v63 = vor.u32 1.1754944e-38, %v2616_v55  ;;  %vm2730_vm1 = vweird.f32 %v7862_v62  ;;  %v2679_v57 = vmul.f32 %v2678_v42, %v7418_v7 }
 0x2f9   : > { %v2562_v34 = vadd.f32 0.4994258, %v2561_v45  ;;  %v4487_v27 = vclamps-f32 %v2459_v23, 1.0  ;;  %v2606_v13 = vmul.f32 %v5106_v28, %v7849_v44  ;;  %v2734_v56 = vand.u32 2147483647, %v7862_v62 }
 0x2fa   : > { %v2836_v10 = vadd.f32 0.001143296, %v2835_v16  ;;  %v2680_v9 = vadd.f32 0.112945676, %v2679_v57  ;;  %v2956_v0 = vadd.f32 0.001143296, %v2955_v1  ;;  %vm2611_vm2 = vweird.f32 %v5106_v28  ;;  %v7907_v16 = vpop.f32.mrf.mxu2 }
 0x2fb   : > { %v2563_v47 = vmul.f32 %v2562_v34, %v7330_v25  ;;  %v2795_v30 = vmul.f32 3.8918573e-05, %v7572_v5  ;;  %v3016_v6 = vadd.f32 1.0, %v4487_v27  ;;  %v2607_v11 = vsub.f32 1.0, %v2606_v13  ;;  %vm7896_vm3 = vmor %vm2610_vm0, %vm2611_vm2  ;;  %v4559_v13 = vld [vmem:[#allocation8 + $0x68] sm:$0xf] }
 0x2fc   : > { %v5108_v59 = vpop.eup %5107  ;;  %v2837_v2 = vmul.f32 %v2836_v10, %v7467_v22  ;;  %v2736_v39 = vand.u32 2147483648, %v7862_v62  ;;  %v2681_v41 = vmul.f32 %v2680_v9, %v7418_v7  ;;  %v2957_v19 = vmul.f32 %v2956_v0, %v7653_v46  ;;  %v4858_v10 = vld [vmem:[#allocation8 + $0x70] sm:$0xf0]  ;;  %v4904_v0 = vld [vmem:[#allocation8 + $0x1e4] sm:$0xf] }
 0x2fd   : > { %v2726_v33 = vmul.f32 %v5108_v59, %v7862_v62  ;;  %v7889_v29 = vadd.f32 1.0, %v2563_v47  ;;  %v3064_v25 = vmul.f32 %v3016_v6, %v8793_v18  ;;  %v2608_v36 = vmul.f32 %v5106_v28, %v2607_v11  ;;  %v8802_v11 = vld [vmem:[#allocation58_spill] sm:$0xff] }
 0x2fe   : > { %v2838_v12 = vadd.f32 0.014752088, %v2837_v2  ;;  %vm2731_vm4 = vweird.f32 %v5108_v59  ;;  %v2796_v38 = vadd.f32 0.001143296, %v2795_v30  ;;  %vm7901_vm5 = vcmp.eq.f32.partialorder %v2614_v35, 8.507059e+37 }
 0x2ff   : > { %v2727_v55 = vsub.f32 1.0, %v2726_v33  ;;  %5109 = vrcp.f32 %v7889_v29  ;;  %v3094_v54 = vpack.c.bf16 %v3064_v25, %v3061_v31  ;;  %v2609_v4 = vadd.f32 %v5106_v28, %v2608_v36  ;;  %vm7914_vm6 = vmor %vm2730_vm1, %vm2731_vm4  ;;  %v4751_v30 = vld [vmem:[#allocation8 + $0x1e8] sm:$0xf] }
 0x300   : > { %v2682_v42 = vadd.f32 0.4994258, %v2681_v41  ;;  %v2906_v23 = vmul.f32 %v7855_v40, %v7753_v51  ;;  %v2839_v1 = vmul.f32 %v2838_v12, %v7467_v22  ;;  %v2958_v34 = vadd.f32 0.014752088, %v2957_v19  ;;  %v4906_v41 = vld [vmem:[#allocation8 + $0x1f0] sm:$0xf0] }
 0x301   : > { %v2728_v44 = vmul.f32 %v5108_v59, %v2727_v55  ;;  %3720 = vmatmul.bf16.gmra.mxu3 %v3094_v54  ;;  %v2613_v57 = vsel %vm7896_vm3, %v5106_v28, %v2609_v4  ;;  %vm7918_vm7 = vcmp.eq.f32.partialorder %v2734_v56, 8.507059e+37  ;;  %v2737_v40 = vor.u32 1.1754944e-38, %v2736_v39  ;;  %3867 = vmatmul.bf16.gmra.mxu2 %v3094_v54  ;;  %v7925_v28 = vpop.f32.mrf.mxu1  ;;  %v4745_v56 = vld [vmem:[#allocation8 + $0x1ec] sm:$0xf0] }
 0x302   : > { %v2683_v27 = vmul.f32 %v2682_v42, %v7418_v7  ;;  %v2950_v47 = vmul.f32 %v7864_v50, %v7653_v46  ;;  %v2618_v62 = vsel %vm7901_vm5, %v2617_v63, %v2613_v57  ;;  %v2797_v6 = vmul.f32 %v2796_v38, %v7572_v5  ;;  %4014 = vmatmul.bf16.gmra.mxu1 %v3094_v54 }
 0x303   : > { %v2729_v9 = vadd.f32 %v5108_v59, %v2728_v44  ;;  %v2619_v7 = vmul.f32 %v2618_v62, %v8802_v11  ;;  %v4560_v33 = vor.u32 %v4858_v10, %v4559_v13  ;;  %v4748_v39 = vor.u32 %v4904_v0, %v4745_v56  ;;  %v7948_v10 = vpop.f32.mrf.mxu2 }
 0x304   : > { %v7931_v2 = vadd.f32 1.0, %v2683_v27  ;;  %v4752_v25 = vor.u32 %v4906_v41, %v4751_v30  ;;  %v2840_v63 = vadd.f32 0.112945676, %v2839_v1  ;;  %v2959_v36 = vmul.f32 %v2958_v34, %v7653_v46  ;;  %v8803_v27 = vld [vmem:[#allocation80_spill] sm:$0xff] }
 0x305   : > { %v5110_v50 = vpop.eup %5109  ;;  %v2733_v18 = vsel %vm7914_vm6, %v5108_v59, %v2729_v9  ;;  %v2907_v12 = vadd.f32 0.0036580483, %v2906_v23  ;;  %v4491_v19 = vclamps-f32 %v2619_v7, 1.0  ;;  %3935 = vmatpush.bf16.msrb.mxu0 %v4560_v33  ;;  %3886 = vmatpush.bf16.msrb.mxu3 %v4748_v39  ;;  %v2951_v38 = vadd.f32 0.18741608, %v2950_v47 }
 0x306   : > { %v2738_v3 = vsel %vm7918_vm7, %v2737_v40, %v2733_v18  ;;  %v2566_v55 = vmul.f32 %v5110_v50, %v7889_v29  ;;  %5111 = vrcp.f32 %v7931_v2  ;;  %4033 = vmatpush.bf16.msrb.mxu2 %v4752_v25  ;;  %v2915_v59 = vmul.f32 3.8918573e-05, %v7753_v51  ;;  %v4547_v18 = vld [vmem:[#allocation8 + $0x50] sm:$0xf]  ;;  %v4855_v25 = vld [vmem:[#allocation8 + $0x58] sm:$0xf0] }
 0x307   : > { %v2739_v54 = vmul.f32 %v2738_v3, %v7638_v48  ;;  %v3020_v4 = vadd.f32 1.0, %v4491_v19  ;;  %v2576_v42 = vand.u32 2147483648, %v7889_v29  ;;  %v2841_v23 = vmul.f32 %v2840_v63, %v7467_v22 }
 0x308   : > { %v2567_v45 = vsub.f32 1.0, %v2566_v55  ;;  %v2790_v44 = vmul.f32 %v7663_v8, %v7572_v5  ;;  %v2960_v34 = vadd.f32 0.112945676, %v2959_v36  ;;  %v2798_v57 = vadd.f32 0.014752088, %v2797_v6 }
 0x309   : > { %v4494_v1 = vclamps-f32 %v2739_v54, 1.0  ;;  %vm2571_vm8 = vweird.f32 %v5110_v50  ;;  %v2574_v48 = vand.u32 2147483647, %v7889_v29  ;;  %v2842_v31 = vadd.f32 0.4994258, %v2841_v23 }
 0x30a   : > { %v2568_v35 = vmul.f32 %v5110_v50, %v2567_v45  ;;  %v3068_v13 = vmul.f32 %v3020_v4, %v8803_v27  ;;  %v2961_v47 = vmul.f32 %v2960_v34, %v7653_v46  ;;  %v2799_v62 = vmul.f32 %v2798_v57, %v7572_v5 }
 0x30b   : > { %v3023_v40 = vadd.f32 1.0, %v4494_v1  ;;  %vm2570_vm9 = vweird.f32 %v7889_v29  ;;  %v2577_v8 = vor.u32 1.1754944e-38, %v2576_v42  ;;  %v2843_v0 = vmul.f32 %v2842_v31, %v7467_v22 }
 0x30c   : > { %v2569_v9 = vadd.f32 %v5110_v50, %v2568_v35  ;;  %v5112_v56 = vpop.eup %5111  ;;  %vm2572_vm10 = vmor %vm2570_vm9, %vm2571_vm8  ;;  %v2962_v6 = vadd.f32 0.4994258, %v2961_v47  ;;  %v2800_v11 = vadd.f32 0.112945676, %v2799_v62  ;;  %v2916_v7 = vadd.f32 0.001143296, %v2915_v59 }
 0x30d   : > { %v3071_v30 = vmul.f32 %v3023_v40, %v7632_v60  ;;  %vm2575_vm11 = vcmp.eq.f32.partialorder %v2574_v48, 8.507059e+37  ;;  %v2686_v39 = vmul.f32 %v5112_v56, %v7931_v2  ;;  %v7956_v41 = vadd.f32 1.0, %v2843_v0  ;;  %v8806_v35 = vld [vmem:[#allocation79_spill] sm:$0xff]  ;;  %v7982_v40 = vpop.f32.mrf.mxu2 }
 0x30e   : > { %v2573_v33 = vsel %vm2572_vm10, %v5110_v50, %v2569_v9  ;;  %v2908_v29 = vmul.f32 %v2907_v12, %v7753_v51  ;;  %v2963_v36 = vmul.f32 %v2962_v6, %v7653_v46  ;;  %v2952_v60 = vmul.f32 %v2951_v38, %v7653_v46  ;;  %v8804_v46 = vld [vmem:[#allocation82_spill] sm:$0xff] }
 0x30f   : > { %v7959_v63 = vpack.c.bf16 %v3071_v30, %v3068_v13  ;;  %v2578_v22 = vsel %vm2575_vm11, %v2577_v8, %v2573_v33  ;;  %v2687_v3 = vsub.f32 1.0, %v2686_v39  ;;  %5113 = vrcp.f32 %v7956_v41  ;;  %v7992_v39 = vpop.f32.mrf.mxu1 }
 0x310   : > { %v2579_v19 = vmul.f32 %v2578_v22, %v7629_v37  ;;  %v2694_v50 = vand.u32 2147483647, %v7931_v2  ;;  %v2696_v55 = vand.u32 2147483648, %v7931_v2  ;;  %v2964_v54 = vadd.f32 1.0, %v2963_v36  ;;  %v8805_v37 = vld [vmem:[#allocation96_spill] sm:$0xff] }
 0x311   : > { %3774 = vmatmul.bf16.gmra.mxu0 %v7959_v63  ;;  %v4548_v12 = vor.u32 %v4855_v25, %v4547_v18  ;;  %v2688_v59 = vmul.f32 %v5112_v56, %v2687_v3  ;;  %vm2691_vm12 = vweird.f32 %v5112_v56  ;;  %v2801_v4 = vmul.f32 %v2800_v11, %v7572_v5 }
 0x312   : > { %v2917_v45 = vmul.f32 %v2916_v7, %v7753_v51  ;;  %v1006_v38 = vmul.f32 0.5, %v8804_v46  ;;  %v2674_v42 = vmul.f32 %v7646_v43, %v8805_v37  ;;  %v7973_v23 = vadd.f32 0.18741608, %v2790_v44 }
 0x313   : > { %5115 = vrcp.f32 %v2964_v54  ;;  %3936 = vmatpush.bf16.msrb.mxu0 %v4548_v12  ;;  %v7975_v1 = vadd.f32 0.05243302, %v2908_v29  ;;  %v4490_v34 = vclamps-f32 %v2579_v19, 1.0  ;;  %v2689_v57 = vadd.f32 %v5112_v56, %v2688_v59 }
 0x314   : > { %vm2690_vm13 = vweird.f32 %v7931_v2  ;;  %v7980_v48 = vmul.f32 %v7648_v15, %v8806_v35  ;;  %v2697_v31 = vor.u32 1.1754944e-38, %v2696_v55  ;;  %v2802_v27 = vadd.f32 0.4994258, %v2801_v4 }
 0x315   : > { %vm2692_vm14 = vmor %vm2690_vm13, %vm2691_vm12  ;;  %v2918_v43 = vadd.f32 0.014752088, %v2917_v45  ;;  %v5114_v44 = vpop.eup %5113  ;;  %v2953_v13 = vadd.f32 1.1283791, %v2952_v60  ;;  %vm2695_vm15 = vcmp.eq.f32.partialorder %v2694_v50, 8.507059e+37  ;;  %vm2850_vm0 = vweird.f32 %v7956_v41 }
 0x316   : > { %v2693_v47 = vsel %vm2692_vm14, %v5112_v56, %v2689_v57  ;;  %v2846_v9 = vmul.f32 %v5114_v44, %v7956_v41  ;;  %v2854_v2 = vand.u32 2147483647, %v7956_v41  ;;  %v2803_v15 = vmul.f32 %v2802_v27, %v7572_v5  ;;  %v4733_v27 = vld [vmem:[#allocation8 + $0x1d4] sm:$0xf0] }
 0x317   : > { %v2698_v62 = vsel %vm2695_vm15, %v2697_v31, %v2693_v47  ;;  %v3019_v0 = vadd.f32 1.0, %v4490_v34  ;;  %v2856_v30 = vand.u32 2147483648, %v7956_v41  ;;  %v2919_v6 = vmul.f32 %v2918_v43, %v7753_v51  ;;  %v8010_v41 = vld [vmem:[%s8374_s4] sm:$0x7]  ;;  %v4901_v31 = vld [vmem:[#allocation8 + $0x1cc] sm:$0xf]  ;;  %v8020_v47 = vpop.f32.mrf.mxu2 }
 0x318   : > { %v2699_v8 = vmul.f32 %v2698_v62, %v2674_v42  ;;  %v2847_v7 = vsub.f32 1.0, %v2846_v9  ;;  %vm2851_vm1 = vweird.f32 %v5114_v44  ;;  %v2974_v56 = vand.u32 2147483647, %v2964_v54  ;;  %v4535_v43 = vld [vmem:[#allocation8 + $0x38] sm:$0xf] }
 0x319   : > { %v5116_v11 = vpop.eup %5115  ;;  %v7990_v33 = vadd.f32 1.0, %v2803_v15  ;;  %v2976_v29 = vand.u32 2147483648, %v2964_v54  ;;  %v2920_v22 = vadd.f32 0.112945676, %v2919_v6  ;;  %vm2970_vm2 = vweird.f32 %v2964_v54  ;;  %vm7997_vm4 = vmor %vm2850_vm0, %vm2851_vm1  ;;  %v4898_v15 = vld [vmem:[#allocation8 + $0x1b4] sm:$0xf] }
 0x31a   : > { %v4493_v18 = vclamps-f32 %v2699_v8, 1.0  ;;  %v2966_v25 = vmul.f32 %v5116_v11, %v2964_v54  ;;  %v2848_v36 = vmul.f32 %v5114_v44, %v2847_v7  ;;  %vm2971_vm3 = vweird.f32 %v5116_v11  ;;  %v4721_v8 = vld [vmem:[#allocation8 + $0x1bc] sm:$0xf0]  ;;  %v4849_v7 = vld [vmem:[#allocation8 + $0x28] sm:$0xf0] }
 0x31b   : > { %5117 = vrcp.f32 %v7990_v33  ;;  %v2857_v3 = vor.u32 1.1754944e-38, %v2856_v30  ;;  %v2921_v55 = vmul.f32 %v2920_v22, %v7753_v51  ;;  %v3067_v12 = vmul.f32 %v3019_v0, %v7604_v53  ;;  %vm8013_vm7 = vmor %vm2970_vm2, %vm2971_vm3  ;;  %v4523_v6 = vld [vmem:[#allocation8 + $0x20] sm:$0xf]  ;;  %v4895_v22 = vld [vmem:[#allocation8 + $0x19c] sm:$0xf] }
 0x31c   : > { %v3022_v60 = vadd.f32 1.0, %v4493_v18  ;;  %v2967_v50 = vsub.f32 1.0, %v2966_v25  ;;  %v2849_v59 = vadd.f32 %v5114_v44, %v2848_v36  ;;  %vm2855_vm5 = vcmp.eq.f32.partialorder %v2854_v2, 8.507059e+37  ;;  %v4852_v2 = vld [vmem:[#allocation8 + $0x40] sm:$0xf0] }
 0x31d   : > { %vm8003_vm6 = vcmp.eq.f32.partialorder %v2974_v56, 8.507059e+37  ;;  %v2977_v34 = vor.u32 1.1754944e-38, %v2976_v29  ;;  %v2922_v53 = vadd.f32 0.4994258, %v2921_v55  ;;  %v2954_v57 = vmul.f32 %v2953_v13, %v7613_v52  ;;  %v4846_v55 = vld [vmem:[#allocation8 + $0x10] sm:$0xf0] }
 0x31e   : > { %v3070_v45 = vmul.f32 %v3022_v60, %v1006_v38  ;;  %v2968_v37 = vmul.f32 %v5116_v11, %v2967_v50  ;;  %v2853_v35 = vsel %vm7997_vm4, %v5114_v44, %v2849_v59  ;;  %v2910_v52 = vmul.f32 %v7975_v1, %v7753_v51  ;;  %v4709_v1 = vld [vmem:[#allocation8 + $0x1a4] sm:$0xf0]  ;;  %v8041_v59 = vpop.f32.mrf.mxu1  ;;  %v4739_v42 = vld [vmem:[#allocation8 + $0x1d0] sm:$0xf] }
 0x31f   : > { %v2858_v38 = vsel %vm2855_vm5, %v2857_v3, %v2853_v35  ;;  %v2923_v54 = vmul.f32 %v2922_v53, %v7753_v51  ;;  %v4736_v13 = vor.u32 %v4901_v31, %v4733_v27  ;;  %v4536_v30 = vor.u32 %v4852_v2, %v4535_v43  ;;  %v4511_v50 = vld [vmem:[#allocation8 + $0x8] sm:$0xf]  ;;  %v4903_v53 = vld [vmem:[#allocation8 + $0x1d8] sm:$0xf0]  ;;  %v3745_v27 = vpop.f32.mrf.mxu0 }
 0x320   : > { %v3097_v62 = vpack.c.bf16 %v3070_v45, %v3067_v12  ;;  %v2969_v9 = vadd.f32 %v5116_v11, %v2968_v37  ;;  %v2859_v44 = vmul.f32 %v2858_v38, %v7980_v48  ;;  %v8029_v56 = vperm.slane %v8010_v41, 0  ;;  %v8813_v48 = vld [vmem:[#allocation75_spill] sm:$0xff] }
 0x321   : > { %v8023_v0 = vpop.eup %5117  ;;  %v8035_v29 = vadd.f32 1.0, %v2923_v54  ;;  %v1010_v36 = vmul.f32 0.5, %v8813_v48  ;;  %3887 = vmatpush.bf16.msrb.mxu3 %v4736_v13  ;;  %3937 = vmatpush.bf16.msrb.mxu0 %v4536_v30  ;;  %v4724_v3 = vor.u32 %v4898_v15, %v4721_v8  ;;  %v2792_v4 = vmul.f32 %v7973_v23, %v7572_v5  ;;  %v8050_v15 = vpop.f32.mrf.mxu2 }
 0x322   : > { %3725 = vmatmul.bf16.gmra.mxu3 %v3097_v62  ;;  %v2973_v18 = vsel %vm8013_vm7, %v5116_v11, %v2969_v9  ;;  %v2806_v25 = vmul.f32 %v8023_v0, %v7990_v33  ;;  %3872 = vmatmul.bf16.gmra.mxu2 %v3097_v62  ;;  %v4497_v60 = vclamps-f32 %v2859_v44, 1.0  ;;  %v8814_v11 = vld [vmem:[#allocation83_spill] sm:$0xff]  ;;  %v4524_v31 = vor.u32 %v4849_v7, %v4523_v6  ;;  %v4697_v44 = vld [vmem:[#allocation8 + $0x18c] sm:$0xf0] }
 0x323   : > { %v2978_v19 = vsel %vm8003_vm6, %v2977_v34, %v2973_v18  ;;  %v1013_v12 = vmul.f32 0.5, %v8814_v11  ;;  %5119 = vrcp.f32 %v8035_v29  ;;  %4019 = vmatmul.bf16.gmra.mxu1 %v3097_v62  ;;  %v2911_v34 = vadd.f32 0.18741608, %v2910_v52  ;;  %v4892_v52 = vld [vmem:[#allocation8 + $0x184] sm:$0xf] }
 0x324   : > { %v2979_v45 = vmul.f32 %v2978_v19, %v2954_v57  ;;  %v2807_v37 = vsub.f32 1.0, %v2806_v25  ;;  %v3026_v35 = vadd.f32 1.0, %v4497_v60  ;;  %vm2811_vm8 = vweird.f32 %v8023_v0 }
 0x325   : > { %v2816_v57 = vand.u32 2147483648, %v7990_v33  ;;  %v2814_v9 = vand.u32 2147483647, %v7990_v33  ;;  %3888 = vmatpush.bf16.msrb.mxu3 %v4724_v3  ;;  %3938 = vmatpush.bf16.msrb.mxu0 %v4524_v31  ;;  %v4712_v54 = vor.u32 %v4895_v22, %v4709_v1  ;;  %v4512_v62 = vor.u32 %v4846_v55, %v4511_v50  ;;  %v8815_v1 = vld [vmem:[#allocation20_spill] sm:$0xff] }
 0x326   : > { %v4500_v43 = vclamps-f32 %v2979_v45, 1.0  ;;  %v2808_v38 = vmul.f32 %v8023_v0, %v2807_v37  ;;  %v4740_v2 = vor.u32 %v4903_v53, %v4739_v42  ;;  %v3074_v23 = vmul.f32 %v3026_v35, %v1010_v36  ;;  %v8816_v3 = vld [vmem:[#allocation56_spill] sm:$0xff]  ;;  %v3696_v35 = vpop.f32.mrf.mxu3 }
 0x327   : > { %vm2810_vm9 = vweird.f32 %v7990_v33  ;;  %v2793_v13 = vadd.f32 1.1283791, %v2792_v4  ;;  %v2912_v6 = vmul.f32 %v2911_v34, %v7753_v51  ;;  %v2817_v25 = vor.u32 1.1754944e-38, %v2816_v57  ;;  %v3747_v53 = vpop.f32.mrf.mxu0  ;;  %v4727_v4 = vld [vmem:[#allocation8 + $0x1b8] sm:$0xf] }
 0x328   : > { %v3029_v5 = vadd.f32 1.0, %v4500_v43  ;;  %v2809_v8 = vadd.f32 %v8023_v0, %v2808_v38  ;;  %vm2812_vm10 = vmor %vm2810_vm9, %vm2811_vm8  ;;  %4034 = vmatpush.bf16.msrb.mxu2 %v4740_v2  ;;  %vm2815_vm11 = vcmp.eq.f32.partialorder %v2814_v9, 8.507059e+37  ;;  %v4700_v33 = vor.u32 %v4892_v52, %v4697_v44  ;;  %v4900_v34 = vld [vmem:[#allocation8 + $0x1c0] sm:$0xf0]  ;;  %v8075_v52 = vpop.f32.mrf.mxu1 }
 0x329   : > { %v5120_v30 = vpop.eup %5119  ;;  %3889 = vmatpush.bf16.msrb.mxu3 %v4712_v54  ;;  %3939 = vmatpush.bf16.msrb.mxu0 %v4512_v62  ;;  %v3206_v36 = vadd.f32 %v8029_v56, %v8815_v1  ;;  %v2794_v50 = vmul.f32 %v2793_v13, %v8816_v3  ;;  %v2913_v55 = vadd.f32 1.1283791, %v2912_v6  ;;  %v2934_v42 = vand.u32 2147483647, %v8035_v29  ;;  %v8069_v31 = vpop.f32.mrf.mxu2 }
 0x32a   : > { %v3077_v7 = vmul.f32 %v3029_v5, %v1013_v12  ;;  %v2813_v18 = vsel %vm2812_vm10, %v8023_v0, %v2809_v8  ;;  %v2926_v22 = vmul.f32 %v5120_v30, %v8035_v29  ;;  %v2936_v12 = vand.u32 2147483648, %v8035_v29 }
 0x32b   : > { %v2818_v19 = vsel %vm2815_vm11, %v2817_v25, %v2813_v18  ;;  %v3648_v0 = vadd.f32 %v7755_v20, %v3206_v36  ;;  %vm2931_vm12 = vweird.f32 %v5120_v30  ;;  %v4728_v43 = vor.u32 %v4900_v34, %v4727_v4  ;;  %v8819_v25 = vld [vmem:[#allocation42_spill] sm:$0xff] }
 0x32c   : > { %v8061_v60 = vpack.c.bf16 %v3077_v7, %v3074_v23  ;;  %v2927_v51 = vsub.f32 1.0, %v2926_v22  ;;  %v2819_v45 = vmul.f32 %v2818_v19, %v2794_v50  ;;  %vm2930_vm13 = vweird.f32 %v8035_v29  ;;  %v8817_v23 = vld [vmem:[#allocation22_spill] sm:$0xff]  ;;  %v8820_v50 = vld [vmem:[#allocation25_spill] sm:$0xff] }
 0x32d   : > { %3890 = vmatpush.bf16.msrb.mxu3 %v4700_v33  ;;  %v3697_v20 = vadd.f32 %v3696_v35, %v3648_v0  ;;  %v2914_v57 = vmul.f32 %v2913_v55, %v7659_v17  ;;  %vm2932_vm14 = vmor %vm2930_vm13, %vm2931_vm12  ;;  %v2937_v9 = vor.u32 1.1754944e-38, %v2936_v12  ;;  %4035 = vmatpush.bf16.msrb.mxu2 %v4728_v43  ;;  %vm2935_vm15 = vcmp.eq.f32.partialorder %v2934_v42, 8.507059e+37  ;;  %v4897_v42 = vld [vmem:[#allocation8 + $0x1a8] sm:$0xf0] }
 0x32e   : > { %3779 = vmatmul.bf16.gmra.mxu0 %v8061_v60  ;;  %v2928_v37 = vmul.f32 %v5120_v30, %v2927_v51  ;;  %v4496_v54 = vclamps-f32 %v2819_v45, 1.0  ;;  %v3209_v8 = vadd.f32 %v8029_v56, %v8817_v23  ;;  %v1012_v22 = vmul.f32 0.5, %v8819_v25 }
 0x32f   : > { %v3746_v2 = vadd.f32 %v3745_v27, %v3697_v20  ;;  %v3750_v6 = vpop.f32.mrf.mxu0  ;;  %v8818_v27 = vld [vmem:[#allocation35_spill] sm:$0xff]  ;;  %v3212_v51 = vadd.f32 %v8029_v56, %v8820_v50 }
 0x330   : > { %v2929_v38 = vadd.f32 %v5120_v30, %v2928_v37  ;;  %v3650_v17 = vadd.f32 %v7802_v14, %v3209_v8  ;;  %v3025_v13 = vadd.f32 1.0, %v4496_v54  ;;  %v1009_v18 = vmul.f32 0.5, %v8818_v27  ;;  %v8821_v14 = vld [vmem:[#allocation50_spill] sm:$0xff]  ;;  %v8090_v12 = vpop.f32.mrf.mxu1  ;;  %v4715_v37 = vld [vmem:[#allocation8 + $0x1a0] sm:$0xf]  ;;  %v8824_v8 = vld [vmem:[#allocation37_spill] sm:$0xff] }
 0x331   : > { %4079 = vst [vmem:[%s8077_s16] sm:$0xff] %v3746_v2  ;;  %v8081_v7 = vpop.f32.mrf.mxu2  ;;  %v3653_v0 = vadd.f32 %v7838_v61, %v3212_v51  ;;  %v4716_v34 = vor.u32 %v4897_v42, %v4715_v37  ;;  %v8829_v42 = vld [vmem:[#allocation29_spill] sm:$0xff] }
 0x332   : > { %v2933_v62 = vsel %vm2932_vm14, %v5120_v30, %v2929_v38  ;;  %v3698_v30 = vpop.f32.mrf.mxu3  ;;  %v3073_v36 = vmul.f32 %v3025_v13, %v1009_v18  ;;  %v8822_v38 = vld [vmem:[#allocation32_spill] sm:$0xff]  ;;  %v4894_v13 = vld [vmem:[#allocation8 + $0x190] sm:$0xf0] }
 0x333   : > { %v2938_v5 = vsel %vm2935_vm15, %v2937_v9, %v2933_v62  ;;  %v3699_v1 = vadd.f32 %v3698_v30, %v3650_v17  ;;  %4036 = vmatpush.bf16.msrb.mxu2 %v4716_v34  ;;  %v3215_v20 = vadd.f32 %v8029_v56, %v8822_v38  ;;  %v8825_v17 = vld [vmem:[#allocation70_spill] sm:$0xff]  ;;  %v8830_v38 = vld [vmem:[#allocation44_spill] sm:$0xff] }
 0x334   : > { %v2939_v44 = vmul.f32 %v2938_v5, %v2914_v57  ;;  %v8823_v5 = vld [vmem:[#allocation15_spill] sm:$0xff] }
 0x335   : > { %v3748_v3 = vadd.f32 %v3747_v53, %v3699_v1  ;;  %v3655_v61 = vadd.f32 %v7870_v21, %v3215_v20  ;;  %v3218_v23 = vadd.f32 %v8029_v56, %v8823_v5  ;;  %v8826_v1 = vld [vmem:[#allocation16_spill] sm:$0xff] }
 0x336   : > { %v4499_v29 = vclamps-f32 %v2939_v44, 1.0 }
 0x337   : > { %4082 = vst [vmem:[%s8077_s16 + $0x18] sm:$0xff] %v3748_v3  ;;  %v3752_v45 = vpop.f32.mrf.mxu0  ;;  %v3658_v44 = vadd.f32 %v7907_v16, %v3218_v23 }
 0x338   : > { %v3028_v33 = vadd.f32 1.0, %v4499_v29  ;;  %v4703_v29 = vld [vmem:[#allocation8 + $0x188] sm:$0xf] }
 0x339   : > { %v8092_v53 = vpop.f32.mrf.mxu2  ;;  %v4704_v30 = vor.u32 %v4894_v13, %v4703_v29  ;;  %v8833_v13 = vld [vmem:[#allocation19_spill] sm:$0xff] }
 0x33a   : > { %v3076_v19 = vmul.f32 %v3028_v33, %v1012_v22  ;;  %v3701_v4 = vpop.f32.mrf.mxu3 }
 0x33b   : > { %v3702_v35 = vadd.f32 %v3701_v4, %v3653_v0  ;;  %4037 = vmatpush.bf16.msrb.mxu2 %v4704_v30  ;;  %v8834_v30 = vld [vmem:[#allocation76_spill] sm:$0xff] }
 0x33c   : > { %v3100_v55 = vpack.c.bf16 %v3076_v19, %v3073_v36  ;;  %v3221_v36 = vadd.f32 %v8029_v56, %v8826_v1 }
 0x33d   : > { %v3751_v43 = vadd.f32 %v3750_v6, %v3702_v35 }
 0x33e   : > { %3940 = vmatmul.bf16.vlgmr.msrb.gmra.mxu0 %v8821_v14  ;;  %3730 = vmatmul.bf16.gmra.mxu3 %v3100_v55  ;;  %v3660_v16 = vadd.f32 %v7948_v10, %v3221_v36  ;;  %v8827_v14 = vld [vmem:[#allocation17_spill] sm:$0xff]  ;;  %v8124_v10 = vperm.slane %v8010_v41, 1 }
 0x33f   : > { %3877 = vmatmul.bf16.gmra.mxu2 %v3100_v55  ;;  %4024 = vmatmul.bf16.gmra.mxu1 %v3100_v55  ;;  %4085 = vst [vmem:[%s8077_s16 + $0x30] sm:$0xff] %v3751_v43  ;;  %v3755_v57 = vpop.f32.mrf.mxu0  ;;  %v3224_v0 = vadd.f32 %v8029_v56, %v8827_v14 }
 0x340   : > { %v3207_v20 = vadd.f32 %v8124_v10, %v8830_v38 }
 0x341   : > { %v8098_v54 = vpop.f32.mrf.mxu2  ;;  %v3663_v37 = vadd.f32 %v7982_v40, %v3224_v0 }
 0x342   : > { %v3703_v9 = vpop.f32.mrf.mxu3  ;;  %v3795_v40 = vadd.f32 %v7800_v49, %v3207_v20  ;;  %v8839_v20 = vld [vmem:[#allocation33_spill] sm:$0xff] }
 0x343   : > { %v3704_v62 = vadd.f32 %v3703_v9, %v3655_v61  ;;  %v8831_v61 = vld [vmem:[#allocation18_spill] sm:$0xff] }
 0x345   : > { %v3753_v2 = vadd.f32 %v3752_v45, %v3704_v62  ;;  %v8828_v45 = vld [vmem:[#allocation23_spill] sm:$0xff] }
 0x347   : > { %4088 = vst [vmem:[%s8077_s16 + $0x48] sm:$0xff] %v3753_v2  ;;  %v3757_v18 = vpop.f32.mrf.mxu0 }
 0x349   : > { %v8106_v6 = vpop.f32.mrf.mxu2 }
 0x34a   : > { %v3706_v21 = vpop.f32.mrf.mxu3 }
 0x34b   : > { %v3707_v22 = vadd.f32 %v3706_v21, %v3658_v44  ;;  %v3230_v21 = vadd.f32 %v8029_v56, %v8833_v13 }
 0x34d   : > { %v3756_v33 = vadd.f32 %v3755_v57, %v3707_v22  ;;  %v3227_v57 = vadd.f32 %v8029_v56, %v8831_v61 }
 0x34e   : > { %3945 = vmatmul.bf16.gmra.mxu0 %v8824_v8  ;;  %3891 = vmatmul.bf16.vlgmr.msrb.gmra.mxu3 %v8825_v17 }
 0x34f   : > { %4091 = vst [vmem:[%s8077_s16 + $0x60] sm:$0xff] %v3756_v33  ;;  %4038 = vmatmul.bf16.vlgmr.msrb.gmra.mxu2 %v8825_v17  ;;  %v3760_v51 = vpop.f32.mrf.mxu0  ;;  %v3665_v62 = vadd.f32 %v8020_v47, %v3227_v57  ;;  %v8832_v17 = vld [vmem:[#allocation53_spill] sm:$0xff]  ;;  %v3668_v47 = vadd.f32 %v8050_v15, %v3230_v21  ;;  %v3814_v57 = vpop.f32.mrf.mxu1 }
 0x350   : > { %v3210_v29 = vadd.f32 %v8124_v10, %v8832_v17 }
 0x351   : > { %v8113_v3 = vpop.f32.mrf.mxu2 }
 0x352   : > { %v3708_v19 = vpop.f32.mrf.mxu3  ;;  %v3797_v49 = vadd.f32 %v7836_v26, %v3210_v29 }
 0x353   : > { %v3709_v50 = vadd.f32 %v3708_v19, %v3660_v16 }
 0x355   : > { %v3758_v55 = vadd.f32 %v3757_v18, %v3709_v50  ;;  %v8835_v18 = vld [vmem:[#allocation72_spill] sm:$0xff]  ;;  %v8836_v50 = vld [vmem:[#allocation21_spill] sm:$0xff] }
 0x357   : > { %4094 = vst [vmem:[%s8077_s16 + $0x78] sm:$0xff] %v3758_v55  ;;  %v3762_v9 = vpop.f32.mrf.mxu0  ;;  %v8837_v55 = vld [vmem:[#allocation26_spill] sm:$0xff] }
 0x358   : > { %v3233_v14 = vadd.f32 %v8029_v56, %v8837_v55 }
 0x359   : > { %v8121_v34 = vpop.f32.mrf.mxu2 }
 0x35a   : > { %v3711_v4 = vpop.f32.mrf.mxu3  ;;  %v3670_v15 = vadd.f32 %v8069_v31, %v3233_v14 }
 0x35b   : > { %v3712_v35 = vadd.f32 %v3711_v4, %v3663_v37 }
 0x35d   : > { %v3761_v43 = vadd.f32 %v3760_v51, %v3712_v35  ;;  %v3213_v51 = vadd.f32 %v8124_v10, %v8836_v50 }
 0x35e   : > { %3950 = vmatmul.bf16.gmra.mxu0 %v8828_v45  ;;  %3896 = vmatmul.bf16.gmra.mxu3 %v8829_v42 }
 0x35f   : > { %4097 = vst [vmem:[%s8077_s16 + $0x90] sm:$0xff] %v3761_v43  ;;  %4043 = vmatmul.bf16.gmra.mxu2 %v8829_v42  ;;  %v3765_v22 = vpop.f32.mrf.mxu0  ;;  %v3800_v26 = vadd.f32 %v7878_v24, %v3213_v51  ;;  %v8838_v43 = vld [vmem:[#allocation62_spill] sm:$0xff] }
 0x360   : > { %v3216_v38 = vadd.f32 %v8124_v10, %v8838_v43  ;;  %v8848_v43 = vld [vmem:[#allocation28_spill] sm:$0xff] }
 0x361   : > { %v3843_v5 = vpop.f32.mrf.mxu2 }
 0x362   : > { %v3713_v2 = vpop.f32.mrf.mxu3  ;;  %v8134_v8 = vadd.f32 %v3843_v5, %v3795_v40  ;;  %v3802_v61 = vadd.f32 %v7925_v28, %v3216_v38  ;;  %v8841_v40 = vld [vmem:[#allocation24_spill] sm:$0xff]  ;;  %v8842_v5 = vld [vmem:[#allocation27_spill] sm:$0xff]  ;;  %v3242_v38 = vadd.f32 %v8029_v56, %v8848_v43 }
 0x363   : > { %v3714_v23 = vadd.f32 %v3713_v2, %v3665_v62  ;;  %v3236_v62 = vadd.f32 %v8029_v56, %v8841_v40  ;;  %v8856_v43 = vld [vmem:[#allocation47_spill] sm:$0xff] }
 0x365   : > { %v3763_v44 = vadd.f32 %v3762_v9, %v3714_v23  ;;  %v8840_v9 = vld [vmem:[#allocation49_spill] sm:$0xff]  ;;  %v3673_v2 = vadd.f32 %v8081_v7, %v3236_v62  ;;  %v3219_v23 = vadd.f32 %v8124_v10, %v8842_v5 }
 0x367   : > { %4100 = vst [vmem:[%s8077_s16 + $0xa8] sm:$0xff] %v3763_v44  ;;  %v3767_v4 = vpop.f32.mrf.mxu0  ;;  %v3805_v29 = vadd.f32 %v7992_v39, %v3219_v23  ;;  %v8850_v23 = vld [vmem:[#allocation41_spill] sm:$0xff] }
 0x369   : > { %v3845_v1 = vpop.f32.mrf.mxu2 }
 0x36a   : > { %v3716_v33 = vpop.f32.mrf.mxu3  ;;  %v8145_v16 = vadd.f32 %v3845_v1, %v3797_v49 }
 0x36b   : > { %v3717_v36 = vadd.f32 %v3716_v33, %v3668_v47  ;;  %v8843_v47 = vld [vmem:[#allocation38_spill] sm:$0xff] }
 0x36d   : > { %v3766_v19 = vadd.f32 %v3765_v22, %v3717_v36  ;;  %v8844_v22 = vld [vmem:[#allocation65_spill] sm:$0xff]  ;;  %v8845_v36 = vld [vmem:[#allocation46_spill] sm:$0xff] }
 0x36e   : > { %3955 = vmatmul.bf16.gmra.mxu0 %v8834_v30  ;;  %3901 = vmatmul.bf16.gmra.mxu3 %v8835_v18  ;;  %v3816_v30 = vpop.f32.mrf.mxu1  ;;  %v3222_v33 = vadd.f32 %v8124_v10, %v8844_v22 }
 0x36f   : > { %4103 = vst [vmem:[%s8077_s16 + $0xc0] sm:$0xff] %v3766_v19  ;;  %4048 = vmatmul.bf16.gmra.mxu2 %v8835_v18  ;;  %v3239_v18 = vadd.f32 %v8029_v56, %v8843_v47 }
 0x370   : > { %v3807_v39 = vadd.f32 %v8041_v59, %v3222_v33  ;;  %v8853_v33 = vld [vmem:[#allocation89_spill] sm:$0xff] }
 0x371   : > { %v3848_v45 = vpop.f32.mrf.mxu2  ;;  %v3675_v7 = vadd.f32 %v8092_v53, %v3239_v18 }
 0x372   : > { %v3718_v0 = vpop.f32.mrf.mxu3  ;;  %v8155_v42 = vadd.f32 %v3848_v45, %v3800_v26 }
 0x373   : > { %v3719_v37 = vadd.f32 %v3718_v0, %v3670_v15  ;;  %v3770_v44 = vpop.f32.mrf.mxu0  ;;  %v8846_v15 = vld [vmem:[#allocation36_spill] sm:$0xff] }
 0x374   : > { %v3225_v53 = vadd.f32 %v8124_v10, %v8846_v15  ;;  %v8855_v15 = vld [vmem:[#allocation34_spill] sm:$0xff] }
 0x375   : > { %v3768_v35 = vadd.f32 %v3767_v4, %v3719_v37  ;;  %v8847_v4 = vld [vmem:[#allocation51_spill] sm:$0xff] }
 0x376   : > { %v3819_v26 = vpop.f32.mrf.mxu1  ;;  %v3810_v0 = vadd.f32 %v8075_v52, %v3225_v53  ;;  %v3248_v53 = vadd.f32 %v8029_v56, %v8855_v15 }
 0x377   : > { %4106 = vst [vmem:[%s8077_s16 + $0xd8] sm:$0xff] %v3768_v35 }
 0x379   : > { %v3850_v24 = vpop.f32.mrf.mxu2 }
 0x37a   : > { %v8163_v31 = vadd.f32 %v3850_v24, %v3802_v61 }
 0x37b   : > { %v3772_v50 = vpop.f32.mrf.mxu0 }
 0x37e   : > { %3960 = vmatmul.bf16.gmra.mxu0 %v8839_v20  ;;  %3906 = vmatmul.bf16.gmra.mxu3 %v8840_v9  ;;  %v3821_v59 = vpop.f32.mrf.mxu1  ;;  %v8849_v20 = vld [vmem:[#allocation74_spill] sm:$0xff] }
 0x37f   : > { %4053 = vmatmul.bf16.gmra.mxu2 %v8840_v9  ;;  %v3228_v61 = vadd.f32 %v8124_v10, %v8849_v20 }
 0x381   : > { %v3853_v21 = vpop.f32.mrf.mxu2  ;;  %v3812_v52 = vadd.f32 %v8090_v12, %v3228_v61 }
 0x382   : > { %v8172_v49 = vadd.f32 %v3853_v21, %v3805_v29  ;;  %v8852_v21 = vld [vmem:[#allocation43_spill] sm:$0xff] }
 0x384   : > { %v3721_v17 = vpop.f32.mrf.mxu3 }
 0x385   : > { %v3722_v28 = vadd.f32 %v3721_v17, %v3673_v2 }
 0x386   : > { %v3824_v40 = vpop.f32.mrf.mxu1 }
 0x387   : > { %v3771_v13 = vadd.f32 %v3770_v44, %v3722_v28  ;;  %v3245_v44 = vadd.f32 %v8029_v56, %v8850_v23  ;;  %v8851_v28 = vld [vmem:[#allocation88_spill] sm:$0xff] }
 0x389   : > { %4109 = vst [vmem:[%s8077_s16 + $0xf0] sm:$0xff] %v3771_v13  ;;  %v3855_v55 = vpop.f32.mrf.mxu2  ;;  %v3680_v29 = vadd.f32 %v8106_v6, %v3245_v44  ;;  %v8858_v44 = vld [vmem:[#allocation94_spill] sm:$0xff] }
 0x38a   : > { %v8183_v14 = vadd.f32 %v3855_v55, %v3807_v39 }
 0x38c   : > { %v3723_v1 = vpop.f32.mrf.mxu3 }
 0x38d   : > { %v3724_v19 = vadd.f32 %v3723_v1, %v3675_v7  ;;  %v3234_v1 = vadd.f32 %v8124_v10, %v8853_v33 }
 0x38e   : > { %3965 = vmatmul.bf16.gmra.mxu0 %v8845_v36  ;;  %3911 = vmatmul.bf16.gmra.mxu3 %v7742_v32  ;;  %v3775_v35 = vpop.f32.mrf.mxu0  ;;  %v3826_v22 = vpop.f32.mrf.mxu1 }
 0x38f   : > { %v3773_v51 = vadd.f32 %v3772_v50, %v3724_v19  ;;  %4058 = vmatmul.bf16.gmra.mxu2 %v7742_v32  ;;  %v3678_v32 = vadd.f32 %v8098_v54, %v3242_v38  ;;  %v3231_v54 = vadd.f32 %v8124_v10, %v8851_v28  ;;  %v3817_v6 = vadd.f32 %v3816_v30, %v3234_v1  ;;  %v8854_v50 = vld [vmem:[#allocation71_spill] sm:$0xff] }
 0x390   : > { %v3240_v38 = vadd.f32 %v8124_v10, %v8856_v43  ;;  %v3249_v1 = vadd.f32 %v8124_v10, %v8818_v27 }
 0x391   : > { %4112 = vst [vmem:[%s8077_s16 + $0x108] sm:$0xff] %v3773_v51  ;;  %v3858_v45 = vpop.f32.mrf.mxu2  ;;  %v3815_v13 = vadd.f32 %v3814_v57, %v3231_v54  ;;  %v3237_v51 = vadd.f32 %v8124_v10, %v8854_v50 }
 0x392   : > { %v8190_v37 = vadd.f32 %v3858_v45, %v3810_v0 }
 0x393   : > { %v3820_v55 = vadd.f32 %v3819_v26, %v3237_v51  ;;  %v3822_v26 = vadd.f32 %v3821_v59, %v3240_v38  ;;  %v3252_v51 = vadd.f32 %v8124_v10, %v8819_v25 }
 0x396   : > { %v3777_v17 = vpop.f32.mrf.mxu0  ;;  %v3829_v39 = vpop.f32.mrf.mxu1 }
 0x399   : > { %v3860_v62 = vpop.f32.mrf.mxu2 }
 0x39a   : > { %v8201_v5 = vadd.f32 %v3860_v62, %v3812_v52 }
 0x39e   : > { %3970 = vmatmul.bf16.gmra.mxu0 %v8847_v4  ;;  %3916 = vmatmul.bf16.gmra.mxu3 %v7860_v58  ;;  %v3831_v20 = vpop.f32.mrf.mxu1 }
 0x39f   : > { %4063 = vmatmul.bf16.gmra.mxu2 %v7860_v58 }
 0x3a1   : > { %v3863_v47 = vpop.f32.mrf.mxu2 }
 0x3a2   : > { %v8211_v7 = vadd.f32 %v3863_v47, %v3815_v13 }
 0x3a5   : > { %v3726_v9 = vpop.f32.mrf.mxu3 }
 0x3a6   : > { %v3727_v24 = vadd.f32 %v3726_v9, %v3678_v32  ;;  %v8857_v32 = vld [vmem:[#allocation45_spill] sm:$0xff] }
 0x3a7   : > { %v3251_v9 = vadd.f32 %v8029_v56, %v8857_v32 }
 0x3a8   : > { %v3776_v2 = vadd.f32 %v3775_v35, %v3727_v24 }
 0x3a9   : > { %v3865_v19 = vpop.f32.mrf.mxu2 }
 0x3aa   : > { %4115 = vst [vmem:[%s8077_s16 + $0x120] sm:$0xff] %v3776_v2  ;;  %v8217_v57 = vadd.f32 %v3865_v19, %v3817_v6  ;;  %v3830_v6 = vadd.f32 %v3829_v39, %v3249_v1  ;;  %v8859_v39 = vld [vmem:[#allocation40_spill] sm:$0xff] }
 0x3ab   : > { %v3780_v36 = vpop.f32.mrf.mxu0 }
 0x3ad   : > { %v3728_v58 = vpop.f32.mrf.mxu3 }
 0x3ae   : > { %v3729_v12 = vadd.f32 %v3728_v58, %v3680_v29  ;;  %3975 = vmatmul.bf16.gmra.mxu0 %v8852_v21  ;;  %3921 = vmatmul.bf16.gmra.mxu3 %v7959_v63 }
 0x3af   : > { %4068 = vmatmul.bf16.gmra.mxu2 %v7959_v63  ;;  %v3683_v63 = vadd.f32 %v8113_v3, %v3248_v53  ;;  %v3685_v3 = vadd.f32 %v8121_v34, %v3251_v9  ;;  %v3246_v34 = vadd.f32 %v8124_v10, %v8804_v46 }
 0x3b0   : > { %v3778_v18 = vadd.f32 %v3777_v17, %v3729_v12  ;;  %v3243_v17 = vadd.f32 %v8124_v10, %v8858_v44  ;;  %v8860_v10 = vld [vmem:[#allocation52_spill] sm:$0xff] }
 0x3b1   : > { %v3868_v45 = vpop.f32.mrf.mxu2  ;;  %v3827_v12 = vadd.f32 %v3826_v22, %v3246_v34 }
 0x3b2   : > { %4118 = vst [vmem:[%s8077_s16 + $0x138] sm:$0xff] %v3778_v18  ;;  %v8224_v4 = vadd.f32 %v3868_v45, %v3820_v55  ;;  %v3825_v54 = vadd.f32 %v3824_v40, %v3243_v17  ;;  %v8257_v55 = vperm.slane %v8010_v41, 2 }
 0x3b3   : > { %v3782_v0 = vpop.f32.mrf.mxu0 }
 0x3b4   : > { %v3208_v53 = vadd.f32 %v8257_v55, %v8859_v39 }
 0x3b9   : > { %v3870_v52 = vpop.f32.mrf.mxu2 }
 0x3ba   : > { %v8233_v24 = vadd.f32 %v3870_v52, %v3822_v26  ;;  %v8861_v52 = vld [vmem:[#allocation59_spill] sm:$0xff] }
 0x3bb   : > { %v3941_v62 = vpop.f32.mrf.mxu0 }
 0x3bc   : > { %v3942_v45 = vadd.f32 %v3941_v62, %v3208_v53 }
 0x3be   : > { %3926 = vmatmul.bf16.gmra.mxu3 %v8061_v60 }
 0x3bf   : > { %4073 = vmatmul.bf16.gmra.mxu2 %v8061_v60  ;;  %v3990_v60 = vpop.f32.mrf.mxu1 }
 0x3c0   : > { %v3991_v25 = vadd.f32 %v3990_v60, %v3942_v45 }
 0x3c1   : > { %v3731_v30 = vpop.f32.mrf.mxu3  ;;  %v3873_v59 = vpop.f32.mrf.mxu2 }
 0x3c2   : > { %v3732_v35 = vadd.f32 %v3731_v30, %v3683_v63  ;;  %v8239_v56 = vadd.f32 %v3873_v59, %v3825_v54 }
 0x3c3   : > { %v3943_v58 = vpop.f32.mrf.mxu0 }
 0x3c4   : > { %v3781_v61 = vadd.f32 %v3780_v36, %v3732_v35  ;;  %v3211_v35 = vadd.f32 %v8257_v55, %v8860_v10 }
 0x3c6   : > { %4121 = vst [vmem:[%s8077_s16 + $0x150] sm:$0xff] %v3781_v61 }
 0x3c7   : > { %v3992_v40 = vpop.f32.mrf.mxu1 }
 0x3c9   : > { %v3733_v2 = vpop.f32.mrf.mxu3  ;;  %v3875_v21 = vpop.f32.mrf.mxu2 }
 0x3ca   : > { %v3734_v23 = vadd.f32 %v3733_v2, %v3685_v3  ;;  %v8245_v47 = vadd.f32 %v3875_v21, %v3827_v12  ;;  %v3214_v3 = vadd.f32 %v8257_v55, %v8861_v52 }
 0x3cb   : > { %v3946_v36 = vpop.f32.mrf.mxu0 }
 0x3cc   : > { %v3783_v28 = vadd.f32 %v3782_v0, %v3734_v23  ;;  %v3947_v2 = vadd.f32 %v3946_v36, %v3214_v3 }
 0x3ce   : > { %4124 = vst [vmem:[%s8077_s16 + $0x168] sm:$0xff] %v3783_v28 }
 0x3cf   : > { %v3995_v22 = vpop.f32.mrf.mxu1 }
 0x3d0   : > { %v3996_v28 = vadd.f32 %v3995_v22, %v3947_v2 }
 0x3d1   : > { %v3892_v29 = vpop.f32.mrf.mxu3 }
 0x3d2   : > { %v3893_v13 = vadd.f32 %v3892_v29, %v8134_v8  ;;  %v3878_v8 = vpop.f32.mrf.mxu2 }
 0x3d3   : > { %v8251_v19 = vadd.f32 %v3878_v8, %v3830_v6  ;;  %v3948_v27 = vpop.f32.mrf.mxu0 }
 0x3d4   : > { %4080 = vst [vmem:[%s8077_s16 + $0x8] sm:$0xff] %v3893_v13 }
 0x3d7   : > { %v3997_v30 = vpop.f32.mrf.mxu1 }
 0x3d9   : > { %v3894_v18 = vpop.f32.mrf.mxu3 }
 0x3da   : > { %v3895_v33 = vadd.f32 %v3894_v18, %v8145_v16  ;;  %v3832_v16 = vadd.f32 %v3831_v20, %v3252_v51  ;;  %v3880_v15 = vpop.f32.mrf.mxu2  ;;  %v3944_v20 = vadd.f32 %v3943_v58, %v3211_v35 }
 0x3db   : > { %v3951_v38 = vpop.f32.mrf.mxu0 }
 0x3dc   : > { %4083 = vst [vmem:[%s8077_s16 + $0x20] sm:$0xff] %v3895_v33  ;;  %v8262_v0 = vadd.f32 %v3880_v15, %v3832_v16  ;;  %v3993_v32 = vadd.f32 %v3992_v40, %v3944_v20  ;;  %v8866_v20 = vld [vmem:[#allocation73_spill] sm:$0xff] }
 0x3df   : > { %v4000_v9 = vpop.f32.mrf.mxu1 }
 0x3e1   : > { %v3897_v46 = vpop.f32.mrf.mxu3 }
 0x3e2   : > { %v3898_v50 = vadd.f32 %v3897_v46, %v8155_v42  ;;  %v4039_v41 = vpop.f32.mrf.mxu2 }
 0x3e3   : > { %v4040_v43 = vadd.f32 %v4039_v41, %v3991_v25  ;;  %v3953_v44 = vpop.f32.mrf.mxu0 }
 0x3e4   : > { %4086 = vst [vmem:[%s8077_s16 + $0x38] sm:$0xff] %v3898_v50  ;;  %v8864_v50 = vld [vmem:[#allocation64_spill] sm:$0xff] }
 0x3e5   : > { %4081 = vst [vmem:[%s8077_s16 + $0x10] sm:$0xff] %v4040_v43  ;;  %v3223_v51 = vadd.f32 %v8257_v55, %v8864_v50 }
 0x3e7   : > { %v4002_v29 = vpop.f32.mrf.mxu1 }
 0x3e9   : > { %v3899_v63 = vpop.f32.mrf.mxu3 }
 0x3ea   : > { %v3900_v42 = vadd.f32 %v3899_v63, %v8163_v31  ;;  %v4041_v31 = vpop.f32.mrf.mxu2 }
 0x3eb   : > { %v4042_v62 = vadd.f32 %v4041_v31, %v3993_v32  ;;  %v3956_v12 = vpop.f32.mrf.mxu0 }
 0x3ec   : > { %4089 = vst [vmem:[%s8077_s16 + $0x50] sm:$0xff] %v3900_v42 }
 0x3ed   : > { %4084 = vst [vmem:[%s8077_s16 + $0x28] sm:$0xff] %v4042_v62 }
 0x3ef   : > { %v4005_v6 = vpop.f32.mrf.mxu1 }
 0x3f1   : > { %v3902_v61 = vpop.f32.mrf.mxu3 }
 0x3f2   : > { %v3903_v26 = vadd.f32 %v3902_v61, %v8172_v49  ;;  %v4044_v54 = vpop.f32.mrf.mxu2  ;;  %v8862_v49 = vld [vmem:[#allocation60_spill] sm:$0xff]  ;;  %v3229_v61 = vadd.f32 %v8257_v55, %v8866_v20 }
 0x3f3   : > { %v3217_v60 = vadd.f32 %v8257_v55, %v8862_v49  ;;  %v4045_v59 = vadd.f32 %v4044_v54, %v3996_v28  ;;  %v3958_v22 = vpop.f32.mrf.mxu0 }
 0x3f4   : > { %4092 = vst [vmem:[%s8077_s16 + $0x68] sm:$0xff] %v3903_v26  ;;  %v3959_v32 = vadd.f32 %v3958_v22, %v3229_v61 }
 0x3f5   : > { %v3949_v58 = vadd.f32 %v3948_v27, %v3217_v60  ;;  %4087 = vst [vmem:[%s8077_s16 + $0x40] sm:$0xff] %v4045_v59  ;;  %v3954_v27 = vadd.f32 %v3953_v44, %v3223_v51 }
 0x3f7   : > { %v3998_v21 = vadd.f32 %v3997_v30, %v3949_v58  ;;  %v4007_v53 = vpop.f32.mrf.mxu1  ;;  %v4003_v45 = vadd.f32 %v4002_v29, %v3954_v27 }
 0x3f8   : > { %v4008_v3 = vadd.f32 %v4007_v53, %v3959_v32 }
 0x3f9   : > { %v3904_v23 = vpop.f32.mrf.mxu3 }
 0x3fa   : > { %v3905_v17 = vadd.f32 %v3904_v23, %v8183_v14  ;;  %v4046_v40 = vpop.f32.mrf.mxu2  ;;  %v8863_v14 = vld [vmem:[#allocation63_spill] sm:$0xff] }
 0x3fb   : > { %v3220_v18 = vadd.f32 %v8257_v55, %v8863_v14  ;;  %v4047_v33 = vadd.f32 %v4046_v40, %v3998_v21  ;;  %v3961_v25 = vpop.f32.mrf.mxu0 }
 0x3fc   : > { %4095 = vst [vmem:[%s8077_s16 + $0x80] sm:$0xff] %v3905_v17 }
 0x3fd   : > { %v3952_v1 = vadd.f32 %v3951_v38, %v3220_v18  ;;  %4090 = vst [vmem:[%s8077_s16 + $0x58] sm:$0xff] %v4047_v33  ;;  %v8869_v18 = vld [vmem:[#allocation39_spill] sm:$0xff] }
 0x3fe   : > { %v3238_v33 = vadd.f32 %v8257_v55, %v8869_v18 }
 0x3ff   : > { %v4001_v46 = vadd.f32 %v4000_v9, %v3952_v1  ;;  %v4010_v38 = vpop.f32.mrf.mxu1 }
 0x401   : > { %v3907_v13 = vpop.f32.mrf.mxu3 }
 0x402   : > { %v3908_v34 = vadd.f32 %v3907_v13, %v8190_v37  ;;  %v4049_v37 = vpop.f32.mrf.mxu2 }
 0x403   : > { %v4050_v16 = vadd.f32 %v4049_v37, %v4001_v46  ;;  %v3963_v31 = vpop.f32.mrf.mxu0 }
 0x404   : > { %4098 = vst [vmem:[%s8077_s16 + $0x98] sm:$0xff] %v3908_v34 }
 0x405   : > { %4093 = vst [vmem:[%s8077_s16 + $0x70] sm:$0xff] %v4050_v16 }
 0x407   : > { %v4012_v44 = vpop.f32.mrf.mxu1 }
 0x409   : > { %v3909_v36 = vpop.f32.mrf.mxu3 }
 0x40a   : > { %v3910_v8 = vadd.f32 %v3909_v36, %v8201_v5  ;;  %v4051_v63 = vpop.f32.mrf.mxu2  ;;  %v8865_v5 = vld [vmem:[#allocation69_spill] sm:$0xff] }
 0x40b   : > { %v3226_v42 = vadd.f32 %v8257_v55, %v8865_v5  ;;  %v4052_v30 = vadd.f32 %v4051_v63, %v4003_v45  ;;  %v3966_v49 = vpop.f32.mrf.mxu0  ;;  %v8871_v63 = vld [vmem:[#allocation93_spill] sm:$0xff] }
 0x40c   : > { %4101 = vst [vmem:[%s8077_s16 + $0xb0] sm:$0xff] %v3910_v8  ;;  %v3967_v36 = vadd.f32 %v3966_v49, %v3238_v33  ;;  %v3244_v5 = vadd.f32 %v8257_v55, %v8871_v63 }
 0x40d   : > { %v3957_v41 = vadd.f32 %v3956_v12, %v3226_v42  ;;  %4096 = vst [vmem:[%s8077_s16 + $0x88] sm:$0xff] %v4052_v30 }
 0x40f   : > { %v4006_v43 = vadd.f32 %v4005_v6, %v3957_v41  ;;  %v4015_v12 = vpop.f32.mrf.mxu1 }
 0x410   : > { %v4016_v22 = vadd.f32 %v4015_v12, %v3967_v36 }
 0x411   : > { %v3912_v15 = vpop.f32.mrf.mxu3 }
 0x412   : > { %v3913_v39 = vadd.f32 %v3912_v15, %v8211_v7  ;;  %v4054_v7 = vpop.f32.mrf.mxu2 }
 0x413   : > { %v4055_v26 = vadd.f32 %v4054_v7, %v4006_v43  ;;  %v3968_v14 = vpop.f32.mrf.mxu0  ;;  %v8872_v43 = vld [vmem:[#allocation95_spill] sm:$0xff] }
 0x414   : > { %4104 = vst [vmem:[%s8077_s16 + $0xc8] sm:$0xff] %v3913_v39 }
 0x415   : > { %4099 = vst [vmem:[%s8077_s16 + $0xa0] sm:$0xff] %v4055_v26 }
 0x417   : > { %v4017_v46 = vpop.f32.mrf.mxu1 }
 0x419   : > { %v3914_v10 = vpop.f32.mrf.mxu3 }
 0x41a   : > { %v3915_v35 = vadd.f32 %v3914_v10, %v8217_v57  ;;  %v4056_v62 = vpop.f32.mrf.mxu2  ;;  %v8867_v57 = vld [vmem:[#allocation77_spill] sm:$0xff] }
 0x41b   : > { %v3232_v2 = vadd.f32 %v8257_v55, %v8867_v57  ;;  %v4057_v23 = vadd.f32 %v4056_v62, %v4008_v3  ;;  %v3971_v16 = vpop.f32.mrf.mxu0 }
 0x41c   : > { %4107 = vst [vmem:[%s8077_s16 + $0xe0] sm:$0xff] %v3915_v35  ;;  %v3972_v30 = vadd.f32 %v3971_v16, %v3244_v5 }
 0x41d   : > { %v3962_v17 = vadd.f32 %v3961_v25, %v3232_v2  ;;  %4102 = vst [vmem:[%s8077_s16 + $0xb8] sm:$0xff] %v4057_v23  ;;  %v3253_v23 = vadd.f32 %v8257_v55, %v8814_v11 }
 0x41f   : > { %v4011_v60 = vadd.f32 %v4010_v38, %v3962_v17  ;;  %v4020_v45 = vpop.f32.mrf.mxu1  ;;  %v3247_v38 = vadd.f32 %v8257_v55, %v8872_v43 }
 0x420   : > { %v4021_v35 = vadd.f32 %v4020_v45, %v3972_v30 }
 0x421   : > { %v3917_v9 = vpop.f32.mrf.mxu3 }
 0x422   : > { %v3918_v52 = vadd.f32 %v3917_v9, %v8224_v4  ;;  %v4059_v59 = vpop.f32.mrf.mxu2  ;;  %v8868_v4 = vld [vmem:[#allocation55_spill] sm:$0xff] }
 0x423   : > { %v3235_v29 = vadd.f32 %v8257_v55, %v8868_v4  ;;  %v4060_v58 = vadd.f32 %v4059_v59, %v4011_v60  ;;  %v3973_v41 = vpop.f32.mrf.mxu0 }
 0x424   : > { %4110 = vst [vmem:[%s8077_s16 + $0xf8] sm:$0xff] %v3918_v52  ;;  %v3974_v61 = vadd.f32 %v3973_v41, %v3247_v38 }
 0x425   : > { %v3964_v13 = vadd.f32 %v3963_v31, %v3235_v29  ;;  %4105 = vst [vmem:[%s8077_s16 + $0xd0] sm:$0xff] %v4060_v58  ;;  %v3250_v31 = vadd.f32 %v8257_v55, %v8813_v48 }
 0x427   : > { %v4013_v40 = vadd.f32 %v4012_v44, %v3964_v13  ;;  %v4022_v20 = vpop.f32.mrf.mxu1 }
 0x428   : > { %v4023_v32 = vadd.f32 %v4022_v20, %v3974_v61 }
 0x429   : > { %v3919_v28 = vpop.f32.mrf.mxu3 }
 0x42a   : > { %v3920_v54 = vadd.f32 %v3919_v28, %v8233_v24  ;;  %v4061_v24 = vpop.f32.mrf.mxu2 }
 0x42b   : > { %v4062_v1 = vadd.f32 %v4061_v24, %v4013_v40  ;;  %v3976_v26 = vpop.f32.mrf.mxu0 }
 0x42c   : > { %4113 = vst [vmem:[%s8077_s16 + $0x110] sm:$0xff] %v3920_v54  ;;  %v3977_v52 = vadd.f32 %v3976_v26, %v3250_v31 }
 0x42d   : > { %4108 = vst [vmem:[%s8077_s16 + $0xe8] sm:$0xff] %v4062_v1 }
 0x42f   : > { %v4025_v3 = vpop.f32.mrf.mxu1 }
 0x430   : > { %v4026_v62 = vadd.f32 %v4025_v3, %v3977_v52 }
 0x431   : > { %v3922_v34 = vpop.f32.mrf.mxu3 }
 0x432   : > { %v3923_v21 = vadd.f32 %v3922_v34, %v8239_v56  ;;  %v4064_v37 = vpop.f32.mrf.mxu2  ;;  %v8870_v56 = vld [vmem:[#allocation92_spill] sm:$0xff] }
 0x433   : > { %v3241_v50 = vadd.f32 %v8257_v55, %v8870_v56  ;;  %v4065_v51 = vadd.f32 %v4064_v37, %v4016_v22  ;;  %v3978_v57 = vpop.f32.mrf.mxu0 }
 0x434   : > { %4116 = vst [vmem:[%s8077_s16 + $0x128] sm:$0xff] %v3923_v21  ;;  %v3979_v17 = vadd.f32 %v3978_v57, %v3253_v23 }
 0x435   : > { %v3969_v27 = vadd.f32 %v3968_v14, %v3241_v50  ;;  %4111 = vst [vmem:[%s8077_s16 + $0x100] sm:$0xff] %v4065_v51 }
 0x437   : > { %v4018_v53 = vadd.f32 %v4017_v46, %v3969_v27  ;;  %v4027_v48 = vpop.f32.mrf.mxu1 }
 0x438   : > { %v4028_v28 = vadd.f32 %v4027_v48, %v3979_v17 }
 0x439   : > { %v3924_v6 = vpop.f32.mrf.mxu3 }
 0x43a   : > { %v3925_v8 = vadd.f32 %v3924_v6, %v8245_v47  ;;  %v4066_v47 = vpop.f32.mrf.mxu2 }
 0x43b   : > { %v4067_v42 = vadd.f32 %v4066_v47, %v4018_v53 }
 0x43c   : > { %4119 = vst [vmem:[%s8077_s16 + $0x140] sm:$0xff] %v3925_v8 }
 0x43d   : > { %4114 = vst [vmem:[%s8077_s16 + $0x118] sm:$0xff] %v4067_v42 }
 0x441   : > { %v3927_v15 = vpop.f32.mrf.mxu3 }
 0x442   : > { %v3928_v39 = vadd.f32 %v3927_v15, %v8251_v19  ;;  %v4069_v19 = vpop.f32.mrf.mxu2 }
 0x443   : > { %v4070_v7 = vadd.f32 %v4069_v19, %v4021_v35 }
 0x444   : > { %4122 = vst [vmem:[%s8077_s16 + $0x158] sm:$0xff] %v3928_v39 }
 0x445   : > { %4117 = vst [vmem:[%s8077_s16 + $0x130] sm:$0xff] %v4070_v7 }
 0x449   : > { %v3929_v25 = vpop.f32.mrf.mxu3 }
 0x44a   : > { %v3930_v10 = vadd.f32 %v3929_v25, %v8262_v0  ;;  %v4071_v9 = vpop.f32.mrf.mxu2 }
 0x44b   : > { %v4072_v0 = vadd.f32 %v4071_v9, %v4023_v32 }
 0x44c   : > { %4125 = vst [vmem:[%s8077_s16 + $0x170] sm:$0xff] %v3930_v10 }
 0x44d   : > { %4120 = vst [vmem:[%s8077_s16 + $0x148] sm:$0xff] %v4072_v0 }
 0x452   : > { %v4074_v2 = vpop.f32.mrf.mxu2 }
 0x453   : > { %v4075_v44 = vadd.f32 %v4074_v2, %v4026_v62 }
 0x455   : > { %4123 = vst [vmem:[%s8077_s16 + $0x160] sm:$0xff] %v4075_v44 }
 0x45a   : > { %v4076_v54 = vpop.f32.mrf.mxu2 }
 0x45b   : > { %v4077_v49 = vadd.f32 %v4076_v54, %v4028_v28 }
 0x45d   : > { %4126 = vst [vmem:[%s8077_s16 + $0x178] sm:$0xff] %v4077_v49 }
 0x45e   : > { %5268 = shalt.err (!%p5265_p10)
}
 0x45f   : > { %s5324_s15 = smov 384   ;;  %s5325_s14 = smov 24  }
 0x460   : > { %4956 = dma.vmem_to_hbm [thread:$0]  (%p5439_p7), %s4142_s13, 6144, %s4144_s11, %s4128_s22, %s5324_s15, %s5324_s15, %s5325_s14  }
 0x461 PF: > { %s4158_s16 = sand.u32 1, %s5303_s18   ;;  %p8873_p12 = scmp.ge.s32.totalorder %s5315_s21, 2 }
 0x462   : > { %s4159_s17 = scalar_lea.sflag [#allocation4], %s4158_s16 }
 0x463   : > { %p4973_p13 = pnand %p8873_p12, %p5391_p6 }
 0x465   : > { %p4974_p0 = pneg %p4973_p13 }
 0x467   : > { %5298 = dma.done.wait (%p4974_p0), %s4159_s17, 6144  }
 0x468   : > { %5300 = vsyncadd (%p4974_p0), %s4159_s17, 4294961152  ;;  %p20_p3 = scmp.ge.s32.totalorder %s5423_s27, 4   ;;  %s8874_s18 = smov %s5307_s19 }
 0x469   : > { %s8875_s19 = smov %s5311_s20  ;;  %s8876_s20 = smov %s5435_s6 }
 0x46a   : > { %s8877_s21 = smov %s5423_s27  ;;  %22 = sbr.rel (!%p20_p3) target bundleno = 7 (0x7), region = 97 }
 0x46f   :  { %4165 = vsyncpa [#allocation3], 1 }
 0x470   :  { %4167 = vsyncpa [#allocation3 + $0x1], 1 }
 0x471   :  { %4168 = vsyncpa [#allocation6], 1 }
 0x472   :  { %4169 = vsyncpa [#allocation9], 1 }
 0x473   :  { %4170 = vsyncpa [#allocation4], 1 }
 0x474   :  { %4172 = vsyncpa [#allocation4 + $0x1], 1 }

// kernel: tpu_custom_call.1
= control target key start
LH: loop header
LB: loop body
LE: loop exit
PB: predicated region body
PF: predicated region fallthrough
CT: control target
= control target key end

     0   :  { %10 = vsyncpa [#allocation3], 0  ;;  %s8370_s0 = inlined_call_operand.hbm [shape: f32[256,256], index: 0, kind: input, shape index: {}]   ;;  %s8371_s1 = inlined_call_operand.hbm [shape: bf16[256,384], index: 1, kind: input, shape index: {}]   ;;  %s8372_s2 = inlined_call_operand.hbm [shape: f32[1,384], index: 2, kind: input, shape index: {}]   ;;  %s8373_s3 = inlined_call_operand.hbm [shape: bf16[384,384], index: 3, kind: input, shape index: {}]   ;;  %s8374_s4 = inlined_call_operand.vmem [shape: f32[1,384], index: 4, kind: input, shape index: {}]   ;;  %s8375_s5 = inlined_call_operand.hbm [shape: f32[256,384], index: 5, kind: output, shape index: {}]  }
   0x1   :  { %12 = vsyncpa [#allocation3 + $0x1], 0 }
   0x2   :  { %13 = vsyncpa [#allocation6], 0 }
   0x3   :  { %14 = vsyncpa [#allocation9], 0 }
   0x4   :  { %15 = vsyncpa [#allocation4], 0 }
   0x5   :  { %17 = vsyncpa [#allocation4 + $0x1], 0  ;;  %s5356_s18 = smov 0   ;;  %s5358_s19 = smov 0  }
   0x6   :  { %s5360_s20 = smov 0   ;;  %s5362_s21 = smov 0  }
   0x7 LB: > { %s5377_s22 = sadd.s32 4294967295, %s5315_s21   ;;  %s4246_s23 = sadd.s32 4294967294, %s5315_s21   ;;  %s5315_s21 = sphi %s5362_s21, %s8877_s21   ;;  %s5311_s20 = sphi %s5360_s20, %s8876_s20   ;;  %s5307_s19 = sphi %s5358_s19, %s8875_s19   ;;  %s5303_s18 = sphi %s5356_s18, %s8874_s18  }
   0x8   : > { %p43_p0 = scmp.ne.s32.totalorder %s5307_s19, %s5303_s18  ;;  %p44_p1 = scmp.eq.s32.totalorder %s5377_s22, 0 }
   0x9   : > { %p151_p2 = scmp.eq.s32.totalorder %s5377_s22, 1  ;;  %p157_p3 = scmp.eq.s32.totalorder %s4246_s23, 1 }
   0xa   : > { %p5386_p4 = por %p44_p1, %p43_p0  ;;  %p4247_p5 = scmp.ge.s32.totalorder %s5315_s21, 1 }
   0xb   : > { %p5391_p6 = por %p157_p3, %p43_p0  ;;  %p164_p7 = scmp.lt.s32.totalorder %s5315_s21, 3 }
   0xc   : > { %s175_s28 = sshll.u32 %s8371_s1, 4  ;;  %s5317_s30 = smov [#allocation5]   ;;  %s176_s28 = int_to_ptr.hbm [resolvable:$true] %s175_s28 }
   0xd   : > { %p5399_p8 = pnand %p4247_p5, %p164_p7  ;;  %s177_s6 = sshll.u32 %s5317_s30, 4  ;;  %s178_s6 = int_to_ptr.vmem [resolvable:$true] %s177_s6 }
   0xe   : > { %s190_s10 = sshll.u32 %s8372_s2, 4  ;;  %s5318_s11 = smov 192   ;;  %s191_s10 = int_to_ptr.hbm [resolvable:$true] %s190_s10 }
   0xf   : > { %p4958_p9 = pneg %p5399_p8  ;;  %s5319_s12 = smov 12  }
  0x10   : > { %s5320_s13 = smov [#allocation7]   ;;  %s201_s17 = sshll.u32 %s8373_s3, 4  ;;  %s202_s17 = int_to_ptr.hbm [resolvable:$true] %s201_s17 }
  0x11   : > { %p5407_p10 = pnand %p4958_p9, %p44_p1  ;;  %s192_s14 = sshll.u32 %s5320_s13, 4  ;;  %s193_s14 = int_to_ptr.vmem [resolvable:$true] %s192_s14 }
  0x12   : > { %s5321_s23 = smov [#allocation8]   ;;  %s5423_s27 = sadd.s32 1, %s5315_s21  }
  0x13   : > { %4961 = dma.hbm_to_vmem [thread:$0]  (!%p5407_p10), %s176_s28, 6144, %s178_s6, [#allocation6], %s5318_s11, %s5318_s11, %s5319_s12  }
  0x14   : > { %4964 = dma.hbm_to_vmem [thread:$0]  (!%p5407_p10), %s191_s10, 48, %s193_s14, [#allocation6]  }
  0x15   : > { %s203_s26 = sshll.u32 %s5321_s23, 4  ;;  %s27_s28 = ssub.s32 %s5315_s21, %s5423_s27  ;;  %s204_s26 = int_to_ptr.vmem [resolvable:$true] %s203_s26 }
  0x16   : > { %4967 = dma.hbm_to_vmem [thread:$0]  (!%p5407_p10), %s202_s17, 9216, %s204_s26, [#allocation9], %s5318_s11, %s5318_s11, %s5319_s12  }
  0x17   : > { %s30_s30 = sadd.s32 1, %s5311_s20  ;;  %p28_p12 = scmp.eq.s32.totalorder %s27_s28, 0 }
  0x18   : > { %p37_p13 = scmp.ne.s32.totalorder %s5311_s20, %s5307_s19  ;;  %p38_p0 = scmp.eq.s32.totalorder %s5315_s21, 0 }
  0x19   : > { %p4979_p3 = scmp.lt.s32.totalorder %s5315_s21, 2  ;;  %s220_s9 = sand.u32 1, %s5311_s20  }
  0x1a   : > { %s5435_s6 = scalar_select %p28_p12, %s5311_s20, %s30_s30  }
  0x1b   : > { %p39_p5 = por %p38_p0, %p37_p13  ;;  %p5439_p7 = por %p151_p2, %p37_p13 }
  0x1c   : > { %s4795_s10 = sshll.u32 %s5315_s21, 8  ;;  %s4252_s7 = sshll.u32 %s220_s9, 8 }
  0x1d   : > { %s230_s12 = scalar_lea.hbm %s8370_s0, %s4795_s10  ;;  %s224_s15 = scalar_lea.vmem [#allocation2], %s4252_s7 }
  0x1e   : > { %s231_s14 = sshll.u32 %s230_s12, 4  ;;  %s233_s16 = sshll.u32 %s224_s15, 4  ;;  %s232_s14 = int_to_ptr.hbm [resolvable:$true] %s231_s14  ;;  %s234_s16 = int_to_ptr.vmem [resolvable:$true] %s233_s16 }
  0x1f   : > { %p5450_p9 = pnand %p4979_p3, %p39_p5  ;;  %s221_s23 = scalar_lea.sflag [#allocation3], %s220_s9 }
  0x20   : > { %s5211_s26 = sshra.s32 %s232_s14, 4  ;;  %s5218_s7 = scalar_lea.hbm %s8370_s0, 512  ;;  %s5212_s26 = int_to_ptr.hbm [resolvable:$true] %s5211_s26 }
  0x21   : > { %s5213_s28 = scalar_lea.hbm %s5212_s26, 256  ;;  %p5215_p10 = pneg %p5450_p9 }
  0x22   : > { %p5214_p2 = scmp.ne.s32.totalorder %s5212_s26, %s5213_s28  ;;  %p5219_p0 = scmp.lt.s32.totalorder %s5212_s26, %s8370_s0 }
  0x23   : > { %p5220_p3 = scmp.lt.s32.totalorder %s5218_s7, %s5213_s28 }
  0x24   : > { %p5216_p12 = pnand %p5215_p10, %p5214_p2 }
  0x25   : > { %p5221_p5 = por %p5220_p3, %p5219_p0 }
  0x26   : > { %p5217_p13 = pneg %p5216_p12 }
  0x28   : > { %p5222_p11 = pnand %p5221_p5, %p5217_p13 }
  0x2a   : > { %5225 = shalt.err (!%p5222_p11)
}
  0x2b   : > { %s5322_s9 = smov 256   ;;  %s5323_s12 = smov 16  }
  0x2c   : > { %4971 = dma.hbm_to_vmem [thread:$0]  (!%p5450_p9), %s232_s14, 4096, %s234_s16, %s221_s23, %s5322_s9, %s5322_s9, %s5323_s12  }
  0x2d   : > { %245 = sbr.rel (%p5399_p8) target bundleno = 1121 (0x461), region = 40 }
  0x32   : > { %s5467_s15 = sand.u32 1, %s5307_s19  }
  0x33   : > { %s4257_s30 = sshll.u32 %s5467_s15, 8  ;;  %s248_s26 = scalar_lea.sflag [#allocation3], %s5467_s15 }
  0x34   : > { %s5471_s28 = scalar_lea.vmem [#allocation2], %s4257_s30 }
  0x35   : > { %5286 = dma.done.wait (%p5386_p4), %s248_s26, 4096  }
  0x36   : > { %5288 = vsyncadd (%p5386_p4), %s248_s26, 4294963200 }
  0x37   : > { %5290 = dma.done.wait (%p44_p1), [#allocation6], 6192  }
  0x38   : > { %5292 = vsyncadd (%p44_p1), [#allocation6], 4294961104 }
  0x39   : > { %5294 = dma.done.wait (%p44_p1), [#allocation9], 9216  }
  0x3a   : > { %5296 = vsyncadd (%p44_p1), [#allocation9], 4294958080  ;;  %v4347_v0 = vld [vmem:[#allocation5 + $0xa8] sm:$0xf]  ;;  %v4818_v1 = vld [vmem:[#allocation5 + $0xb0] sm:$0xf0] }
  0x3b   : > { %v4443_v2 = vld [vmem:[#allocation5 + $0x168] sm:$0xf]  ;;  %v4348_v3 = vor.u32 %v4818_v1, %v4347_v0  ;;  %v4842_v4 = vld [vmem:[#allocation5 + $0x170] sm:$0xf0]  ;;  %v4335_v5 = vld [vmem:[#allocation5 + $0x90] sm:$0xf] }
  0x3c   : > { %v4815_v6 = vld [vmem:[#allocation5 + $0x98] sm:$0xf0]  ;;  %v5485_v7 = vor.u32 %v4842_v4, %v4443_v2  ;;  %v4431_v8 = vld [vmem:[#allocation5 + $0x150] sm:$0xf]  ;;  %v4323_v12 = vld [vmem:[#allocation5 + $0x78] sm:$0xf] }
  0x3d   : > { %v4839_v9 = vld [vmem:[#allocation5 + $0x158] sm:$0xf0]  ;;  %672 = vmatpush.bf16.msra.mxu0 %v4348_v3  ;;  %4916 = vmatpush.bf16.msra.mxu3 %v4348_v3  ;;  %v4336_v10 = vor.u32 %v4815_v6, %v4335_v5  ;;  %v4812_v13 = vld [vmem:[#allocation5 + $0x80] sm:$0xf0]  ;;  %v4419_v14 = vld [vmem:[#allocation5 + $0x138] sm:$0xf] }
  0x3e   : > { %4924 = vmatpush.bf16.msra.mxu1 %v5485_v7  ;;  %v5488_v11 = vor.u32 %v4839_v9, %v4431_v8  ;;  %v4836_v15 = vld [vmem:[#allocation5 + $0x140] sm:$0xf0]  ;;  %v4324_v16 = vor.u32 %v4812_v13, %v4323_v12  ;;  %v4311_v18 = vld [vmem:[#allocation5 + $0x60] sm:$0xf]  ;;  %v4809_v19 = vld [vmem:[#allocation5 + $0x68] sm:$0xf0] }
  0x3f   : > { %v5491_v17 = vor.u32 %v4836_v15, %v4419_v14  ;;  %v4407_v20 = vld [vmem:[#allocation5 + $0x120] sm:$0xf]  ;;  %v4833_v21 = vld [vmem:[#allocation5 + $0x128] sm:$0xf0]  ;;  %v4312_v22 = vor.u32 %v4809_v19, %v4311_v18  ;;  %v4299_v24 = vld [vmem:[#allocation5 + $0x48] sm:$0xf] }
  0x40   : > { %v5494_v23 = vor.u32 %v4833_v21, %v4407_v20  ;;  %v4806_v25 = vld [vmem:[#allocation5 + $0x50] sm:$0xf0]  ;;  %v4395_v26 = vld [vmem:[#allocation5 + $0x108] sm:$0xf]  ;;  %v4287_v30 = vld [vmem:[#allocation5 + $0x30] sm:$0xf] }
  0x41   : > { %673 = vmatpush.bf16.msra.mxu0 %v4336_v10  ;;  %4917 = vmatpush.bf16.msra.mxu3 %v4336_v10  ;;  %v4830_v27 = vld [vmem:[#allocation5 + $0x110] sm:$0xf0]  ;;  %v4300_v28 = vor.u32 %v4806_v25, %v4299_v24  ;;  %v4803_v31 = vld [vmem:[#allocation5 + $0x38] sm:$0xf0]  ;;  %v4383_v32 = vld [vmem:[#allocation5 + $0xf0] sm:$0xf] }
  0x42   : > { %4925 = vmatpush.bf16.msra.mxu1 %v5488_v11  ;;  %v5497_v29 = vor.u32 %v4830_v27, %v4395_v26  ;;  %v4827_v33 = vld [vmem:[#allocation5 + $0xf8] sm:$0xf0]  ;;  %v4288_v34 = vor.u32 %v4803_v31, %v4287_v30  ;;  %v4275_v36 = vld [vmem:[#allocation5 + $0x18] sm:$0xf]  ;;  %v4800_v37 = vld [vmem:[#allocation5 + $0x20] sm:$0xf0] }
  0x43   : > { %v5500_v35 = vor.u32 %v4827_v33, %v4383_v32  ;;  %v4371_v38 = vld [vmem:[#allocation5 + $0xd8] sm:$0xf]  ;;  %v4824_v39 = vld [vmem:[#allocation5 + $0xe0] sm:$0xf0]  ;;  %v4276_v40 = vor.u32 %v4800_v37, %v4275_v36  ;;  %v4263_v42 = vld [vmem:[#allocation5] sm:$0xf] }
  0x44   : > { %v5503_v41 = vor.u32 %v4824_v39, %v4371_v38  ;;  %v4797_v43 = vld [vmem:[#allocation5 + $0x8] sm:$0xf0]  ;;  %v4359_v44 = vld [vmem:[#allocation5 + $0xc0] sm:$0xf]  ;;  %v298_v48 = vld [vmem:[%s5471_s28 + $0x10] sm:$0xff]  ;;  %s4940_s14 = smul.u32 384, %s5467_s15 }
  0x45   : > { %674 = vmatpush.bf16.msra.mxu0 %v4324_v16  ;;  %4918 = vmatpush.bf16.msra.mxu3 %v4324_v16  ;;  %v4821_v45 = vld [vmem:[#allocation5 + $0xc8] sm:$0xf0]  ;;  %v296_v46 = vld [vmem:[%s5471_s28] sm:$0xff]  ;;  %v4264_v47 = vor.u32 %v4797_v43, %v4263_v42  ;;  %v306_v50 = vld [vmem:[%s5471_s28 + $0x50] sm:$0xff]  ;;  %s4941_s17 = smul.u32 384, %s5377_s22  ;;  %s4128_s22 = scalar_lea.sflag [#allocation4], %s5467_s15 }
  0x46   : > { %4926 = vmatpush.bf16.msra.mxu1 %v5491_v17  ;;  %v304_v49 = vld [vmem:[%s5471_s28 + $0x40] sm:$0xff]  ;;  %v5510_v51 = vor.u32 %v4821_v45, %v4359_v44  ;;  %v305_v52 = vld [vmem:[%s5471_s28 + $0x48] sm:$0xff]  ;;  %v307_v53 = vld [vmem:[%s5471_s28 + $0x58] sm:$0xff]  ;;  %v5514_v54 = vpack.c.bf16 %v298_v48, %v296_v46  ;;  %s8077_s16 = scalar_lea.vmem [#allocation10], %s4940_s14 }
  0x47   : > { %v5516_v55 = vpack.c.bf16 %v306_v50, %v304_v49  ;;  %v5518_v56 = vpack.c.bf16 %v307_v53, %v305_v52  ;;  %v4817_v57 = vld [vmem:[#allocation5 + $0xac] sm:$0xf]  ;;  %v4349_v58 = vld [vmem:[#allocation5 + $0xb4] sm:$0xf0]  ;;  %v4814_v60 = vld [vmem:[#allocation5 + $0x94] sm:$0xf]  ;;  %s4140_s7 = scalar_lea.hbm %s8375_s5, %s4941_s17 }
  0x48   : > { %v4352_v59 = vor.u32 %v4817_v57, %v4349_v58  ;;  %v4337_v61 = vld [vmem:[#allocation5 + $0x9c] sm:$0xf0]  ;;  %v4811_v63 = vld [vmem:[#allocation5 + $0x7c] sm:$0xf]  ;;  %v4325_v0 = vld [vmem:[#allocation5 + $0x84] sm:$0xf0] }
  0x49   : > { %675 = vmatpush.bf16.msra.mxu0 %v4312_v22  ;;  %4919 = vmatpush.bf16.msra.mxu3 %v4312_v22  ;;  %v4340_v62 = vor.u32 %v4814_v60, %v4337_v61  ;;  %v300_v1 = vld [vmem:[%s5471_s28 + $0x20] sm:$0xff]  ;;  %v302_v2 = vld [vmem:[%s5471_s28 + $0x30] sm:$0xff]  ;;  %v4328_v4 = vor.u32 %v4811_v63, %v4325_v0  ;;  %v309_v8 = vld [vmem:[%s5471_s28 + $0x68] sm:$0xff]  ;;  %s4141_s13 = sshll.u32 %s8077_s16, 4  ;;  %s4143_s11 = sshll.u32 %s4140_s7, 4  ;;  %s4142_s13 = int_to_ptr.vmem [resolvable:$true] %s4141_s13  ;;  %s4144_s11 = int_to_ptr.hbm [resolvable:$true] %s4143_s11 }
  0x4a   : > { %4927 = vmatpush.bf16.msra.mxu1 %v5494_v23  ;;  %4932 = vmatpush.bf16.msra.mxu2 %v4352_v59  ;;  %v308_v3 = vld [vmem:[%s5471_s28 + $0x60] sm:$0xff]  ;;  %v310_v5 = vld [vmem:[%s5471_s28 + $0x70] sm:$0xff]  ;;  %v311_v9 = vld [vmem:[%s5471_s28 + $0x78] sm:$0xff]  ;;  %v5534_v10 = vpack.c.bf16 %v302_v2, %v300_v1  ;;  %s5255_s9 = sshra.s32 %s4144_s11, 4  ;;  %s5256_s9 = int_to_ptr.hbm [resolvable:$true] %s5255_s9 }
  0x4b   : > { %v4808_v6 = vld [vmem:[#allocation5 + $0x64] sm:$0xf]  ;;  %v5540_v13 = vpack.c.bf16 %v311_v9, %v309_v8  ;;  %v4805_v14 = vld [vmem:[#allocation5 + $0x4c] sm:$0xf]  ;;  %v4301_v15 = vld [vmem:[#allocation5 + $0x54] sm:$0xf0]  ;;  %p5262_p11 = scmp.lt.s32.totalorder %s5256_s9, %s8375_s5 }
  0x4c   : > { %v5546_v16 = vor.u32 %v4805_v14, %v4301_v15  ;;  %v4289_v18 = vld [vmem:[#allocation5 + $0x3c] sm:$0xf0]  ;;  %v4841_v19 = vld [vmem:[#allocation5 + $0x16c] sm:$0xf]  ;;  %v4445_v20 = vld [vmem:[#allocation5 + $0x174] sm:$0xf0] }
  0x4d   : > { %676 = vmatpush.bf16.msra.mxu0 %v4300_v28  ;;  %4920 = vmatpush.bf16.msra.mxu3 %v4300_v28  ;;  %v4448_v21 = vor.u32 %v4841_v19, %v4445_v20  ;;  %v4277_v24 = vld [vmem:[#allocation5 + $0x24] sm:$0xf0]  ;;  %v312_v25 = vld [vmem:[%s5471_s28 + $0x80] sm:$0xff]  ;;  %v314_v26 = vld [vmem:[%s5471_s28 + $0x90] sm:$0xff]  ;;  %s5257_s12 = scalar_lea.hbm %s5256_s9, 384 }
  0x4e   : > { %4928 = vmatpush.bf16.msra.mxu1 %v5497_v29  ;;  %4933 = vmatpush.bf16.msra.mxu2 %v4340_v62  ;;  %v297_v27 = vld [vmem:[%s5471_s28 + $0x8] sm:$0xff]  ;;  %v299_v28 = vld [vmem:[%s5471_s28 + $0x18] sm:$0xff]  ;;  %v4796_v32 = vld [vmem:[#allocation5 + $0x4] sm:$0xf]  ;;  %p5258_p1 = scmp.ne.s32.totalorder %s5256_s9, %s5257_s12 }
  0x4f   : > { %v315_v31 = vld [vmem:[%s5471_s28 + $0x98] sm:$0xff]  ;;  %v4265_v33 = vld [vmem:[#allocation5 + $0xc] sm:$0xf0]  ;;  %v4433_v42 = vld [vmem:[#allocation5 + $0x15c] sm:$0xf0] }
  0x50   : > { %v5571_v37 = vor.u32 %v4796_v32, %v4265_v33  ;;  %v4451_v38 = vld [vmem:[#allocation5 + $0x170] sm:$0xf]  ;;  %v4843_v39 = vld [vmem:[#allocation5 + $0x178] sm:$0xf0]  ;;  %v4439_v44 = vld [vmem:[#allocation5 + $0x158] sm:$0xf]  ;;  %p5259_p4 = pnand %p5258_p1, %p5439_p7 }
  0x51   : > { %677 = vmatpush.bf16.msra.mxu0 %v4288_v34  ;;  %4921 = vmatpush.bf16.msra.mxu3 %v4288_v34  ;;  %v5565_v34 = vpack.c.bf16 %v314_v26, %v312_v25  ;;  %v4840_v45 = vld [vmem:[#allocation5 + $0x160] sm:$0xf0]  ;;  %v4421_v48 = vld [vmem:[#allocation5 + $0x144] sm:$0xf0]  ;;  %v4427_v50 = vld [vmem:[#allocation5 + $0x140] sm:$0xf] }
  0x52   : > { %4929 = vmatpush.bf16.msra.mxu1 %v5500_v35  ;;  %4934 = vmatpush.bf16.msra.mxu2 %v4328_v4  ;;  %v4440_v46 = vor.u32 %v4840_v45, %v4439_v44  ;;  %v4832_v52 = vld [vmem:[#allocation5 + $0x124] sm:$0xf]  ;;  %v4409_v53 = vld [vmem:[#allocation5 + $0x12c] sm:$0xf0]  ;;  %v4415_v60 = vld [vmem:[#allocation5 + $0x128] sm:$0xf]  ;;  %p5260_p8 = pneg %p5259_p4 }
  0x53   : > { %v316_v58 = vld [vmem:[%s5471_s28 + $0xa0] sm:$0xff]  ;;  %v4834_v61 = vld [vmem:[#allocation5 + $0x130] sm:$0xf0]  ;;  %v301_v63 = vld [vmem:[%s5471_s28 + $0x28] sm:$0xff] }
  0x54   : > { %v303_v0 = vld [vmem:[%s5471_s28 + $0x38] sm:$0xff]  ;;  %v317_v1 = vld [vmem:[%s5471_s28 + $0xa8] sm:$0xff]  ;;  %v4355_v9 = vld [vmem:[#allocation5 + $0xb0] sm:$0xf] }
  0x55   : > { %678 = vmatpush.bf16.msra.mxu0 %v4276_v40  ;;  %4922 = vmatpush.bf16.msra.mxu3 %v4276_v40  ;;  %v4452_v40 = vor.u32 %v4843_v39, %v4451_v38  ;;  %v319_v2 = vld [vmem:[%s5471_s28 + $0xb8] sm:$0xff]  ;;  %v4403_v14 = vld [vmem:[#allocation5 + $0x110] sm:$0xf]  ;;  %v4385_v19 = vld [vmem:[#allocation5 + $0xfc] sm:$0xf0] }
  0x56   : > { %4930 = vmatpush.bf16.msra.mxu1 %v5503_v41  ;;  %v4397_v8 = vld [vmem:[#allocation5 + $0x114] sm:$0xf0]  ;;  %v4831_v15 = vld [vmem:[#allocation5 + $0x118] sm:$0xf0]  ;;  %v4373_v25 = vld [vmem:[#allocation5 + $0xe4] sm:$0xf0] }
  0x57   : > { %v4361_v38 = vld [vmem:[#allocation5 + $0xcc] sm:$0xf0]  ;;  %v321_v44 = vld [vmem:[%s5471_s28 + $0xc8] sm:$0xff]  ;;  %v323_v45 = vld [vmem:[%s5471_s28 + $0xd8] sm:$0xff] }
  0x59   : > { %679 = vmatpush.bf16.msra.mxu0 %v4264_v47  ;;  %4923 = vmatpush.bf16.msra.mxu3 %v4264_v47  ;;  %v4835_v47 = vld [vmem:[#allocation5 + $0x13c] sm:$0xf] }
  0x5a   : > { %4931 = vmatpush.bf16.msra.mxu1 %v5510_v51  ;;  %v4424_v49 = vor.u32 %v4835_v47, %v4421_v48  ;;  %v4813_v47 = vld [vmem:[#allocation5 + $0x88] sm:$0xf0] }
  0x5c   : > { %680 = vmatmul.bf16.vlgmr.msra.gmra.mxu0 %v5514_v54  ;;  %690 = vmatmul.bf16.vlgmr.msra.gmra.mxu3 %v5516_v55 }
  0x5d   : > { %721 = vmatpush.bf16.msrb.mxu0 %v5485_v7  ;;  %739 = vmatmul.bf16.vlgmr.msra.gmra.mxu1 %v5518_v56  ;;  %v4313_v7 = vld [vmem:[#allocation5 + $0x6c] sm:$0xf0] }
  0x5e   : > { %v5538_v12 = vor.u32 %v4808_v6, %v4313_v7  ;;  %819 = vmatpush.bf16.msrb.mxu3 %v4448_v21  ;;  %917 = vmatpush.bf16.msrb.mxu1 %v4452_v40  ;;  %v5590_v6 = vpack.c.bf16 %v319_v2, %v317_v1  ;;  %v4829_v7 = vld [vmem:[#allocation5 + $0x10c] sm:$0xf]  ;;  %v4391_v21 = vld [vmem:[#allocation5 + $0xf8] sm:$0xf]  ;;  %v4367_v40 = vld [vmem:[#allocation5 + $0xc8] sm:$0xf] }
  0x5f   : > { %v325_v1 = vld [vmem:[%s5471_s28 + $0xe8] sm:$0xff] }
  0x60   : > { %4935 = vmatpush.bf16.msra.mxu2 %v5538_v12 }
  0x61   : > { %722 = vmatpush.bf16.msrb.mxu0 %v5488_v11  ;;  %v5536_v11 = vpack.c.bf16 %v310_v5, %v308_v3  ;;  %v4416_v3 = vor.u32 %v4834_v61, %v4415_v60  ;;  %v5588_v5 = vpack.c.bf16 %v303_v0, %v301_v63  ;;  %v4295_v61 = vld [vmem:[#allocation5 + $0x38] sm:$0xf]  ;;  %v324_v63 = vld [vmem:[%s5471_s28 + $0xe0] sm:$0xff]  ;;  %v326_v0 = vld [vmem:[%s5471_s28 + $0xf0] sm:$0xff] }
  0x62   : > { %918 = vmatpush.bf16.msrb.mxu1 %v4440_v46  ;;  %v4331_v46 = vld [vmem:[#allocation5 + $0x80] sm:$0xf] }
  0x64   : > { %4936 = vmatpush.bf16.msra.mxu2 %v5546_v16 }
  0x65   : > { %723 = vmatpush.bf16.msrb.mxu0 %v5491_v17  ;;  %v4802_v17 = vld [vmem:[#allocation5 + $0x34] sm:$0xf] }
  0x66   : > { %v5551_v22 = vor.u32 %v4802_v17, %v4289_v18  ;;  %v4404_v17 = vor.u32 %v4831_v15, %v4403_v14  ;;  %v4826_v18 = vld [vmem:[#allocation5 + $0xf4] sm:$0xf]  ;;  %v4271_v15 = vld [vmem:[#allocation5 + $0x8] sm:$0xf] }
  0x67   : > { %v4388_v20 = vor.u32 %v4826_v18, %v4385_v19  ;;  %v4587_v18 = vld [vmem:[#allocation8 + $0xa8] sm:$0xf]  ;;  %v4866_v19 = vld [vmem:[#allocation8 + $0xb0] sm:$0xf0] }
  0x68   : > { %4937 = vmatpush.bf16.msra.mxu2 %v5551_v22 }
  0x69   : > { %724 = vmatpush.bf16.msrb.mxu0 %v5494_v23  ;;  %v4799_v23 = vld [vmem:[#allocation5 + $0x1c] sm:$0xf] }
  0x6a   : > { %v5560_v30 = vor.u32 %v4799_v23, %v4277_v24  ;;  %v4823_v24 = vld [vmem:[#allocation5 + $0xdc] sm:$0xf] }
  0x6b   : > { %v4376_v32 = vor.u32 %v4823_v24, %v4373_v25  ;;  %v4863_v24 = vld [vmem:[#allocation8 + $0x98] sm:$0xf0] }
  0x6c   : > { %685 = vmatmul.bf16.gmra.mxu0 %v5534_v10  ;;  %695 = vmatmul.bf16.gmra.mxu3 %v5536_v11 }
  0x6d   : > { %725 = vmatpush.bf16.msrb.mxu0 %v5497_v29  ;;  %744 = vmatmul.bf16.gmra.mxu1 %v5540_v13  ;;  %v313_v29 = vld [vmem:[%s5471_s28 + $0x88] sm:$0xff] }
  0x6e   : > { %4938 = vmatpush.bf16.msra.mxu2 %v5560_v30  ;;  %v5569_v36 = vpack.c.bf16 %v315_v31, %v313_v29  ;;  %v4343_v29 = vld [vmem:[#allocation5 + $0x98] sm:$0xf]  ;;  %v4816_v31 = vld [vmem:[#allocation5 + $0xa0] sm:$0xf0] }
  0x6f   : > { %v4344_v39 = vor.u32 %v4816_v31, %v4343_v29 }
  0x71   : > { %726 = vmatpush.bf16.msrb.mxu0 %v5500_v35  ;;  %v5567_v35 = vpack.c.bf16 %v299_v28, %v297_v27  ;;  %v4379_v27 = vld [vmem:[#allocation5 + $0xe0] sm:$0xf]  ;;  %v4825_v28 = vld [vmem:[#allocation5 + $0xe8] sm:$0xf0] }
  0x72   : > { %4939 = vmatpush.bf16.msra.mxu2 %v5571_v37  ;;  %v4380_v33 = vor.u32 %v4825_v28, %v4379_v27 }
  0x75   : > { %727 = vmatpush.bf16.msrb.mxu0 %v5503_v41  ;;  %v4838_v41 = vld [vmem:[#allocation5 + $0x154] sm:$0xf]  ;;  %788 = vmatmul.bf16.vlgmr.msra.gmra.mxu2 %v5516_v55 }
  0x76   : > { %v4436_v43 = vor.u32 %v4838_v41, %v4433_v42  ;;  %v4822_v41 = vld [vmem:[#allocation5 + $0xd0] sm:$0xf0]  ;;  %v320_v42 = vld [vmem:[%s5471_s28 + $0xc0] sm:$0xff] }
  0x78   : > { %820 = vmatpush.bf16.msrb.mxu3 %v4436_v43  ;;  %v322_v43 = vld [vmem:[%s5471_s28 + $0xd0] sm:$0xff] }
  0x79   : > { %728 = vmatpush.bf16.msrb.mxu0 %v5510_v51  ;;  %v4837_v51 = vld [vmem:[#allocation5 + $0x148] sm:$0xf0] }
  0x7a   : > { %v4428_v57 = vor.u32 %v4837_v51, %v4427_v50  ;;  %v5603_v50 = vpack.c.bf16 %v322_v43, %v320_v42  ;;  %v4332_v51 = vor.u32 %v4813_v47, %v4331_v46  ;;  %v4551_v46 = vld [vmem:[#allocation8 + $0x60] sm:$0xf] }
  0x7c   : > { %700 = vmatmul.bf16.gmra.mxu3 %v5565_v34  ;;  %729 = vmatmul.bf16.vlgmr.msrb.gmra.mxu0 %v5567_v35 }
  0x7d   : > { %770 = vmatpush.bf16.msra.mxu0 %v4352_v59  ;;  %749 = vmatmul.bf16.gmra.mxu1 %v5569_v36  ;;  %v4412_v59 = vor.u32 %v4832_v52, %v4409_v53  ;;  %v4319_v52 = vld [vmem:[#allocation5 + $0x68] sm:$0xf]  ;;  %v4810_v53 = vld [vmem:[#allocation5 + $0x70] sm:$0xf0] }
  0x7e   : > { %821 = vmatpush.bf16.msrb.mxu3 %v4424_v49  ;;  %919 = vmatpush.bf16.msrb.mxu1 %v4428_v57  ;;  %v4368_v49 = vor.u32 %v4822_v41, %v4367_v40  ;;  %v4320_v57 = vor.u32 %v4810_v53, %v4319_v52  ;;  %v4865_v53 = vld [vmem:[#allocation8 + $0xac] sm:$0xf] }
  0x81   : > { %771 = vmatpush.bf16.msra.mxu0 %v4340_v62  ;;  %v318_v62 = vld [vmem:[%s5471_s28 + $0xb0] sm:$0xff] }
  0x82   : > { %822 = vmatpush.bf16.msrb.mxu3 %v4412_v59  ;;  %920 = vmatpush.bf16.msrb.mxu1 %v4416_v3  ;;  %v4807_v59 = vld [vmem:[#allocation5 + $0x58] sm:$0xf0] }
  0x83   : > { %v327_v3 = vld [vmem:[%s5471_s28 + $0xf8] sm:$0xff]  ;;  %s5261_s28 = scalar_lea.hbm %s8375_s5, 768 }
  0x84   : > { %p5263_p9 = scmp.lt.s32.totalorder %s5261_s28, %s5257_s12 }
  0x85   : > { %772 = vmatpush.bf16.msra.mxu0 %v4328_v4  ;;  %v5586_v4 = vpack.c.bf16 %v318_v62, %v316_v58  ;;  %793 = vmatmul.bf16.gmra.mxu2 %v5536_v11  ;;  %v4307_v58 = vld [vmem:[#allocation5 + $0x50] sm:$0xf]  ;;  %v4804_v62 = vld [vmem:[#allocation5 + $0x40] sm:$0xf0] }
  0x86   : > { %921 = vmatpush.bf16.msrb.mxu1 %v4404_v17  ;;  %v4308_v60 = vor.u32 %v4807_v59, %v4307_v58  ;;  %v4296_v2 = vor.u32 %v4804_v62, %v4295_v61  ;;  %p5264_p2 = por %p5263_p9, %p5262_p11 }
  0x88   : > { %p5265_p10 = pnand %p5264_p2, %p5260_p8 }
  0x89   : > { %773 = vmatpush.bf16.msra.mxu0 %v5538_v12  ;;  %v4400_v12 = vor.u32 %v4829_v7, %v4397_v8  ;;  %v4283_v7 = vld [vmem:[#allocation5 + $0x20] sm:$0xf]  ;;  %v4801_v8 = vld [vmem:[#allocation5 + $0x28] sm:$0xf0] }
  0x8a   : > { %v4284_v14 = vor.u32 %v4801_v8, %v4283_v7  ;;  %v4577_v7 = vld [vmem:[#allocation8 + $0x9c] sm:$0xf0] }
  0x8b   : > { %823 = vmatpush.bf16.msrb.mxu3 %v4400_v12  ;;  %v5617_v12 = vpack.c.bf16 %v327_v3, %v325_v1  ;;  %v4862_v3 = vld [vmem:[#allocation8 + $0x94] sm:$0xf] }
  0x8c   : > { %705 = vmatmul.bf16.gmra.mxu3 %v5586_v4  ;;  %734 = vmatmul.bf16.gmra.mxu0 %v5588_v5 }
  0x8d   : > { %774 = vmatpush.bf16.msra.mxu0 %v5546_v16  ;;  %754 = vmatmul.bf16.gmra.mxu1 %v5590_v6  ;;  %v4819_v16 = vld [vmem:[#allocation5 + $0xb8] sm:$0xf0] }
  0x8e   : > { %v4356_v26 = vor.u32 %v4819_v16, %v4355_v9  ;;  %v5615_v9 = vpack.c.bf16 %v326_v0, %v324_v63  ;;  %v4798_v16 = vld [vmem:[#allocation5 + $0x10] sm:$0xf0] }
  0x8f   : > { %824 = vmatpush.bf16.msrb.mxu3 %v4388_v20  ;;  %v4272_v17 = vor.u32 %v4798_v16, %v4271_v15  ;;  %v4588_v20 = vor.u32 %v4866_v19, %v4587_v18  ;;  %v4580_v15 = vor.u32 %v4862_v3, %v4577_v7  ;;  %v4859_v18 = vld [vmem:[#allocation8 + $0x7c] sm:$0xf]  ;;  %v4565_v19 = vld [vmem:[#allocation8 + $0x84] sm:$0xf0]  ;;  %v4515_v7 = vld [vmem:[#allocation8 + $0x18] sm:$0xf] }
  0x91   : > { %775 = vmatpush.bf16.msra.mxu0 %v5551_v22  ;;  %v4828_v22 = vld [vmem:[#allocation5 + $0x100] sm:$0xf0]  ;;  %3638 = vmatpush.bf16.msrb.mxu2 %v4588_v20 }
  0x92   : > { %v4392_v23 = vor.u32 %v4828_v22, %v4391_v21 }
  0x93   : > { %825 = vmatpush.bf16.msrb.mxu3 %v4376_v32 }
  0x94   : > { %922 = vmatpush.bf16.msrb.mxu1 %v4392_v23  ;;  %v5631_v23 = vld [vmem:[#allocation7] sm:$0x7] }
  0x95   : > { %776 = vmatpush.bf16.msra.mxu0 %v5560_v30  ;;  %v4820_v30 = vld [vmem:[#allocation5 + $0xc4] sm:$0xf]  ;;  %798 = vmatmul.bf16.gmra.mxu2 %v5565_v34 }
  0x96   : > { %v4364_v48 = vor.u32 %v4820_v30, %v4361_v38  ;;  %v4563_v30 = vld [vmem:[#allocation8 + $0x78] sm:$0xf]  ;;  %v4860_v38 = vld [vmem:[#allocation8 + $0x80] sm:$0xf0] }
  0x97   : > { %v4564_v40 = vor.u32 %v4860_v38, %v4563_v30 }
  0x98   : > { %923 = vmatpush.bf16.msrb.mxu1 %v4380_v33  ;;  %826 = vmatpush.bf16.msrb.mxu3 %v4364_v48 }
  0x99   : > { %777 = vmatpush.bf16.msra.mxu0 %v5571_v37  ;;  %v5605_v37 = vpack.c.bf16 %v323_v45, %v321_v44 }
  0x9c   : > { %924 = vmatpush.bf16.msrb.mxu1 %v4368_v49  ;;  %710 = vmatmul.bf16.gmra.mxu3 %v5603_v50 }
  0x9d   : > { %868 = vmatpush.bf16.msrb.mxu0 %v4356_v26  ;;  %759 = vmatmul.bf16.gmra.mxu1 %v5605_v37 }
  0x9e   : > { %778 = vmatmul.bf16.vlgmr.msra.gmra.mxu0 %v5514_v54 }
  0xa1   : > { %869 = vmatpush.bf16.msrb.mxu0 %v4344_v39 }
  0xa5   : > { %870 = vmatpush.bf16.msrb.mxu0 %v4332_v51  ;;  %803 = vmatmul.bf16.gmra.mxu2 %v5586_v4 }
  0xa9   : > { %871 = vmatpush.bf16.msrb.mxu0 %v4320_v57  ;;  %v4589_v57 = vld [vmem:[#allocation8 + $0xb4] sm:$0xf0] }
  0xaa   : > { %v4592_v61 = vor.u32 %v4865_v53, %v4589_v57 }
  0xac   : > { %715 = vmatmul.bf16.gmra.mxu3 %v5615_v9  ;;  %3785 = vmatpush.bf16.msra.mxu1 %v4592_v61 }
  0xad   : > { %872 = vmatpush.bf16.msrb.mxu0 %v4308_v60  ;;  %764 = vmatmul.bf16.gmra.mxu1 %v5617_v12 }
  0xae   : > { %783 = vmatmul.bf16.gmra.mxu0 %v5534_v10 }
  0xb0   : > { %3786 = vmatpush.bf16.msra.mxu1 %v4580_v15 }
  0xb1   : > { %873 = vmatpush.bf16.msrb.mxu0 %v4296_v2 }
  0xb5   : > { %874 = vmatpush.bf16.msrb.mxu0 %v4284_v14  ;;  %808 = vmatmul.bf16.gmra.mxu2 %v5603_v50 }
  0xb9   : > { %875 = vmatpush.bf16.msrb.mxu0 %v4272_v17 }
  0xbc   : > { %827 = vmatmul.bf16.vlgmr.msrb.gmra.mxu3 %v5567_v35 }
  0xbd   : > { %925 = vmatmul.bf16.vlgmr.msrb.gmra.mxu1 %v5567_v35  ;;  %v4575_v35 = vld [vmem:[#allocation8 + $0x90] sm:$0xf] }
  0xbe   : > { %876 = vmatmul.bf16.vlgmr.msrb.gmra.mxu0 %v5514_v54  ;;  %v5637_v54 = vperm.slane %v5631_v23, 0  ;;  %v4576_v25 = vor.u32 %v4863_v24, %v4575_v35  ;;  %v4568_v35 = vor.u32 %v4859_v18, %v4565_v19 }
  0xc0   : > { %3639 = vmatpush.bf16.msrb.mxu2 %v4576_v25  ;;  %3787 = vmatpush.bf16.msra.mxu1 %v4568_v35 }
  0xc4   : > { %3640 = vmatpush.bf16.msrb.mxu2 %v4564_v40  ;;  %v4553_v40 = vld [vmem:[#allocation8 + $0x6c] sm:$0xf0] }
  0xc5   : > { %813 = vmatmul.bf16.gmra.mxu2 %v5615_v9 }
  0xcc   : > { %832 = vmatmul.bf16.gmra.mxu3 %v5588_v5 }
  0xcd   : > { %930 = vmatmul.bf16.gmra.mxu1 %v5588_v5 }
  0xce   : > { %881 = vmatmul.bf16.gmra.mxu0 %v5534_v10 }
  0xd9   : > { %v681_v21 = vpop.f32.mrf.mxu0 }
  0xda   : > { %v740_v22 = vpop.f32.mrf.mxu1  ;;  %v682_v63 = vadd.f32 %v681_v21, %v5637_v54 }
  0xdc   : > { %837 = vmatmul.bf16.gmra.mxu3 %v5518_v56 }
  0xdd   : > { %935 = vmatmul.bf16.gmra.mxu1 %v5518_v56 }
  0xde   : > { %886 = vmatmul.bf16.gmra.mxu0 %v5516_v55 }
  0xdf   : > { %v691_v10 = vpop.f32.mrf.mxu3 }
  0xe0   : > { %v692_v5 = vadd.f32 %v691_v10, %v5637_v54 }
  0xe1   : > { %v5640_v26 = vpop.f32.mrf.mxu0 }
  0xe2   : > { %v5642_v27 = vadd.f32 %v740_v22, %v692_v5  ;;  %v742_v28 = vpop.f32.mrf.mxu1 }
  0xe4   : > { %8500 = vst [vmem:[#allocation15_spill] sm:$0xff] %v5642_v27  ;;  %v5658_v44 = vmul.f32 0.70710677, %v5642_v27 }
  0xe6   : > { %v1542_v52 = vmul.f32 %v5658_v44, %v5658_v44 }
  0xe7   : > { %v693_v29 = vpop.f32.mrf.mxu3 }
  0xe8   : > { %v694_v55 = vadd.f32 %v693_v29, %v5637_v54  ;;  %v5668_v58 = vmin.f32 %v1542_v52, 16.0  ;;  %v4851_v52 = vld [vmem:[#allocation8 + $0x38] sm:$0xf0] }
  0xe9   : > { %v5645_v31 = vpop.f32.mrf.mxu0 }
  0xea   : > { %v5647_v56 = vadd.f32 %v742_v28, %v694_v55  ;;  %v745_v32 = vpop.f32.mrf.mxu1  ;;  %v1544_v0 = vmul.f32 2.1237322e-06, %v5668_v58  ;;  %v684_v28 = vadd.f32 %v5640_v26, %v5637_v54 }
  0xec   : > { %8501 = vst [vmem:[#allocation16_spill] sm:$0xff] %v5647_v56  ;;  %842 = vmatmul.bf16.gmra.mxu3 %v5540_v13  ;;  %v5671_v59 = vmul.f32 0.70710677, %v5647_v56  ;;  %v1545_v16 = vadd.f32 0.00028619796, %v1544_v0 }
  0xed   : > { %940 = vmatmul.bf16.gmra.mxu1 %v5540_v13 }
  0xee   : > { %891 = vmatmul.bf16.gmra.mxu0 %v5536_v11  ;;  %v4857_v11 = vld [vmem:[#allocation8 + $0x68] sm:$0xf0]  ;;  %v1662_v8 = vmul.f32 %v5671_v59, %v5671_v59  ;;  %v1546_v10 = vmul.f32 %v1545_v16, %v5668_v58 }
  0xef   : > { %v696_v33 = vpop.f32.mrf.mxu3  ;;  %v4552_v47 = vor.u32 %v4857_v11, %v4551_v46 }
  0xf0   : > { %v697_v39 = vadd.f32 %v696_v33, %v5637_v54  ;;  %v5689_v20 = vmin.f32 %v1662_v8, 16.0  ;;  %v4854_v33 = vld [vmem:[#allocation8 + $0x50] sm:$0xf0]  ;;  %v1547_v11 = vadd.f32 0.0036580483, %v1546_v10 }
  0xf1   : > { %v5653_v41 = vpop.f32.mrf.mxu0  ;;  %3641 = vmatpush.bf16.msrb.mxu2 %v4552_v47  ;;  %v4848_v8 = vld [vmem:[#allocation8 + $0x20] sm:$0xf0] }
  0xf2   : > { %v5655_v42 = vadd.f32 %v745_v32, %v697_v39  ;;  %v747_v43 = vpop.f32.mrf.mxu1  ;;  %v1664_v25 = vmul.f32 2.1237322e-06, %v5689_v20  ;;  %v4539_v32 = vld [vmem:[#allocation8 + $0x48] sm:$0xf]  ;;  %v4856_v39 = vld [vmem:[#allocation8 + $0x64] sm:$0xf]  ;;  %v1548_v61 = vmul.f32 %v1547_v11, %v5668_v58  ;;  %v4516_v19 = vor.u32 %v4848_v8, %v4515_v7 }
  0xf3   : > { %v4540_v38 = vor.u32 %v4854_v33, %v4539_v32  ;;  %v4556_v26 = vor.u32 %v4856_v39, %v4553_v40  ;;  %v687_v11 = vadd.f32 %v5645_v31, %v5637_v54  ;;  %v4850_v7 = vld [vmem:[#allocation8 + $0x34] sm:$0xf]  ;;  %v4529_v8 = vld [vmem:[#allocation8 + $0x3c] sm:$0xf0] }
  0xf4   : > { %8502 = vst [vmem:[#allocation17_spill] sm:$0xff] %v5655_v42  ;;  %v1549_v18 = vadd.f32 0.05243302, %v1548_v61  ;;  %v4541_v61 = vld [vmem:[#allocation8 + $0x54] sm:$0xf0] }
  0xf5   : > { %3642 = vmatpush.bf16.msrb.mxu2 %v4540_v38  ;;  %3788 = vmatpush.bf16.msra.mxu1 %v4556_v26 }
  0xf7   : > { %v698_v45 = vpop.f32.mrf.mxu3 }
  0xf8   : > { %v699_v13 = vadd.f32 %v698_v45, %v5637_v54 }
  0xf9   : > { %v730_v48 = vpop.f32.mrf.mxu0 }
  0xfa   : > { %v5661_v49 = vadd.f32 %v747_v43, %v699_v13  ;;  %v750_v51 = vpop.f32.mrf.mxu1  ;;  %v5685_v14 = vadd.f32 %v730_v48, %v682_v63  ;;  %v1665_v13 = vadd.f32 0.00028619796, %v1664_v25 }
  0xfc   : > { %8503 = vst [vmem:[#allocation18_spill] sm:$0xff] %v5661_v49  ;;  %847 = vmatmul.bf16.gmra.mxu3 %v5569_v36  ;;  %v5692_v21 = vmul.f32 0.70710677, %v5685_v14  ;;  %v5695_v24 = vmul.f32 0.70710677, %v5661_v49  ;;  %v1666_v15 = vmul.f32 %v1665_v13, %v5689_v20 }
  0xfd   : > { %945 = vmatmul.bf16.gmra.mxu1 %v5569_v36  ;;  %8505 = vst [vmem:[#allocation20_spill] sm:$0xff] %v5685_v14 }
  0xfe   : > { %896 = vmatmul.bf16.gmra.mxu0 %v5565_v34  ;;  %v5677_v34 = vmul.f32 0.70710677, %v5655_v42  ;;  %v1062_v30 = vmul.f32 %v5692_v21, %v5692_v21  ;;  %v1902_v45 = vmul.f32 %v5695_v24, %v5695_v24 }
  0xff   : > { %v701_v60 = vpop.f32.mrf.mxu3 }
 0x100   : > { %v702_v62 = vadd.f32 %v701_v60, %v5637_v54  ;;  %v1782_v17 = vmul.f32 %v5677_v34, %v5677_v34  ;;  %v5715_v47 = vmin.f32 %v1062_v30, 16.0  ;;  %v5717_v57 = vmin.f32 %v1902_v45, 16.0  ;;  %v4845_v45 = vld [vmem:[#allocation8 + $0x8] sm:$0xf0] }
 0x101   : > { %v732_v1 = vpop.f32.mrf.mxu0  ;;  %v1550_v30 = vmul.f32 %v1549_v18, %v5668_v58 }
 0x102   : > { %v5679_v36 = vadd.f32 %v750_v51, %v702_v62  ;;  %v5681_v2 = vpop.f32.mrf.mxu1  ;;  %v5703_v29 = vmin.f32 %v1782_v17, 16.0  ;;  %v5710_v46 = vadd.f32 %v732_v1, %v684_v28  ;;  %v4527_v51 = vld [vmem:[#allocation8 + $0x30] sm:$0xf]  ;;  %8508 = vst [vmem:[#allocation23_spill] sm:$0xff] %v5717_v57  ;;  %v1904_v63 = vmul.f32 2.1237322e-06, %v5717_v57 }
 0x103   : > { %v1064_v3 = vmul.f32 2.1237322e-06, %v5715_v47  ;;  %v1075_v26 = vmul.f32 3.8918573e-05, %v5715_v47  ;;  %v1551_v31 = vadd.f32 0.18741608, %v1550_v30  ;;  %v4532_v30 = vor.u32 %v4850_v7, %v4529_v8 }
 0x104   : > { %8504 = vst [vmem:[#allocation19_spill] sm:$0xff] %v5679_v36  ;;  %v1784_v43 = vmul.f32 2.1237322e-06, %v5703_v29  ;;  %v5720_v60 = vmul.f32 0.70710677, %v5710_v46 }
 0x105   : > { %8506 = vst [vmem:[#allocation21_spill] sm:$0xff] %v5703_v29  ;;  %v1905_v35 = vadd.f32 0.00028619796, %v1904_v63  ;;  %v1065_v10 = vadd.f32 0.00028619796, %v1064_v3 }
 0x106   : > { %8507 = vst [vmem:[#allocation22_spill] sm:$0xff] %v5710_v46  ;;  %v1785_v53 = vadd.f32 0.00028619796, %v1784_v43  ;;  %v1182_v17 = vmul.f32 %v5720_v60, %v5720_v60  ;;  %v5737_v25 = vmul.f32 0.70710677, %v5679_v36 }
 0x107   : > { %v703_v22 = vpop.f32.mrf.mxu3  ;;  %v4503_v43 = vld [vmem:[#allocation8] sm:$0xf]  ;;  %v1906_v13 = vmul.f32 %v1905_v35, %v5717_v57 }
 0x108   : > { %v1786_v16 = vmul.f32 %v1785_v53, %v5703_v29  ;;  %v5741_v33 = vmin.f32 %v1182_v17, 16.0  ;;  %v704_v39 = vadd.f32 %v703_v22, %v5637_v54  ;;  %v4504_v63 = vor.u32 %v4845_v45, %v4503_v43  ;;  %v4847_v45 = vld [vmem:[#allocation8 + $0x1c] sm:$0xf] }
 0x109   : > { %v5699_v5 = vpop.f32.mrf.mxu0 }
 0x10a   : > { %v755_v55 = vpop.f32.mrf.mxu1  ;;  %v1787_v32 = vadd.f32 0.0036580483, %v1786_v16  ;;  %v1184_v22 = vmul.f32 2.1237322e-06, %v5741_v33  ;;  %v5764_v3 = vadd.f32 %v5681_v2, %v704_v39  ;;  %v1907_v16 = vadd.f32 0.0036580483, %v1906_v13 }
 0x10c   : > { %852 = vmatmul.bf16.gmra.mxu3 %v5590_v6  ;;  %v1788_v53 = vmul.f32 %v1787_v32, %v5703_v29  ;;  %8511 = vst [vmem:[#allocation26_spill] sm:$0xff] %v5764_v3  ;;  %v5776_v39 = vmul.f32 0.70710677, %v5764_v3  ;;  %v1908_v13 = vmul.f32 %v1907_v16, %v5717_v57 }
 0x10d   : > { %950 = vmatmul.bf16.gmra.mxu1 %v5590_v6  ;;  %v4528_v6 = vor.u32 %v4851_v52, %v4527_v51  ;;  %v2022_v51 = vmul.f32 %v5737_v25, %v5737_v25 }
 0x10e   : > { %901 = vmatmul.bf16.gmra.mxu0 %v5586_v4  ;;  %v2142_v8 = vmul.f32 %v5776_v39, %v5776_v39 }
 0x10f   : > { %v706_v48 = vpop.f32.mrf.mxu3  ;;  %3643 = vmatpush.bf16.msrb.mxu2 %v4528_v6  ;;  %v5760_v6 = vadd.f32 %v5699_v5, %v687_v11  ;;  %v5766_v18 = vmin.f32 %v2022_v51, 16.0  ;;  %v1185_v5 = vadd.f32 0.00028619796, %v1184_v22 }
 0x110   : > { %v707_v4 = vadd.f32 %v706_v48, %v5637_v54  ;;  %v1066_v48 = vmul.f32 %v1065_v10, %v5715_v47  ;;  %v1789_v10 = vadd.f32 0.05243302, %v1788_v53  ;;  %v1552_v53 = vmul.f32 %v1551_v31, %v5668_v58 }
 0x111   : > { %v5724_v62 = vpop.f32.mrf.mxu0  ;;  %8510 = vst [vmem:[#allocation25_spill] sm:$0xff] %v5760_v6  ;;  %v1195_v31 = vmul.f32 3.8918573e-05, %v5741_v33 }
 0x112   : > { %v5727_v0 = vadd.f32 %v755_v55, %v707_v4  ;;  %v5729_v1 = vpop.f32.mrf.mxu1  ;;  %v1667_v55 = vadd.f32 0.0036580483, %v1666_v15  ;;  %v4853_v4 = vld [vmem:[#allocation8 + $0x4c] sm:$0xf]  ;;  %v1076_v15 = vadd.f32 0.001143296, %v1075_v26  ;;  %v1790_v7 = vmul.f32 %v1789_v10, %v5703_v29 }
 0x113   : > { %3644 = vmatpush.bf16.msrb.mxu2 %v4516_v19  ;;  %v1067_v17 = vadd.f32 0.0036580483, %v1066_v48  ;;  %8512 = vst [vmem:[#allocation27_spill] sm:$0xff] %v5766_v18  ;;  %v4544_v19 = vor.u32 %v4853_v4, %v4541_v61  ;;  %v4517_v26 = vld [vmem:[#allocation8 + $0x24] sm:$0xf0] }
 0x114   : > { %8509 = vst [vmem:[#allocation24_spill] sm:$0xff] %v5727_v0  ;;  %v1668_v52 = vmul.f32 %v1667_v55, %v5689_v20  ;;  %v2024_v55 = vmul.f32 2.1237322e-06, %v5766_v18  ;;  %v1077_v11 = vmul.f32 %v1076_v15, %v5715_v47  ;;  %v4520_v61 = vor.u32 %v4847_v45, %v4517_v26 }
 0x115   : > { %3789 = vmatpush.bf16.msra.mxu1 %v4544_v19  ;;  %v1068_v48 = vmul.f32 %v1067_v17, %v5715_v47  ;;  %v1791_v26 = vadd.f32 0.18741608, %v1790_v7 }
 0x116   : > { %v1669_v35 = vadd.f32 0.05243302, %v1668_v52  ;;  %v1186_v52 = vmul.f32 %v1185_v5, %v5741_v33  ;;  %v2025_v22 = vadd.f32 0.00028619796, %v2024_v55  ;;  %v1078_v15 = vadd.f32 0.014752088, %v1077_v11 }
 0x117   : > { %v5739_v28 = vpop.f32.mrf.mxu3  ;;  %3645 = vmatpush.bf16.msrb.mxu2 %v4504_v63  ;;  %v1069_v16 = vadd.f32 0.05243302, %v1068_v48  ;;  %v1553_v55 = vadd.f32 1.1283791, %v1552_v53  ;;  %v689_v11 = vadd.f32 %v5653_v41, %v5637_v54 }
 0x118   : > { %v1670_v63 = vmul.f32 %v1669_v35, %v5689_v20  ;;  %v1187_v19 = vadd.f32 0.0036580483, %v1186_v52  ;;  %v1079_v5 = vmul.f32 %v1078_v15, %v5715_v47  ;;  %v2026_v35 = vmul.f32 %v2025_v22, %v5766_v18 }
 0x119   : > { %3790 = vmatpush.bf16.msra.mxu1 %v4532_v30  ;;  %v1196_v30 = vadd.f32 0.001143296, %v1195_v31  ;;  %v1070_v53 = vmul.f32 %v1069_v16, %v5715_v47  ;;  %v5826_v31 = vmul.f32 %v1553_v55, %v5658_v44 }
 0x11a   : > { %v760_v40 = vpop.f32.mrf.mxu1  ;;  %v1671_v45 = vadd.f32 0.18741608, %v1670_v63  ;;  %v1080_v15 = vadd.f32 0.112945676, %v1079_v5  ;;  %v1188_v63 = vmul.f32 %v1187_v19, %v5741_v33  ;;  %v2027_v7 = vadd.f32 0.0036580483, %v2026_v35 }
 0x11b   : > { %v5744_v38 = vpop.f32.mrf.mxu0  ;;  %v1197_v22 = vmul.f32 %v1196_v30, %v5741_v33  ;;  %8516 = vst [vmem:[#allocation31_spill] sm:$0xff] %v5826_v31  ;;  %v1792_v19 = vmul.f32 %v1791_v26, %v5703_v29  ;;  %v5831_v30 = vadd.f32 %v5724_v62, %v689_v11 }
 0x11c   : > { %857 = vmatmul.bf16.gmra.mxu3 %v5605_v37  ;;  %v1672_v5 = vmul.f32 %v1671_v45, %v5689_v20  ;;  %v2028_v55 = vmul.f32 %v2027_v7, %v5766_v18 }
 0x11d   : > { %955 = vmatmul.bf16.gmra.mxu1 %v5605_v37  ;;  %v5770_v37 = vmul.f32 0.70710677, %v5760_v6  ;;  %v1198_v16 = vadd.f32 0.014752088, %v1197_v22  ;;  %8517 = vst [vmem:[#allocation32_spill] sm:$0xff] %v5831_v30 }
 0x11e   : > { %906 = vmatmul.bf16.gmra.mxu0 %v5603_v50  ;;  %3791 = vmatpush.bf16.msra.mxu1 %v4520_v61  ;;  %v5816_v61 = vmul.f32 0.5, %v5685_v14  ;;  %v5846_v22 = vmul.f32 0.70710677, %v5831_v30 }
 0x11f   : > { %v711_v50 = vpop.f32.mrf.mxu3  ;;  %v1302_v4 = vmul.f32 %v5770_v37, %v5770_v37  ;;  %v1199_v14 = vmul.f32 %v1198_v16, %v5741_v33 }
 0x120   : > { %v712_v2 = vadd.f32 %v711_v50, %v5637_v54  ;;  %v5797_v50 = vmul.f32 0.5, %v5642_v27 }
 0x121   : > { %v5801_v10 = vmin.f32 %v1302_v4, 16.0  ;;  %v5813_v4 = vmul.f32 0.5, %v5655_v42  ;;  %v1200_v11 = vadd.f32 0.112945676, %v1199_v14 }
 0x122   : > { %v5778_v43 = vpop.f32.mrf.mxu1  ;;  %v5783_v51 = vadd.f32 %v760_v40, %v712_v2  ;;  %v1909_v40 = vadd.f32 0.05243302, %v1908_v13  ;;  %8514 = vst [vmem:[#allocation29_spill] sm:$0xff] %v5797_v50  ;;  %v5807_v13 = vmin.f32 %v2142_v8, 16.0 }
 0x123   : > { %v5773_v32 = vpop.f32.mrf.mxu0  ;;  %8515 = vst [vmem:[#allocation30_spill] sm:$0xff] %v5813_v4  ;;  %v1304_v8 = vmul.f32 2.1237322e-06, %v5801_v10  ;;  %v1201_v16 = vmul.f32 %v1200_v11, %v5741_v33  ;;  %v4844_v4 = vld [vmem:[#allocation8 + $0x4] sm:$0xf] }
 0x124   : > { %8513 = vst [vmem:[#allocation28_spill] sm:$0xff] %v5783_v51  ;;  %v1910_v52 = vmul.f32 %v1909_v40, %v5717_v57  ;;  %v2144_v41 = vmul.f32 2.1237322e-06, %v5807_v13  ;;  %v1081_v40 = vmul.f32 %v1080_v15, %v5715_v47  ;;  %v5835_v15 = vmul.f32 0.70710677, %v5727_v0 }
 0x125   : > { %v1305_v45 = vadd.f32 0.00028619796, %v1304_v8 }
 0x126   : > { %v1911_v42 = vadd.f32 0.18741608, %v1910_v52  ;;  %v1082_v27 = vadd.f32 0.4994258, %v1081_v40  ;;  %v2145_v3 = vadd.f32 0.00028619796, %v2144_v41 }
 0x127   : > { %v5793_v17 = vpop.f32.mrf.mxu3  ;;  %v1673_v52 = vadd.f32 1.1283791, %v1672_v5  ;;  %v1793_v40 = vadd.f32 1.1283791, %v1792_v19  ;;  %v2262_v5 = vmul.f32 %v5835_v15, %v5835_v15  ;;  %v1306_v19 = vmul.f32 %v1305_v45, %v5801_v10 }
 0x128   : > { %v1083_v62 = vmul.f32 %v1082_v27, %v5715_v47  ;;  %v1912_v7 = vmul.f32 %v1911_v42, %v5717_v57  ;;  %v2146_v14 = vmul.f32 %v2145_v3, %v5807_v13  ;;  %v1422_v3 = vmul.f32 %v5846_v22, %v5846_v22 }
 0x129   : > { %v5866_v42 = vmul.f32 %v1673_v52, %v5671_v59  ;;  %v5884_v11 = vmin.f32 %v2262_v5, 16.0 }
 0x12a   : > { %v765_v48 = vpop.f32.mrf.mxu1  ;;  %v5853_v8 = vadd.f32 1.0, %v1083_v62  ;;  %v5874_v62 = vperm.slane %v5631_v23, 2  ;;  %v2147_v45 = vadd.f32 0.0036580483, %v2146_v14  ;;  %v4505_v14 = vld [vmem:[#allocation8 + $0xc] sm:$0xf0] }
 0x12b   : > { %v5803_v2 = vpop.f32.mrf.mxu0  ;;  %8520 = vst [vmem:[#allocation35_spill] sm:$0xff] %v5866_v42 }
 0x12c   : > { %862 = vmatmul.bf16.gmra.mxu3 %v5617_v12  ;;  %5025 = vrcp.f32 %v5853_v8  ;;  %vm1090_vm1 = vweird.f32 %v5853_v8 }
 0x12d   : > { %960 = vmatmul.bf16.gmra.mxu1 %v5617_v12  ;;  %v1189_v12 = vadd.f32 0.05243302, %v1188_v63 }
 0x12e   : > { %911 = vmatmul.bf16.gmra.mxu0 %v5615_v9  ;;  %v1071_v9 = vadd.f32 0.18741608, %v1070_v53  ;;  %v5843_v53 = vmul.f32 0.5, %v5679_v36 }
 0x12f   : > { %v716_v35 = vpop.f32.mrf.mxu3  ;;  %v1190_v27 = vmul.f32 %v1189_v12, %v5741_v33  ;;  %v5869_v12 = vmul.f32 0.5, %v5710_v46 }
 0x130   : > { %v717_v44 = vadd.f32 %v716_v35, %v5637_v54  ;;  %8518 = vst [vmem:[#allocation33_spill] sm:$0xff] %v5843_v53  ;;  %v1072_v35 = vmul.f32 %v1071_v9, %v5715_v47  ;;  %v5879_v47 = vadd.f32 1.1283791, %v1912_v7  ;;  %v5882_v9 = vmul.f32 0.5, %v5760_v6 }
 0x131   : > { %v1191_v59 = vadd.f32 0.18741608, %v1190_v27  ;;  %v5894_v6 = vmul.f32 0.5, %v5727_v0  ;;  %v5897_v27 = vmin.f32 %v1422_v3, 16.0 }
 0x132   : > { %v5848_v63 = vadd.f32 %v765_v48, %v717_v44  ;;  %v5850_v41 = vpop.f32.mrf.mxu1  ;;  %v709_v48 = vadd.f32 %v5739_v28, %v5637_v54  ;;  %v2029_v44 = vadd.f32 0.05243302, %v2028_v55  ;;  %v5877_v28 = vmul.f32 %v1793_v40, %v5677_v34  ;;  %8522 = vst [vmem:[#allocation37_spill] sm:$0xff] %v5882_v9  ;;  %v5026_v5 = vpop.eup %5025 }
 0x133   : > { %v5839_v26 = vpop.f32.mrf.mxu0  ;;  %v1202_v55 = vadd.f32 0.4994258, %v1201_v16  ;;  %v1073_v46 = vadd.f32 1.1283791, %v1072_v35  ;;  %v1307_v34 = vadd.f32 0.0036580483, %v1306_v19  ;;  %v714_v35 = vadd.f32 %v5793_v17, %v5637_v54 }
 0x134   : > { %8519 = vst [vmem:[#allocation34_spill] sm:$0xff] %v5848_v63  ;;  %v5887_v52 = vadd.f32 %v5729_v1, %v709_v48  ;;  %v2030_v53 = vmul.f32 %v2029_v44, %v5766_v18  ;;  %v2264_v16 = vmul.f32 2.1237322e-06, %v5884_v11  ;;  %v5901_v48 = vperm.slane %v5631_v23, 1 }
 0x135   : > { %8521 = vst [vmem:[#allocation36_spill] sm:$0xff] %v5877_v28  ;;  %v1203_v7 = vmul.f32 %v1202_v55, %v5741_v33  ;;  %v4508_v55 = vor.u32 %v4844_v4, %v4505_v14  ;;  %v1192_v0 = vmul.f32 %v1191_v59, %v5741_v33  ;;  %v1074_v49 = vmul.f32 %v1073_v46, %v5692_v21 }
 0x136   : > { %8523 = vst [vmem:[#allocation38_spill] sm:$0xff] %v5887_v52  ;;  %v5910_v3 = vmul.f32 0.70710677, %v5887_v52  ;;  %v5915_v23 = vadd.f32 0.18741608, %v2030_v53  ;;  %v1086_v28 = vmul.f32 %v5026_v5, %v5853_v8  ;;  %v1308_v17 = vmul.f32 %v1307_v34, %v5801_v10 }
 0x137   : > { %v5889_v36 = vpop.f32.mrf.mxu3  ;;  %8524 = vst [vmem:[#allocation39_spill] sm:$0xff] %v5894_v6  ;;  %v5905_v19 = vadd.f32 1.0, %v1203_v7  ;;  %v2148_v6 = vmul.f32 %v2147_v45, %v5807_v13  ;;  %3792 = vmatpush.bf16.msra.mxu1 %v4508_v55  ;;  %v2265_v4 = vadd.f32 0.00028619796, %v2264_v16  ;;  %v1424_v33 = vmul.f32 2.1237322e-06, %v5897_v27 }
 0x138   : > { %v5922_v59 = vmul.f32 0.70710677, %v5783_v51  ;;  %v780_v45 = vadd.f32 %v5744_v38, %v5901_v48  ;;  %v5927_v21 = vadd.f32 %v5778_v43, %v714_v35  ;;  %v1087_v53 = vsub.f32 1.0, %v1086_v28 }
 0x139   : > { %5027 = vrcp.f32 %v5905_v19  ;;  %v1193_v7 = vadd.f32 1.1283791, %v1192_v0  ;;  %v2382_v34 = vmul.f32 %v5910_v3, %v5910_v3  ;;  %v1096_v16 = vand.u32 2147483648, %v5853_v8 }
 0x13a   : > { %v926_v44 = vpop.f32.mrf.mxu1  ;;  %8526 = vst [vmem:[#allocation41_spill] sm:$0xff] %v5927_v21  ;;  %vm1091_vm0 = vweird.f32 %v5026_v5  ;;  %v1094_v38 = vand.u32 2147483647, %v5853_v8  ;;  %v5940_v43 = vadd.f32 0.05243302, %v1308_v17  ;;  %v2266_v35 = vmul.f32 %v2265_v4, %v5884_v11 }
 0x13b   : > { %v877_v40 = vpop.f32.mrf.mxu0  ;;  %v1425_v28 = vadd.f32 0.00028619796, %v1424_v33  ;;  %v2502_v0 = vmul.f32 %v5922_v59, %v5922_v59  ;;  %v5946_v52 = vmul.f32 0.70710677, %v5927_v21  ;;  %v5954_v17 = vmul.f32 0.70710677, %v5848_v63  ;;  %vm1092_vm2 = vmor %vm1090_vm1, %vm1091_vm0 }
 0x13c   : > { %v878_v1 = vadd.f32 %v877_v40, %v5874_v62  ;;  %v1097_v4 = vor.u32 1.1754944e-38, %v1096_v16  ;;  %vm1095_vm3 = vcmp.eq.f32.partialorder %v1094_v38, 8.507059e+37  ;;  %v719_v16 = vadd.f32 %v5889_v36, %v5637_v54 }
 0x13d   : > { %8527 = vst [vmem:[#allocation42_spill] sm:$0xff] %v5946_v52  ;;  %v5962_v8 = vmin.f32 %v2502_v0, 16.0  ;;  %v2622_v9 = vmul.f32 %v5946_v52, %v5946_v52  ;;  %v1216_v38 = vand.u32 2147483648, %v5905_v19  ;;  %v2267_v54 = vadd.f32 0.0036580483, %v2266_v35 }
 0x13e   : > { %v5912_v40 = vadd.f32 %v926_v44, %v878_v1  ;;  %v5932_v1 = vadd.f32 0.05243302, %v2148_v6  ;;  %v1088_v44 = vmul.f32 %v5026_v5, %v1087_v53  ;;  %v5951_v53 = vmin.f32 %v2382_v34, 16.0  ;;  %8528 = vst [vmem:[#allocation43_spill] sm:$0xff] %v5954_v17 }
 0x13f   : > { %v828_v6 = vpop.f32.mrf.mxu3  ;;  %v5028_v55 = vpop.eup %5027  ;;  %vm1210_vm5 = vweird.f32 %v5905_v19 }
 0x140   : > { %8525 = vst [vmem:[#allocation40_spill] sm:$0xff] %v5912_v40  ;;  %v5930_v46 = vmul.f32 0.70710677, %v5912_v40  ;;  %v1089_v57 = vadd.f32 %v5026_v5, %v1088_v44  ;;  %v1206_v33 = vmul.f32 %v5028_v55, %v5905_v19  ;;  %v5958_v21 = vadd.f32 %v828_v6, %v780_v45 }
 0x141   : > { %v2384_v44 = vmul.f32 2.1237322e-06, %v5951_v53  ;;  %v1214_v45 = vand.u32 2147483647, %v5905_v19  ;;  %vm1211_vm4 = vweird.f32 %v5028_v55  ;;  %v1194_v6 = vmul.f32 %v1193_v7, %v5720_v60 }
 0x142   : > { %v1142_v14 = vmul.f32 %v5930_v46, %v5930_v46  ;;  %v1093_v31 = vsel %vm1092_vm2, %v5026_v5, %v1089_v57  ;;  %8529 = vst [vmem:[#allocation44_spill] sm:$0xff] %v5958_v21  ;;  %v1207_v56 = vsub.f32 1.0, %v1206_v33  ;;  %v2742_v57 = vmul.f32 %v5954_v17, %v5954_v17  ;;  %vm1212_vm6 = vmor %vm1210_vm5, %vm1211_vm4 }
 0x143   : > { %v1098_v34 = vsel %vm1095_vm3, %v1097_v4, %v1093_v31  ;;  %v5974_v31 = vmul.f32 0.70710677, %v5958_v21  ;;  %v5979_v4 = vadd.f32 %v5850_v41, %v719_v16  ;;  %v1217_v17 = vor.u32 1.1754944e-38, %v1216_v38  ;;  %v4683_v38 = vld [vmem:[#allocation8 + $0x168] sm:$0xf] }
 0x144   : > { %v5948_v50 = vmin.f32 %v1142_v14, 16.0  ;;  %v1426_v14 = vmul.f32 %v1425_v28, %v5897_v27  ;;  %v1099_v5 = vmul.f32 %v1098_v34, %v1074_v49  ;;  %v1208_v0 = vmul.f32 %v5028_v55, %v1207_v56 }
 0x145   : > { %8530 = vst [vmem:[#allocation45_spill] sm:$0xff] %v5979_v4  ;;  %v2385_v34 = vadd.f32 0.00028619796, %v2384_v44  ;;  %v5984_v52 = vmin.f32 %v2742_v57, 16.0  ;;  %vm1215_vm7 = vcmp.eq.f32.partialorder %v1214_v45, 8.507059e+37  ;;  %v1102_v7 = vmul.f32 %v5974_v31, %v5974_v31 }
 0x146   : > { %v1155_v42 = vmul.f32 3.8918573e-05, %v5948_v50  ;;  %v1427_v36 = vadd.f32 0.0036580483, %v1426_v14  ;;  %v1209_v33 = vadd.f32 %v5028_v55, %v1208_v0  ;;  %v4453_v56 = vclamps-f32 %v1099_v5, 1.0 }
 0x147   : > { %8532 = vst [vmem:[#allocation47_spill] sm:$0xff] %v5984_v52  ;;  %v1315_v16 = vmul.f32 3.8918573e-05, %v5801_v10  ;;  %v2744_v19 = vmul.f32 2.1237322e-06, %v5984_v52  ;;  %v2032_v5 = vmul.f32 %v5915_v23, %v5766_v18  ;;  %v6002_v45 = vmul.f32 0.5, %v5831_v30 }
 0x148   : > { %v1156_v29 = vadd.f32 0.001143296, %v1155_v42  ;;  %v2504_v42 = vmul.f32 2.1237322e-06, %v5962_v8  ;;  %v1213_v60 = vsel %vm1212_vm6, %v5028_v55, %v1209_v33  ;;  %v5997_v55 = vmul.f32 %v5879_v47, %v5695_v24  ;;  %v4914_v30 = vld [vmem:[#allocation8 + $0x230] sm:$0xf0] }
 0x149   : > { %v1218_v14 = vsel %vm1215_vm7, %v1217_v17, %v1213_v60  ;;  %8534 = vst [vmem:[#allocation49_spill] sm:$0xff] %v6002_v45  ;;  %v2982_v17 = vadd.f32 1.0, %v4453_v56  ;;  %v2150_v0 = vmul.f32 %v5932_v1, %v5807_v13  ;;  %v6006_v60 = vmin.f32 %v1102_v7, 16.0 }
 0x14a   : > { %v1157_v28 = vmul.f32 %v1156_v29, %v5948_v50  ;;  %v5982_v29 = vmin.f32 %v2622_v9, 16.0  ;;  %v2505_v35 = vadd.f32 0.00028619796, %v2504_v42  ;;  %v5992_v9 = vmul.f32 0.70710677, %v5979_v4  ;;  %8533 = vst [vmem:[#allocation48_spill] sm:$0xff] %v5997_v55  ;;  %v879_v4 = vpop.f32.mrf.mxu0 }
 0x14b   : > { %v1219_v57 = vmul.f32 %v1218_v14, %v1194_v6  ;;  %v4685_v6 = vld [vmem:[#allocation8 + $0x174] sm:$0xf0]  ;;  %v2268_v24 = vmul.f32 %v2267_v54, %v5884_v11  ;;  %v2386_v47 = vmul.f32 %v2385_v34, %v5951_v53  ;;  %v4779_v14 = vld [vmem:[#allocation8 + $0x228] sm:$0xf]  ;;  %v1316_v56 = vadd.f32 0.001143296, %v1315_v16 }
 0x14c   : > { %v1158_v49 = vadd.f32 0.014752088, %v1157_v28  ;;  %8531 = vst [vmem:[#allocation46_spill] sm:$0xff] %v5982_v29  ;;  %v2624_v41 = vmul.f32 2.1237322e-06, %v5982_v29  ;;  %v1428_v55 = vmul.f32 %v1427_v36, %v5897_v27  ;;  %v4780_v1 = vor.u32 %v4914_v30, %v4779_v14 }
 0x14d   : > { %v4890_v28 = vld [vmem:[#allocation8 + $0x170] sm:$0xf0]  ;;  %v4456_v42 = vclamps-f32 %v1219_v57, 1.0  ;;  %v2506_v57 = vmul.f32 %v2505_v35, %v5962_v8  ;;  %v2745_v7 = vadd.f32 0.00028619796, %v2744_v19  ;;  %v2862_v54 = vmul.f32 %v5992_v9, %v5992_v9 }
 0x14e   : > { %v1159_v44 = vmul.f32 %v1158_v49, %v5948_v50  ;;  %v4684_v33 = vor.u32 %v4890_v28, %v4683_v38  ;;  %v4889_v49 = vld [vmem:[#allocation8 + $0x16c] sm:$0xf]  ;;  %v2625_v38 = vadd.f32 0.00028619796, %v2624_v41  ;;  %v3030_v34 = vmul.f32 %v2982_v17, %v5816_v61  ;;  %3736 = vmatpush.bf16.msra.mxu0 %v4780_v1 }
 0x14f   : > { %v4688_v23 = vor.u32 %v4889_v49, %v4685_v6  ;;  %v2985_v45 = vadd.f32 1.0, %v4456_v42  ;;  %v1115_v16 = vmul.f32 3.8918573e-05, %v6006_v60  ;;  %v880_v36 = vadd.f32 %v879_v4, %v5874_v62  ;;  %v928_v49 = vpop.f32.mrf.mxu1 }
 0x150   : > { %v1160_v18 = vadd.f32 0.112945676, %v1159_v44  ;;  %3687 = vmatpush.bf16.msra.mxu3 %v4684_v33  ;;  %v2151_v44 = vadd.f32 0.18741608, %v2150_v0  ;;  %v2387_v42 = vadd.f32 0.0036580483, %v2386_v47  ;;  %v782_v30 = vadd.f32 %v5773_v32, %v5901_v48 }
 0x151   : > { %3834 = vmatpush.bf16.msra.mxu2 %v4688_v23  ;;  %v3033_v28 = vmul.f32 %v2985_v45, %v5869_v12  ;;  %v1317_v35 = vmul.f32 %v1316_v56, %v5801_v10  ;;  %v1310_v41 = vmul.f32 %v5940_v43, %v5801_v10  ;;  %v1144_v19 = vmul.f32 2.1237322e-06, %v5948_v50  ;;  %v830_v45 = vpop.f32.mrf.mxu3 }
 0x152   : > { %v1161_v61 = vmul.f32 %v1160_v18, %v5948_v50  ;;  %v2269_v17 = vadd.f32 0.05243302, %v2268_v24  ;;  %v1429_v33 = vadd.f32 0.05243302, %v1428_v55  ;;  %v2507_v4 = vadd.f32 0.0036580483, %v2506_v57 }
 0x153   : > { %v6025_v12 = vpack.c.bf16 %v3033_v28, %v3030_v34  ;;  %v2626_v0 = vmul.f32 %v2625_v38, %v5982_v29  ;;  %v2746_v32 = vmul.f32 %v2745_v7, %v5984_v52  ;;  %v6029_v6 = vmin.f32 %v2862_v54, 16.0 }
 0x154   : > { %v1116_v43 = vadd.f32 0.001143296, %v1115_v16  ;;  %v6033_v47 = vadd.f32 %v928_v49, %v880_v36  ;;  %v2033_v18 = vadd.f32 1.1283791, %v2032_v5  ;;  %v2388_v23 = vmul.f32 %v2387_v42, %v5951_v53 }
 0x155   : > { %8535 = vst [vmem:[#allocation50_spill] sm:$0xff] %v6025_v12  ;;  %3646 = vmatmul.bf16.vlgmr.msrb.gmra.mxu2 %v6025_v12  ;;  %3793 = vmatmul.bf16.vlgmr.msra.gmra.mxu1 %v6025_v12  ;;  %v6036_v24 = vadd.f32 %v830_v45, %v782_v30  ;;  %v1318_v55 = vadd.f32 0.014752088, %v1317_v35  ;;  %v2152_v14 = vmul.f32 %v2151_v44, %v5807_v13  ;;  %v2864_v56 = vmul.f32 2.1237322e-06, %v6029_v6 }
 0x156   : > { %8536 = vst [vmem:[#allocation51_spill] sm:$0xff] %v6029_v6  ;;  %v1145_v1 = vadd.f32 0.00028619796, %v1144_v19  ;;  %v1162_v57 = vadd.f32 0.4994258, %v1161_v61  ;;  %v2270_v7 = vmul.f32 %v2269_v17, %v5884_v11  ;;  %v1430_v54 = vmul.f32 %v1429_v33, %v5897_v27 }
 0x157   : > { %8537 = vst [vmem:[#allocation52_spill] sm:$0xff] %v6033_v47  ;;  %v1311_v38 = vadd.f32 0.18741608, %v1310_v41  ;;  %v2508_v34 = vmul.f32 %v2507_v4, %v5962_v8  ;;  %v2627_v28 = vadd.f32 0.0036580483, %v2626_v0  ;;  %v1117_v16 = vmul.f32 %v1116_v43, %v6006_v60 }
 0x158   : > { %8538 = vst [vmem:[#allocation53_spill] sm:$0xff] %v6036_v24  ;;  %v2747_v5 = vadd.f32 0.0036580483, %v2746_v32  ;;  %v6045_v36 = vmul.f32 0.70710677, %v6033_v47  ;;  %v1319_v35 = vmul.f32 %v1318_v55, %v5801_v10  ;;  %v1146_v61 = vmul.f32 %v1145_v1, %v5948_v50 }
 0x159   : > { %v2389_v42 = vadd.f32 0.05243302, %v2388_v23  ;;  %v1104_v44 = vmul.f32 2.1237322e-06, %v6006_v60  ;;  %v6049_v30 = vmul.f32 0.70710677, %v6036_v24  ;;  %v1163_v45 = vmul.f32 %v1162_v57, %v5948_v50 }
 0x15a   : > { %v2153_v41 = vadd.f32 1.1283791, %v2152_v14  ;;  %v2865_v19 = vadd.f32 0.00028619796, %v2864_v56  ;;  %v6055_v17 = vmul.f32 %v2033_v18, %v5737_v25  ;;  %v2271_v33 = vadd.f32 0.18741608, %v2270_v7 }
 0x15b   : > { %v1431_v4 = vadd.f32 0.18741608, %v1430_v54  ;;  %v2509_v0 = vadd.f32 0.05243302, %v2508_v34  ;;  %v2628_v49 = vmul.f32 %v2627_v28, %v5982_v29  ;;  %v2748_v32 = vmul.f32 %v2747_v5, %v5984_v52 }
 0x15c   : > { %v1118_v43 = vadd.f32 0.014752088, %v1117_v16  ;;  %v1262_v23 = vmul.f32 %v6045_v36, %v6045_v36  ;;  %v2390_v55 = vmul.f32 %v2389_v42, %v5951_v53  ;;  %v1105_v14 = vadd.f32 0.00028619796, %v1104_v44 }
 0x15d   : > { %v1222_v56 = vmul.f32 %v6049_v30, %v6049_v30  ;;  %v1320_v1 = vadd.f32 0.112945676, %v1319_v35  ;;  %v1312_v25 = vmul.f32 %v1311_v38, %v5801_v10  ;;  %v2866_v18 = vmul.f32 %v2865_v19, %v6029_v6 }
 0x15e   : > { %v1147_v57 = vadd.f32 0.0036580483, %v1146_v61  ;;  %v6066_v7 = vadd.f32 1.0, %v1163_v45  ;;  %v2272_v54 = vmul.f32 %v2271_v33, %v5884_v11  ;;  %v1432_v34 = vmul.f32 %v1431_v4, %v5897_v27 }
 0x15f   : > { %v6071_v28 = vmul.f32 0.5, %v5783_v51  ;;  %v2510_v5 = vmul.f32 %v2509_v0, %v5962_v8  ;;  %v2629_v16 = vadd.f32 0.05243302, %v2628_v49  ;;  %v2749_v42 = vadd.f32 0.05243302, %v2748_v32 }
 0x160   : > { %v1119_v44 = vmul.f32 %v1118_v43, %v6006_v60  ;;  %v6075_v35 = vmin.f32 %v1262_v23, 16.0  ;;  %v2391_v38 = vadd.f32 0.18741608, %v2390_v55  ;;  %v1106_v19 = vmul.f32 %v1105_v14, %v6006_v60 }
 0x161   : > { %8539 = vst [vmem:[#allocation54_spill] sm:$0xff] %v6071_v28  ;;  %v6078_v61 = vmin.f32 %v1222_v56, 16.0  ;;  %v1321_v45 = vmul.f32 %v1320_v1, %v5801_v10  ;;  %v1313_v33 = vadd.f32 1.1283791, %v1312_v25  ;;  %v2867_v4 = vadd.f32 0.0036580483, %v2866_v18 }
 0x162   : > { %v1148_v51 = vmul.f32 %v1147_v57, %v5948_v50  ;;  %5029 = vrcp.f32 %v6066_v7  ;;  %v6084_v0 = vmul.f32 %v2153_v41, %v5776_v39  ;;  %v2273_v49 = vadd.f32 1.1283791, %v2272_v54 }
 0x163   : > { %v1433_v32 = vadd.f32 1.1283791, %v1432_v34  ;;  %v2511_v43 = vadd.f32 0.18741608, %v2510_v5  ;;  %v2630_v23 = vmul.f32 %v2629_v16, %v5982_v29  ;;  %v2750_v55 = vmul.f32 %v2749_v42, %v5984_v52 }
 0x164   : > { %v1120_v14 = vadd.f32 0.112945676, %v1119_v44  ;;  %v1275_v56 = vmul.f32 3.8918573e-05, %v6075_v35  ;;  %v2392_v1 = vmul.f32 %v2391_v38, %v5951_v53  ;;  %v1107_v25 = vadd.f32 0.0036580483, %v1106_v19 }
 0x165   : > { %v1235_v18 = vmul.f32 3.8918573e-05, %v6078_v61  ;;  %v1322_v57 = vadd.f32 0.4994258, %v1321_v45  ;;  %v6092_v12 = vmul.f32 %v1313_v33, %v5770_v37  ;;  %v6096_v39 = vadd.f32 %v5803_v2, %v5901_v48 }
 0x166   : > { %v2868_v41 = vmul.f32 %v2867_v4, %v6029_v6  ;;  %v1149_v54 = vadd.f32 0.05243302, %v1148_v51  ;;  %v6100_v34 = vmul.f32 %v2273_v49, %v5835_v15  ;;  %v6103_v5 = vmul.f32 %v1433_v32, %v5846_v22 }
 0x167   : > { %v2512_v16 = vmul.f32 %v2511_v43, %v5962_v8  ;;  %v1264_v42 = vmul.f32 2.1237322e-06, %v6075_v35  ;;  %v2631_v37 = vadd.f32 0.18741608, %v2630_v23  ;;  %v2751_v38 = vadd.f32 0.18741608, %v2750_v55 }
 0x168   : > { %8540 = vst [vmem:[#allocation55_spill] sm:$0xff] %v6100_v34  ;;  %v6107_v44 = vpop.eup %5029  ;;  %v1121_v2 = vmul.f32 %v1120_v14, %v6006_v60  ;;  %v1276_v19 = vadd.f32 0.001143296, %v1275_v56  ;;  %v2393_v45 = vadd.f32 1.1283791, %v2392_v1  ;;  %v1108_v51 = vmul.f32 %v1107_v25, %v6006_v60 }
 0x169   : > { %v1236_v33 = vadd.f32 0.001143296, %v1235_v18  ;;  %v1323_v15 = vmul.f32 %v1322_v57, %v5801_v10  ;;  %v6113_v22 = vmul.f32 0.5, %v5848_v63  ;;  %v6117_v4 = vadd.f32 %v5839_v26, %v5901_v48 }
 0x16a   : > { %v2869_v49 = vadd.f32 0.05243302, %v2868_v41  ;;  %v1150_v32 = vmul.f32 %v1149_v54, %v5948_v50  ;;  %v2513_v43 = vadd.f32 1.1283791, %v2512_v16  ;;  %v1166_v23 = vmul.f32 %v6107_v44, %v6066_v7  ;;  %v882_v41 = vpop.f32.mrf.mxu0 }
 0x16b   : > { %8541 = vst [vmem:[#allocation56_spill] sm:$0xff] %v6113_v22  ;;  %v1265_v55 = vadd.f32 0.00028619796, %v1264_v42  ;;  %v1224_v14 = vmul.f32 2.1237322e-06, %v6078_v61  ;;  %v2632_v56 = vmul.f32 %v2631_v37, %v5982_v29  ;;  %v2752_v10 = vmul.f32 %v2751_v38, %v5984_v52 }
 0x16c   : > { %v1122_v1 = vadd.f32 0.4994258, %v1121_v2  ;;  %v1277_v25 = vmul.f32 %v1276_v19, %v6075_v35  ;;  %v6127_v26 = vmul.f32 %v2393_v45, %v5910_v3  ;;  %v1109_v18 = vadd.f32 0.05243302, %v1108_v51 }
 0x16d   : > { %v1237_v57 = vmul.f32 %v1236_v33, %v6078_v61  ;;  %v6130_v54 = vadd.f32 1.0, %v1323_v15  ;;  %v2870_v16 = vmul.f32 %v2869_v49, %v6029_v6  ;;  %v6134_v42 = vmul.f32 0.5, %v5912_v40 }
 0x16e   : > { %8542 = vst [vmem:[#allocation57_spill] sm:$0xff] %v6127_v26  ;;  %v1151_v37 = vadd.f32 0.18741608, %v1150_v32  ;;  %v883_v38 = vadd.f32 %v882_v41, %v5874_v62  ;;  %v6138_v2 = vmul.f32 %v2513_v43, %v5922_v59  ;;  %v1167_v19 = vsub.f32 1.0, %v1166_v23  ;;  %v931_v32 = vpop.f32.mrf.mxu1 }
 0x16f   : > { %v1266_v3 = vmul.f32 %v1265_v55, %v6075_v35  ;;  %v1225_v45 = vadd.f32 0.00028619796, %v1224_v14  ;;  %v6141_v51 = vadd.f32 1.1283791, %v2632_v56  ;;  %v6143_v33 = vadd.f32 1.1283791, %v2752_v10 }
 0x170   : > { %8543 = vst [vmem:[#allocation58_spill] sm:$0xff] %v6138_v2  ;;  %v1123_v15 = vmul.f32 %v1122_v1, %v6006_v60  ;;  %v1278_v49 = vadd.f32 0.014752088, %v1277_v25  ;;  %v1110_v40 = vmul.f32 %v1109_v18, %v6006_v60  ;;  %v1238_v63 = vadd.f32 0.014752088, %v1237_v57 }
 0x171   : > { %5031 = vrcp.f32 %v6130_v54  ;;  %v1435_v59 = vmul.f32 3.8918573e-05, %v5897_v27  ;;  %v2871_v43 = vadd.f32 0.18741608, %v2870_v16  ;;  %v1152_v23 = vmul.f32 %v1151_v37, %v5948_v50 }
 0x172   : > { %vm1170_vm8 = vweird.f32 %v6066_v7  ;;  %v6151_v55 = vadd.f32 %v931_v32, %v883_v38  ;;  %v1168_v14 = vmul.f32 %v6107_v44, %v1167_v19  ;;  %v1267_v56 = vadd.f32 0.0036580483, %v1266_v3 }
 0x173   : > { %v1226_v10 = vmul.f32 %v1225_v45, %v6078_v61  ;;  %v1436_v1 = vadd.f32 0.001143296, %v1435_v59  ;;  %v1174_v25 = vand.u32 2147483647, %v6066_v7  ;;  %v1176_v18 = vand.u32 2147483648, %v6066_v7 }
 0x174   : > { %8544 = vst [vmem:[#allocation59_spill] sm:$0xff] %v6151_v55  ;;  %v6157_v57 = vadd.f32 1.0, %v1123_v15  ;;  %v1279_v41 = vmul.f32 %v1278_v49, %v6075_v35  ;;  %vm1171_vm9 = vweird.f32 %v6107_v44  ;;  %v1111_v50 = vadd.f32 0.18741608, %v1110_v40 }
 0x175   : > { %v1239_v16 = vmul.f32 %v1238_v63, %v6078_v61  ;;  %v1437_v37 = vmul.f32 %v1436_v1, %v5897_v27  ;;  %v2872_v38 = vmul.f32 %v2871_v43, %v6029_v6  ;;  %v6165_v19 = vmul.f32 0.70710677, %v6151_v55  ;;  %vm6175_vm10 = vmor %vm1170_vm8, %vm1171_vm9 }
 0x176   : > { %v1555_v3 = vmul.f32 3.8918573e-05, %v5668_v58  ;;  %v1675_v45 = vmul.f32 3.8918573e-05, %v5689_v20  ;;  %v1169_v49 = vadd.f32 %v6107_v44, %v1168_v14  ;;  %v1268_v32 = vmul.f32 %v1267_v56, %v6075_v35 }
 0x177   : > { %v6169_v15 = vpop.eup %5031  ;;  %v1227_v40 = vadd.f32 0.0036580483, %v1226_v10  ;;  %v1438_v59 = vadd.f32 0.014752088, %v1437_v37  ;;  %v1153_v63 = vadd.f32 1.1283791, %v1152_v23  ;;  %5033 = vrcp.f32 %v6157_v57 }
 0x178   : > { %v1280_v1 = vadd.f32 0.112945676, %v1279_v41  ;;  %v1556_v22 = vadd.f32 0.001143296, %v1555_v3  ;;  %vm6180_vm11 = vcmp.eq.f32.partialorder %v1174_v25, 8.507059e+37  ;;  %v1177_v14 = vor.u32 1.1754944e-38, %v1176_v18 }
 0x179   : > { %v1112_v56 = vmul.f32 %v1111_v50, %v6006_v60  ;;  %v1240_v10 = vadd.f32 0.112945676, %v1239_v16  ;;  %v1326_v23 = vmul.f32 %v6169_v15, %v6130_v54  ;;  %v1439_v7 = vmul.f32 %v1438_v59, %v5897_v27 }
 0x17a   : > { %v1557_v37 = vmul.f32 %v1556_v22, %v5668_v58  ;;  %v1676_v28 = vadd.f32 0.001143296, %v1675_v45  ;;  %v1173_v41 = vsel %vm6175_vm10, %v6107_v44, %v1169_v49  ;;  %v1269_v25 = vadd.f32 0.05243302, %v1268_v32 }
 0x17b   : > { %v1228_v3 = vmul.f32 %v1227_v40, %v6078_v61  ;;  %v1382_v18 = vmul.f32 %v6165_v19, %v6165_v19  ;;  %v1281_v60 = vmul.f32 %v1280_v1, %v6075_v35  ;;  %v1440_v50 = vadd.f32 0.112945676, %v1439_v7  ;;  %v8549_v1 = vld [vmem:[#allocation16_spill] sm:$0xff] }
 0x17c   : > { %v1558_v16 = vadd.f32 0.014752088, %v1557_v37  ;;  %v1677_v52 = vmul.f32 %v1676_v28, %v5689_v20  ;;  %v6197_v59 = vadd.f32 1.1283791, %v2872_v38  ;;  %v1154_v22 = vmul.f32 %v1153_v63, %v5930_v46 }
 0x17d   : > { %v6201_v45 = vmul.f32 0.5, %v5958_v21  ;;  %v1113_v44 = vadd.f32 1.1283791, %v1112_v56  ;;  %v6203_v49 = vpop.eup %5033  ;;  %v1241_v32 = vmul.f32 %v1240_v10, %v6078_v61  ;;  %v1327_v40 = vsub.f32 1.0, %v1326_v23  ;;  %v8550_v10 = vld [vmem:[#allocation42_spill] sm:$0xff] }
 0x17e   : > { %v1441_v43 = vmul.f32 %v1440_v50, %v5897_v27  ;;  %v6208_v7 = vmul.f32 0.5, %v8549_v1  ;;  %v1178_v28 = vsel %vm6180_vm11, %v1177_v14, %v1173_v41  ;;  %v1270_v38 = vmul.f32 %v1269_v25, %v6075_v35  ;;  %v8552_v50 = vld [vmem:[#allocation43_spill] sm:$0xff]  ;;  %v4671_v41 = vld [vmem:[#allocation8 + $0x150] sm:$0xf]  ;;  %v4887_v25 = vld [vmem:[#allocation8 + $0x158] sm:$0xf0] }
 0x17f   : > { %v1229_v46 = vadd.f32 0.05243302, %v1228_v3  ;;  %v6213_v63 = vmin.f32 %v1382_v18, 16.0  ;;  %v1282_v37 = vadd.f32 0.4994258, %v1281_v60  ;;  %v1559_v21 = vmul.f32 %v1558_v16, %v5668_v58 }
 0x180   : > { %v1442_v56 = vadd.f32 0.4994258, %v1441_v43  ;;  %v1678_v2 = vadd.f32 0.014752088, %v1677_v52  ;;  %v6218_v23 = vmul.f32 %v6141_v51, %v8550_v10  ;;  %v6222_v1 = vmul.f32 %v6143_v33, %v8552_v50  ;;  %v4886_v3 = vld [vmem:[#allocation8 + $0x154] sm:$0xf] }
 0x181   : > { %v6225_v6 = vmul.f32 %v1113_v44, %v5974_v31  ;;  %v1126_v14 = vmul.f32 %v6203_v49, %v6157_v57  ;;  %v1242_v18 = vadd.f32 0.4994258, %v1241_v32  ;;  %v1328_v52 = vmul.f32 %v6169_v15, %v1327_v40  ;;  %v4673_v16 = vld [vmem:[#allocation8 + $0x15c] sm:$0xf0]  ;;  %v4767_v43 = vld [vmem:[#allocation8 + $0x210] sm:$0xf] }
 0x182   : > { %8551 = vst [vmem:[#allocation42_spill] sm:$0xff] %v6218_v23  ;;  %v1443_v60 = vmul.f32 %v1442_v56, %v5897_v27  ;;  %v4672_v51 = vor.u32 %v4887_v25, %v4671_v41  ;;  %v1179_v10 = vmul.f32 %v1178_v28, %v1154_v22  ;;  %v1271_v33 = vadd.f32 0.18741608, %v1270_v38  ;;  %v4911_v44 = vld [vmem:[#allocation8 + $0x218] sm:$0xf0] }
 0x183   : > { %8553 = vst [vmem:[#allocation43_spill] sm:$0xff] %v6222_v1  ;;  %v1230_v50 = vmul.f32 %v1229_v46, %v6078_v61  ;;  %v4676_v31 = vor.u32 %v4886_v3, %v4673_v16  ;;  %v4768_v23 = vor.u32 %v4911_v44, %v4767_v43  ;;  %v1560_v29 = vadd.f32 0.112945676, %v1559_v21  ;;  %v833_v43 = vpop.f32.mrf.mxu3  ;;  %v8556_v44 = vld [vmem:[#allocation21_spill] sm:$0xff] }
 0x184   : > { %v6232_v1 = vadd.f32 1.0, %v1443_v60  ;;  %3688 = vmatpush.bf16.msra.mxu3 %v4672_v51  ;;  %v1679_v32 = vmul.f32 %v1678_v2, %v5689_v20  ;;  %v1127_v26 = vsub.f32 1.0, %v1126_v14  ;;  %v1136_v40 = vand.u32 2147483648, %v6157_v57 }
 0x185   : > { %v1283_v27 = vmul.f32 %v1282_v37, %v6075_v35  ;;  %vm1330_vm12 = vweird.f32 %v6130_v54  ;;  %3835 = vmatpush.bf16.msra.mxu2 %v4676_v31  ;;  %vm1130_vm13 = vweird.f32 %v6157_v57  ;;  %v1243_v22 = vmul.f32 %v1242_v18, %v6078_v61  ;;  %3737 = vmatpush.bf16.msra.mxu0 %v4768_v23 }
 0x186   : > { %v1329_v28 = vadd.f32 %v6169_v15, %v1328_v52  ;;  %vm1331_vm14 = vweird.f32 %v6169_v15  ;;  %5035 = vrcp.f32 %v6232_v1  ;;  %v4455_v21 = vclamps-f32 %v1179_v10, 1.0 }
 0x187   : > { %v1272_v2 = vmul.f32 %v1271_v33, %v6075_v35  ;;  %v1334_v38 = vand.u32 2147483647, %v6130_v54  ;;  %v1336_v46 = vand.u32 2147483648, %v6130_v54  ;;  %v1231_v37 = vadd.f32 0.18741608, %v1230_v50  ;;  %vm6258_vm0 = vmor %vm1330_vm12, %vm1331_vm14 }
 0x188   : > { %v1384_v56 = vmul.f32 2.1237322e-06, %v6213_v63  ;;  %v1561_v14 = vmul.f32 %v1560_v29, %v5668_v58  ;;  %v1680_v41 = vadd.f32 0.112945676, %v1679_v32  ;;  %vm1131_vm15 = vweird.f32 %v6203_v49 }
 0x189   : > { %v1134_v25 = vand.u32 2147483647, %v6157_v57  ;;  %v6250_v3 = vor.u32 1.1754944e-38, %v1136_v40  ;;  %v6252_v23 = vadd.f32 1.0, %v1283_v27  ;;  %v1128_v18 = vmul.f32 %v6203_v49, %v1127_v26  ;;  %v884_v26 = vpop.f32.mrf.mxu0  ;;  %vm6295_vm3 = vmor %vm1130_vm13, %vm1131_vm15  ;;  %v933_v57 = vpop.f32.mrf.mxu1 }
 0x18a   : > { %v6263_v29 = vadd.f32 1.0, %v1243_v22  ;;  %v1333_v52 = vsel %vm6258_vm0, %v6169_v15, %v1329_v28  ;;  %v1562_v60 = vadd.f32 0.4994258, %v1561_v14  ;;  %v6268_v51 = vadd.f32 1.0, %v4455_v21 }
 0x18b   : > { %vm1335_vm1 = vcmp.eq.f32.partialorder %v1334_v38, 8.507059e+37  ;;  %v1337_v16 = vor.u32 1.1754944e-38, %v1336_v46  ;;  %v1681_v54 = vmul.f32 %v1680_v41, %v5689_v20  ;;  %v1273_v33 = vadd.f32 1.1283791, %v1272_v2 }
 0x18c   : > { %v5036_v10 = vpop.eup %5035  ;;  %v1232_v50 = vmul.f32 %v1231_v37, %v6078_v61  ;;  %v1385_v31 = vadd.f32 0.00028619796, %v1384_v56  ;;  %v1795_v32 = vmul.f32 3.8918573e-05, %v8556_v44  ;;  %vm6273_vm2 = vcmp.eq.f32.partialorder %v1134_v25, 8.507059e+37 }
 0x18d   : > { %5037 = vrcp.f32 %v6252_v23  ;;  %v1338_v15 = vsel %vm1335_vm1, %v1337_v16, %v1333_v52  ;;  %v1446_v27 = vmul.f32 %v5036_v10, %v6232_v1  ;;  %v1563_v22 = vmul.f32 %v1562_v60, %v5668_v58 }
 0x18e   : > { %v1129_v28 = vadd.f32 %v6203_v49, %v1128_v18  ;;  %v1296_v21 = vand.u32 2147483648, %v6252_v23  ;;  %5039 = vrcp.f32 %v6263_v29  ;;  %v6284_v61 = vadd.f32 %v833_v43, %v6096_v39 }
 0x18f   : > { %v1447_v2 = vsub.f32 1.0, %v1446_v27  ;;  %v885_v38 = vadd.f32 %v884_v26, %v5874_v62  ;;  %v6287_v46 = vadd.f32 1.0, %v1563_v22  ;;  %v1682_v37 = vadd.f32 0.4994258, %v1681_v54  ;;  %v4659_v27 = vld [vmem:[#allocation8 + $0x138] sm:$0xf] }
 0x190   : > { %8559 = vst [vmem:[#allocation21_spill] sm:$0xff] %v6284_v61  ;;  %v1233_v56 = vadd.f32 1.1283791, %v1232_v50  ;;  %v1339_v14 = vmul.f32 %v1338_v15, %v6092_v12  ;;  %v1456_v58 = vand.u32 2147483648, %v6232_v1  ;;  %v1796_v41 = vadd.f32 0.001143296, %v1795_v32 }
 0x191   : > { %v1448_v39 = vmul.f32 %v5036_v10, %v1447_v2  ;;  %vm1451_vm4 = vweird.f32 %v5036_v10  ;;  %v1454_v35 = vand.u32 2147483647, %v6232_v1  ;;  %5041 = vrcp.f32 %v6287_v46  ;;  %v936_v34 = vpop.f32.mrf.mxu1 }
 0x192   : > { %v6302_v18 = vmul.f32 %v1273_v33, %v6045_v36  ;;  %v1386_v52 = vmul.f32 %v1385_v31, %v6213_v63  ;;  %v6307_v60 = vmul.f32 0.70710677, %v6284_v61  ;;  %vm1450_vm5 = vweird.f32 %v6232_v1 }
 0x193   : > { %v6309_v16 = vpop.eup %5037  ;;  %v1449_v43 = vadd.f32 %v5036_v10, %v1448_v39  ;;  %v6312_v54 = vadd.f32 %v933_v57, %v885_v38  ;;  %v1683_v50 = vmul.f32 %v1682_v37, %v5689_v20  ;;  %v1133_v36 = vsel %vm6295_vm3, %v6203_v49, %v1129_v28  ;;  %vm1452_vm6 = vmor %vm1450_vm5, %vm1451_vm4  ;;  %v4884_v28 = vld [vmem:[#allocation8 + $0x140] sm:$0xf0] }
 0x194   : > { %v6315_v26 = vpop.eup %5039  ;;  %v6320_v33 = vor.u32 1.1754944e-38, %v1296_v21  ;;  %v4459_v31 = vclamps-f32 %v1339_v14, 1.0  ;;  %v1457_v32 = vor.u32 1.1754944e-38, %v1456_v58  ;;  %v6324_v15 = vmul.f32 %v1233_v56, %v6049_v30 }
 0x195   : > { %8562 = vst [vmem:[#allocation60_spill] sm:$0xff] %v6312_v54  ;;  %v1453_v1 = vsel %vm1452_vm6, %v5036_v10, %v1449_v43  ;;  %vm1455_vm7 = vcmp.eq.f32.partialorder %v1454_v35, 8.507059e+37  ;;  %v1797_v20 = vmul.f32 %v1796_v41, %v8556_v44  ;;  %v1286_v22 = vmul.f32 %v6309_v16, %v6252_v23  ;;  %v835_v35 = vpop.f32.mrf.mxu3 }
 0x196   : > { %v1387_v2 = vadd.f32 0.0036580483, %v1386_v52  ;;  %v1458_v38 = vsel %vm1455_vm7, %v1457_v32, %v1453_v1  ;;  %v1342_v49 = vmul.f32 %v6307_v60, %v6307_v60  ;;  %v6333_v30 = vmul.f32 0.70710677, %v6312_v54 }
 0x197   : > { %v5042_v21 = vpop.eup %5041  ;;  %v1459_v37 = vmul.f32 %v1458_v38, %v6103_v5  ;;  %v6335_v10 = vadd.f32 1.0, %v1683_v50  ;;  %v4660_v56 = vor.u32 %v4884_v28, %v4659_v27  ;;  %v6340_v14 = vsel %vm6273_vm2, %v6250_v3, %v1133_v36  ;;  %v4883_v38 = vld [vmem:[#allocation8 + $0x13c] sm:$0xf]  ;;  %v4661_v28 = vld [vmem:[#allocation8 + $0x144] sm:$0xf0] }
 0x198   : > { %8563 = vst [vmem:[#allocation61_spill] sm:$0xff] %v6333_v30  ;;  %v1246_v58 = vmul.f32 %v6315_v26, %v6263_v29  ;;  %v2988_v41 = vadd.f32 1.0, %v4459_v31  ;;  %v1566_v25 = vmul.f32 %v5042_v21, %v6287_v46  ;;  %v1576_v5 = vand.u32 2147483648, %v6287_v46  ;;  %v887_v31 = vpop.f32.mrf.mxu0 }
 0x199   : > { %v4462_v39 = vclamps-f32 %v1459_v37, 1.0  ;;  %5043 = vrcp.f32 %v6335_v10  ;;  %3689 = vmatpush.bf16.msra.mxu3 %v4660_v56  ;;  %v1798_v52 = vadd.f32 0.014752088, %v1797_v20  ;;  %vm1570_vm8 = vweird.f32 %v6287_v46  ;;  %v8565_v37 = vld [vmem:[#allocation37_spill] sm:$0xff] }
 0x19a   : > { %v1567_v57 = vsub.f32 1.0, %v1566_v25  ;;  %vm1571_vm9 = vweird.f32 %v5042_v21  ;;  %v1574_v3 = vand.u32 2147483647, %v6287_v46  ;;  %v1287_v40 = vsub.f32 1.0, %v1286_v22  ;;  %v8566_v56 = vld [vmem:[#allocation49_spill] sm:$0xff] }
 0x19b   : > { %v2991_v43 = vadd.f32 1.0, %v4462_v39  ;;  %v6349_v50 = vmin.f32 %v1342_v49, 16.0  ;;  %v1502_v36 = vmul.f32 %v6333_v30, %v6333_v30  ;;  %vm1290_vm10 = vweird.f32 %v6252_v23  ;;  %vm6364_vm11 = vmor %vm1570_vm8, %vm1571_vm9 }
 0x19c   : > { %v1247_v32 = vsub.f32 1.0, %v1246_v58  ;;  %v6355_v1 = vadd.f32 %v835_v35, %v6117_v4  ;;  %v888_v27 = vadd.f32 %v887_v31, %v5874_v62  ;;  %v1568_v20 = vmul.f32 %v5042_v21, %v1567_v57  ;;  %v4908_v31 = vld [vmem:[#allocation8 + $0x200] sm:$0xf0] }
 0x19d   : > { %v3036_v22 = vmul.f32 %v2988_v41, %v8565_v37  ;;  %v3039_v49 = vmul.f32 %v2991_v43, %v8566_v56  ;;  %v1344_v25 = vmul.f32 2.1237322e-06, %v6349_v50  ;;  %v1577_v4 = vor.u32 1.1754944e-38, %v1576_v5  ;;  %v4755_v41 = vld [vmem:[#allocation8 + $0x1f8] sm:$0xf] }
 0x19e   : > { %8564 = vst [vmem:[#allocation62_spill] sm:$0xff] %v6355_v1  ;;  %v1388_v58 = vmul.f32 %v1387_v2, %v6213_v63  ;;  %v1569_v35 = vadd.f32 %v5042_v21, %v1568_v20  ;;  %vm6369_vm12 = vcmp.eq.f32.partialorder %v1574_v3, 8.507059e+37  ;;  %v1799_v43 = vmul.f32 %v1798_v52, %v8556_v44 }
 0x19f   : > { %v5044_v37 = vpop.eup %5043  ;;  %v1288_v56 = vmul.f32 %v6309_v16, %v1287_v40  ;;  %v6375_v46 = vpack.c.bf16 %v3039_v49, %v3036_v22  ;;  %v6377_v12 = vmin.f32 %v1502_v36, 16.0  ;;  %v4664_v5 = vor.u32 %v4883_v38, %v4661_v28  ;;  %v8577_v22 = vld [vmem:[#allocation31_spill] sm:$0xff] }
 0x1a0   : > { %v1248_v2 = vmul.f32 %v6315_v26, %v1247_v32  ;;  %v6381_v3 = vmul.f32 0.70710677, %v6355_v1  ;;  %v6383_v20 = vadd.f32 %v936_v34, %v888_v27  ;;  %v1573_v30 = vsel %vm6364_vm11, %v5042_v21, %v1569_v35 }
 0x1a1   : > { %8571 = vst [vmem:[#allocation37_spill] sm:$0xff] %v6375_v46  ;;  %3651 = vmatmul.bf16.gmra.mxu2 %v6375_v46  ;;  %3798 = vmatmul.bf16.gmra.mxu1 %v6375_v46  ;;  %v1504_v52 = vmul.f32 2.1237322e-06, %v6377_v12  ;;  %v1578_v40 = vsel %vm6369_vm12, %v1577_v4, %v1573_v30  ;;  %v1686_v36 = vmul.f32 %v5044_v37, %v6335_v10  ;;  %v1345_v38 = vadd.f32 0.00028619796, %v1344_v25  ;;  %v8584_v46 = vld [vmem:[#allocation35_spill] sm:$0xff] }
 0x1a2   : > { %8572 = vst [vmem:[#allocation49_spill] sm:$0xff] %v6381_v3  ;;  %v4756_v32 = vor.u32 %v4908_v31, %v4755_v41  ;;  %vm1690_vm13 = vweird.f32 %v6335_v10  ;;  %v1696_v34 = vand.u32 2147483648, %v6335_v10  ;;  %3836 = vmatpush.bf16.msra.mxu2 %v4664_v5  ;;  %v1800_v27 = vadd.f32 0.112945676, %v1799_v43 }
 0x1a3   : > { %8573 = vst [vmem:[#allocation63_spill] sm:$0xff] %v6383_v20  ;;  %v8574_v21 = vand.u32 2147483647, %v6252_v23  ;;  %v1579_v49 = vmul.f32 %v1578_v40, %v8577_v22  ;;  %v1687_v39 = vsub.f32 1.0, %v1686_v36  ;;  %vm1691_vm15 = vweird.f32 %v5044_v37  ;;  %v4743_v40 = vld [vmem:[#allocation8 + $0x1e0] sm:$0xf] }
 0x1a4   : > { %v1694_v30 = vand.u32 2147483647, %v6335_v10  ;;  %3738 = vmatpush.bf16.msra.mxu0 %v4756_v32  ;;  %v6405_v25 = vmul.f32 %v6340_v14, %v6225_v6  ;;  %vm1291_vm0 = vweird.f32 %v6309_v16  ;;  %v1389_v4 = vadd.f32 0.05243302, %v1388_v58  ;;  %vm6419_vm2 = vmor %vm1690_vm13, %vm1691_vm15  ;;  %v4905_v36 = vld [vmem:[#allocation8 + $0x1e8] sm:$0xf0] }
 0x1a5   : > { %vm6397_vm14 = vcmp.eq.f32.partialorder %v8574_v21, 8.507059e+37  ;;  %v1462_v35 = vmul.f32 %v6381_v3, %v6381_v3  ;;  %vm1251_vm1 = vweird.f32 %v6315_v26  ;;  %v1505_v57 = vadd.f32 0.00028619796, %v1504_v52  ;;  %vm6425_vm3 = vmor %vm1290_vm10, %vm1291_vm0  ;;  %v8588_v23 = vld [vmem:[#allocation29_spill] sm:$0xff] }
 0x1a6   : > { %v6412_v41 = vmul.f32 0.70710677, %v6383_v20  ;;  %v1688_v31 = vmul.f32 %v5044_v37, %v1687_v39  ;;  %v1289_v43 = vadd.f32 %v6309_v16, %v1288_v56  ;;  %v1249_v5 = vadd.f32 %v6315_v26, %v1248_v2 }
 0x1a7   : > { %v1346_v6 = vmul.f32 %v1345_v38, %v6349_v50  ;;  %v1697_v58 = vor.u32 1.1754944e-38, %v1696_v34  ;;  %v4465_v56 = vclamps-f32 %v1579_v49, 1.0  ;;  %vm1695_vm4 = vcmp.eq.f32.partialorder %v1694_v30, 8.507059e+37 }
 0x1a8   : > { %v1689_v32 = vadd.f32 %v5044_v37, %v1688_v31  ;;  %v1801_v2 = vmul.f32 %v1800_v27, %v8556_v44  ;;  %vm1250_vm5 = vweird.f32 %v6263_v29  ;;  %v1254_v10 = vand.u32 2147483647, %v6263_v29 }
 0x1a9   : > { %v1256_v38 = vand.u32 2147483648, %v6263_v29  ;;  %v6433_v34 = vmin.f32 %v1462_v35, 16.0  ;;  %vm6437_vm6 = vmor %vm1250_vm5, %vm1251_vm1  ;;  %v1390_v21 = vmul.f32 %v1389_v4, %v6213_v63  ;;  %v1506_v22 = vmul.f32 %v1505_v57, %v6377_v12  ;;  %v789_v4 = vpop.f32.mrf.mxu2 }
 0x1aa   : > { %v1693_v27 = vsel %vm6419_vm2, %v5044_v37, %v1689_v32  ;;  %v4744_v49 = vor.u32 %v4905_v36, %v4743_v40  ;;  %v1293_v29 = vsel %vm6425_vm3, %v6309_v16, %v1289_v43  ;;  %v1253_v39 = vsel %vm6437_vm6, %v6315_v26, %v1249_v5  ;;  %v8585_v16 = vld [vmem:[#allocation23_spill] sm:$0xff]  ;;  %v838_v26 = vpop.f32.mrf.mxu3 }
 0x1ab   : > { %v1622_v30 = vmul.f32 %v6412_v41, %v6412_v41  ;;  %v1698_v35 = vsel %vm1695_vm4, %v1697_v58, %v1693_v27  ;;  %v1347_v31 = vadd.f32 0.0036580483, %v1346_v6  ;;  %v2994_v3 = vadd.f32 1.0, %v4465_v56  ;;  %v8586_v32 = vld [vmem:[#allocation27_spill] sm:$0xff] }
 0x1ac   : > { %v1699_v57 = vmul.f32 %v1698_v35, %v8584_v46  ;;  %3739 = vmatpush.bf16.msra.mxu0 %v4744_v49  ;;  %v1802_v37 = vadd.f32 0.4994258, %v1801_v2  ;;  %vm1255_vm7 = vcmp.eq.f32.partialorder %v1254_v10, 8.507059e+37  ;;  %v1257_v14 = vor.u32 1.1754944e-38, %v1256_v38 }
 0x1ad   : > { %v1464_v40 = vmul.f32 2.1237322e-06, %v6433_v34  ;;  %v1915_v43 = vmul.f32 3.8918573e-05, %v8585_v16  ;;  %v1507_v36 = vadd.f32 0.0036580483, %v1506_v22  ;;  %v1298_v46 = vsel %vm6397_vm14, %v6320_v33, %v1293_v29 }
 0x1ae   : > { %v4468_v52 = vclamps-f32 %v1699_v57, 1.0  ;;  %v1803_v5 = vmul.f32 %v1802_v37, %v8556_v44  ;;  %v2035_v58 = vmul.f32 3.8918573e-05, %v8586_v32  ;;  %v1258_v6 = vsel %vm1255_vm7, %v1257_v14, %v1253_v39  ;;  %v889_v14 = vpop.f32.mrf.mxu0 }
 0x1af   : > { %v1391_v56 = vadd.f32 0.18741608, %v1390_v21  ;;  %v6461_v2 = vmin.f32 %v1622_v30, 16.0  ;;  %v1348_v10 = vmul.f32 %v1347_v31, %v6349_v50  ;;  %v3042_v27 = vmul.f32 %v2994_v3, %v8588_v23 }
 0x1b0   : > { %v2997_v38 = vadd.f32 1.0, %v4468_v52  ;;  %v6465_v22 = vadd.f32 1.0, %v1803_v5  ;;  %v790_v49 = vadd.f32 %v789_v4, %v5901_v48  ;;  %v1465_v44 = vadd.f32 0.00028619796, %v1464_v40 }
 0x1b1   : > { %8587 = vst [vmem:[#allocation31_spill] sm:$0xff] %v6461_v2  ;;  %v1624_v35 = vmul.f32 2.1237322e-06, %v6461_v2  ;;  %v1916_v57 = vadd.f32 0.001143296, %v1915_v43  ;;  %v1508_v28 = vmul.f32 %v1507_v36, %v6377_v12  ;;  %v6474_v29 = vmul.f32 %v6197_v59, %v5992_v9 }
 0x1b2   : > { %v3045_v33 = vmul.f32 %v2997_v38, %v6208_v7  ;;  %5045 = vrcp.f32 %v6465_v22  ;;  %v2036_v21 = vadd.f32 0.001143296, %v2035_v58  ;;  %v4454_v3 = vclamps-f32 %v6405_v25, 1.0  ;;  %v840_v38 = vpop.f32.mrf.mxu3 }
 0x1b3   : > { %8589 = vst [vmem:[#allocation35_spill] sm:$0xff] %v6474_v29  ;;  %v6478_v39 = vmul.f32 0.5, %v6033_v47  ;;  %v6481_v30 = vmul.f32 0.5, %v6036_v24  ;;  %v1299_v31 = vmul.f32 %v1298_v46, %v6302_v18  ;;  %v1259_v4 = vmul.f32 %v1258_v6, %v6324_v15  ;;  %v791_v18 = vpop.f32.mrf.mxu2  ;;  %v4649_v24 = vld [vmem:[#allocation8 + $0x12c] sm:$0xf0] }
 0x1b4   : > { %v1349_v7 = vadd.f32 0.05243302, %v1348_v10  ;;  %v6485_v37 = vpack.c.bf16 %v3045_v33, %v3042_v27  ;;  %v6489_v9 = vmul.f32 %v6268_v51, %v6134_v42  ;;  %v1466_v59 = vmul.f32 %v1465_v44, %v6433_v34  ;;  %v938_v33 = vpop.f32.mrf.mxu1 }
 0x1b5   : > { %v1625_v25 = vadd.f32 0.00028619796, %v1624_v35  ;;  %v1917_v40 = vmul.f32 %v1916_v57, %v8585_v16  ;;  %v1392_v43 = vmul.f32 %v1391_v56, %v6213_v63  ;;  %v1509_v36 = vadd.f32 0.05243302, %v1508_v28 }
 0x1b6   : > { %8590 = vst [vmem:[#allocation23_spill] sm:$0xff] %v6485_v37  ;;  %3656 = vmatmul.bf16.gmra.mxu2 %v6485_v37  ;;  %3803 = vmatmul.bf16.gmra.mxu1 %v6485_v37  ;;  %v6496_v15 = vadd.f32 %v838_v26, %v790_v49  ;;  %v2037_v52 = vmul.f32 %v2036_v21, %v8586_v32  ;;  %v2983_v5 = vadd.f32 1.0, %v4454_v3  ;;  %v6500_v42 = vmul.f32 0.5, %v6151_v55  ;;  %v4881_v55 = vld [vmem:[#allocation8 + $0x128] sm:$0xf0] }
 0x1b7   : > { %v890_v51 = vadd.f32 %v889_v14, %v5874_v62  ;;  %v1918_v58 = vadd.f32 0.014752088, %v1917_v40  ;;  %v4458_v6 = vclamps-f32 %v1299_v31, 1.0  ;;  %v4457_v56 = vclamps-f32 %v1259_v4, 1.0  ;;  %v4878_v37 = vld [vmem:[#allocation8 + $0x110] sm:$0xf0] }
 0x1b8   : > { %8591 = vst [vmem:[#allocation27_spill] sm:$0xff] %v6496_v15  ;;  %v6503_v46 = vpop.eup %5045  ;;  %v1350_v10 = vmul.f32 %v1349_v7, %v6349_v50  ;;  %v2038_v23 = vadd.f32 0.014752088, %v2037_v52  ;;  %v1467_v27 = vadd.f32 0.0036580483, %v1466_v59  ;;  %v1626_v26 = vmul.f32 %v1625_v25, %v6461_v2 }
 0x1b9   : > { %8592 = vst [vmem:[#allocation29_spill] sm:$0xff] %v6500_v42  ;;  %v792_v49 = vadd.f32 %v791_v18, %v5901_v48  ;;  %v1806_v44 = vmul.f32 %v6503_v46, %v6465_v22  ;;  %v6510_v35 = vadd.f32 1.1283791, %v1392_v43  ;;  %v1510_v57 = vmul.f32 %v1509_v36, %v6377_v12  ;;  %v4899_v42 = vld [vmem:[#allocation8 + $0x1b8] sm:$0xf0] }
 0x1ba   : > { %v6514_v28 = vmul.f32 0.70710677, %v6496_v15  ;;  %v1919_v21 = vmul.f32 %v1918_v58, %v8585_v16  ;;  %v6517_v3 = vadd.f32 %v938_v33, %v890_v51  ;;  %v2155_v7 = vmul.f32 3.8918573e-05, %v5807_v13 }
 0x1bb   : > { %v6519_v31 = vadd.f32 %v840_v38, %v792_v49  ;;  %v1807_v4 = vsub.f32 1.0, %v1806_v44  ;;  %v2987_v14 = vadd.f32 1.0, %v4458_v6  ;;  %v6523_v59 = vmul.f32 0.5, %v6284_v61 }
 0x1bc   : > { %8593 = vst [vmem:[#allocation64_spill] sm:$0xff] %v6517_v3  ;;  %v1920_v25 = vadd.f32 0.112945676, %v1919_v21  ;;  %v2039_v40 = vmul.f32 %v2038_v23, %v8586_v32  ;;  %v6526_v43 = vadd.f32 1.0, %v4457_v56  ;;  %v1351_v36 = vadd.f32 0.18741608, %v1350_v10  ;;  %v892_v23 = vpop.f32.mrf.mxu0 }
 0x1bd   : > { %8594 = vst [vmem:[#allocation65_spill] sm:$0xff] %v6519_v31  ;;  %v1468_v18 = vmul.f32 %v1467_v27, %v6433_v34  ;;  %v6529_v52 = vadd.f32 0.0036580483, %v1626_v26  ;;  %v6531_v51 = vadd.f32 0.18741608, %v1510_v57  ;;  %v1582_v58 = vmul.f32 %v6514_v28, %v6514_v28 }
 0x1be   : > { %8595 = vst [vmem:[#allocation66_spill] sm:$0xff] %v6523_v59  ;;  %v1808_v6 = vmul.f32 %v6503_v46, %v1807_v4  ;;  %v1921_v38 = vmul.f32 %v1920_v25, %v8585_v16  ;;  %v6538_v49 = vmul.f32 0.70710677, %v6517_v3  ;;  %v6541_v56 = vmul.f32 0.70710677, %v6519_v31 }
 0x1bf   : > { %vm1810_vm8 = vweird.f32 %v6465_v22  ;;  %v2156_v10 = vadd.f32 0.001143296, %v2155_v7  ;;  %vm1811_vm9 = vweird.f32 %v6503_v46  ;;  %v1814_v27 = vand.u32 2147483647, %v6465_v22  ;;  %v4647_v25 = vld [vmem:[#allocation8 + $0x120] sm:$0xf] }
 0x1c0   : > { %v1922_v26 = vadd.f32 0.4994258, %v1921_v38  ;;  %v2040_v44 = vadd.f32 0.112945676, %v2039_v40  ;;  %v6547_v57 = vmul.f32 %v2983_v5, %v6201_v45  ;;  %v6550_v33 = vmul.f32 0.5, %v6312_v54  ;;  %vm6565_vm10 = vmor %vm1810_vm8, %vm1811_vm9 }
 0x1c1   : > { %v893_v21 = vadd.f32 %v892_v23, %v5874_v62  ;;  %v1816_v4 = vand.u32 2147483648, %v6465_v22  ;;  %v3035_v7 = vmul.f32 %v2987_v14, %v6478_v39  ;;  %v1809_v47 = vadd.f32 %v6503_v46, %v1808_v6  ;;  %v4880_v40 = vld [vmem:[#allocation8 + $0x124] sm:$0xf]  ;;  %v4731_v45 = vld [vmem:[#allocation8 + $0x1c8] sm:$0xf] }
 0x1c2   : > { %8596 = vst [vmem:[#allocation67_spill] sm:$0xff] %v6550_v33  ;;  %v1923_v61 = vmul.f32 %v1922_v26, %v8585_v16  ;;  %v4648_v38 = vor.u32 %v4881_v55, %v4647_v25  ;;  %v6557_v5 = vmin.f32 %v1582_v58, 16.0  ;;  %v1702_v54 = vmul.f32 %v6541_v56, %v6541_v56  ;;  %v4902_v14 = vld [vmem:[#allocation8 + $0x1d0] sm:$0xf0]  ;;  %v4635_v16 = vld [vmem:[#allocation8 + $0x108] sm:$0xf]  ;;  %v941_v26 = vpop.f32.mrf.mxu1 }
 0x1c3   : > { %v4652_v39 = vor.u32 %v4880_v40, %v4649_v24  ;;  %v2157_v55 = vmul.f32 %v2156_v10, %v5807_v13  ;;  %v1469_v6 = vadd.f32 0.05243302, %v1468_v18  ;;  %v4732_v25 = vor.u32 %v4902_v14, %v4731_v45  ;;  %v4719_v40 = vld [vmem:[#allocation8 + $0x1b0] sm:$0xf]  ;;  %v794_v10 = vpop.f32.mrf.mxu2  ;;  %v4896_v14 = vld [vmem:[#allocation8 + $0x1a0] sm:$0xf0] }
 0x1c4   : > { %v6570_v58 = vadd.f32 1.0, %v1923_v61  ;;  %3690 = vmatpush.bf16.msra.mxu3 %v4648_v38  ;;  %v2041_v29 = vmul.f32 %v2040_v44, %v8586_v32  ;;  %v6574_v22 = vmul.f32 0.5, %v6355_v1  ;;  %v6576_v59 = vadd.f32 %v941_v26, %v893_v21  ;;  %v4623_v44 = vld [vmem:[#allocation8 + $0xf0] sm:$0xf]  ;;  %v4875_v21 = vld [vmem:[#allocation8 + $0xf8] sm:$0xf0] }
 0x1c5   : > { %v1817_v33 = vor.u32 1.1754944e-38, %v1816_v4  ;;  %3837 = vmatpush.bf16.msra.mxu2 %v4652_v39  ;;  %v4636_v24 = vor.u32 %v4878_v37, %v4635_v16  ;;  %v1352_v18 = vmul.f32 %v1351_v36, %v6349_v50  ;;  %v1813_v61 = vsel %vm6565_vm10, %v6503_v46, %v1809_v47  ;;  %3740 = vmatpush.bf16.msra.mxu0 %v4732_v25  ;;  %v843_v46 = vpop.f32.mrf.mxu3  ;;  %v4707_v39 = vld [vmem:[#allocation8 + $0x198] sm:$0xf] }
 0x1c6   : > { %8599 = vst [vmem:[#allocation68_spill] sm:$0xff] %v6574_v22  ;;  %vm6582_vm11 = vcmp.eq.f32.partialorder %v1814_v27, 8.507059e+37  ;;  %5047 = vrcp.f32 %v6570_v58  ;;  %v1584_v37 = vmul.f32 2.1237322e-06, %v6557_v5  ;;  %v1742_v4 = vmul.f32 %v6538_v49, %v6538_v49 }
 0x1c7   : > { %8600 = vst [vmem:[#allocation69_spill] sm:$0xff] %v6576_v59  ;;  %v6590_v36 = vmin.f32 %v1702_v54, 16.0  ;;  %v2158_v45 = vadd.f32 0.014752088, %v2157_v55  ;;  %v6593_v23 = vpack.c.bf16 %v3035_v7, %v6489_v9  ;;  %v6597_v47 = vmul.f32 %v6510_v35, %v6165_v19  ;;  %v4611_v55 = vld [vmem:[#allocation8 + $0xd8] sm:$0xf] }
 0x1c8   : > { %3691 = vmatpush.bf16.msra.mxu3 %v4636_v24  ;;  %v4720_v27 = vor.u32 %v4899_v42, %v4719_v40  ;;  %v2042_v16 = vadd.f32 0.4994258, %v2041_v29  ;;  %v6601_v26 = vmul.f32 %v6526_v43, %v6481_v30  ;;  %v6604_v54 = vmul.f32 0.70710677, %v6576_v59  ;;  %v4872_v19 = vld [vmem:[#allocation8 + $0xe0] sm:$0xf0] }
 0x1c9   : > { %8603 = vst [vmem:[#allocation70_spill] sm:$0xff] %v6593_v23  ;;  %v1818_v9 = vsel %vm6582_vm11, %v1817_v33, %v1813_v61  ;;  %v4624_v7 = vor.u32 %v4875_v21, %v4623_v44  ;;  %v6608_v35 = vadd.f32 1.1283791, %v1352_v18  ;;  %v1512_v42 = vmul.f32 %v6531_v51, %v6377_v12  ;;  %v4695_v33 = vld [vmem:[#allocation8 + $0x180] sm:$0xf]  ;;  %v8605_v44 = vld [vmem:[#allocation36_spill] sm:$0xff] }
 0x1ca   : > { %8604 = vst [vmem:[#allocation71_spill] sm:$0xff] %v6597_v47  ;;  %v1628_v29 = vmul.f32 %v6529_v52, %v6461_v2  ;;  %3741 = vmatpush.bf16.msra.mxu0 %v4720_v27  ;;  %v4708_v30 = vor.u32 %v4896_v14, %v4707_v39  ;;  %v1470_v43 = vmul.f32 %v1469_v6, %v6433_v34  ;;  %v6615_v25 = vmin.f32 %v1742_v4, 16.0  ;;  %v4893_v40 = vld [vmem:[#allocation8 + $0x188] sm:$0xf0] }
 0x1cb   : > { %v795_v24 = vadd.f32 %v794_v10, %v5901_v48  ;;  %v2159_v61 = vmul.f32 %v2158_v45, %v5807_v13  ;;  %v1585_v38 = vadd.f32 0.00028619796, %v1584_v37  ;;  %v1819_v21 = vmul.f32 %v1818_v9, %v8605_v44  ;;  %v894_v37 = vpop.f32.mrf.mxu0  ;;  %v796_v44 = vpop.f32.mrf.mxu2 }
 0x1cc   : > { %v5048_v18 = vpop.eup %5047  ;;  %3692 = vmatpush.bf16.msra.mxu3 %v4624_v7  ;;  %v4612_v51 = vor.u32 %v4872_v19, %v4611_v55  ;;  %v2043_v52 = vmul.f32 %v2042_v16, %v8586_v32  ;;  %v1744_v27 = vmul.f32 2.1237322e-06, %v6615_v25  ;;  %v1704_v6 = vmul.f32 2.1237322e-06, %v6590_v36 }
 0x1cd   : > { %v1862_v4 = vmul.f32 %v6604_v54, %v6604_v54  ;;  %v1926_v10 = vmul.f32 %v5048_v18, %v6570_v58  ;;  %vm1930_vm12 = vweird.f32 %v6570_v58  ;;  %v1936_v45 = vand.u32 2147483648, %v6570_v58 }
 0x1ce   : > { %3742 = vmatpush.bf16.msra.mxu0 %v4708_v30  ;;  %v4696_v39 = vor.u32 %v4893_v40, %v4695_v33  ;;  %v6628_v14 = vadd.f32 1.0, %v2043_v52  ;;  %vm1931_vm13 = vweird.f32 %v5048_v18  ;;  %v1934_v32 = vand.u32 2147483647, %v6570_v58 }
 0x1cf   : > { %v1927_v9 = vsub.f32 1.0, %v1926_v10  ;;  %v2160_v16 = vadd.f32 0.112945676, %v2159_v61  ;;  %v6631_v7 = vadd.f32 1.1283791, %v1512_v42  ;;  %v4471_v19 = vclamps-f32 %v1819_v21, 1.0  ;;  %vm6643_vm14 = vmor %vm1930_vm12, %vm1931_vm13 }
 0x1d0   : > { %v1629_v55 = vadd.f32 0.05243302, %v1628_v29  ;;  %v6633_v1 = vadd.f32 %v843_v46, %v795_v24  ;;  %3693 = vmatpush.bf16.msra.mxu3 %v4612_v51  ;;  %v1586_v22 = vmul.f32 %v1585_v38, %v6557_v5  ;;  %v895_v30 = vadd.f32 %v894_v37, %v5874_v62  ;;  %v845_v29 = vpop.f32.mrf.mxu3 }
 0x1d1   : > { %v1928_v47 = vmul.f32 %v5048_v18, %v1927_v9  ;;  %5049 = vrcp.f32 %v6628_v14  ;;  %v1745_v33 = vadd.f32 0.00028619796, %v1744_v27  ;;  %v1705_v40 = vadd.f32 0.00028619796, %v1704_v6 }
 0x1d2   : > { %8606 = vst [vmem:[#allocation36_spill] sm:$0xff] %v6633_v1  ;;  %v6638_v52 = vmin.f32 %v1862_v4, 16.0  ;;  %v1937_v46 = vor.u32 1.1754944e-38, %v1936_v45  ;;  %3743 = vmatpush.bf16.msra.mxu0 %v4696_v39  ;;  %vm6647_vm15 = vcmp.eq.f32.partialorder %v1934_v32, 8.507059e+37  ;;  %v797_v38 = vadd.f32 %v796_v44, %v5901_v48  ;;  %v943_v4 = vpop.f32.mrf.mxu1  ;;  %v8614_v32 = vld [vmem:[#allocation18_spill] sm:$0xff] }
 0x1d3   : > { %v1929_v24 = vadd.f32 %v5048_v18, %v1928_v47  ;;  %v2161_v21 = vmul.f32 %v2160_v16, %v5807_v13  ;;  %v6654_v51 = vmul.f32 0.5, %v6383_v20  ;;  %v3000_v27 = vadd.f32 1.0, %v4471_v19  ;;  %v897_v61 = vpop.f32.mrf.mxu0 }
 0x1d4   : > { %v1864_v58 = vmul.f32 2.1237322e-06, %v6638_v52  ;;  %v6658_v6 = vmul.f32 0.70710677, %v6633_v1  ;;  %v6662_v10 = vadd.f32 %v943_v4, %v895_v30  ;;  %v6664_v45 = vadd.f32 %v845_v29, %v797_v38  ;;  %v8616_v38 = vld [vmem:[#allocation30_spill] sm:$0xff] }
 0x1d5   : > { %8611 = vst [vmem:[#allocation72_spill] sm:$0xff] %v6654_v51  ;;  %v1933_v47 = vsel %vm6643_vm14, %v5048_v18, %v1929_v24  ;;  %v2162_v37 = vadd.f32 0.4994258, %v2161_v21  ;;  %3744 = vmatmul.bf16.vlgmr.msra.gmra.mxu0 %v6593_v23  ;;  %v1471_v39 = vadd.f32 0.18741608, %v1470_v43  ;;  %v987_v16 = vmul.f32 0.5, %v8614_v32 }
 0x1d6   : > { %8612 = vst [vmem:[#allocation73_spill] sm:$0xff] %v6662_v10  ;;  %v1587_v9 = vadd.f32 0.0036580483, %v1586_v22  ;;  %v1938_v19 = vsel %vm6647_vm15, %v1937_v46, %v1933_v47  ;;  %v1746_v20 = vmul.f32 %v1745_v33, %v6615_v25  ;;  %v1706_v42 = vmul.f32 %v1705_v40, %v6590_v36  ;;  %v8615_v18 = vld [vmem:[#allocation48_spill] sm:$0xff] }
 0x1d7   : > { %8613 = vst [vmem:[#allocation74_spill] sm:$0xff] %v6664_v45  ;;  %v5050_v44 = vpop.eup %5049  ;;  %v1939_v30 = vmul.f32 %v1938_v19, %v8615_v18  ;;  %v2163_v29 = vmul.f32 %v2162_v37, %v5807_v13  ;;  %v1865_v24 = vadd.f32 0.00028619796, %v1864_v58  ;;  %v3048_v21 = vmul.f32 %v3000_v27, %v8616_v38 }
 0x1d8   : > { %v1822_v22 = vmul.f32 %v6658_v6, %v6658_v6  ;;  %v2046_v43 = vmul.f32 %v5050_v44, %v6628_v14  ;;  %v6679_v46 = vmul.f32 0.70710677, %v6662_v10  ;;  %v6682_v33 = vmul.f32 0.70710677, %v6664_v45 }
 0x1d9   : > { %v4474_v4 = vclamps-f32 %v1939_v30, 1.0  ;;  %v6684_v40 = vadd.f32 1.0, %v2163_v29  ;;  %vm2050_vm0 = vweird.f32 %v6628_v14  ;;  %vm2051_vm1 = vweird.f32 %v5050_v44 }
 0x1da   : > { %8617 = vst [vmem:[#allocation48_spill] sm:$0xff] %v6679_v46  ;;  %v2047_v47 = vsub.f32 1.0, %v2046_v43  ;;  %v2056_v13 = vand.u32 2147483648, %v6628_v14  ;;  %v898_v27 = vadd.f32 %v897_v61, %v5874_v62  ;;  %v2054_v37 = vand.u32 2147483647, %v6628_v14  ;;  %vm6698_vm2 = vmor %vm2050_vm0, %vm2051_vm1 }
 0x1db   : > { %8618 = vst [vmem:[#allocation30_spill] sm:$0xff] %v6682_v33  ;;  %v3003_v58 = vadd.f32 1.0, %v4474_v4  ;;  %5051 = vrcp.f32 %v6684_v40  ;;  %v1472_v19 = vmul.f32 %v1471_v39, %v6433_v34  ;;  %v1630_v18 = vmul.f32 %v1629_v55, %v6461_v2 }
 0x1dc   : > { %v1747_v30 = vadd.f32 0.0036580483, %v1746_v20  ;;  %v2048_v29 = vmul.f32 %v5050_v44, %v2047_v47  ;;  %v1588_v38 = vmul.f32 %v1587_v9, %v6557_v5  ;;  %v1707_v43 = vadd.f32 0.0036580483, %v1706_v42  ;;  %v946_v20 = vpop.f32.mrf.mxu1  ;;  %v4877_v9 = vld [vmem:[#allocation8 + $0x10c] sm:$0xf] }
 0x1dd   : > { %v3051_v32 = vmul.f32 %v3003_v58, %v987_v16  ;;  %v6694_v23 = vmin.f32 %v1822_v22, 16.0  ;;  %v1982_v61 = vmul.f32 %v6679_v46, %v6679_v46  ;;  %v1942_v55 = vmul.f32 %v6682_v33, %v6682_v33  ;;  %v4637_v42 = vld [vmem:[#allocation8 + $0x114] sm:$0xf0]  ;;  %v4599_v46 = vld [vmem:[#allocation8 + $0xc0] sm:$0xf] }
 0x1de   : > { %v2049_v39 = vadd.f32 %v5050_v44, %v2048_v29  ;;  %v2057_v47 = vor.u32 1.1754944e-38, %v2056_v13  ;;  %v1866_v16 = vmul.f32 %v1865_v24, %v6638_v52  ;;  %v6709_v14 = vadd.f32 %v946_v20, %v898_v27  ;;  %v4869_v24 = vld [vmem:[#allocation8 + $0xc8] sm:$0xf0] }
 0x1df   : > { %8619 = vst [vmem:[#allocation75_spill] sm:$0xff] %v6694_v23  ;;  %v6707_v22 = vpack.c.bf16 %v3051_v32, %v3048_v21  ;;  %vm6711_vm3 = vcmp.eq.f32.partialorder %v2054_v37, 8.507059e+37  ;;  %v6717_v51 = vpack.c.bf16 %v6601_v26, %v6547_v57  ;;  %v1631_v33 = vadd.f32 0.18741608, %v1630_v18 }
 0x1e0   : > { %8623 = vst [vmem:[#allocation77_spill] sm:$0xff] %v6709_v14  ;;  %v1748_v29 = vmul.f32 %v1747_v30, %v6615_v25  ;;  %v2053_v13 = vsel %vm6698_vm2, %v5050_v44, %v2049_v39  ;;  %v6722_v21 = vadd.f32 1.1283791, %v1472_v19  ;;  %v1589_v27 = vadd.f32 0.05243302, %v1588_v38 }
 0x1e1   : > { %8622 = vst [vmem:[#allocation76_spill] sm:$0xff] %v6707_v22  ;;  %v5052_v32 = vpop.eup %5051  ;;  %v1708_v37 = vmul.f32 %v1707_v43, %v6590_v36  ;;  %3661 = vmatmul.bf16.gmra.mxu2 %v6707_v22  ;;  %3808 = vmatmul.bf16.gmra.mxu1 %v6707_v22  ;;  %v4640_v57 = vor.u32 %v4877_v9, %v4637_v42  ;;  %v1824_v26 = vmul.f32 2.1237322e-06, %v6694_v23  ;;  %v6728_v18 = vmin.f32 %v1982_v61, 16.0 }
 0x1e2   : > { %8626 = vst [vmem:[#allocation78_spill] sm:$0xff] %v6717_v51  ;;  %v6730_v30 = vmin.f32 %v1942_v55, 16.0  ;;  %v2058_v44 = vsel %vm6711_vm3, %v2057_v47, %v2053_v13  ;;  %v1867_v4 = vadd.f32 0.0036580483, %v1866_v16  ;;  %v6735_v19 = vmul.f32 0.70710677, %v6709_v14 }
 0x1e3   : > { %8627 = vst [vmem:[#allocation79_spill] sm:$0xff] %v6728_v18  ;;  %v2166_v38 = vmul.f32 %v5052_v32, %v6684_v40  ;;  %3838 = vmatpush.bf16.msra.mxu2 %v4640_v57  ;;  %v4600_v43 = vor.u32 %v4869_v24, %v4599_v46  ;;  %v1749_v20 = vadd.f32 0.05243302, %v1748_v29  ;;  %v1984_v39 = vmul.f32 2.1237322e-06, %v6728_v18 }
 0x1e4   : > { %8628 = vst [vmem:[#allocation80_spill] sm:$0xff] %v6730_v30  ;;  %vm2170_vm4 = vweird.f32 %v6684_v40  ;;  %v2176_v61 = vand.u32 2147483648, %v6684_v40  ;;  %v2059_v55 = vmul.f32 %v2058_v44, %v6055_v17  ;;  %vm2171_vm5 = vweird.f32 %v5052_v32 }
 0x1e5   : > { %8629 = vst [vmem:[#allocation81_spill] sm:$0xff] %v6735_v19  ;;  %v2167_v9 = vsub.f32 1.0, %v2166_v38  ;;  %v2174_v47 = vand.u32 2147483647, %v6684_v40  ;;  %3694 = vmatpush.bf16.msra.mxu3 %v4600_v43  ;;  %v6745_v42 = vmul.f32 %v6608_v35, %v6307_v60  ;;  %v1825_v16 = vadd.f32 0.00028619796, %v1824_v26  ;;  %vm6758_vm6 = vmor %vm2170_vm4, %vm2171_vm5 }
 0x1e6   : > { %v1944_v46 = vmul.f32 2.1237322e-06, %v6730_v30  ;;  %v2275_v58 = vmul.f32 3.8918573e-05, %v5884_v11  ;;  %v1632_v29 = vmul.f32 %v1631_v33, %v6461_v2  ;;  %v1868_v13 = vmul.f32 %v1867_v4, %v6638_v52 }
 0x1e7   : > { %v2102_v17 = vmul.f32 %v6735_v19, %v6735_v19  ;;  %v2168_v24 = vmul.f32 %v5052_v32, %v2167_v9  ;;  %v6754_v57 = vmul.f32 0.5, %v6496_v15  ;;  %v1709_v44 = vadd.f32 0.05243302, %v1708_v37 }
 0x1e8   : > { %v1985_v38 = vadd.f32 0.00028619796, %v1984_v39  ;;  %v2177_v35 = vor.u32 1.1754944e-38, %v2176_v61  ;;  %3695 = vmatmul.bf16.vlgmr.msra.gmra.mxu3 %v6717_v51  ;;  %v1590_v33 = vmul.f32 %v1589_v27, %v6557_v5  ;;  %v4477_v26 = vclamps-f32 %v2059_v55, 1.0 }
 0x1e9   : > { %8630 = vst [vmem:[#allocation82_spill] sm:$0xff] %v6754_v57  ;;  %v2169_v4 = vadd.f32 %v5052_v32, %v2168_v24  ;;  %vm2175_vm7 = vcmp.eq.f32.partialorder %v2174_v47, 8.507059e+37  ;;  %v1750_v43 = vmul.f32 %v1749_v20, %v6615_v25  ;;  %v1826_v9 = vmul.f32 %v1825_v16, %v6694_v23 }
 0x1ea   : > { %v1945_v37 = vadd.f32 0.00028619796, %v1944_v46  ;;  %v2276_v39 = vadd.f32 0.001143296, %v2275_v58  ;;  %v1869_v15 = vadd.f32 0.05243302, %v1868_v13  ;;  %v1710_v51 = vmul.f32 %v1709_v44, %v6590_v36 }
 0x1eb   : > { %v6766_v40 = vmin.f32 %v2102_v17, 16.0  ;;  %v2173_v22 = vsel %vm6758_vm6, %v5052_v32, %v2169_v4  ;;  %v2395_v61 = vmul.f32 3.8918573e-05, %v5951_v53  ;;  %v1986_v27 = vmul.f32 %v1985_v38, %v6728_v18  ;;  %v8634_v4 = vld [vmem:[#allocation26_spill] sm:$0xff] }
 0x1ec   : > { %v2178_v55 = vsel %vm2175_vm7, %v2177_v35, %v2173_v22  ;;  %v2277_v47 = vmul.f32 %v2276_v39, %v5884_v11  ;;  %v3006_v46 = vadd.f32 1.0, %v4477_v26  ;;  %v1591_v13 = vadd.f32 0.18741608, %v1590_v33 }
 0x1ed   : > { %8633 = vst [vmem:[#allocation83_spill] sm:$0xff] %v6766_v40  ;;  %v2104_v20 = vmul.f32 2.1237322e-06, %v6766_v40  ;;  %v2179_v16 = vmul.f32 %v2178_v55, %v6084_v0  ;;  %v2396_v58 = vadd.f32 0.001143296, %v2395_v61  ;;  %v1946_v24 = vmul.f32 %v1945_v37, %v6730_v30  ;;  %v8635_v61 = vld [vmem:[#allocation33_spill] sm:$0xff] }
 0x1ee   : > { %v1827_v17 = vadd.f32 0.0036580483, %v1826_v9  ;;  %v2278_v32 = vadd.f32 0.014752088, %v2277_v47  ;;  %v1870_v60 = vmul.f32 %v1869_v15, %v6638_v52  ;;  %v993_v44 = vmul.f32 0.5, %v8634_v4 }
 0x1ef   : > { %v4480_v57 = vclamps-f32 %v2179_v16, 1.0  ;;  %v2397_v22 = vmul.f32 %v2396_v58, %v5951_v53  ;;  %v1751_v38 = vadd.f32 0.18741608, %v1750_v43  ;;  %v1711_v35 = vadd.f32 0.18741608, %v1710_v51 }
 0x1f0   : > { %v1987_v39 = vadd.f32 0.0036580483, %v1986_v27  ;;  %v2279_v19 = vmul.f32 %v2278_v32, %v5884_v11  ;;  %v2105_v0 = vadd.f32 0.00028619796, %v2104_v20  ;;  %v3054_v33 = vmul.f32 %v3006_v46, %v8635_v61  ;;  %v799_v20 = vpop.f32.mrf.mxu2 }
 0x1f1   : > { %v3009_v26 = vadd.f32 1.0, %v4480_v57  ;;  %v2398_v9 = vadd.f32 0.014752088, %v2397_v22  ;;  %v1633_v55 = vadd.f32 1.1283791, %v1632_v29  ;;  %v1828_v37 = vmul.f32 %v1827_v17, %v6694_v23 }
 0x1f2   : > { %v1947_v47 = vadd.f32 0.0036580483, %v1946_v24  ;;  %v2280_v15 = vadd.f32 0.112945676, %v2279_v19  ;;  %v1592_v4 = vmul.f32 %v1591_v13, %v6557_v5  ;;  %v1871_v16 = vadd.f32 0.18741608, %v1870_v60  ;;  %v848_v60 = vpop.f32.mrf.mxu3 }
 0x1f3   : > { %v3057_v2 = vmul.f32 %v3009_v26, %v993_v44  ;;  %v2399_v43 = vmul.f32 %v2398_v9, %v5951_v53  ;;  %v1752_v51 = vmul.f32 %v1751_v38, %v6615_v25  ;;  %v1712_v27 = vmul.f32 %v1711_v35, %v6590_v36 }
 0x1f4   : > { %v2281_v57 = vmul.f32 %v2280_v15, %v5884_v11  ;;  %v2515_v46 = vmul.f32 3.8918573e-05, %v5962_v8  ;;  %v1988_v29 = vmul.f32 %v1987_v39, %v6728_v18  ;;  %v2106_v58 = vmul.f32 %v2105_v0, %v6766_v40 }
 0x1f5   : > { %v6791_v19 = vpack.c.bf16 %v3057_v2, %v3054_v33  ;;  %v2400_v13 = vadd.f32 0.112945676, %v2399_v43  ;;  %v6794_v17 = vmul.f32 0.5, %v6517_v3  ;;  %v1829_v24 = vadd.f32 0.05243302, %v1828_v37  ;;  %v8637_v33 = vld [vmem:[#allocation61_spill] sm:$0xff] }
 0x1f6   : > { %v1948_v32 = vmul.f32 %v1947_v47, %v6730_v30  ;;  %v2282_v44 = vadd.f32 0.4994258, %v2281_v57  ;;  %v1593_v22 = vadd.f32 1.1283791, %v1592_v4  ;;  %v6798_v38 = vmul.f32 0.5, %v6519_v31 }
 0x1f7   : > { %8636 = vst [vmem:[#allocation33_spill] sm:$0xff] %v6791_v19  ;;  %v1872_v35 = vmul.f32 %v1871_v16, %v6638_v52  ;;  %3666 = vmatmul.bf16.gmra.mxu2 %v6791_v19  ;;  %3813 = vmatmul.bf16.gmra.mxu1 %v6791_v19  ;;  %v2401_v2 = vmul.f32 %v2400_v13, %v5951_v53  ;;  %v1753_v39 = vadd.f32 1.1283791, %v1752_v51  ;;  %v1713_v0 = vadd.f32 1.1283791, %v1712_v27  ;;  %v8639_v13 = vld [vmem:[#allocation49_spill] sm:$0xff] }
 0x1f8   : > { %v2283_v26 = vmul.f32 %v2282_v44, %v5884_v11  ;;  %v2516_v61 = vadd.f32 0.001143296, %v2515_v46  ;;  %v6807_v9 = vmul.f32 %v6631_v7, %v8637_v33  ;;  %v1989_v4 = vadd.f32 0.05243302, %v1988_v29  ;;  %v4874_v46 = vld [vmem:[#allocation8 + $0xf4] sm:$0xf] }
 0x1f9   : > { %v2107_v37 = vadd.f32 0.0036580483, %v2106_v58  ;;  %v2402_v47 = vadd.f32 0.4994258, %v2401_v2  ;;  %v6810_v15 = vmul.f32 0.5, %v6576_v59  ;;  %v1830_v16 = vmul.f32 %v1829_v24, %v6694_v23 }
 0x1fa   : > { %v1949_v43 = vadd.f32 0.05243302, %v1948_v32  ;;  %v2284_v57 = vadd.f32 1.0, %v2283_v26  ;;  %v6815_v51 = vmul.f32 %v6722_v21, %v8639_v13  ;;  %v6818_v11 = vmul.f32 %v1633_v55, %v6412_v41  ;;  %v4625_v29 = vld [vmem:[#allocation8 + $0xfc] sm:$0xf0]  ;;  %v850_v33 = vpop.f32.mrf.mxu3 }
 0x1fb   : > { %8638 = vst [vmem:[#allocation61_spill] sm:$0xff] %v6810_v15  ;;  %v1873_v27 = vadd.f32 1.1283791, %v1872_v35  ;;  %v2403_v7 = vmul.f32 %v2402_v47, %v5951_v53  ;;  %v6822_v58 = vmul.f32 %v1593_v22, %v6514_v28  ;;  %v800_v44 = vadd.f32 %v799_v20, %v5901_v48  ;;  %v801_v28 = vpop.f32.mrf.mxu2 }
 0x1fc   : > { %5053 = vrcp.f32 %v2284_v57  ;;  %v2517_v24 = vmul.f32 %v2516_v61, %v5962_v8  ;;  %v6827_v32 = vmul.f32 %v1753_v39, %v6538_v49  ;;  %v6830_v21 = vmul.f32 %v1713_v0, %v6541_v56  ;;  %v899_v61 = vpop.f32.mrf.mxu0 }
 0x1fd   : > { %v1990_v41 = vmul.f32 %v1989_v4, %v6728_v18  ;;  %v2108_v53 = vmul.f32 %v2107_v37, %v6766_v40  ;;  %v1831_v55 = vadd.f32 0.18741608, %v1830_v16  ;;  %v1950_v35 = vmul.f32 %v1949_v43, %v6730_v30  ;;  %v8646_v16 = vld [vmem:[#allocation38_spill] sm:$0xff] }
 0x1fe   : > { %v2404_v22 = vadd.f32 1.0, %v2403_v7  ;;  %v4628_v2 = vor.u32 %v4874_v46, %v4625_v29  ;;  %v6836_v20 = vmul.f32 %v1873_v27, %v6604_v54  ;;  %v6839_v26 = vmul.f32 0.5, %v6633_v1 }
 0x1ff   : > { %v6842_v49 = vmul.f32 0.5, %v6662_v10  ;;  %v6845_v56 = vmul.f32 0.5, %v6664_v45  ;;  %v6848_v39 = vmul.f32 0.5, %v6709_v14  ;;  %v6850_v0 = vadd.f32 %v848_v60, %v800_v44 }
 0x200   : > { %8640 = vst [vmem:[#allocation49_spill] sm:$0xff] %v6836_v20  ;;  %5055 = vrcp.f32 %v2404_v22  ;;  %3839 = vmatpush.bf16.msra.mxu2 %v4628_v2  ;;  %v2518_v54 = vadd.f32 0.014752088, %v2517_v24  ;;  %v6852_v4 = vadd.f32 0.18741608, %v1990_v41  ;;  %v802_v47 = vadd.f32 %v801_v28, %v5901_v48 }
 0x201   : > { %8641 = vst [vmem:[#allocation84_spill] sm:$0xff] %v6839_v26  ;;  %v6854_v37 = vadd.f32 0.05243302, %v2108_v53  ;;  %v6858_v43 = vmul.f32 0.5, %v8646_v16  ;;  %v6861_v27 = vmul.f32 %v1831_v55, %v6694_v23  ;;  %v6863_v60 = vadd.f32 0.18741608, %v1950_v35 }
 0x202   : > { %8642 = vst [vmem:[#allocation85_spill] sm:$0xff] %v6842_v49  ;;  %v5054_v13 = vpop.eup %5053  ;;  %v2294_v7 = vand.u32 2147483647, %v2284_v57  ;;  %v1395_v46 = vmul.f32 3.8918573e-05, %v6213_v63  ;;  %v900_v29 = vadd.f32 %v899_v61, %v5874_v62  ;;  %v6867_v44 = vadd.f32 %v850_v33, %v802_v47 }
 0x203   : > { %8643 = vst [vmem:[#allocation86_spill] sm:$0xff] %v6845_v56  ;;  %v2286_v24 = vmul.f32 %v5054_v13, %v2284_v57  ;;  %v2296_v41 = vand.u32 2147483648, %v2284_v57  ;;  %v6870_v53 = vmul.f32 0.70710677, %v6850_v0  ;;  %vm2290_vm8 = vweird.f32 %v2284_v57  ;;  %v948_v56 = vpop.f32.mrf.mxu1 }
 0x204   : > { %8644 = vst [vmem:[#allocation87_spill] sm:$0xff] %v6848_v39  ;;  %v1396_v28 = vadd.f32 0.001143296, %v1395_v46  ;;  %v2519_v2 = vmul.f32 %v2518_v54, %v5962_v8  ;;  %vm2291_vm9 = vweird.f32 %v5054_v13  ;;  %v1515_v35 = vmul.f32 3.8918573e-05, %v6377_v12 }
 0x205   : > { %8645 = vst [vmem:[#allocation88_spill] sm:$0xff] %v6850_v0  ;;  %v2287_v55 = vsub.f32 1.0, %v2286_v24  ;;  %v1355_v14 = vmul.f32 3.8918573e-05, %v6349_v50  ;;  %vm6875_vm10 = vcmp.eq.f32.partialorder %v2294_v7, 8.507059e+37  ;;  %v2416_v47 = vand.u32 2147483648, %v2404_v22  ;;  %vm6881_vm11 = vmor %vm2290_vm8, %vm2291_vm9 }
 0x206   : > { %8647 = vst [vmem:[#allocation89_spill] sm:$0xff] %v6867_v44  ;;  %v5056_v10 = vpop.eup %5055  ;;  %v2414_v33 = vand.u32 2147483647, %v2404_v22  ;;  %v1397_v59 = vmul.f32 %v1396_v28, %v6213_v63  ;;  %v2297_v45 = vor.u32 1.1754944e-38, %v2296_v41  ;;  %v1516_v1 = vadd.f32 0.001143296, %v1515_v35 }
 0x207   : > { %v2288_v3 = vmul.f32 %v5054_v13, %v2287_v55  ;;  %v2406_v46 = vmul.f32 %v5056_v10, %v2404_v22  ;;  %vm2410_vm12 = vweird.f32 %v2404_v22  ;;  %vm2411_vm13 = vweird.f32 %v5056_v10 }
 0x208   : > { %v1398_v24 = vadd.f32 0.014752088, %v1397_v59  ;;  %v1356_v7 = vadd.f32 0.001143296, %v1355_v14  ;;  %v1517_v19 = vmul.f32 %v1516_v1, %v6377_v12  ;;  %v1475_v39 = vmul.f32 3.8918573e-05, %v6433_v34  ;;  %vm6899_vm15 = vmor %vm2410_vm12, %vm2411_vm13 }
 0x209   : > { %v2289_v31 = vadd.f32 %v5054_v13, %v2288_v3  ;;  %v2407_v16 = vsub.f32 1.0, %v2406_v46  ;;  %vm6887_vm14 = vcmp.eq.f32.partialorder %v2414_v33, 8.507059e+37  ;;  %v2417_v41 = vor.u32 1.1754944e-38, %v2416_v47  ;;  %v902_v33 = vpop.f32.mrf.mxu0 }
 0x20a   : > { %v1399_v57 = vmul.f32 %v1398_v24, %v6213_v63  ;;  %v1357_v55 = vmul.f32 %v1356_v7, %v6349_v50  ;;  %v1518_v14 = vadd.f32 0.014752088, %v1517_v19  ;;  %v1476_v3 = vadd.f32 0.001143296, %v1475_v39  ;;  %v8656_v7 = vld [vmem:[#allocation55_spill] sm:$0xff] }
 0x20b   : > { %v2293_v35 = vsel %vm6881_vm11, %v5054_v13, %v2289_v31  ;;  %v2408_v59 = vmul.f32 %v5056_v10, %v2407_v16  ;;  %v2520_v24 = vadd.f32 0.112945676, %v2519_v2  ;;  %v6908_v39 = vadd.f32 %v948_v56, %v900_v29 }
 0x20c   : > { %v2298_v1 = vsel %vm6875_vm10, %v2297_v45, %v2293_v35  ;;  %v1400_v47 = vadd.f32 0.112945676, %v1399_v57  ;;  %v1358_v46 = vadd.f32 0.014752088, %v1357_v55  ;;  %v1519_v31 = vmul.f32 %v1518_v14, %v6377_v12 }
 0x20d   : > { %v2299_v26 = vmul.f32 %v2298_v1, %v8656_v7  ;;  %v2409_v54 = vadd.f32 %v5056_v10, %v2408_v59  ;;  %v1477_v19 = vmul.f32 %v1476_v3, %v6433_v34  ;;  %v2062_v45 = vmul.f32 %v6870_v53, %v6870_v53  ;;  %8657 = vst [vmem:[#allocation55_spill] sm:$0xff] %v6908_v39  ;;  %v8658_v3 = vld [vmem:[#allocation57_spill] sm:$0xff] }
 0x20e   : > { %v1401_v22 = vmul.f32 %v1400_v47, %v6213_v63  ;;  %v1359_v16 = vmul.f32 %v1358_v46, %v6349_v50  ;;  %v1520_v61 = vadd.f32 0.112945676, %v1519_v31  ;;  %v2521_v14 = vmul.f32 %v2520_v24, %v5962_v8 }
 0x20f   : > { %v4483_v13 = vclamps-f32 %v2299_v26, 1.0  ;;  %v2413_v2 = vsel %vm6899_vm15, %v5056_v10, %v2409_v54  ;;  %v1478_v57 = vadd.f32 0.014752088, %v1477_v19  ;;  %v2110_v26 = vmul.f32 %v6854_v37, %v6766_v40 }
 0x210   : > { %v2418_v55 = vsel %vm6887_vm14, %v2417_v41, %v2413_v2  ;;  %v1402_v35 = vadd.f32 0.4994258, %v1401_v22  ;;  %v1360_v59 = vadd.f32 0.112945676, %v1359_v16  ;;  %v1521_v1 = vmul.f32 %v1520_v61, %v6377_v12 }
 0x211   : > { %v2419_v56 = vmul.f32 %v2418_v55, %v8658_v3  ;;  %v3012_v29 = vadd.f32 1.0, %v4483_v13  ;;  %v1479_v47 = vmul.f32 %v1478_v57, %v6433_v34  ;;  %v6923_v10 = vmul.f32 0.70710677, %v6867_v44  ;;  %v8660_v13 = vld [vmem:[#allocation39_spill] sm:$0xff] }
 0x212   : > { %v1403_v28 = vmul.f32 %v1402_v35, %v6213_v63  ;;  %v1361_v41 = vmul.f32 %v1360_v59, %v6349_v50  ;;  %v6928_v46 = vmul.f32 0.70710677, %v6908_v39  ;;  %v903_v24 = vadd.f32 %v902_v33, %v5874_v62 }
 0x213   : > { %v4486_v7 = vclamps-f32 %v2419_v56, 1.0  ;;  %v1522_v54 = vadd.f32 0.4994258, %v1521_v1  ;;  %v6931_v31 = vmin.f32 %v2062_v45, 16.0  ;;  %v1480_v22 = vadd.f32 0.112945676, %v1479_v47  ;;  %v951_v56 = vpop.f32.mrf.mxu1 }
 0x214   : > { %v6933_v19 = vadd.f32 1.0, %v1403_v28  ;;  %v1362_v37 = vadd.f32 0.4994258, %v1361_v41  ;;  %v3060_v2 = vmul.f32 %v3012_v29, %v8660_v13  ;;  %v2522_v61 = vadd.f32 0.4994258, %v2521_v14  ;;  %v8661_v45 = vld [vmem:[#allocation46_spill] sm:$0xff] }
 0x215   : > { %8659 = vst [vmem:[#allocation57_spill] sm:$0xff] %v6931_v31  ;;  %v3015_v16 = vadd.f32 1.0, %v4486_v7  ;;  %v1523_v63 = vmul.f32 %v1522_v54, %v6377_v12  ;;  %v1992_v57 = vmul.f32 %v6852_v4, %v6728_v18  ;;  %v2182_v55 = vmul.f32 %v6923_v10, %v6923_v10 }
 0x216   : > { %5057 = vrcp.f32 %v6933_v19  ;;  %v2635_v35 = vmul.f32 3.8918573e-05, %v8661_v45  ;;  %v1952_v59 = vmul.f32 %v6863_v60, %v6730_v30  ;;  %v2111_v3 = vadd.f32 0.18741608, %v2110_v26 }
 0x217   : > { %v3063_v29 = vmul.f32 %v3015_v16, %v6858_v43  ;;  %v6946_v1 = vadd.f32 1.0, %v1523_v63  ;;  %v2222_v12 = vmul.f32 %v6928_v46, %v6928_v46  ;;  %v6950_v4 = vadd.f32 %v951_v56, %v903_v24  ;;  %v804_v43 = vpop.f32.mrf.mxu2 }
 0x218   : > { %v1363_v14 = vmul.f32 %v1362_v37, %v6349_v50  ;;  %v1481_v47 = vmul.f32 %v1480_v22, %v6433_v34  ;;  %v2064_v33 = vmul.f32 2.1237322e-06, %v6931_v31  ;;  %v2523_v60 = vmul.f32 %v2522_v61, %v5962_v8 }
 0x219   : > { %8662 = vst [vmem:[#allocation39_spill] sm:$0xff] %v6950_v4  ;;  %v6955_v28 = vpack.c.bf16 %v3063_v29, %v3060_v2  ;;  %5059 = vrcp.f32 %v6946_v1  ;;  %v6959_v26 = vmin.f32 %v2182_v55, 16.0  ;;  %v2636_v24 = vadd.f32 0.001143296, %v2635_v35 }
 0x21a   : > { %v6961_v41 = vadd.f32 1.0, %v1363_v14  ;;  %v1482_v7 = vadd.f32 0.4994258, %v1481_v47  ;;  %v6964_v54 = vadd.f32 1.1283791, %v6861_v27  ;;  %v6971_v22 = vadd.f32 %v804_v43, %v5901_v48 }
 0x21b   : > { %8663 = vst [vmem:[#allocation46_spill] sm:$0xff] %v6955_v28  ;;  %v6966_v50 = vadd.f32 1.1283791, %v1992_v57  ;;  %v6968_v37 = vadd.f32 1.1283791, %v1952_v59  ;;  %3671 = vmatmul.bf16.gmra.mxu2 %v6955_v28  ;;  %3818 = vmatmul.bf16.gmra.mxu1 %v6955_v28  ;;  %v6976_v16 = vmul.f32 %v2111_v3, %v6766_v40  ;;  %v6978_v13 = vmin.f32 %v2222_v12, 16.0 }
 0x21c   : > { %v5058_v8 = vpop.eup %5057  ;;  %v6981_v27 = vmul.f32 0.70710677, %v6950_v4  ;;  %5061 = vrcp.f32 %v6961_v41  ;;  %v2065_v2 = vadd.f32 0.00028619796, %v2064_v33  ;;  %v1416_v61 = vand.u32 2147483648, %v6933_v19 }
 0x21d   : > { %8664 = vst [vmem:[#allocation90_spill] sm:$0xff] %v6978_v13  ;;  %v1406_v63 = vmul.f32 %v5058_v8, %v6933_v19  ;;  %v6986_v57 = vadd.f32 1.0, %v2523_v60  ;;  %v2224_v55 = vmul.f32 2.1237322e-06, %v6978_v13  ;;  %v2184_v35 = vmul.f32 2.1237322e-06, %v6959_v26 }
 0x21e   : > { %v1483_v59 = vmul.f32 %v1482_v7, %v6433_v34  ;;  %v2637_v3 = vmul.f32 %v2636_v24, %v8661_v45  ;;  %vm1410_vm0 = vweird.f32 %v6933_v19  ;;  %vm1411_vm1 = vweird.f32 %v5058_v8  ;;  %v8669_v24 = vld [vmem:[#allocation71_spill] sm:$0xff] }
 0x21f   : > { %v5060_v56 = vpop.eup %5059  ;;  %v1407_v29 = vsub.f32 1.0, %v1406_v63  ;;  %v1414_v12 = vand.u32 2147483647, %v6933_v19  ;;  %v2342_v14 = vmul.f32 %v6981_v27, %v6981_v27  ;;  %v1536_v33 = vand.u32 2147483648, %v6946_v1  ;;  %vm7002_vm3 = vmor %vm1410_vm0, %vm1411_vm1 }
 0x220   : > { %v1526_v47 = vmul.f32 %v5060_v56, %v6946_v1  ;;  %v6998_v60 = vadd.f32 1.0, %v1483_v59  ;;  %v1417_v34 = vor.u32 1.1754944e-38, %v1416_v61  ;;  %vm1530_vm2 = vweird.f32 %v6946_v1 }
 0x221   : > { %v1408_v43 = vmul.f32 %v5058_v8, %v1407_v29  ;;  %5063 = vrcp.f32 %v6986_v57  ;;  %vm1531_vm4 = vweird.f32 %v5060_v56  ;;  %v1534_v63 = vand.u32 2147483647, %v6946_v1 }
 0x222   : > { %v5062_v7 = vpop.eup %5061  ;;  %v1527_v19 = vsub.f32 1.0, %v1526_v47  ;;  %5065 = vrcp.f32 %v6998_v60  ;;  %vm1415_vm5 = vcmp.eq.f32.partialorder %v1414_v12, 8.507059e+37  ;;  %v2638_v61 = vadd.f32 0.014752088, %v2637_v3  ;;  %vm7015_vm6 = vmor %vm1530_vm2, %vm1531_vm4 }
 0x223   : > { %v1409_v28 = vadd.f32 %v5058_v8, %v1408_v43  ;;  %v1366_v59 = vmul.f32 %v5062_v7, %v6961_v41  ;;  %v1537_v49 = vor.u32 1.1754944e-38, %v1536_v33  ;;  %v1374_v15 = vand.u32 2147483647, %v6961_v41 }
 0x224   : > { %v1528_v29 = vmul.f32 %v5060_v56, %v1527_v19  ;;  %v1376_v40 = vand.u32 2147483648, %v6961_v41  ;;  %vm1370_vm7 = vweird.f32 %v6961_v41  ;;  %vm1371_vm8 = vweird.f32 %v5062_v7  ;;  %v8675_v41 = vld [vmem:[#allocation29_spill] sm:$0xff] }
 0x225   : > { %v1413_v20 = vsel %vm7002_vm3, %v5058_v8, %v1409_v28  ;;  %v1367_v43 = vsub.f32 1.0, %v1366_v59  ;;  %v2066_v3 = vmul.f32 %v2065_v2, %v6931_v31  ;;  %vm1535_vm9 = vcmp.eq.f32.partialorder %v1534_v63, 8.507059e+37  ;;  %vm7027_vm10 = vmor %vm1370_vm7, %vm1371_vm8  ;;  %v853_v63 = vpop.f32.mrf.mxu3 }
 0x226   : > { %v1418_v12 = vsel %vm1415_vm5, %v1417_v34, %v1413_v20  ;;  %v1529_v33 = vadd.f32 %v5060_v56, %v1528_v29  ;;  %v2225_v30 = vadd.f32 0.00028619796, %v2224_v55  ;;  %v2639_v1 = vmul.f32 %v2638_v61, %v8661_v45 }
 0x227   : > { %v7021_v19 = vpop.eup %5063  ;;  %v1419_v28 = vmul.f32 %v1418_v12, %v8669_v24  ;;  %v1368_v8 = vmul.f32 %v5062_v7, %v1367_v43  ;;  %v2185_v23 = vadd.f32 0.00028619796, %v2184_v35  ;;  %vm7031_vm11 = vcmp.eq.f32.partialorder %v1374_v15, 8.507059e+37 }
 0x228   : > { %v5066_v18 = vpop.eup %5065  ;;  %v1533_v59 = vsel %vm7015_vm6, %v5060_v56, %v1529_v33  ;;  %v1377_v2 = vor.u32 1.1754944e-38, %v1376_v40  ;;  %v2067_v43 = vadd.f32 0.0036580483, %v2066_v3  ;;  %v7036_v35 = vmin.f32 %v2342_v14, 16.0 }
 0x229   : > { %v4461_v55 = vclamps-f32 %v1419_v28, 1.0  ;;  %v1538_v34 = vsel %vm1535_vm9, %v1537_v49, %v1533_v59  ;;  %v1369_v29 = vadd.f32 %v5062_v7, %v1368_v8  ;;  %v1486_v61 = vmul.f32 %v5066_v18, %v6998_v60 }
 0x22a   : > { %v1539_v56 = vmul.f32 %v1538_v34, %v6807_v9  ;;  %v2526_v47 = vmul.f32 %v7021_v19, %v6986_v57  ;;  %v2640_v40 = vadd.f32 0.112945676, %v2639_v1  ;;  %v7044_v49 = vadd.f32 %v853_v63, %v6971_v22 }
 0x22b   : > { %v2990_v12 = vadd.f32 1.0, %v4461_v55  ;;  %v1373_v15 = vsel %vm7027_vm10, %v5062_v7, %v1369_v29  ;;  %v1487_v33 = vsub.f32 1.0, %v1486_v61  ;;  %v1496_v14 = vand.u32 2147483648, %v6998_v60 }
 0x22c   : > { %v4464_v24 = vclamps-f32 %v1539_v56, 1.0  ;;  %8674 = vst [vmem:[#allocation71_spill] sm:$0xff] %v7044_v49  ;;  %v1378_v3 = vsel %vm7031_vm11, %v1377_v2, %v1373_v15  ;;  %vm1491_vm12 = vweird.f32 %v5066_v18  ;;  %v1494_v8 = vand.u32 2147483647, %v6998_v60  ;;  %v8676_v2 = vld [vmem:[#allocation67_spill] sm:$0xff] }
 0x22d   : > { %v1379_v9 = vmul.f32 %v1378_v3, %v6745_v42  ;;  %v1488_v28 = vmul.f32 %v5066_v18, %v1487_v33  ;;  %v2226_v59 = vmul.f32 %v2225_v30, %v6978_v13  ;;  %v3038_v1 = vmul.f32 %v2990_v12, %v8675_v41 }
 0x22e   : > { %v2993_v7 = vadd.f32 1.0, %v4464_v24  ;;  %v2527_v55 = vsub.f32 1.0, %v2526_v47  ;;  %v2186_v22 = vmul.f32 %v2185_v23, %v6959_v26  ;;  %v2344_v34 = vmul.f32 2.1237322e-06, %v7036_v35 }
 0x22f   : > { %v1489_v20 = vadd.f32 %v5066_v18, %v1488_v28  ;;  %vm1490_vm13 = vweird.f32 %v6998_v60  ;;  %v7058_v42 = vmul.f32 0.70710677, %v7044_v49  ;;  %v1497_v29 = vor.u32 1.1754944e-38, %v1496_v14 }
 0x230   : > { %v3041_v63 = vmul.f32 %v2993_v7, %v8676_v2  ;;  %vm1492_vm14 = vmor %vm1490_vm13, %vm1491_vm12  ;;  %v2641_v30 = vmul.f32 %v2640_v40, %v8661_v45  ;;  %v2113_v61 = vadd.f32 1.1283791, %v6976_v16  ;;  %v4460_v56 = vclamps-f32 %v1379_v9, 1.0  ;;  %v904_v9 = vpop.f32.mrf.mxu0 }
 0x231   : > { %v1493_v47 = vsel %vm1492_vm14, %v5066_v18, %v1489_v20  ;;  %vm1495_vm15 = vcmp.eq.f32.partialorder %v1494_v8, 8.507059e+37  ;;  %v2068_v23 = vmul.f32 %v2067_v43, %v6931_v31  ;;  %v2528_v60 = vmul.f32 %v7021_v19, %v2527_v55  ;;  %v8679_v55 = vld [vmem:[#allocation31_spill] sm:$0xff] }
 0x232   : > { %v7063_v12 = vpack.c.bf16 %v3041_v63, %v3038_v1  ;;  %v1498_v15 = vsel %vm1495_vm15, %v1497_v29, %v1493_v47  ;;  %v2227_v33 = vadd.f32 0.0036580483, %v2226_v59  ;;  %v2187_v24 = vadd.f32 0.0036580483, %v2186_v22  ;;  %v4613_v1 = vld [vmem:[#allocation8 + $0xe4] sm:$0xf0] }
 0x233   : > { %v2345_v3 = vadd.f32 0.00028619796, %v2344_v34  ;;  %v1499_v28 = vmul.f32 %v1498_v15, %v6815_v51  ;;  %v2302_v16 = vmul.f32 %v7058_v42, %v7058_v42  ;;  %vm2530_vm0 = vweird.f32 %v6986_v57  ;;  %v4871_v51 = vld [vmem:[#allocation8 + $0xdc] sm:$0xf] }
 0x234   : > { %8677 = vst [vmem:[#allocation29_spill] sm:$0xff] %v7063_v12  ;;  %3749 = vmatmul.bf16.gmra.mxu0 %v7063_v12  ;;  %vm2531_vm1 = vweird.f32 %v7021_v19  ;;  %v2642_v18 = vadd.f32 0.4994258, %v2641_v30  ;;  %v7074_v43 = vmul.f32 %v6964_v54, %v6658_v6  ;;  %v2989_v14 = vadd.f32 1.0, %v4460_v56  ;;  %v8682_v56 = vld [vmem:[#allocation66_spill] sm:$0xff] }
 0x235   : > { %v4463_v40 = vclamps-f32 %v1499_v28, 1.0  ;;  %v2536_v8 = vand.u32 2147483648, %v6986_v57  ;;  %v2529_v59 = vadd.f32 %v7021_v19, %v2528_v60  ;;  %v2534_v7 = vand.u32 2147483647, %v6986_v57  ;;  %vm7087_vm2 = vmor %vm2530_vm0, %vm2531_vm1 }
 0x236   : > { %8678 = vst [vmem:[#allocation67_spill] sm:$0xff] %v7074_v43  ;;  %v2643_v41 = vmul.f32 %v2642_v18, %v8661_v45  ;;  %v1635_v22 = vmul.f32 3.8918573e-05, %v8679_v55  ;;  %v2069_v34 = vadd.f32 0.05243302, %v2068_v23  ;;  %v2228_v20 = vmul.f32 %v2227_v33, %v6978_v13  ;;  %v8683_v23 = vld [vmem:[#allocation68_spill] sm:$0xff] }
 0x237   : > { %v2346_v6 = vmul.f32 %v2345_v3, %v7036_v35  ;;  %v2992_v54 = vadd.f32 1.0, %v4463_v40  ;;  %v7091_v63 = vmin.f32 %v2302_v16, 16.0  ;;  %v905_v45 = vadd.f32 %v904_v9, %v5874_v62  ;;  %v8686_v16 = vld [vmem:[#allocation48_spill] sm:$0xff] }
 0x238   : > { %v7094_v29 = vadd.f32 1.0, %v2643_v41  ;;  %v4616_v30 = vor.u32 %v4871_v51, %v4613_v1  ;;  %v3037_v47 = vmul.f32 %v2989_v14, %v8682_v56  ;;  %v2537_v60 = vor.u32 1.1754944e-38, %v2536_v8  ;;  %v806_v1 = vpop.f32.mrf.mxu2 }
 0x239   : > { %v3040_v15 = vmul.f32 %v2992_v54, %v8683_v23  ;;  %v1636_v33 = vadd.f32 0.001143296, %v1635_v22  ;;  %v2188_v3 = vmul.f32 %v2187_v24, %v6959_v26  ;;  %v2533_v57 = vsel %vm7087_vm2, %v7021_v19, %v2529_v59  ;;  %v8689_v24 = vld [vmem:[#allocation30_spill] sm:$0xff]  ;;  %v953_v59 = vpop.f32.mrf.mxu1 }
 0x23a   : > { %vm7102_vm3 = vcmp.eq.f32.partialorder %v2534_v7, 8.507059e+37  ;;  %5067 = vrcp.f32 %v7094_v29  ;;  %3840 = vmatpush.bf16.msra.mxu2 %v4616_v30  ;;  %v7109_v18 = vmul.f32 %v6966_v50, %v8686_v16  ;;  %v2070_v40 = vmul.f32 %v2069_v34, %v6931_v31  ;;  %v8695_v34 = vld [vmem:[#allocation81_spill] sm:$0xff] }
 0x23b   : > { %v2347_v14 = vadd.f32 0.0036580483, %v2346_v6  ;;  %v7112_v9 = vpack.c.bf16 %v3040_v15, %v3037_v47  ;;  %v7116_v8 = vmul.f32 %v6968_v37, %v8689_v24  ;;  %v7119_v19 = vmul.f32 0.5, %v6850_v0 }
 0x23c   : > { %8687 = vst [vmem:[#allocation31_spill] sm:$0xff] %v7109_v18  ;;  %v2304_v51 = vmul.f32 2.1237322e-06, %v7091_v63  ;;  %v1637_v7 = vmul.f32 %v1636_v33, %v8679_v55  ;;  %v7124_v50 = vmul.f32 0.5, %v6908_v39  ;;  %v7127_v41 = vmul.f32 0.5, %v6867_v44 }
 0x23d   : > { %8688 = vst [vmem:[#allocation66_spill] sm:$0xff] %v7112_v9  ;;  %3700 = vmatmul.bf16.gmra.mxu3 %v7112_v9  ;;  %v7130_v22 = vadd.f32 %v953_v59, %v905_v45  ;;  %v2538_v37 = vsel %vm7102_vm3, %v2537_v60, %v2533_v57  ;;  %v7135_v6 = vmul.f32 %v2113_v61, %v8695_v34  ;;  %v2229_v54 = vadd.f32 0.05243302, %v2228_v20  ;;  %v8697_v60 = vld [vmem:[#allocation58_spill] sm:$0xff] }
 0x23e   : > { %8690 = vst [vmem:[#allocation68_spill] sm:$0xff] %v7116_v8  ;;  %v7137_v2 = vadd.f32 0.05243302, %v2188_v3  ;;  %v1638_v30 = vadd.f32 0.014752088, %v1637_v7  ;;  %v2348_v47 = vmul.f32 %v2347_v14, %v7036_v35  ;;  %v807_v33 = vadd.f32 %v806_v1, %v5901_v48  ;;  %v855_v1 = vpop.f32.mrf.mxu3 }
 0x23f   : > { %8691 = vst [vmem:[#allocation48_spill] sm:$0xff] %v7119_v19  ;;  %v7139_v56 = vadd.f32 0.18741608, %v2070_v40  ;;  %v1755_v23 = vmul.f32 3.8918573e-05, %v6615_v25  ;;  %v2539_v57 = vmul.f32 %v2538_v37, %v8697_v60  ;;  %v2656_v16 = vand.u32 2147483648, %v7094_v29 }
 0x240   : > { %8692 = vst [vmem:[#allocation30_spill] sm:$0xff] %v7124_v50  ;;  %v1595_v15 = vmul.f32 3.8918573e-05, %v6557_v5  ;;  %v5068_v45 = vpop.eup %5067  ;;  %v2305_v28 = vadd.f32 0.00028619796, %v2304_v51  ;;  %v1639_v61 = vmul.f32 %v1638_v30, %v8679_v55  ;;  %v8699_v40 = vld [vmem:[#allocation47_spill] sm:$0xff]  ;;  %vm2650_vm4 = vweird.f32 %v7094_v29 }
 0x241   : > { %8693 = vst [vmem:[#allocation91_spill] sm:$0xff] %v7127_v41  ;;  %v7148_v20 = vmul.f32 0.70710677, %v7130_v22  ;;  %v2646_v3 = vmul.f32 %v5068_v45, %v7094_v29  ;;  %v2755_v14 = vmul.f32 3.8918573e-05, %v8699_v40  ;;  %vm2651_vm5 = vweird.f32 %v5068_v45 }
 0x242   : > { %8694 = vst [vmem:[#allocation92_spill] sm:$0xff] %v7130_v22  ;;  %v1640_v24 = vadd.f32 0.112945676, %v1639_v61  ;;  %v1756_v59 = vadd.f32 0.001143296, %v1755_v23  ;;  %v4489_v30 = vclamps-f32 %v2539_v57, 1.0  ;;  %v7159_v23 = vadd.f32 %v855_v1, %v807_v33  ;;  %vm7163_vm6 = vmor %vm2650_vm4, %vm2651_vm5 }
 0x243   : > { %8696 = vst [vmem:[#allocation81_spill] sm:$0xff] %v7135_v6  ;;  %v1596_v7 = vadd.f32 0.001143296, %v1595_v15  ;;  %v2647_v51 = vsub.f32 1.0, %v2646_v3  ;;  %v2654_v37 = vand.u32 2147483647, %v7094_v29 }
 0x244   : > { %8698 = vst [vmem:[#allocation58_spill] sm:$0xff] %v7148_v20  ;;  %v1715_v34 = vmul.f32 3.8918573e-05, %v6590_v36  ;;  %v1641_v60 = vmul.f32 %v1640_v24, %v8679_v55  ;;  %v1757_v39 = vmul.f32 %v1756_v59, %v6615_v25  ;;  %v2657_v12 = vor.u32 1.1754944e-38, %v2656_v16  ;;  %v907_v59 = vpop.f32.mrf.mxu0 }
 0x245   : > { %v1597_v44 = vmul.f32 %v1596_v7, %v6557_v5  ;;  %v2648_v0 = vmul.f32 %v5068_v45, %v2647_v51  ;;  %v2756_v61 = vadd.f32 0.001143296, %v2755_v14  ;;  %8700 = vst [vmem:[#allocation47_spill] sm:$0xff] %v7159_v23  ;;  %v2462_v24 = vmul.f32 %v7148_v20, %v7148_v20 }
 0x246   : > { %v1716_v41 = vadd.f32 0.001143296, %v1715_v34  ;;  %v1642_v3 = vadd.f32 0.4994258, %v1641_v60  ;;  %v1758_v57 = vadd.f32 0.014752088, %v1757_v39  ;;  %v908_v33 = vadd.f32 %v907_v59, %v5874_v62  ;;  %v858_v9 = vpop.f32.mrf.mxu3 }
 0x247   : > { %v1598_v19 = vadd.f32 0.014752088, %v1597_v44  ;;  %v2649_v7 = vadd.f32 %v5068_v45, %v2648_v0  ;;  %vm2655_vm7 = vcmp.eq.f32.partialorder %v2654_v37, 8.507059e+37  ;;  %v3018_v44 = vadd.f32 1.0, %v4489_v30  ;;  %v8705_v30 = vld [vmem:[#allocation41_spill] sm:$0xff] }
 0x248   : > { %v1717_v16 = vmul.f32 %v1716_v41, %v6590_v36  ;;  %v1643_v14 = vmul.f32 %v1642_v3, %v8679_v55  ;;  %v1759_v29 = vmul.f32 %v1758_v57, %v6615_v25  ;;  %v2757_v34 = vmul.f32 %v2756_v61, %v8699_v40  ;;  %v8703_v55 = vld [vmem:[#allocation42_spill] sm:$0xff] }
 0x249   : > { %v1599_v1 = vmul.f32 %v1598_v19, %v6557_v5  ;;  %v2653_v39 = vsel %vm7163_vm6, %v5068_v45, %v2649_v7  ;;  %v2230_v59 = vmul.f32 %v2229_v54, %v6978_v13  ;;  %v2349_v50 = vadd.f32 0.05243302, %v2348_v47 }
 0x24a   : > { %v1718_v51 = vadd.f32 0.014752088, %v1717_v16  ;;  %v2658_v60 = vsel %vm2655_vm7, %v2657_v12, %v2653_v39  ;;  %v7177_v0 = vadd.f32 1.0, %v1643_v14  ;;  %v1760_v37 = vadd.f32 0.112945676, %v1759_v29  ;;  %v956_v12 = vpop.f32.mrf.mxu1  ;;  %v8707_v29 = vld [vmem:[#allocation54_spill] sm:$0xff] }
 0x24b   : > { %v1600_v41 = vadd.f32 0.112945676, %v1599_v1  ;;  %v2659_v3 = vmul.f32 %v2658_v60, %v8703_v55  ;;  %v2306_v19 = vmul.f32 %v2305_v28, %v7091_v63  ;;  %v7184_v45 = vmul.f32 0.70710677, %v7159_v23 }
 0x24c   : > { %v1719_v57 = vmul.f32 %v1718_v51, %v6590_v36  ;;  %v1005_v15 = vmul.f32 0.5, %v8705_v30  ;;  %5069 = vrcp.f32 %v7177_v0  ;;  %v1761_v7 = vmul.f32 %v1760_v37, %v6615_v25 }
 0x24d   : > { %8704 = vst [vmem:[#allocation42_spill] sm:$0xff] %v7184_v45  ;;  %v4492_v61 = vclamps-f32 %v2659_v3, 1.0  ;;  %v1601_v54 = vmul.f32 %v1600_v41, %v6557_v5  ;;  %v7190_v16 = vmin.f32 %v2462_v24, 16.0  ;;  %v7192_v14 = vadd.f32 %v956_v12, %v908_v33  ;;  %v4691_v33 = vld [vmem:[#allocation8 + $0x170] sm:$0xf] }
 0x24e   : > { %v1720_v47 = vadd.f32 0.112945676, %v1719_v57  ;;  %v3066_v28 = vmul.f32 %v3018_v44, %v8707_v29  ;;  %v2758_v1 = vadd.f32 0.014752088, %v2757_v34  ;;  %v1762_v51 = vadd.f32 0.4994258, %v1761_v7 }
 0x24f   : > { %8706 = vst [vmem:[#allocation93_spill] sm:$0xff] %v7192_v14  ;;  %v3021_v39 = vadd.f32 1.0, %v4492_v61  ;;  %v1602_v60 = vadd.f32 0.4994258, %v1601_v54  ;;  %v2072_v3 = vmul.f32 %v7139_v56, %v6931_v31  ;;  %v2190_v37 = vmul.f32 %v7137_v2, %v6959_v26  ;;  %v4891_v57 = vld [vmem:[#allocation8 + $0x178] sm:$0xf0] }
 0x250   : > { %v1721_v55 = vmul.f32 %v1720_v47, %v6590_v36  ;;  %v2307_v41 = vadd.f32 0.0036580483, %v2306_v19  ;;  %v2422_v24 = vmul.f32 %v7184_v45, %v7184_v45  ;;  %v2464_v44 = vmul.f32 2.1237322e-06, %v7190_v16  ;;  %v8709_v2 = vld [vmem:[#allocation51_spill] sm:$0xff] }
 0x251   : > { %v3069_v34 = vmul.f32 %v3021_v39, %v1005_v15  ;;  %v1763_v12 = vmul.f32 %v1762_v51, %v6615_v25  ;;  %v4692_v61 = vor.u32 %v4891_v57, %v4691_v33  ;;  %v7205_v54 = vmul.f32 0.70710677, %v7192_v14 }
 0x252   : > { %v5070_v7 = vpop.eup %5069  ;;  %v1603_v56 = vmul.f32 %v1602_v60, %v6557_v5  ;;  %v1722_v47 = vadd.f32 0.4994258, %v1721_v55  ;;  %v2875_v19 = vmul.f32 3.8918573e-05, %v8709_v2  ;;  %v2759_v15 = vmul.f32 %v2758_v1, %v8699_v40 }
 0x253   : > { %8708 = vst [vmem:[#allocation54_spill] sm:$0xff] %v7205_v54  ;;  %v7209_v29 = vpack.c.bf16 %v3069_v34, %v3066_v28  ;;  %v1646_v30 = vmul.f32 %v5070_v7, %v7177_v0  ;;  %v7212_v6 = vadd.f32 1.0, %v1763_v12  ;;  %3981 = vmatpush.bf16.msrb.mxu1 %v4692_v61  ;;  %vm1650_vm8 = vweird.f32 %v7177_v0  ;;  %v809_v61 = vpop.f32.mrf.mxu2 }
 0x254   : > { %v1656_v25 = vand.u32 2147483648, %v7177_v0  ;;  %v7217_v39 = vadd.f32 1.0, %v1603_v56  ;;  %v1723_v5 = vmul.f32 %v1722_v47, %v6590_v36  ;;  %vm1651_vm9 = vweird.f32 %v5070_v7 }
 0x255   : > { %8710 = vst [vmem:[#allocation51_spill] sm:$0xff] %v7209_v29  ;;  %3676 = vmatmul.bf16.gmra.mxu2 %v7209_v29  ;;  %v1647_v51 = vsub.f32 1.0, %v1646_v30  ;;  %v1654_v28 = vand.u32 2147483647, %v7177_v0  ;;  %5071 = vrcp.f32 %v7212_v6  ;;  %3823 = vmatmul.bf16.gmra.mxu1 %v7209_v29  ;;  %v2231_v60 = vadd.f32 0.18741608, %v2230_v59  ;;  %vm7235_vm10 = vmor %vm1650_vm8, %vm1651_vm9 }
 0x256   : > { %v7224_v1 = vadd.f32 0.18741608, %v2190_v37  ;;  %v2350_v55 = vmul.f32 %v2349_v50, %v7036_v35  ;;  %5073 = vrcp.f32 %v7217_v39  ;;  %v2308_v33 = vmul.f32 %v2307_v41, %v7091_v63 }
 0x257   : > { %v2465_v36 = vadd.f32 0.00028619796, %v2464_v44  ;;  %v7229_v57 = vmin.f32 %v2422_v24, 16.0  ;;  %v1648_v30 = vmul.f32 %v5070_v7, %v1647_v51  ;;  %v7231_v34 = vadd.f32 1.1283791, %v2072_v3 }
 0x258   : > { %v1657_v59 = vor.u32 1.1754944e-38, %v1656_v25  ;;  %v7239_v37 = vadd.f32 1.0, %v1723_v5  ;;  %v2760_v50 = vadd.f32 0.112945676, %v2759_v15  ;;  %v2582_v41 = vmul.f32 %v7205_v54, %v7205_v54 }
 0x259   : > { %v1649_v44 = vadd.f32 %v5070_v7, %v1648_v30  ;;  %vm1655_vm11 = vcmp.eq.f32.partialorder %v1654_v28, 8.507059e+37  ;;  %v2876_v24 = vadd.f32 0.001143296, %v2875_v19  ;;  %v7244_v3 = vmul.f32 %v2231_v60, %v6978_v13  ;;  %v4679_v30 = vld [vmem:[#allocation8 + $0x158] sm:$0xf] }
 0x25a   : > { %v7246_v56 = vadd.f32 0.18741608, %v2350_v55  ;;  %v810_v0 = vadd.f32 %v809_v61, %v5901_v48  ;;  %5075 = vrcp.f32 %v7239_v37  ;;  %v7250_v25 = vadd.f32 0.05243302, %v2308_v33  ;;  %v4888_v61 = vld [vmem:[#allocation8 + $0x160] sm:$0xf0] }
 0x25b   : > { %v5072_v47 = vpop.eup %5071  ;;  %v7253_v15 = vmul.f32 %v2465_v36, %v7190_v16  ;;  %v7256_v5 = vmul.f32 2.1237322e-06, %v7229_v57  ;;  %v1653_v19 = vsel %vm7235_vm10, %v5070_v7, %v1649_v44  ;;  %v1776_v55 = vand.u32 2147483648, %v7212_v6  ;;  %v4667_v44 = vld [vmem:[#allocation8 + $0x140] sm:$0xf] }
 0x25c   : > { %v5074_v51 = vpop.eup %5073  ;;  %v1658_v28 = vsel %vm1655_vm11, %v1657_v59, %v1653_v19  ;;  %v1766_v60 = vmul.f32 %v5072_v47, %v7212_v6  ;;  %v2761_v33 = vmul.f32 %v2760_v50, %v8699_v40  ;;  %v7263_v29 = vmin.f32 %v2582_v41, 16.0  ;;  %v4885_v19 = vld [vmem:[#allocation8 + $0x148] sm:$0xf0] }
 0x25d   : > { %v1774_v36 = vand.u32 2147483647, %v7212_v6  ;;  %v1606_v31 = vmul.f32 %v5074_v51, %v7217_v39  ;;  %v2877_v12 = vmul.f32 %v2876_v24, %v8709_v2  ;;  %v1659_v7 = vmul.f32 %v1658_v28, %v6818_v11 }
 0x25e   : > { %v1767_v59 = vsub.f32 1.0, %v1766_v60  ;;  %vm1770_vm12 = vweird.f32 %v7212_v6  ;;  %vm1771_vm13 = vweird.f32 %v5072_v47  ;;  %v1614_v50 = vand.u32 2147483647, %v7217_v39 }
 0x25f   : > { %v1607_v8 = vsub.f32 1.0, %v1606_v31  ;;  %v1616_v41 = vand.u32 2147483648, %v7217_v39  ;;  %v4680_v43 = vor.u32 %v4888_v61, %v4679_v30  ;;  %v1777_v54 = vor.u32 1.1754944e-38, %v1776_v55  ;;  %vm7274_vm14 = vmor %vm1770_vm12, %vm1771_vm13 }
 0x260   : > { %v5076_v18 = vpop.eup %5075  ;;  %v1768_v13 = vmul.f32 %v5072_v47, %v1767_v59  ;;  %v7272_v45 = vadd.f32 %v858_v9, %v810_v0  ;;  %v2762_v24 = vadd.f32 0.4994258, %v2761_v33  ;;  %vm1611_vm15 = vweird.f32 %v5074_v51 }
 0x261   : > { %v1608_v6 = vmul.f32 %v5074_v51, %v1607_v8  ;;  %v1726_v28 = vmul.f32 %v5076_v18, %v7239_v37  ;;  %3982 = vmatpush.bf16.msrb.mxu1 %v4680_v43  ;;  %v4668_v31 = vor.u32 %v4885_v19, %v4667_v44  ;;  %v4467_v60 = vclamps-f32 %v1659_v7, 1.0 }
 0x262   : > { %8713 = vst [vmem:[#allocation94_spill] sm:$0xff] %v7272_v45  ;;  %v1769_v20 = vadd.f32 %v5072_v47, %v1768_v13  ;;  %vm1775_vm0 = vcmp.eq.f32.partialorder %v1774_v36, 8.507059e+37  ;;  %vm1610_vm1 = vweird.f32 %v7217_v39  ;;  %vm7280_vm2 = vcmp.eq.f32.partialorder %v1614_v50, 8.507059e+37 }
 0x263   : > { %v1609_v30 = vadd.f32 %v5074_v51, %v1608_v6  ;;  %v1617_v0 = vor.u32 1.1754944e-38, %v1616_v41  ;;  %v1727_v55 = vsub.f32 1.0, %v1726_v28  ;;  %vm1612_vm3 = vmor %vm1610_vm1, %vm1611_vm15  ;;  %v1734_v61 = vand.u32 2147483647, %v7239_v37  ;;  %v909_v6 = vpop.f32.mrf.mxu0 }
 0x264   : > { %v1773_v8 = vsel %vm7274_vm14, %v5072_v47, %v1769_v20  ;;  %v1736_v43 = vand.u32 2147483648, %v7239_v37  ;;  %v2763_v13 = vmul.f32 %v2762_v24, %v8699_v40  ;;  %vm1731_vm4 = vweird.f32 %v5076_v18 }
 0x265   : > { %v1778_v33 = vsel %vm1775_vm0, %v1777_v54, %v1773_v8  ;;  %v1613_v36 = vsel %vm1612_vm3, %v5074_v51, %v1609_v30  ;;  %v1728_v39 = vmul.f32 %v5076_v18, %v1727_v55  ;;  %3983 = vmatpush.bf16.msrb.mxu1 %v4668_v31  ;;  %v2584_v7 = vmul.f32 2.1237322e-06, %v7263_v29  ;;  %v8718_v31 = vld [vmem:[#allocation72_spill] sm:$0xff] }
 0x266   : > { %v1779_v59 = vmul.f32 %v1778_v33, %v6827_v32  ;;  %v2996_v44 = vadd.f32 1.0, %v4467_v60  ;;  %v1618_v20 = vsel %vm7280_vm2, %v1617_v0, %v1613_v36  ;;  %vm1730_vm5 = vweird.f32 %v7239_v37 }
 0x267   : > { %v1619_v47 = vmul.f32 %v1618_v20, %v6822_v58  ;;  %v1729_v19 = vadd.f32 %v5076_v18, %v1728_v39  ;;  %v2878_v50 = vadd.f32 0.014752088, %v2877_v12  ;;  %v7296_v54 = vmul.f32 0.70710677, %v7272_v45  ;;  %vm1732_vm6 = vmor %vm1730_vm5, %vm1731_vm4 }
 0x268   : > { %v4470_v40 = vclamps-f32 %v1779_v59, 1.0  ;;  %v1737_v51 = vor.u32 1.1754944e-38, %v1736_v43  ;;  %v7298_v41 = vadd.f32 1.0, %v2763_v13  ;;  %v2425_v32 = vadd.f32 0.00028619796, %v7256_v5 }
 0x269   : > { %v4466_v24 = vclamps-f32 %v1619_v47, 1.0  ;;  %v1733_v11 = vsel %vm1732_vm6, %v5076_v18, %v1729_v19  ;;  %vm1735_vm7 = vcmp.eq.f32.partialorder %v1734_v61, 8.507059e+37  ;;  %v2467_v58 = vadd.f32 0.0036580483, %v7253_v15 }
 0x26a   : > { %v2999_v28 = vadd.f32 1.0, %v4470_v40  ;;  %v3044_v37 = vmul.f32 %v2996_v44, %v8718_v31  ;;  %v1738_v12 = vsel %vm1735_vm7, %v1737_v51, %v1733_v11  ;;  %v2192_v60 = vmul.f32 %v7224_v1, %v6959_v26  ;;  %v860_v11 = vpop.f32.mrf.mxu3 }
 0x26b   : > { %v2585_v30 = vadd.f32 0.00028619796, %v2584_v7  ;;  %v1739_v9 = vmul.f32 %v1738_v12, %v6830_v21  ;;  %v2879_v0 = vmul.f32 %v2878_v50, %v8709_v2  ;;  %v2542_v18 = vmul.f32 %v7296_v54, %v7296_v54  ;;  %v958_v7 = vpop.f32.mrf.mxu1 }
 0x26c   : > { %v3047_v5 = vmul.f32 %v2999_v28, %v6794_v17  ;;  %v910_v55 = vadd.f32 %v909_v6, %v5874_v62  ;;  %5077 = vrcp.f32 %v7298_v41  ;;  %v2352_v15 = vmul.f32 %v7246_v56, %v7036_v35 }
 0x26d   : > { %v2426_v8 = vmul.f32 %v2425_v32, %v7229_v57  ;;  %v4469_v1 = vclamps-f32 %v1739_v9, 1.0  ;;  %v2995_v61 = vadd.f32 1.0, %v4466_v24  ;;  %v2233_v21 = vadd.f32 1.1283791, %v7244_v3  ;;  %v811_v3 = vpop.f32.mrf.mxu2 }
 0x26e   : > { %v2310_v43 = vmul.f32 %v7250_v25, %v7091_v63  ;;  %v2468_v17 = vmul.f32 %v2467_v58, %v7190_v16  ;;  %v7319_v13 = vpack.c.bf16 %v3047_v5, %v3044_v37  ;;  %v7323_v33 = vmul.f32 %v7231_v34, %v6870_v53  ;;  %v8721_v53 = vld [vmem:[#allocation82_spill] sm:$0xff] }
 0x26f   : > { %v7326_v36 = vmul.f32 0.5, %v6950_v4  ;;  %v2586_v56 = vmul.f32 %v2585_v30, %v7263_v29  ;;  %v2998_v39 = vadd.f32 1.0, %v4469_v1  ;;  %v2193_v59 = vadd.f32 1.1283791, %v2192_v60  ;;  %v4655_v1 = vld [vmem:[#allocation8 + $0x128] sm:$0xf] }
 0x270   : > { %8719 = vst [vmem:[#allocation72_spill] sm:$0xff] %v7319_v13  ;;  %3754 = vmatmul.bf16.gmra.mxu0 %v7319_v13  ;;  %v7330_v25 = vmin.f32 %v2542_v18, 16.0  ;;  %v7332_v44 = vadd.f32 %v958_v7, %v910_v55  ;;  %v2880_v20 = vadd.f32 0.112945676, %v2879_v0  ;;  %v2353_v47 = vadd.f32 1.1283791, %v2352_v15 }
 0x271   : > { %v2427_v19 = vadd.f32 0.0036580483, %v2426_v8  ;;  %v3043_v34 = vmul.f32 %v2995_v61, %v8721_v53  ;;  %v3046_v50 = vmul.f32 %v2998_v39, %v6798_v38  ;;  %v7339_v51 = vmul.f32 %v2233_v21, %v6928_v46  ;;  %v4868_v18 = vld [vmem:[#allocation8 + $0xc4] sm:$0xf]  ;;  %v4601_v55 = vld [vmem:[#allocation8 + $0xcc] sm:$0xf0] }
 0x272   : > { %8720 = vst [vmem:[#allocation95_spill] sm:$0xff] %v7332_v44  ;;  %v7336_v40 = vpop.eup %5077  ;;  %v2311_v32 = vadd.f32 0.18741608, %v2310_v43  ;;  %v2469_v24 = vadd.f32 0.05243302, %v2468_v17  ;;  %v2881_v6 = vmul.f32 %v2880_v20, %v8709_v2  ;;  %v812_v28 = vadd.f32 %v811_v3, %v5901_v48 }
 0x273   : > { %v2587_v58 = vadd.f32 0.0036580483, %v2586_v56  ;;  %v7343_v31 = vpack.c.bf16 %v3046_v50, %v3043_v34  ;;  %v2766_v37 = vmul.f32 %v7336_v40, %v7298_v41  ;;  %v7348_v38 = vmul.f32 %v2193_v59, %v6923_v10  ;;  %v4882_v61 = vld [vmem:[#allocation8 + $0x130] sm:$0xf0] }
 0x274   : > { %v2544_v12 = vmul.f32 2.1237322e-06, %v7330_v25  ;;  %v7352_v46 = vmul.f32 0.70710677, %v7332_v44  ;;  %v2882_v60 = vadd.f32 0.4994258, %v2881_v6  ;;  %v7355_v30 = vmul.f32 %v2353_v47, %v6981_v27 }
 0x275   : > { %v2428_v9 = vmul.f32 %v2427_v19, %v7229_v57  ;;  %3705 = vmatmul.bf16.gmra.mxu3 %v7343_v31  ;;  %v7359_v0 = vadd.f32 %v860_v11, %v812_v28  ;;  %v2767_v5 = vsub.f32 1.0, %v2766_v37  ;;  %v2470_v10 = vmul.f32 %v2469_v24, %v7190_v16  ;;  %v8727_v37 = vld [vmem:[#allocation75_spill] sm:$0xff] }
 0x276   : > { %v2883_v15 = vmul.f32 %v2882_v60, %v8709_v2  ;;  %v4604_v8 = vor.u32 %v4868_v18, %v4601_v55  ;;  %v1875_v21 = vmul.f32 3.8918573e-05, %v6638_v52  ;;  %vm2770_vm8 = vweird.f32 %v7298_v41  ;;  %v912_v55 = vpop.f32.mrf.mxu0 }
 0x277   : > { %8722 = vst [vmem:[#allocation82_spill] sm:$0xff] %v7359_v0  ;;  %v2768_v27 = vmul.f32 %v7336_v40, %v2767_v5  ;;  %vm2771_vm9 = vweird.f32 %v7336_v40  ;;  %v4656_v43 = vor.u32 %v4882_v61, %v4655_v1  ;;  %v2312_v17 = vmul.f32 %v2311_v32, %v7091_v63 }
 0x278   : > { %v2776_v56 = vand.u32 2147483648, %v7298_v41  ;;  %v7369_v39 = vadd.f32 1.0, %v2883_v15  ;;  %3841 = vmatpush.bf16.msra.mxu2 %v4604_v8  ;;  %v1876_v2 = vadd.f32 0.001143296, %v1875_v21  ;;  %v2429_v7 = vadd.f32 0.05243302, %v2428_v9  ;;  %vm7385_vm10 = vmor %vm2770_vm8, %vm2771_vm9 }
 0x279   : > { %v7372_v59 = vmul.f32 0.70710677, %v7359_v0  ;;  %v2769_v3 = vadd.f32 %v7336_v40, %v2768_v27  ;;  %v2774_v20 = vand.u32 2147483647, %v7298_v41  ;;  %3984 = vmatpush.bf16.msrb.mxu1 %v4656_v43  ;;  %v7377_v47 = vmul.f32 0.5, %v7044_v49  ;;  %v8728_v21 = vld [vmem:[#allocation79_spill] sm:$0xff] }
 0x27a   : > { %v2471_v19 = vadd.f32 0.18741608, %v2470_v10  ;;  %v2702_v53 = vmul.f32 %v7352_v46, %v7352_v46  ;;  %5079 = vrcp.f32 %v7369_v39  ;;  %v7391_v50 = vmul.f32 0.5, %v7130_v22  ;;  %v8735_v49 = vld [vmem:[#allocation35_spill] sm:$0xff] }
 0x27b   : > { %8723 = vst [vmem:[#allocation96_spill] sm:$0xff] %v7372_v59  ;;  %v7394_v32 = vmul.f32 0.5, %v7159_v23  ;;  %v2588_v24 = vmul.f32 %v2587_v58, %v7263_v29  ;;  %v2545_v11 = vadd.f32 0.00028619796, %v2544_v12  ;;  %v7397_v6 = vadd.f32 1.1283791, %v2312_v17 }
 0x27c   : > { %v2777_v28 = vor.u32 1.1754944e-38, %v2776_v56  ;;  %v1877_v41 = vmul.f32 %v1876_v2, %v6638_v52  ;;  %v1835_v60 = vmul.f32 3.8918573e-05, %v8727_v37  ;;  %v2430_v9 = vmul.f32 %v2429_v7, %v7229_v57  ;;  %v8761_v0 = vld [vmem:[#allocation67_spill] sm:$0xff] }
 0x27d   : > { %8726 = vst [vmem:[#allocation97_spill] sm:$0xff] %v7394_v32  ;;  %v2662_v5 = vmul.f32 %v7372_v59, %v7372_v59  ;;  %v2773_v18 = vsel %vm7385_vm10, %v7336_v40, %v2769_v3  ;;  %vm2775_vm11 = vcmp.eq.f32.partialorder %v2774_v20, 8.507059e+37  ;;  %v7408_v58 = vmul.f32 %v2471_v19, %v7190_v16 }
 0x27e   : > { %v7410_v12 = vmin.f32 %v2702_v53, 16.0  ;;  %v1878_v10 = vadd.f32 0.014752088, %v1877_v41  ;;  %v1836_v15 = vadd.f32 0.001143296, %v1835_v60  ;;  %v2546_v1 = vmul.f32 %v2545_v11, %v7330_v25  ;;  %v961_v11 = vpop.f32.mrf.mxu1  ;;  %v8729_v41 = vld [vmem:[#allocation43_spill] sm:$0xff] }
 0x27f   : > { %v2589_v8 = vadd.f32 0.05243302, %v2588_v24  ;;  %v913_v61 = vadd.f32 %v912_v55, %v5874_v62  ;;  %v1995_v27 = vmul.f32 3.8918573e-05, %v8728_v21  ;;  %v2778_v40 = vsel %vm2775_vm11, %v2777_v28, %v2773_v18  ;;  %v8730_v18 = vld [vmem:[#allocation80_spill] sm:$0xff] }
 0x280   : > { %v5080_v43 = vpop.eup %5079  ;;  %v2704_v17 = vmul.f32 2.1237322e-06, %v7410_v12  ;;  %v1879_v56 = vmul.f32 %v1878_v10, %v6638_v52  ;;  %v1837_v2 = vmul.f32 %v1836_v15, %v8727_v37  ;;  %v7418_v7 = vmin.f32 %v2662_v5, 16.0 }
 0x281   : > { %v2886_v3 = vmul.f32 %v5080_v43, %v7369_v39  ;;  %v2894_v20 = vand.u32 2147483647, %v7369_v39  ;;  %v2896_v19 = vand.u32 2147483648, %v7369_v39  ;;  %vm2890_vm12 = vweird.f32 %v7369_v39 }
 0x282   : > { %v1880_v53 = vadd.f32 0.112945676, %v1879_v56  ;;  %v1996_v34 = vadd.f32 0.001143296, %v1995_v27  ;;  %v1838_v24 = vadd.f32 0.014752088, %v1837_v2  ;;  %v2779_v28 = vmul.f32 %v2778_v40, %v8729_v41 }
 0x283   : > { %v2887_v60 = vsub.f32 1.0, %v2886_v3  ;;  %vm2891_vm13 = vweird.f32 %v5080_v43  ;;  %v1955_v55 = vmul.f32 3.8918573e-05, %v8730_v18  ;;  %v7426_v5 = vadd.f32 %v961_v11, %v913_v61 }
 0x284   : > { %v1881_v10 = vmul.f32 %v1880_v53, %v6638_v52  ;;  %v1997_v15 = vmul.f32 %v1996_v34, %v8728_v21  ;;  %v1839_v22 = vmul.f32 %v1838_v24, %v8727_v37  ;;  %v2664_v4 = vmul.f32 2.1237322e-06, %v7418_v7  ;;  %vm7435_vm14 = vmor %vm2890_vm12, %vm2891_vm13 }
 0x285   : > { %8731 = vst [vmem:[#allocation75_spill] sm:$0xff] %v7426_v5  ;;  %v2888_v56 = vmul.f32 %v5080_v43, %v2887_v60  ;;  %v2897_v27 = vor.u32 1.1754944e-38, %v2896_v19  ;;  %v1956_v2 = vadd.f32 0.001143296, %v1955_v55  ;;  %v2590_v23 = vmul.f32 %v2589_v8, %v7263_v29 }
 0x286   : > { %v1882_v61 = vadd.f32 0.4994258, %v1881_v10  ;;  %v1998_v3 = vadd.f32 0.014752088, %v1997_v15  ;;  %v1840_v53 = vadd.f32 0.112945676, %v1839_v22 }
 0x287   : > { %v4495_v11 = vclamps-f32 %v2779_v28, 1.0  ;;  %v2889_v34 = vadd.f32 %v5080_v43, %v2888_v56  ;;  %vm2895_vm15 = vcmp.eq.f32.partialorder %v2894_v20, 8.507059e+37  ;;  %v1957_v24 = vmul.f32 %v1956_v2, %v8730_v18 }
 0x288   : > { %v7441_v41 = vmul.f32 0.70710677, %v7426_v5  ;;  %v1883_v19 = vmul.f32 %v1882_v61, %v6638_v52  ;;  %v1999_v8 = vmul.f32 %v1998_v3, %v8728_v21  ;;  %v1841_v39 = vmul.f32 %v1840_v53, %v8727_v37 }
 0x289   : > { %v2547_v60 = vadd.f32 0.0036580483, %v2546_v1  ;;  %v2705_v55 = vadd.f32 0.00028619796, %v2704_v17  ;;  %v2893_v10 = vsel %vm7435_vm14, %v5080_v43, %v2889_v34  ;;  %v1958_v22 = vadd.f32 0.014752088, %v1957_v24 }
 0x28a   : > { %8734 = vst [vmem:[#allocation79_spill] sm:$0xff] %v7441_v41  ;;  %v2898_v28 = vsel %vm2895_vm15, %v2897_v27, %v2893_v10  ;;  %v7448_v15 = vadd.f32 1.0, %v1883_v19  ;;  %v2000_v20 = vadd.f32 0.112945676, %v1999_v8  ;;  %v1842_v56 = vadd.f32 0.4994258, %v1841_v39  ;;  %v814_v10 = vpop.f32.mrf.mxu2 }
 0x28b   : > { %v2431_v2 = vadd.f32 0.18741608, %v2430_v9  ;;  %v2899_v13 = vmul.f32 %v2898_v28, %v8735_v49  ;;  %v3024_v5 = vadd.f32 1.0, %v4495_v11  ;;  %v1959_v52 = vmul.f32 %v1958_v22, %v8730_v18  ;;  %v8736_v43 = vld [vmem:[#allocation45_spill] sm:$0xff]  ;;  %v8737_v34 = vld [vmem:[#allocation56_spill] sm:$0xff] }
 0x28c   : > { %v2591_v61 = vadd.f32 0.18741608, %v2590_v23  ;;  %v2665_v3 = vadd.f32 0.00028619796, %v2664_v4  ;;  %v2822_v1 = vmul.f32 %v7441_v41, %v7441_v41  ;;  %5081 = vrcp.f32 %v7448_v15 }
 0x28d   : > { %v1011_v17 = vmul.f32 0.5, %v8736_v43  ;;  %v4498_v27 = vclamps-f32 %v2899_v13, 1.0  ;;  %v2001_v40 = vmul.f32 %v2000_v20, %v8728_v21  ;;  %v1843_v53 = vmul.f32 %v1842_v56, %v8727_v37 }
 0x28e   : > { %v2473_v9 = vadd.f32 1.1283791, %v7408_v58  ;;  %v2548_v49 = vmul.f32 %v2547_v60, %v7330_v25  ;;  %v2706_v11 = vmul.f32 %v2705_v55, %v7410_v12  ;;  %v1960_v23 = vadd.f32 0.112945676, %v1959_v52  ;;  %v4643_v58 = vld [vmem:[#allocation8 + $0x110] sm:$0xf] }
 0x28f   : > { %v3027_v4 = vadd.f32 1.0, %v4498_v27  ;;  %v3072_v24 = vmul.f32 %v3024_v5, %v8737_v34  ;;  %v2002_v19 = vadd.f32 0.4994258, %v2001_v40  ;;  %v7462_v8 = vadd.f32 1.0, %v1843_v53  ;;  %v4879_v60 = vld [vmem:[#allocation8 + $0x118] sm:$0xf0] }
 0x290   : > { %v2432_v39 = vmul.f32 %v2431_v2, %v7229_v57  ;;  %v2592_v13 = vmul.f32 %v2591_v61, %v7263_v29  ;;  %v2666_v37 = vmul.f32 %v2665_v3, %v7418_v7  ;;  %v7467_v22 = vmin.f32 %v2822_v1, 16.0  ;;  %v8740_v34 = vld [vmem:[#allocation58_spill] sm:$0xff] }
 0x291   : > { %v815_v55 = vadd.f32 %v814_v10, %v5901_v48  ;;  %v3075_v28 = vmul.f32 %v3027_v4, %v1011_v17  ;;  %v2003_v20 = vmul.f32 %v2002_v19, %v8728_v21  ;;  %v4644_v5 = vor.u32 %v4879_v60, %v4643_v58  ;;  %v863_v4 = vpop.f32.mrf.mxu3 }
 0x292   : > { %v5082_v56 = vpop.eup %5081  ;;  %v2549_v52 = vadd.f32 0.05243302, %v2548_v49  ;;  %v2824_v27 = vmul.f32 2.1237322e-06, %v7467_v22  ;;  %5083 = vrcp.f32 %v7462_v8  ;;  %v1961_v2 = vmul.f32 %v1960_v23, %v8730_v18 }
 0x293   : > { %v2707_v61 = vadd.f32 0.0036580483, %v2706_v11  ;;  %v7474_v3 = vpack.c.bf16 %v3075_v28, %v3072_v24  ;;  %v1886_v1 = vmul.f32 %v5082_v56, %v7448_v15  ;;  %v7477_v40 = vadd.f32 1.0, %v2003_v20  ;;  %3985 = vmatpush.bf16.msrb.mxu1 %v4644_v5 }
 0x294   : > { %v7480_v17 = vmul.f32 0.5, %v7192_v14  ;;  %v2667_v21 = vadd.f32 0.0036580483, %v2666_v37  ;;  %v1894_v53 = vand.u32 2147483647, %v7448_v15  ;;  %v1896_v49 = vand.u32 2147483648, %v7448_v15 }
 0x295   : > { %8738 = vst [vmem:[#allocation43_spill] sm:$0xff] %v7474_v3  ;;  %3681 = vmatmul.bf16.gmra.mxu2 %v7474_v3  ;;  %v1887_v23 = vsub.f32 1.0, %v1886_v1  ;;  %vm1890_vm0 = vweird.f32 %v7448_v15  ;;  %vm1891_vm1 = vweird.f32 %v5082_v56  ;;  %5085 = vrcp.f32 %v7477_v40  ;;  %3828 = vmatmul.bf16.gmra.mxu1 %v7474_v3  ;;  %v4619_v1 = vld [vmem:[#allocation8 + $0xe0] sm:$0xf]  ;;  %v4781_v3 = vld [vmem:[#allocation8 + $0x234] sm:$0xf0] }
 0x296   : > { %8739 = vst [vmem:[#allocation80_spill] sm:$0xff] %v7480_v17  ;;  %v7490_v11 = vmul.f32 %v7397_v6, %v7058_v42  ;;  %v7493_v24 = vmul.f32 %v2473_v9, %v8740_v34  ;;  %v2825_v19 = vadd.f32 0.00028619796, %v2824_v27  ;;  %v1962_v10 = vadd.f32 0.4994258, %v1961_v2  ;;  %vm7500_vm2 = vmor %vm1890_vm0, %vm1891_vm1 }
 0x297   : > { %v2433_v37 = vadd.f32 1.1283791, %v2432_v39  ;;  %v2593_v58 = vadd.f32 1.1283791, %v2592_v13  ;;  %v1888_v60 = vmul.f32 %v5082_v56, %v1887_v23  ;;  %v7495_v28 = vadd.f32 %v863_v4, %v815_v55  ;;  %v4876_v2 = vld [vmem:[#allocation8 + $0x100] sm:$0xf0] }
 0x298   : > { %v7497_v15 = vpop.eup %5083  ;;  %v2550_v20 = vmul.f32 %v2549_v52, %v7330_v25  ;;  %vm7504_vm3 = vcmp.eq.f32.partialorder %v1894_v53, 8.507059e+37  ;;  %v1897_v6 = vor.u32 1.1754944e-38, %v1896_v49  ;;  %v1963_v9 = vmul.f32 %v1962_v10, %v8730_v18  ;;  %v4631_v52 = vld [vmem:[#allocation8 + $0xf8] sm:$0xf]  ;;  %v4873_v34 = vld [vmem:[#allocation8 + $0xe8] sm:$0xf0] }
 0x299   : > { %8741 = vst [vmem:[#allocation35_spill] sm:$0xff] %v7495_v28  ;;  %v2708_v39 = vmul.f32 %v2707_v61, %v7410_v12  ;;  %v2668_v13 = vmul.f32 %v2667_v21, %v7418_v7  ;;  %v1889_v55 = vadd.f32 %v5082_v56, %v1888_v60  ;;  %v1846_v27 = vmul.f32 %v7497_v15, %v7462_v8 }
 0x29a   : > { %v2826_v4 = vmul.f32 %v2825_v19, %v7467_v22  ;;  %v1854_v53 = vand.u32 2147483647, %v7462_v8  ;;  %v7515_v23 = vadd.f32 1.0, %v1963_v9  ;;  %v4632_v49 = vor.u32 %v4876_v2, %v4631_v52 }
 0x29b   : > { %v5086_v18 = vpop.eup %5085  ;;  %v1893_v61 = vsel %vm7500_vm2, %v5082_v56, %v1889_v55  ;;  %v7520_v21 = vmul.f32 0.70710677, %v7495_v28  ;;  %v1847_v10 = vsub.f32 1.0, %v1846_v27  ;;  %v1856_v60 = vand.u32 2147483648, %v7462_v8  ;;  %v8747_v56 = vld [vmem:[#allocation49_spill] sm:$0xff] }
 0x29c   : > { %v1898_v14 = vsel %vm7504_vm3, %v1897_v6, %v1893_v61  ;;  %v2006_v19 = vmul.f32 %v5086_v18, %v7477_v40  ;;  %vm2010_vm4 = vweird.f32 %v7477_v40  ;;  %3986 = vmatpush.bf16.msrb.mxu1 %v4632_v49  ;;  %v4620_v9 = vor.u32 %v4873_v34, %v4619_v1  ;;  %v8748_v1 = vld [vmem:[#allocation83_spill] sm:$0xff] }
 0x29d   : > { %8746 = vst [vmem:[#allocation56_spill] sm:$0xff] %v7520_v21  ;;  %v2016_v52 = vand.u32 2147483648, %v7477_v40  ;;  %v1848_v5 = vmul.f32 %v7497_v15, %v1847_v10  ;;  %vm1851_vm5 = vweird.f32 %v7497_v15  ;;  %5087 = vrcp.f32 %v7515_v23 }
 0x29e   : > { %v1899_v55 = vmul.f32 %v1898_v14, %v8747_v56  ;;  %v2007_v27 = vsub.f32 1.0, %v2006_v19  ;;  %vm2011_vm6 = vweird.f32 %v5086_v18  ;;  %v2014_v42 = vand.u32 2147483647, %v7477_v40  ;;  %v4787_v14 = vld [vmem:[#allocation8 + $0x230] sm:$0xf] }
 0x29f   : > { %v2551_v6 = vadd.f32 0.18741608, %v2550_v20  ;;  %v1849_v2 = vadd.f32 %v7497_v15, %v1848_v5  ;;  %vm1850_vm7 = vweird.f32 %v7462_v8  ;;  %v2115_v49 = vmul.f32 3.8918573e-05, %v8748_v1  ;;  %vm7544_vm9 = vmor %vm2010_vm4, %vm2011_vm6  ;;  %v8755_v5 = vld [vmem:[#allocation42_spill] sm:$0xff] }
 0x2a0   : > { %v2709_v34 = vadd.f32 0.05243302, %v2708_v39  ;;  %v7536_v61 = vadd.f32 0.05243302, %v2668_v13  ;;  %v2827_v10 = vadd.f32 0.0036580483, %v2826_v4  ;;  %v2008_v43 = vmul.f32 %v5086_v18, %v2007_v27  ;;  %vm7538_vm8 = vmor %vm1850_vm7, %vm1851_vm5  ;;  %3987 = vmatpush.bf16.msrb.mxu1 %v4620_v9 }
 0x2a1   : > { %v2017_v20 = vor.u32 1.1754944e-38, %v2016_v52  ;;  %v2782_v8 = vmul.f32 %v7520_v21, %v7520_v21  ;;  %v1853_v39 = vsel %vm7538_vm8, %v7497_v15, %v1849_v2  ;;  %vm1855_vm10 = vcmp.eq.f32.partialorder %v1854_v53, 8.507059e+37  ;;  %v8756_v52 = vld [vmem:[#allocation54_spill] sm:$0xff]  ;;  %v4913_v21 = vld [vmem:[#allocation8 + $0x22c] sm:$0xf] }
 0x2a2   : > { %v4473_v13 = vclamps-f32 %v1899_v55, 1.0  ;;  %v2009_v4 = vadd.f32 %v5086_v18, %v2008_v43  ;;  %vm7553_vm11 = vcmp.eq.f32.partialorder %v2014_v42, 8.507059e+37  ;;  %v1857_v40 = vor.u32 1.1754944e-38, %v1856_v60  ;;  %v4607_v42 = vld [vmem:[#allocation8 + $0xc8] sm:$0xf]  ;;  %v8758_v2 = vld [vmem:[#allocation90_spill] sm:$0xff] }
 0x2a3   : > { %v5088_v9 = vpop.eup %5087  ;;  %v7558_v56 = vmul.f32 %v2433_v37, %v8755_v5  ;;  %v7561_v27 = vmul.f32 %v2593_v58, %v8756_v52  ;;  %v2552_v28 = vmul.f32 %v2551_v6, %v7330_v25  ;;  %v2116_v15 = vadd.f32 0.001143296, %v2115_v49  ;;  %v4870_v60 = vld [vmem:[#allocation8 + $0xd0] sm:$0xf0]  ;;  %v8759_v49 = vld [vmem:[#allocation78_spill] sm:$0xff] }
 0x2a4   : > { %v2013_v43 = vsel %vm7544_vm9, %v5086_v18, %v2009_v4  ;;  %v1858_v53 = vsel %vm1855_vm10, %v1857_v40, %v1853_v39  ;;  %v1966_v55 = vmul.f32 %v5088_v9, %v7515_v23  ;;  %v2235_v41 = vmul.f32 3.8918573e-05, %v8758_v2  ;;  %v4915_v18 = vld [vmem:[#allocation8 + $0x238] sm:$0xf0]  ;;  %v8760_v39 = vld [vmem:[#allocation31_spill] sm:$0xff] }
 0x2a5   : > { %8757 = vst [vmem:[#allocation58_spill] sm:$0xff] %v7561_v27  ;;  %v2710_v37 = vmul.f32 %v2709_v34, %v7410_v12  ;;  %v2828_v58 = vmul.f32 %v2827_v10, %v7467_v22  ;;  %v2018_v6 = vsel %vm7553_vm11, %v2017_v20, %v2013_v43  ;;  %v7572_v5 = vmin.f32 %v2782_v8, 16.0  ;;  %3842 = vmatmul.bf16.vlgmr.msra.gmra.mxu2 %v8759_v49 }
 0x2a6   : > { %v2019_v4 = vmul.f32 %v2018_v6, %v8760_v39  ;;  %v3002_v40 = vadd.f32 1.0, %v4473_v13  ;;  %v1967_v52 = vsub.f32 1.0, %v1966_v55  ;;  %v4784_v59 = vor.u32 %v4913_v21, %v4781_v3  ;;  %v8762_v3 = vld [vmem:[#allocation61_spill] sm:$0xff]  ;;  %v914_v55 = vpop.f32.mrf.mxu0 }
 0x2a7   : > { %v1859_v17 = vmul.f32 %v1858_v53, %v8761_v0  ;;  %v1974_v34 = vand.u32 2147483647, %v7515_v23  ;;  %v1976_v10 = vand.u32 2147483648, %v7515_v23  ;;  %v4608_v27 = vor.u32 %v4870_v60, %v4607_v42 }
 0x2a8   : > { %v4476_v19 = vclamps-f32 %v2019_v4, 1.0  ;;  %v1968_v20 = vmul.f32 %v5088_v9, %v1967_v52  ;;  %vm1971_vm12 = vweird.f32 %v5088_v9  ;;  %3883 = vmatpush.bf16.msrb.mxu3 %v4784_v59  ;;  %v4788_v8 = vor.u32 %v4915_v18, %v4787_v14 }
 0x2a9   : > { %v2711_v43 = vadd.f32 0.18741608, %v2710_v37  ;;  %v2829_v32 = vadd.f32 0.05243302, %v2828_v58  ;;  %vm1970_vm13 = vweird.f32 %v7515_v23  ;;  %3988 = vmatpush.bf16.msrb.mxu1 %v4608_v27  ;;  %v2117_v13 = vmul.f32 %v2116_v15, %v8748_v1  ;;  %v8763_v58 = vld [vmem:[#allocation85_spill] sm:$0xff] }
 0x2aa   : > { %v3005_v21 = vadd.f32 1.0, %v4476_v19  ;;  %v3050_v0 = vmul.f32 %v3002_v40, %v8762_v3  ;;  %v1969_v53 = vadd.f32 %v5088_v9, %v1968_v20  ;;  %4030 = vmatpush.bf16.msrb.mxu2 %v4788_v8  ;;  %v2236_v6 = vadd.f32 0.001143296, %v2235_v41  ;;  %vm1972_vm14 = vmor %vm1970_vm13, %vm1971_vm12  ;;  %v8765_v40 = vld [vmem:[#allocation68_spill] sm:$0xff] }
 0x2ab   : > { %v2784_v42 = vmul.f32 2.1237322e-06, %v7572_v5  ;;  %v4472_v60 = vclamps-f32 %v1859_v17, 1.0  ;;  %v1977_v59 = vor.u32 1.1754944e-38, %v1976_v10  ;;  %v2118_v37 = vadd.f32 0.014752088, %v2117_v13 }
 0x2ac   : > { %v3053_v14 = vmul.f32 %v3005_v21, %v8763_v58  ;;  %v1973_v23 = vsel %vm1972_vm14, %v5088_v9, %v1969_v53  ;;  %vm1975_vm15 = vcmp.eq.f32.partialorder %v1974_v34, 8.507059e+37  ;;  %v2237_v27 = vmul.f32 %v2236_v6, %v8758_v2  ;;  %3989 = vmatmul.bf16.vlgmr.msrb.gmra.mxu1 %v8759_v49 }
 0x2ad   : > { %v2670_v15 = vmul.f32 %v7536_v61, %v7418_v7  ;;  %v1978_v18 = vsel %vm1975_vm15, %v1977_v59, %v1973_v23  ;;  %v915_v41 = vadd.f32 %v914_v55, %v5874_v62  ;;  %v2119_v17 = vmul.f32 %v2118_v37, %v8748_v1  ;;  %v963_v61 = vpop.f32.mrf.mxu1  ;;  %v8766_v62 = vld [vmem:[#allocation57_spill] sm:$0xff]  ;;  %v8768_v37 = vld [vmem:[#allocation84_spill] sm:$0xff]  ;;  %v8769_v23 = vld [vmem:[#allocation86_spill] sm:$0xff] }
 0x2ae   : > { %v2553_v39 = vadd.f32 1.1283791, %v2552_v28  ;;  %v7591_v4 = vpack.c.bf16 %v3053_v14, %v3050_v0  ;;  %v1979_v52 = vmul.f32 %v1978_v18, %v8765_v40  ;;  %v2238_v10 = vadd.f32 0.014752088, %v2237_v27  ;;  %v816_v40 = vpop.f32.mrf.mxu2 }
 0x2af   : > { %v2830_v9 = vmul.f32 %v2829_v32, %v7467_v22  ;;  %v2785_v34 = vadd.f32 0.00028619796, %v2784_v42  ;;  %v3001_v19 = vadd.f32 1.0, %v4472_v60  ;;  %v2120_v20 = vadd.f32 0.112945676, %v2119_v17 }
 0x2b0   : > { %8764 = vst [vmem:[#allocation49_spill] sm:$0xff] %v7591_v4  ;;  %3759 = vmatmul.bf16.gmra.mxu0 %v7591_v4  ;;  %v4475_v49 = vclamps-f32 %v1979_v52, 1.0  ;;  %v2239_v8 = vmul.f32 %v2238_v10, %v8758_v2  ;;  %v2075_v13 = vmul.f32 3.8918573e-05, %v8766_v62  ;;  %v2195_v28 = vmul.f32 3.8918573e-05, %v6959_v26 }
 0x2b1   : > { %v2712_v21 = vmul.f32 %v2711_v43, %v7410_v12  ;;  %v2671_v3 = vadd.f32 0.18741608, %v2670_v15  ;;  %v7600_v0 = vadd.f32 %v963_v61, %v915_v41  ;;  %v2121_v32 = vmul.f32 %v2120_v20, %v8748_v1 }
 0x2b2   : > { %v7604_v53 = vmul.f32 0.5, %v7272_v45  ;;  %v3004_v55 = vadd.f32 1.0, %v4475_v49  ;;  %v2240_v6 = vadd.f32 0.112945676, %v2239_v8  ;;  %v2076_v42 = vadd.f32 0.001143296, %v2075_v13  ;;  %v865_v13 = vpop.f32.mrf.mxu3 }
 0x2b3   : > { %8767 = vst [vmem:[#allocation83_spill] sm:$0xff] %v7600_v0  ;;  %v2831_v60 = vadd.f32 0.18741608, %v2830_v9  ;;  %v2786_v59 = vmul.f32 %v2785_v34, %v7572_v5  ;;  %v3049_v58 = vmul.f32 %v3001_v19, %v8768_v37  ;;  %v2122_v14 = vadd.f32 0.4994258, %v2121_v32  ;;  %v8770_v9 = vld [vmem:[#allocation66_spill] sm:$0xff] }
 0x2b4   : > { %v3052_v27 = vmul.f32 %v3004_v55, %v8769_v23  ;;  %v2241_v43 = vmul.f32 %v2240_v6, %v8758_v2  ;;  %v2077_v15 = vmul.f32 %v2076_v42, %v8766_v62  ;;  %v2196_v18 = vadd.f32 0.001143296, %v2195_v28  ;;  %v4595_v32 = vld [vmem:[#allocation8 + $0xb0] sm:$0xf]  ;;  %v4867_v55 = vld [vmem:[#allocation8 + $0xb8] sm:$0xf0] }
 0x2b5   : > { %v2713_v41 = vadd.f32 1.1283791, %v2712_v21  ;;  %v2672_v17 = vmul.f32 %v2671_v3, %v7418_v7  ;;  %v7613_v52 = vmul.f32 0.70710677, %v7600_v0  ;;  %v2123_v10 = vmul.f32 %v2122_v14, %v8748_v1  ;;  %3847 = vmatmul.bf16.gmra.mxu2 %v8770_v9 }
 0x2b6   : > { %v7617_v34 = vpack.c.bf16 %v3052_v27, %v3049_v58  ;;  %v2242_v19 = vadd.f32 0.4994258, %v2241_v43  ;;  %v2078_v20 = vadd.f32 0.014752088, %v2077_v15  ;;  %v2197_v49 = vmul.f32 %v2196_v18, %v6959_v26 }
 0x2b7   : > { %v2832_v61 = vmul.f32 %v2831_v60, %v7467_v22  ;;  %v2787_v8 = vadd.f32 0.0036580483, %v2786_v59  ;;  %v7621_v28 = vadd.f32 1.0, %v2123_v10  ;;  %v2355_v21 = vmul.f32 3.8918573e-05, %v7036_v35 }
 0x2b8   : > { %v817_v3 = vadd.f32 %v816_v40, %v5901_v48  ;;  %3710 = vmatmul.bf16.gmra.mxu3 %v7617_v34  ;;  %v2243_v1 = vmul.f32 %v2242_v19, %v8758_v2  ;;  %v2079_v6 = vmul.f32 %v2078_v20, %v8766_v62  ;;  %v2198_v42 = vadd.f32 0.014752088, %v2197_v49 }
 0x2b9   : > { %v7629_v37 = vmul.f32 %v2553_v39, %v7296_v54  ;;  %v7632_v60 = vmul.f32 0.5, %v7332_v44  ;;  %v2942_v59 = vmul.f32 %v7613_v52, %v7613_v52  ;;  %5089 = vrcp.f32 %v7621_v28  ;;  %v4910_v44 = vld [vmem:[#allocation8 + $0x214] sm:$0xf] }
 0x2ba   : > { %v7638_v48 = vmul.f32 %v2713_v41, %v7352_v46  ;;  %v7640_v2 = vadd.f32 %v865_v13, %v817_v3  ;;  %v7642_v58 = vadd.f32 1.0, %v2243_v1  ;;  %v4596_v14 = vor.u32 %v4867_v55, %v4595_v32 }
 0x2bb   : > { %v2788_v23 = vmul.f32 %v2787_v8, %v7572_v5  ;;  %v2080_v54 = vadd.f32 0.112945676, %v2079_v6  ;;  %v2199_v39 = vmul.f32 %v2198_v42, %v6959_v26  ;;  %v2356_v27 = vadd.f32 0.001143296, %v2355_v21 }
 0x2bc   : > { %8771 = vst [vmem:[#allocation42_spill] sm:$0xff] %v7640_v2  ;;  %v7646_v43 = vadd.f32 1.1283791, %v2672_v17  ;;  %v7648_v15 = vadd.f32 1.1283791, %v2832_v61  ;;  %5091 = vrcp.f32 %v7642_v58  ;;  %3932 = vmatpush.bf16.msrb.mxu0 %v4596_v14  ;;  %3994 = vmatmul.bf16.gmra.mxu1 %v8770_v9  ;;  %v7653_v46 = vmin.f32 %v2942_v59, 16.0 }
 0x2bd   : > { %v2134_v18 = vand.u32 2147483647, %v7621_v28  ;;  %v2136_v41 = vand.u32 2147483648, %v7621_v28  ;;  %v2081_v40 = vmul.f32 %v2080_v54, %v8766_v62  ;;  %v2315_v10 = vmul.f32 3.8918573e-05, %v7091_v63 }
 0x2be   : > { %v7659_v17 = vmul.f32 0.70710677, %v7640_v2  ;;  %v2200_v19 = vadd.f32 0.112945676, %v2199_v39  ;;  %v2357_v20 = vmul.f32 %v2356_v27, %v7036_v35  ;;  %v2475_v49 = vmul.f32 3.8918573e-05, %v7190_v16 }
 0x2bf   : > { %v5090_v61 = vpop.eup %5089  ;;  %v7663_v8 = vadd.f32 0.05243302, %v2788_v23  ;;  %v2944_v9 = vmul.f32 2.1237322e-06, %v7653_v46  ;;  %vm2130_vm0 = vweird.f32 %v7621_v28  ;;  %v2082_v13 = vadd.f32 0.4994258, %v2081_v40 }
 0x2c0   : > { %v2126_v21 = vmul.f32 %v5090_v61, %v7621_v28  ;;  %vm7668_vm1 = vcmp.eq.f32.partialorder %v2134_v18, 8.507059e+37  ;;  %v2201_v1 = vmul.f32 %v2200_v19, %v6959_v26  ;;  %v2358_v32 = vadd.f32 0.014752088, %v2357_v20  ;;  %v4769_v19 = vld [vmem:[#allocation8 + $0x21c] sm:$0xf0] }
 0x2c1   : > { %v2137_v55 = vor.u32 1.1754944e-38, %v2136_v41  ;;  %v2254_v6 = vand.u32 2147483647, %v7642_v58  ;;  %v2083_v42 = vmul.f32 %v2082_v13, %v8766_v62  ;;  %v2316_v59 = vadd.f32 0.001143296, %v2315_v10 }
 0x2c2   : > { %v5092_v14 = vpop.eup %5091  ;;  %v2127_v23 = vsub.f32 1.0, %v2126_v21  ;;  %vm2131_vm2 = vweird.f32 %v5090_v61  ;;  %v2202_v54 = vadd.f32 0.4994258, %v2201_v1  ;;  %v2476_v39 = vadd.f32 0.001143296, %v2475_v49 }
 0x2c3   : > { %v2246_v27 = vmul.f32 %v5092_v14, %v7642_v58  ;;  %v2256_v18 = vand.u32 2147483648, %v7642_v58  ;;  %v7677_v40 = vadd.f32 1.0, %v2083_v42  ;;  %v2359_v41 = vmul.f32 %v2358_v32, %v7036_v35  ;;  %v4775_v10 = vld [vmem:[#allocation8 + $0x218] sm:$0xf]  ;;  %v4912_v13 = vld [vmem:[#allocation8 + $0x220] sm:$0xf0]  ;;  %vm7686_vm4 = vmor %vm2130_vm0, %vm2131_vm2 }
 0x2c4   : > { %v2128_v20 = vmul.f32 %v5090_v61, %v2127_v23  ;;  %vm2250_vm3 = vweird.f32 %v7642_v58  ;;  %v2203_v62 = vmul.f32 %v2202_v54, %v6959_v26  ;;  %v2435_v21 = vmul.f32 3.8918573e-05, %v7229_v57 }
 0x2c5   : > { %v2247_v1 = vsub.f32 1.0, %v2246_v27  ;;  %vm2251_vm5 = vweird.f32 %v5092_v14  ;;  %5093 = vrcp.f32 %v7677_v40  ;;  %v2317_v32 = vmul.f32 %v2316_v59, %v7091_v63  ;;  %3852 = vmatmul.bf16.gmra.mxu2 %v7343_v31 }
 0x2c6   : > { %v2129_v26 = vadd.f32 %v5090_v61, %v2128_v20  ;;  %v7693_v42 = vadd.f32 1.0, %v2203_v62  ;;  %v4772_v23 = vor.u32 %v4910_v44, %v4769_v19  ;;  %v2477_v54 = vmul.f32 %v2476_v39, %v7190_v16  ;;  %vm7700_vm6 = vmor %vm2250_vm3, %vm2251_vm5 }
 0x2c7   : > { %v2248_v45 = vmul.f32 %v5092_v14, %v2247_v1  ;;  %v2257_v28 = vor.u32 1.1754944e-38, %v2256_v18  ;;  %v4776_v4 = vor.u32 %v4912_v13, %v4775_v10  ;;  %v2360_v2 = vadd.f32 0.112945676, %v2359_v41  ;;  %v8778_v18 = vld [vmem:[#allocation81_spill] sm:$0xff] }
 0x2c8   : > { %v2133_v27 = vsel %vm7686_vm4, %v5090_v61, %v2129_v26  ;;  %v2094_v59 = vand.u32 2147483647, %v7677_v40  ;;  %v2096_v20 = vand.u32 2147483648, %v7677_v40  ;;  %5095 = vrcp.f32 %v7693_v42  ;;  %3884 = vmatpush.bf16.msrb.mxu3 %v4772_v23 }
 0x2c9   : > { %v2138_v44 = vsel %vm7668_vm1, %v2137_v55, %v2133_v27  ;;  %v2249_v39 = vadd.f32 %v5092_v14, %v2248_v45  ;;  %vm2255_vm7 = vcmp.eq.f32.partialorder %v2254_v6, 8.507059e+37  ;;  %4031 = vmatpush.bf16.msrb.mxu2 %v4776_v4  ;;  %v2436_v61 = vadd.f32 0.001143296, %v2435_v21 }
 0x2ca   : > { %v2139_v58 = vmul.f32 %v2138_v44, %v8778_v18  ;;  %v2361_v19 = vmul.f32 %v2360_v2, %v7036_v35  ;;  %v2478_v41 = vadd.f32 0.014752088, %v2477_v54  ;;  %v2318_v62 = vadd.f32 0.014752088, %v2317_v32  ;;  %v8781_v18 = vld [vmem:[#allocation87_spill] sm:$0xff] }
 0x2cb   : > { %v5094_v10 = vpop.eup %5093  ;;  %v7711_v13 = vadd.f32 0.00028619796, %v2944_v9  ;;  %v2902_v49 = vmul.f32 %v7659_v17, %v7659_v17  ;;  %v2253_v3 = vsel %vm7700_vm6, %v5092_v14, %v2249_v39  ;;  %vm2090_vm8 = vweird.f32 %v7677_v40 }
 0x2cc   : > { %v4479_v45 = vclamps-f32 %v2139_v58, 1.0  ;;  %v2258_v4 = vsel %vm2255_vm7, %v2257_v28, %v2253_v3  ;;  %v2086_v55 = vmul.f32 %v5094_v10, %v7677_v40  ;;  %vm7719_vm9 = vcmp.eq.f32.partialorder %v2094_v59, 8.507059e+37  ;;  %3999 = vmatmul.bf16.gmra.mxu1 %v7343_v31 }
 0x2cd   : > { %v2097_v2 = vor.u32 1.1754944e-38, %v2096_v20  ;;  %v2259_v9 = vmul.f32 %v2258_v4, %v7339_v51  ;;  %v2214_v21 = vand.u32 2147483647, %v7693_v42  ;;  %v2362_v1 = vadd.f32 0.4994258, %v2361_v19  ;;  %v8782_v4 = vld [vmem:[#allocation30_spill] sm:$0xff] }
 0x2ce   : > { %v2479_v0 = vmul.f32 %v2478_v41, %v7190_v16  ;;  %v5096_v14 = vpop.eup %5095  ;;  %v3008_v32 = vadd.f32 1.0, %v4479_v45  ;;  %v2087_v26 = vsub.f32 1.0, %v2086_v55  ;;  %v2319_v23 = vmul.f32 %v2318_v62, %v7091_v63 }
 0x2cf   : > { %v2437_v54 = vmul.f32 %v2436_v61, %v7229_v57  ;;  %v4482_v28 = vclamps-f32 %v2259_v9, 1.0  ;;  %v2206_v27 = vmul.f32 %v5096_v14, %v7693_v42  ;;  %v2216_v59 = vand.u32 2147483648, %v7693_v42 }
 0x2d0   : > { %v2363_v31 = vmul.f32 %v2362_v1, %v7036_v35  ;;  %v2088_v51 = vmul.f32 %v5094_v10, %v2087_v26  ;;  %vm2091_vm10 = vweird.f32 %v5094_v10  ;;  %v2480_v20 = vadd.f32 0.112945676, %v2479_v0 }
 0x2d1   : > { %v2320_v44 = vadd.f32 0.112945676, %v2319_v23  ;;  %v3011_v39 = vadd.f32 1.0, %v4482_v28  ;;  %v3056_v58 = vmul.f32 %v3008_v32, %v8781_v18  ;;  %v2207_v19 = vsub.f32 1.0, %v2206_v27  ;;  %vm2092_vm11 = vmor %vm2090_vm8, %vm2091_vm10  ;;  %v4864_v28 = vld [vmem:[#allocation8 + $0xa0] sm:$0xf0] }
 0x2d2   : > { %v7733_v41 = vadd.f32 1.0, %v2363_v31  ;;  %v2089_v62 = vadd.f32 %v5094_v10, %v2088_v51  ;;  %v2481_v61 = vmul.f32 %v2480_v20, %v7190_v16  ;;  %v2438_v45 = vadd.f32 0.014752088, %v2437_v54  ;;  %v4583_v54 = vld [vmem:[#allocation8 + $0x98] sm:$0xf]  ;;  %v7755_v20 = vpop.f32.mrf.mxu2 }
 0x2d3   : > { %v2321_v3 = vmul.f32 %v2320_v44, %v7091_v63  ;;  %v3059_v55 = vmul.f32 %v3011_v39, %v8782_v4  ;;  %v2208_v35 = vmul.f32 %v5096_v14, %v2207_v19  ;;  %vm2211_vm12 = vweird.f32 %v5096_v14 }
 0x2d4   : > { %5097 = vrcp.f32 %v7733_v41  ;;  %v2093_v9 = vsel %vm2092_vm11, %v5094_v10, %v2089_v62  ;;  %vm2210_vm13 = vweird.f32 %v7693_v42  ;;  %v2217_v1 = vor.u32 1.1754944e-38, %v2216_v59 }
 0x2d5   : > { %v2482_v0 = vadd.f32 0.4994258, %v2481_v61  ;;  %v7742_v32 = vpack.c.bf16 %v3059_v55, %v3056_v58  ;;  %v2098_v26 = vsel %vm7719_vm9, %v2097_v2, %v2093_v9  ;;  %v2209_v23 = vadd.f32 %v5096_v14, %v2208_v35  ;;  %3857 = vmatmul.bf16.gmra.mxu2 %v7617_v34  ;;  %vm2212_vm14 = vmor %vm2210_vm13, %vm2211_vm12 }
 0x2d6   : > { %v2322_v27 = vadd.f32 0.4994258, %v2321_v3  ;;  %v2099_v40 = vmul.f32 %v2098_v26, %v7323_v33  ;;  %v2439_v42 = vmul.f32 %v2438_v45, %v7229_v57  ;;  %v2595_v59 = vmul.f32 3.8918573e-05, %v7263_v29 }
 0x2d7   : > { %v2483_v10 = vmul.f32 %v2482_v0, %v7190_v16  ;;  %3764 = vmatmul.bf16.gmra.mxu0 %v7742_v32  ;;  %v2213_v31 = vsel %vm2212_vm14, %v5096_v14, %v2209_v23  ;;  %vm2215_vm15 = vcmp.eq.f32.partialorder %v2214_v21, 8.507059e+37  ;;  %v4584_v6 = vor.u32 %v4864_v28, %v4583_v54  ;;  %v8785_v54 = vld [vmem:[#allocation48_spill] sm:$0xff] }
 0x2d8   : > { %v2323_v2 = vmul.f32 %v2322_v27, %v7091_v63  ;;  %v7753_v51 = vmin.f32 %v2902_v49, 16.0  ;;  %v4478_v44 = vclamps-f32 %v2099_v40, 1.0  ;;  %v2218_v33 = vsel %vm2215_vm15, %v2217_v1, %v2213_v31 }
 0x2d9   : > { %v7757_v39 = vadd.f32 1.0, %v2483_v10  ;;  %v2219_v18 = vmul.f32 %v2218_v33, %v7348_v38  ;;  %v2374_v58 = vand.u32 2147483647, %v7733_v41  ;;  %v2376_v19 = vand.u32 2147483648, %v7733_v41  ;;  %3933 = vmatpush.bf16.msrb.mxu0 %v4584_v6 }
 0x2da   : > { %v5098_v16 = vpop.eup %5097  ;;  %v7762_v21 = vadd.f32 1.0, %v2323_v2  ;;  %v2440_v49 = vadd.f32 0.112945676, %v2439_v42  ;;  %v2596_v14 = vadd.f32 0.001143296, %v2595_v59  ;;  %v3007_v61 = vadd.f32 1.0, %v4478_v44 }
 0x2db   : > { %v2366_v63 = vmul.f32 %v5098_v16, %v7733_v41  ;;  %5099 = vrcp.f32 %v7757_v39  ;;  %v4481_v62 = vclamps-f32 %v2219_v18, 1.0  ;;  %vm2370_vm0 = vweird.f32 %v7733_v41  ;;  %v4907_v41 = vld [vmem:[#allocation8 + $0x1fc] sm:$0xf]  ;;  %v4757_v18 = vld [vmem:[#allocation8 + $0x204] sm:$0xf0] }
 0x2dc   : > { %v2715_v3 = vmul.f32 3.8918573e-05, %v7410_v12  ;;  %vm2371_vm1 = vweird.f32 %v5098_v16  ;;  %v2494_v45 = vand.u32 2147483647, %v7757_v39  ;;  %5101 = vrcp.f32 %v7762_v21  ;;  %4004 = vmatmul.bf16.gmra.mxu1 %v7617_v34  ;;  %v8786_v34 = vld [vmem:[#allocation91_spill] sm:$0xff] }
 0x2dd   : > { %v2367_v38 = vsub.f32 1.0, %v2366_v63  ;;  %v2946_v4 = vmul.f32 %v7711_v13, %v7653_v46  ;;  %v7774_v55 = vmul.f32 2.1237322e-06, %v7753_v51  ;;  %v3010_v35 = vadd.f32 1.0, %v4481_v62  ;;  %vm7786_vm3 = vmor %vm2370_vm0, %vm2371_vm1 }
 0x2de   : > { %vm7776_vm2 = vcmp.eq.f32.partialorder %v2374_v58, 8.507059e+37  ;;  %v2377_v0 = vor.u32 1.1754944e-38, %v2376_v19  ;;  %v2441_v26 = vmul.f32 %v2440_v49, %v7229_v57  ;;  %v2597_v23 = vmul.f32 %v2596_v14, %v7263_v29  ;;  %v4763_v58 = vld [vmem:[#allocation8 + $0x200] sm:$0xf]  ;;  %v7800_v49 = vpop.f32.mrf.mxu1  ;;  %v7802_v14 = vpop.f32.mrf.mxu2 }
 0x2df   : > { %v2368_v1 = vmul.f32 %v5098_v16, %v2367_v38  ;;  %v3055_v28 = vmul.f32 %v3007_v61, %v8785_v54  ;;  %v3058_v27 = vmul.f32 %v3010_v35, %v8786_v34  ;;  %v2496_v40 = vand.u32 2147483648, %v7757_v39  ;;  %v4909_v38 = vld [vmem:[#allocation8 + $0x208] sm:$0xf0] }
 0x2e0   : > { %v2716_v10 = vadd.f32 0.001143296, %v2715_v3  ;;  %vm7791_vm4 = vcmp.eq.f32.partialorder %v2494_v45, 8.507059e+37  ;;  %v2442_v6 = vadd.f32 0.4994258, %v2441_v26  ;;  %vm2490_vm5 = vweird.f32 %v7757_v39 }
 0x2e1   : > { %v5100_v42 = vpop.eup %5099  ;;  %v2369_v59 = vadd.f32 %v5098_v16, %v2368_v1  ;;  %v2598_v2 = vadd.f32 0.014752088, %v2597_v23  ;;  %v7795_v44 = vpack.c.bf16 %v3058_v27, %v3055_v28  ;;  %v2334_v61 = vand.u32 2147483647, %v7762_v21 }
 0x2e2   : > { %v2486_v33 = vmul.f32 %v5100_v42, %v7757_v39  ;;  %v2717_v19 = vmul.f32 %v2716_v10, %v7410_v12  ;;  %v5102_v63 = vpop.eup %5101  ;;  %v2443_v3 = vmul.f32 %v2442_v6, %v7229_v57  ;;  %v2555_v45 = vmul.f32 3.8918573e-05, %v7330_v25 }
 0x2e3   : > { %v2373_v62 = vsel %vm7786_vm3, %v5098_v16, %v2369_v59  ;;  %3715 = vmatmul.bf16.gmra.mxu3 %v7795_v44  ;;  %vm2491_vm6 = vweird.f32 %v5100_v42  ;;  %v2326_v26 = vmul.f32 %v5102_v63, %v7762_v21  ;;  %v4760_v16 = vor.u32 %v4907_v41, %v4757_v18 }
 0x2e4   : > { %v2378_v35 = vsel %vm7776_vm2, %v2377_v0, %v2373_v62  ;;  %v2487_v1 = vsub.f32 1.0, %v2486_v33  ;;  %v7814_v54 = vadd.f32 1.0, %v2443_v3  ;;  %v4764_v28 = vor.u32 %v4909_v38, %v4763_v58  ;;  %vm7820_vm7 = vmor %vm2490_vm5, %vm2491_vm6 }
 0x2e5   : > { %v2379_v23 = vmul.f32 %v2378_v35, %v7355_v30  ;;  %v2327_v57 = vsub.f32 1.0, %v2326_v26  ;;  %v2599_v27 = vmul.f32 %v2598_v2, %v7263_v29  ;;  %v2718_v13 = vadd.f32 0.014752088, %v2717_v19  ;;  %3862 = vmatmul.bf16.gmra.mxu2 %v7795_v44  ;;  %3885 = vmatpush.bf16.msrb.mxu3 %v4760_v16 }
 0x2e6   : > { %v2488_v34 = vmul.f32 %v5100_v42, %v2487_v1  ;;  %v2497_v0 = vor.u32 1.1754944e-38, %v2496_v40  ;;  %v2336_v30 = vand.u32 2147483648, %v7762_v21  ;;  %5103 = vrcp.f32 %v7814_v54  ;;  %4032 = vmatpush.bf16.msrb.mxu2 %v4764_v28  ;;  %v7836_v26 = vpop.f32.mrf.mxu1 }
 0x2e7   : > { %v4485_v10 = vclamps-f32 %v2379_v23, 1.0  ;;  %v2328_v6 = vmul.f32 %v5102_v63, %v2327_v57  ;;  %vm2331_vm8 = vweird.f32 %v5102_v63  ;;  %v2600_v2 = vadd.f32 0.112945676, %v2599_v27 }
 0x2e8   : > { %v2489_v59 = vadd.f32 %v5100_v42, %v2488_v34  ;;  %v2947_v33 = vadd.f32 0.0036580483, %v2946_v4  ;;  %vm2330_vm9 = vweird.f32 %v7762_v21  ;;  %v2719_v39 = vmul.f32 %v2718_v13, %v7410_v12 }
 0x2e9   : > { %v2556_v41 = vadd.f32 0.001143296, %v2555_v45  ;;  %v2329_v40 = vadd.f32 %v5102_v63, %v2328_v6  ;;  %vm2335_vm10 = vcmp.eq.f32.partialorder %v2334_v61, 8.507059e+37  ;;  %v2601_v58 = vmul.f32 %v2600_v2, %v7263_v29  ;;  %vm2332_vm11 = vmor %vm2330_vm9, %vm2331_vm8  ;;  %v7838_v61 = vpop.f32.mrf.mxu2  ;;  %v4571_v2 = vld [vmem:[#allocation8 + $0x80] sm:$0xf] }
 0x2ea   : > { %v2493_v18 = vsel %vm7820_vm7, %v5100_v42, %v2489_v59  ;;  %v3014_v62 = vadd.f32 1.0, %v4485_v10  ;;  %v2337_v3 = vor.u32 1.1754944e-38, %v2336_v30  ;;  %v2720_v38 = vadd.f32 0.112945676, %v2719_v39 }
 0x2eb   : > { %v2498_v19 = vsel %vm7791_vm4, %v2497_v0, %v2493_v18  ;;  %v2333_v21 = vsel %vm2332_vm11, %v5102_v63, %v2329_v40  ;;  %v2602_v35 = vadd.f32 0.4994258, %v2601_v58  ;;  %v2557_v45 = vmul.f32 %v2556_v41, %v7330_v25 }
 0x2ec   : > { %v2499_v4 = vmul.f32 %v2498_v19, %v7493_v24  ;;  %v5104_v1 = vpop.eup %5103  ;;  %v2948_v42 = vmul.f32 %v2947_v33, %v7653_v46  ;;  %v2338_v23 = vsel %vm2335_vm10, %v2337_v3, %v2333_v21  ;;  %v2721_v31 = vmul.f32 %v2720_v38, %v7410_v12  ;;  %4009 = vmatmul.bf16.gmra.mxu1 %v7795_v44  ;;  %v4861_v33 = vld [vmem:[#allocation8 + $0x88] sm:$0xf0] }
 0x2ed   : > { %v2675_v16 = vmul.f32 3.8918573e-05, %v7418_v7  ;;  %v2339_v24 = vmul.f32 %v2338_v23, %v7490_v11  ;;  %v2446_v63 = vmul.f32 %v5104_v1, %v7814_v54  ;;  %v2454_v34 = vand.u32 2147483647, %v7814_v54 }
 0x2ee   : > { %v4488_v28 = vclamps-f32 %v2499_v4, 1.0  ;;  %v2603_v57 = vmul.f32 %v2602_v35, %v7263_v29  ;;  %v2722_v27 = vadd.f32 0.4994258, %v2721_v31  ;;  %v2558_v13 = vadd.f32 0.014752088, %v2557_v45 }
 0x2ef   : > { %v2676_v10 = vadd.f32 0.001143296, %v2675_v16  ;;  %v3062_v0 = vmul.f32 %v3014_v62, %v7326_v36  ;;  %v4484_v30 = vclamps-f32 %v2339_v24, 1.0  ;;  %v2447_v59 = vsub.f32 1.0, %v2446_v63  ;;  %v7878_v24 = vpop.f32.mrf.mxu1 }
 0x2f0   : > { %v3017_v9 = vadd.f32 1.0, %v4488_v28  ;;  %v2456_v6 = vand.u32 2147483648, %v7814_v54  ;;  %v7849_v44 = vadd.f32 1.0, %v2603_v57  ;;  %v2723_v11 = vmul.f32 %v2722_v27, %v7410_v12 }
 0x2f1   : > { %v2559_v39 = vmul.f32 %v2558_v13, %v7330_v25  ;;  %v2448_v41 = vmul.f32 %v5104_v1, %v2447_v59  ;;  %vm2451_vm12 = vweird.f32 %v5104_v1  ;;  %v4572_v18 = vor.u32 %v4861_v33, %v4571_v2  ;;  %v7870_v21 = vpop.f32.mrf.mxu2 }
 0x2f2   : > { %v3065_v29 = vmul.f32 %v3017_v9, %v7391_v50  ;;  %v7855_v40 = vadd.f32 0.00028619796, %v7774_v55  ;;  %vm2450_vm13 = vweird.f32 %v7814_v54  ;;  %5105 = vrcp.f32 %v7849_v44 }
 0x2f3   : > { %v2677_v36 = vmul.f32 %v2676_v10, %v7418_v7  ;;  %v2449_v12 = vadd.f32 %v5104_v1, %v2448_v41  ;;  %v3013_v19 = vadd.f32 1.0, %v4484_v30  ;;  %v7862_v62 = vadd.f32 1.0, %v2723_v11  ;;  %3934 = vmatpush.bf16.msrb.mxu0 %v4572_v18  ;;  %vm2452_vm14 = vmor %vm2450_vm13, %vm2451_vm12  ;;  %v8793_v18 = vld [vmem:[#allocation97_spill] sm:$0xff] }
 0x2f4   : > { %v7860_v58 = vpack.c.bf16 %v3065_v29, %v3062_v0  ;;  %v7864_v50 = vadd.f32 0.05243302, %v2948_v42  ;;  %v2457_v3 = vor.u32 1.1754944e-38, %v2456_v6  ;;  %v2616_v55 = vand.u32 2147483648, %v7849_v44 }
 0x2f5   : > { %v2560_v38 = vadd.f32 0.112945676, %v2559_v39  ;;  %v2453_v54 = vsel %vm2452_vm14, %v5104_v1, %v2449_v12  ;;  %vm2455_vm15 = vcmp.eq.f32.partialorder %v2454_v34, 8.507059e+37  ;;  %vm2610_vm0 = vweird.f32 %v7849_v44 }
 0x2f6   : > { %3769 = vmatmul.bf16.gmra.mxu0 %v7860_v58  ;;  %5107 = vrcp.f32 %v7862_v62  ;;  %v2458_v4 = vsel %vm2455_vm15, %v2457_v3, %v2453_v54  ;;  %v2614_v35 = vand.u32 2147483647, %v7849_v44  ;;  %v2678_v42 = vadd.f32 0.014752088, %v2677_v36 }
 0x2f7   : > { %v2561_v45 = vmul.f32 %v2560_v38, %v7330_v25  ;;  %v2459_v23 = vmul.f32 %v2458_v4, %v7558_v56  ;;  %v3061_v31 = vmul.f32 %v3013_v19, %v7377_v47  ;;  %v2835_v16 = vmul.f32 3.8918573e-05, %v7467_v22 }
 0x2f8   : > { %v2955_v1 = vmul.f32 3.8918573e-05, %v7653_v46  ;;  %v5106_v28 = vpop.eup %5105  ;;  %v2617_v63 = vor.u32 1.1754944e-38, %v2616_v55  ;;  %vm2730_vm1 = vweird.f32 %v7862_v62  ;;  %v2679_v57 = vmul.f32 %v2678_v42, %v7418_v7 }
 0x2f9   : > { %v2562_v34 = vadd.f32 0.4994258, %v2561_v45  ;;  %v4487_v27 = vclamps-f32 %v2459_v23, 1.0  ;;  %v2606_v13 = vmul.f32 %v5106_v28, %v7849_v44  ;;  %v2734_v56 = vand.u32 2147483647, %v7862_v62 }
 0x2fa   : > { %v2836_v10 = vadd.f32 0.001143296, %v2835_v16  ;;  %v2680_v9 = vadd.f32 0.112945676, %v2679_v57  ;;  %v2956_v0 = vadd.f32 0.001143296, %v2955_v1  ;;  %vm2611_vm2 = vweird.f32 %v5106_v28  ;;  %v7907_v16 = vpop.f32.mrf.mxu2 }
 0x2fb   : > { %v2563_v47 = vmul.f32 %v2562_v34, %v7330_v25  ;;  %v2795_v30 = vmul.f32 3.8918573e-05, %v7572_v5  ;;  %v3016_v6 = vadd.f32 1.0, %v4487_v27  ;;  %v2607_v11 = vsub.f32 1.0, %v2606_v13  ;;  %vm7896_vm3 = vmor %vm2610_vm0, %vm2611_vm2  ;;  %v4559_v13 = vld [vmem:[#allocation8 + $0x68] sm:$0xf] }
 0x2fc   : > { %v5108_v59 = vpop.eup %5107  ;;  %v2837_v2 = vmul.f32 %v2836_v10, %v7467_v22  ;;  %v2736_v39 = vand.u32 2147483648, %v7862_v62  ;;  %v2681_v41 = vmul.f32 %v2680_v9, %v7418_v7  ;;  %v2957_v19 = vmul.f32 %v2956_v0, %v7653_v46  ;;  %v4858_v10 = vld [vmem:[#allocation8 + $0x70] sm:$0xf0]  ;;  %v4904_v0 = vld [vmem:[#allocation8 + $0x1e4] sm:$0xf] }
 0x2fd   : > { %v2726_v33 = vmul.f32 %v5108_v59, %v7862_v62  ;;  %v7889_v29 = vadd.f32 1.0, %v2563_v47  ;;  %v3064_v25 = vmul.f32 %v3016_v6, %v8793_v18  ;;  %v2608_v36 = vmul.f32 %v5106_v28, %v2607_v11  ;;  %v8802_v11 = vld [vmem:[#allocation58_spill] sm:$0xff] }
 0x2fe   : > { %v2838_v12 = vadd.f32 0.014752088, %v2837_v2  ;;  %vm2731_vm4 = vweird.f32 %v5108_v59  ;;  %v2796_v38 = vadd.f32 0.001143296, %v2795_v30  ;;  %vm7901_vm5 = vcmp.eq.f32.partialorder %v2614_v35, 8.507059e+37 }
 0x2ff   : > { %v2727_v55 = vsub.f32 1.0, %v2726_v33  ;;  %5109 = vrcp.f32 %v7889_v29  ;;  %v3094_v54 = vpack.c.bf16 %v3064_v25, %v3061_v31  ;;  %v2609_v4 = vadd.f32 %v5106_v28, %v2608_v36  ;;  %vm7914_vm6 = vmor %vm2730_vm1, %vm2731_vm4  ;;  %v4751_v30 = vld [vmem:[#allocation8 + $0x1e8] sm:$0xf] }
 0x300   : > { %v2682_v42 = vadd.f32 0.4994258, %v2681_v41  ;;  %v2906_v23 = vmul.f32 %v7855_v40, %v7753_v51  ;;  %v2839_v1 = vmul.f32 %v2838_v12, %v7467_v22  ;;  %v2958_v34 = vadd.f32 0.014752088, %v2957_v19  ;;  %v4906_v41 = vld [vmem:[#allocation8 + $0x1f0] sm:$0xf0] }
 0x301   : > { %v2728_v44 = vmul.f32 %v5108_v59, %v2727_v55  ;;  %3720 = vmatmul.bf16.gmra.mxu3 %v3094_v54  ;;  %v2613_v57 = vsel %vm7896_vm3, %v5106_v28, %v2609_v4  ;;  %vm7918_vm7 = vcmp.eq.f32.partialorder %v2734_v56, 8.507059e+37  ;;  %v2737_v40 = vor.u32 1.1754944e-38, %v2736_v39  ;;  %3867 = vmatmul.bf16.gmra.mxu2 %v3094_v54  ;;  %v7925_v28 = vpop.f32.mrf.mxu1  ;;  %v4745_v56 = vld [vmem:[#allocation8 + $0x1ec] sm:$0xf0] }
 0x302   : > { %v2683_v27 = vmul.f32 %v2682_v42, %v7418_v7  ;;  %v2950_v47 = vmul.f32 %v7864_v50, %v7653_v46  ;;  %v2618_v62 = vsel %vm7901_vm5, %v2617_v63, %v2613_v57  ;;  %v2797_v6 = vmul.f32 %v2796_v38, %v7572_v5  ;;  %4014 = vmatmul.bf16.gmra.mxu1 %v3094_v54 }
 0x303   : > { %v2729_v9 = vadd.f32 %v5108_v59, %v2728_v44  ;;  %v2619_v7 = vmul.f32 %v2618_v62, %v8802_v11  ;;  %v4560_v33 = vor.u32 %v4858_v10, %v4559_v13  ;;  %v4748_v39 = vor.u32 %v4904_v0, %v4745_v56  ;;  %v7948_v10 = vpop.f32.mrf.mxu2 }
 0x304   : > { %v7931_v2 = vadd.f32 1.0, %v2683_v27  ;;  %v4752_v25 = vor.u32 %v4906_v41, %v4751_v30  ;;  %v2840_v63 = vadd.f32 0.112945676, %v2839_v1  ;;  %v2959_v36 = vmul.f32 %v2958_v34, %v7653_v46  ;;  %v8803_v27 = vld [vmem:[#allocation80_spill] sm:$0xff] }
 0x305   : > { %v5110_v50 = vpop.eup %5109  ;;  %v2733_v18 = vsel %vm7914_vm6, %v5108_v59, %v2729_v9  ;;  %v2907_v12 = vadd.f32 0.0036580483, %v2906_v23  ;;  %v4491_v19 = vclamps-f32 %v2619_v7, 1.0  ;;  %3935 = vmatpush.bf16.msrb.mxu0 %v4560_v33  ;;  %3886 = vmatpush.bf16.msrb.mxu3 %v4748_v39  ;;  %v2951_v38 = vadd.f32 0.18741608, %v2950_v47 }
 0x306   : > { %v2738_v3 = vsel %vm7918_vm7, %v2737_v40, %v2733_v18  ;;  %v2566_v55 = vmul.f32 %v5110_v50, %v7889_v29  ;;  %5111 = vrcp.f32 %v7931_v2  ;;  %4033 = vmatpush.bf16.msrb.mxu2 %v4752_v25  ;;  %v2915_v59 = vmul.f32 3.8918573e-05, %v7753_v51  ;;  %v4547_v18 = vld [vmem:[#allocation8 + $0x50] sm:$0xf]  ;;  %v4855_v25 = vld [vmem:[#allocation8 + $0x58] sm:$0xf0] }
 0x307   : > { %v2739_v54 = vmul.f32 %v2738_v3, %v7638_v48  ;;  %v3020_v4 = vadd.f32 1.0, %v4491_v19  ;;  %v2576_v42 = vand.u32 2147483648, %v7889_v29  ;;  %v2841_v23 = vmul.f32 %v2840_v63, %v7467_v22 }
 0x308   : > { %v2567_v45 = vsub.f32 1.0, %v2566_v55  ;;  %v2790_v44 = vmul.f32 %v7663_v8, %v7572_v5  ;;  %v2960_v34 = vadd.f32 0.112945676, %v2959_v36  ;;  %v2798_v57 = vadd.f32 0.014752088, %v2797_v6 }
 0x309   : > { %v4494_v1 = vclamps-f32 %v2739_v54, 1.0  ;;  %vm2571_vm8 = vweird.f32 %v5110_v50  ;;  %v2574_v48 = vand.u32 2147483647, %v7889_v29  ;;  %v2842_v31 = vadd.f32 0.4994258, %v2841_v23 }
 0x30a   : > { %v2568_v35 = vmul.f32 %v5110_v50, %v2567_v45  ;;  %v3068_v13 = vmul.f32 %v3020_v4, %v8803_v27  ;;  %v2961_v47 = vmul.f32 %v2960_v34, %v7653_v46  ;;  %v2799_v62 = vmul.f32 %v2798_v57, %v7572_v5 }
 0x30b   : > { %v3023_v40 = vadd.f32 1.0, %v4494_v1  ;;  %vm2570_vm9 = vweird.f32 %v7889_v29  ;;  %v2577_v8 = vor.u32 1.1754944e-38, %v2576_v42  ;;  %v2843_v0 = vmul.f32 %v2842_v31, %v7467_v22 }
 0x30c   : > { %v2569_v9 = vadd.f32 %v5110_v50, %v2568_v35  ;;  %v5112_v56 = vpop.eup %5111  ;;  %vm2572_vm10 = vmor %vm2570_vm9, %vm2571_vm8  ;;  %v2962_v6 = vadd.f32 0.4994258, %v2961_v47  ;;  %v2800_v11 = vadd.f32 0.112945676, %v2799_v62  ;;  %v2916_v7 = vadd.f32 0.001143296, %v2915_v59 }
 0x30d   : > { %v3071_v30 = vmul.f32 %v3023_v40, %v7632_v60  ;;  %vm2575_vm11 = vcmp.eq.f32.partialorder %v2574_v48, 8.507059e+37  ;;  %v2686_v39 = vmul.f32 %v5112_v56, %v7931_v2  ;;  %v7956_v41 = vadd.f32 1.0, %v2843_v0  ;;  %v8806_v35 = vld [vmem:[#allocation79_spill] sm:$0xff]  ;;  %v7982_v40 = vpop.f32.mrf.mxu2 }
 0x30e   : > { %v2573_v33 = vsel %vm2572_vm10, %v5110_v50, %v2569_v9  ;;  %v2908_v29 = vmul.f32 %v2907_v12, %v7753_v51  ;;  %v2963_v36 = vmul.f32 %v2962_v6, %v7653_v46  ;;  %v2952_v60 = vmul.f32 %v2951_v38, %v7653_v46  ;;  %v8804_v46 = vld [vmem:[#allocation82_spill] sm:$0xff] }
 0x30f   : > { %v7959_v63 = vpack.c.bf16 %v3071_v30, %v3068_v13  ;;  %v2578_v22 = vsel %vm2575_vm11, %v2577_v8, %v2573_v33  ;;  %v2687_v3 = vsub.f32 1.0, %v2686_v39  ;;  %5113 = vrcp.f32 %v7956_v41  ;;  %v7992_v39 = vpop.f32.mrf.mxu1 }
 0x310   : > { %v2579_v19 = vmul.f32 %v2578_v22, %v7629_v37  ;;  %v2694_v50 = vand.u32 2147483647, %v7931_v2  ;;  %v2696_v55 = vand.u32 2147483648, %v7931_v2  ;;  %v2964_v54 = vadd.f32 1.0, %v2963_v36  ;;  %v8805_v37 = vld [vmem:[#allocation96_spill] sm:$0xff] }
 0x311   : > { %3774 = vmatmul.bf16.gmra.mxu0 %v7959_v63  ;;  %v4548_v12 = vor.u32 %v4855_v25, %v4547_v18  ;;  %v2688_v59 = vmul.f32 %v5112_v56, %v2687_v3  ;;  %vm2691_vm12 = vweird.f32 %v5112_v56  ;;  %v2801_v4 = vmul.f32 %v2800_v11, %v7572_v5 }
 0x312   : > { %v2917_v45 = vmul.f32 %v2916_v7, %v7753_v51  ;;  %v1006_v38 = vmul.f32 0.5, %v8804_v46  ;;  %v2674_v42 = vmul.f32 %v7646_v43, %v8805_v37  ;;  %v7973_v23 = vadd.f32 0.18741608, %v2790_v44 }
 0x313   : > { %5115 = vrcp.f32 %v2964_v54  ;;  %3936 = vmatpush.bf16.msrb.mxu0 %v4548_v12  ;;  %v7975_v1 = vadd.f32 0.05243302, %v2908_v29  ;;  %v4490_v34 = vclamps-f32 %v2579_v19, 1.0  ;;  %v2689_v57 = vadd.f32 %v5112_v56, %v2688_v59 }
 0x314   : > { %vm2690_vm13 = vweird.f32 %v7931_v2  ;;  %v7980_v48 = vmul.f32 %v7648_v15, %v8806_v35  ;;  %v2697_v31 = vor.u32 1.1754944e-38, %v2696_v55  ;;  %v2802_v27 = vadd.f32 0.4994258, %v2801_v4 }
 0x315   : > { %vm2692_vm14 = vmor %vm2690_vm13, %vm2691_vm12  ;;  %v2918_v43 = vadd.f32 0.014752088, %v2917_v45  ;;  %v5114_v44 = vpop.eup %5113  ;;  %v2953_v13 = vadd.f32 1.1283791, %v2952_v60  ;;  %vm2695_vm15 = vcmp.eq.f32.partialorder %v2694_v50, 8.507059e+37  ;;  %vm2850_vm0 = vweird.f32 %v7956_v41 }
 0x316   : > { %v2693_v47 = vsel %vm2692_vm14, %v5112_v56, %v2689_v57  ;;  %v2846_v9 = vmul.f32 %v5114_v44, %v7956_v41  ;;  %v2854_v2 = vand.u32 2147483647, %v7956_v41  ;;  %v2803_v15 = vmul.f32 %v2802_v27, %v7572_v5  ;;  %v4733_v27 = vld [vmem:[#allocation8 + $0x1d4] sm:$0xf0] }
 0x317   : > { %v2698_v62 = vsel %vm2695_vm15, %v2697_v31, %v2693_v47  ;;  %v3019_v0 = vadd.f32 1.0, %v4490_v34  ;;  %v2856_v30 = vand.u32 2147483648, %v7956_v41  ;;  %v2919_v6 = vmul.f32 %v2918_v43, %v7753_v51  ;;  %v8010_v41 = vld [vmem:[%s8374_s4] sm:$0x7]  ;;  %v4901_v31 = vld [vmem:[#allocation8 + $0x1cc] sm:$0xf]  ;;  %v8020_v47 = vpop.f32.mrf.mxu2 }
 0x318   : > { %v2699_v8 = vmul.f32 %v2698_v62, %v2674_v42  ;;  %v2847_v7 = vsub.f32 1.0, %v2846_v9  ;;  %vm2851_vm1 = vweird.f32 %v5114_v44  ;;  %v2974_v56 = vand.u32 2147483647, %v2964_v54  ;;  %v4535_v43 = vld [vmem:[#allocation8 + $0x38] sm:$0xf] }
 0x319   : > { %v5116_v11 = vpop.eup %5115  ;;  %v7990_v33 = vadd.f32 1.0, %v2803_v15  ;;  %v2976_v29 = vand.u32 2147483648, %v2964_v54  ;;  %v2920_v22 = vadd.f32 0.112945676, %v2919_v6  ;;  %vm2970_vm2 = vweird.f32 %v2964_v54  ;;  %vm7997_vm4 = vmor %vm2850_vm0, %vm2851_vm1  ;;  %v4898_v15 = vld [vmem:[#allocation8 + $0x1b4] sm:$0xf] }
 0x31a   : > { %v4493_v18 = vclamps-f32 %v2699_v8, 1.0  ;;  %v2966_v25 = vmul.f32 %v5116_v11, %v2964_v54  ;;  %v2848_v36 = vmul.f32 %v5114_v44, %v2847_v7  ;;  %vm2971_vm3 = vweird.f32 %v5116_v11  ;;  %v4721_v8 = vld [vmem:[#allocation8 + $0x1bc] sm:$0xf0]  ;;  %v4849_v7 = vld [vmem:[#allocation8 + $0x28] sm:$0xf0] }
 0x31b   : > { %5117 = vrcp.f32 %v7990_v33  ;;  %v2857_v3 = vor.u32 1.1754944e-38, %v2856_v30  ;;  %v2921_v55 = vmul.f32 %v2920_v22, %v7753_v51  ;;  %v3067_v12 = vmul.f32 %v3019_v0, %v7604_v53  ;;  %vm8013_vm7 = vmor %vm2970_vm2, %vm2971_vm3  ;;  %v4523_v6 = vld [vmem:[#allocation8 + $0x20] sm:$0xf]  ;;  %v4895_v22 = vld [vmem:[#allocation8 + $0x19c] sm:$0xf] }
 0x31c   : > { %v3022_v60 = vadd.f32 1.0, %v4493_v18  ;;  %v2967_v50 = vsub.f32 1.0, %v2966_v25  ;;  %v2849_v59 = vadd.f32 %v5114_v44, %v2848_v36  ;;  %vm2855_vm5 = vcmp.eq.f32.partialorder %v2854_v2, 8.507059e+37  ;;  %v4852_v2 = vld [vmem:[#allocation8 + $0x40] sm:$0xf0] }
 0x31d   : > { %vm8003_vm6 = vcmp.eq.f32.partialorder %v2974_v56, 8.507059e+37  ;;  %v2977_v34 = vor.u32 1.1754944e-38, %v2976_v29  ;;  %v2922_v53 = vadd.f32 0.4994258, %v2921_v55  ;;  %v2954_v57 = vmul.f32 %v2953_v13, %v7613_v52  ;;  %v4846_v55 = vld [vmem:[#allocation8 + $0x10] sm:$0xf0] }
 0x31e   : > { %v3070_v45 = vmul.f32 %v3022_v60, %v1006_v38  ;;  %v2968_v37 = vmul.f32 %v5116_v11, %v2967_v50  ;;  %v2853_v35 = vsel %vm7997_vm4, %v5114_v44, %v2849_v59  ;;  %v2910_v52 = vmul.f32 %v7975_v1, %v7753_v51  ;;  %v4709_v1 = vld [vmem:[#allocation8 + $0x1a4] sm:$0xf0]  ;;  %v8041_v59 = vpop.f32.mrf.mxu1  ;;  %v4739_v42 = vld [vmem:[#allocation8 + $0x1d0] sm:$0xf] }
 0x31f   : > { %v2858_v38 = vsel %vm2855_vm5, %v2857_v3, %v2853_v35  ;;  %v2923_v54 = vmul.f32 %v2922_v53, %v7753_v51  ;;  %v4736_v13 = vor.u32 %v4901_v31, %v4733_v27  ;;  %v4536_v30 = vor.u32 %v4852_v2, %v4535_v43  ;;  %v4511_v50 = vld [vmem:[#allocation8 + $0x8] sm:$0xf]  ;;  %v4903_v53 = vld [vmem:[#allocation8 + $0x1d8] sm:$0xf0]  ;;  %v3745_v27 = vpop.f32.mrf.mxu0 }
 0x320   : > { %v3097_v62 = vpack.c.bf16 %v3070_v45, %v3067_v12  ;;  %v2969_v9 = vadd.f32 %v5116_v11, %v2968_v37  ;;  %v2859_v44 = vmul.f32 %v2858_v38, %v7980_v48  ;;  %v8029_v56 = vperm.slane %v8010_v41, 0  ;;  %v8813_v48 = vld [vmem:[#allocation75_spill] sm:$0xff] }
 0x321   : > { %v8023_v0 = vpop.eup %5117  ;;  %v8035_v29 = vadd.f32 1.0, %v2923_v54  ;;  %v1010_v36 = vmul.f32 0.5, %v8813_v48  ;;  %3887 = vmatpush.bf16.msrb.mxu3 %v4736_v13  ;;  %3937 = vmatpush.bf16.msrb.mxu0 %v4536_v30  ;;  %v4724_v3 = vor.u32 %v4898_v15, %v4721_v8  ;;  %v2792_v4 = vmul.f32 %v7973_v23, %v7572_v5  ;;  %v8050_v15 = vpop.f32.mrf.mxu2 }
 0x322   : > { %3725 = vmatmul.bf16.gmra.mxu3 %v3097_v62  ;;  %v2973_v18 = vsel %vm8013_vm7, %v5116_v11, %v2969_v9  ;;  %v2806_v25 = vmul.f32 %v8023_v0, %v7990_v33  ;;  %3872 = vmatmul.bf16.gmra.mxu2 %v3097_v62  ;;  %v4497_v60 = vclamps-f32 %v2859_v44, 1.0  ;;  %v8814_v11 = vld [vmem:[#allocation83_spill] sm:$0xff]  ;;  %v4524_v31 = vor.u32 %v4849_v7, %v4523_v6  ;;  %v4697_v44 = vld [vmem:[#allocation8 + $0x18c] sm:$0xf0] }
 0x323   : > { %v2978_v19 = vsel %vm8003_vm6, %v2977_v34, %v2973_v18  ;;  %v1013_v12 = vmul.f32 0.5, %v8814_v11  ;;  %5119 = vrcp.f32 %v8035_v29  ;;  %4019 = vmatmul.bf16.gmra.mxu1 %v3097_v62  ;;  %v2911_v34 = vadd.f32 0.18741608, %v2910_v52  ;;  %v4892_v52 = vld [vmem:[#allocation8 + $0x184] sm:$0xf] }
 0x324   : > { %v2979_v45 = vmul.f32 %v2978_v19, %v2954_v57  ;;  %v2807_v37 = vsub.f32 1.0, %v2806_v25  ;;  %v3026_v35 = vadd.f32 1.0, %v4497_v60  ;;  %vm2811_vm8 = vweird.f32 %v8023_v0 }
 0x325   : > { %v2816_v57 = vand.u32 2147483648, %v7990_v33  ;;  %v2814_v9 = vand.u32 2147483647, %v7990_v33  ;;  %3888 = vmatpush.bf16.msrb.mxu3 %v4724_v3  ;;  %3938 = vmatpush.bf16.msrb.mxu0 %v4524_v31  ;;  %v4712_v54 = vor.u32 %v4895_v22, %v4709_v1  ;;  %v4512_v62 = vor.u32 %v4846_v55, %v4511_v50  ;;  %v8815_v1 = vld [vmem:[#allocation20_spill] sm:$0xff] }
 0x326   : > { %v4500_v43 = vclamps-f32 %v2979_v45, 1.0  ;;  %v2808_v38 = vmul.f32 %v8023_v0, %v2807_v37  ;;  %v4740_v2 = vor.u32 %v4903_v53, %v4739_v42  ;;  %v3074_v23 = vmul.f32 %v3026_v35, %v1010_v36  ;;  %v8816_v3 = vld [vmem:[#allocation56_spill] sm:$0xff]  ;;  %v3696_v35 = vpop.f32.mrf.mxu3 }
 0x327   : > { %vm2810_vm9 = vweird.f32 %v7990_v33  ;;  %v2793_v13 = vadd.f32 1.1283791, %v2792_v4  ;;  %v2912_v6 = vmul.f32 %v2911_v34, %v7753_v51  ;;  %v2817_v25 = vor.u32 1.1754944e-38, %v2816_v57  ;;  %v3747_v53 = vpop.f32.mrf.mxu0  ;;  %v4727_v4 = vld [vmem:[#allocation8 + $0x1b8] sm:$0xf] }
 0x328   : > { %v3029_v5 = vadd.f32 1.0, %v4500_v43  ;;  %v2809_v8 = vadd.f32 %v8023_v0, %v2808_v38  ;;  %vm2812_vm10 = vmor %vm2810_vm9, %vm2811_vm8  ;;  %4034 = vmatpush.bf16.msrb.mxu2 %v4740_v2  ;;  %vm2815_vm11 = vcmp.eq.f32.partialorder %v2814_v9, 8.507059e+37  ;;  %v4700_v33 = vor.u32 %v4892_v52, %v4697_v44  ;;  %v4900_v34 = vld [vmem:[#allocation8 + $0x1c0] sm:$0xf0]  ;;  %v8075_v52 = vpop.f32.mrf.mxu1 }
 0x329   : > { %v5120_v30 = vpop.eup %5119  ;;  %3889 = vmatpush.bf16.msrb.mxu3 %v4712_v54  ;;  %3939 = vmatpush.bf16.msrb.mxu0 %v4512_v62  ;;  %v3206_v36 = vadd.f32 %v8029_v56, %v8815_v1  ;;  %v2794_v50 = vmul.f32 %v2793_v13, %v8816_v3  ;;  %v2913_v55 = vadd.f32 1.1283791, %v2912_v6  ;;  %v2934_v42 = vand.u32 2147483647, %v8035_v29  ;;  %v8069_v31 = vpop.f32.mrf.mxu2 }
 0x32a   : > { %v3077_v7 = vmul.f32 %v3029_v5, %v1013_v12  ;;  %v2813_v18 = vsel %vm2812_vm10, %v8023_v0, %v2809_v8  ;;  %v2926_v22 = vmul.f32 %v5120_v30, %v8035_v29  ;;  %v2936_v12 = vand.u32 2147483648, %v8035_v29 }
 0x32b   : > { %v2818_v19 = vsel %vm2815_vm11, %v2817_v25, %v2813_v18  ;;  %v3648_v0 = vadd.f32 %v7755_v20, %v3206_v36  ;;  %vm2931_vm12 = vweird.f32 %v5120_v30  ;;  %v4728_v43 = vor.u32 %v4900_v34, %v4727_v4  ;;  %v8819_v25 = vld [vmem:[#allocation42_spill] sm:$0xff] }
 0x32c   : > { %v8061_v60 = vpack.c.bf16 %v3077_v7, %v3074_v23  ;;  %v2927_v51 = vsub.f32 1.0, %v2926_v22  ;;  %v2819_v45 = vmul.f32 %v2818_v19, %v2794_v50  ;;  %vm2930_vm13 = vweird.f32 %v8035_v29  ;;  %v8817_v23 = vld [vmem:[#allocation22_spill] sm:$0xff]  ;;  %v8820_v50 = vld [vmem:[#allocation25_spill] sm:$0xff] }
 0x32d   : > { %3890 = vmatpush.bf16.msrb.mxu3 %v4700_v33  ;;  %v3697_v20 = vadd.f32 %v3696_v35, %v3648_v0  ;;  %v2914_v57 = vmul.f32 %v2913_v55, %v7659_v17  ;;  %vm2932_vm14 = vmor %vm2930_vm13, %vm2931_vm12  ;;  %v2937_v9 = vor.u32 1.1754944e-38, %v2936_v12  ;;  %4035 = vmatpush.bf16.msrb.mxu2 %v4728_v43  ;;  %vm2935_vm15 = vcmp.eq.f32.partialorder %v2934_v42, 8.507059e+37  ;;  %v4897_v42 = vld [vmem:[#allocation8 + $0x1a8] sm:$0xf0] }
 0x32e   : > { %3779 = vmatmul.bf16.gmra.mxu0 %v8061_v60  ;;  %v2928_v37 = vmul.f32 %v5120_v30, %v2927_v51  ;;  %v4496_v54 = vclamps-f32 %v2819_v45, 1.0  ;;  %v3209_v8 = vadd.f32 %v8029_v56, %v8817_v23  ;;  %v1012_v22 = vmul.f32 0.5, %v8819_v25 }
 0x32f   : > { %v3746_v2 = vadd.f32 %v3745_v27, %v3697_v20  ;;  %v3750_v6 = vpop.f32.mrf.mxu0  ;;  %v8818_v27 = vld [vmem:[#allocation35_spill] sm:$0xff]  ;;  %v3212_v51 = vadd.f32 %v8029_v56, %v8820_v50 }
 0x330   : > { %v2929_v38 = vadd.f32 %v5120_v30, %v2928_v37  ;;  %v3650_v17 = vadd.f32 %v7802_v14, %v3209_v8  ;;  %v3025_v13 = vadd.f32 1.0, %v4496_v54  ;;  %v1009_v18 = vmul.f32 0.5, %v8818_v27  ;;  %v8821_v14 = vld [vmem:[#allocation50_spill] sm:$0xff]  ;;  %v8090_v12 = vpop.f32.mrf.mxu1  ;;  %v4715_v37 = vld [vmem:[#allocation8 + $0x1a0] sm:$0xf]  ;;  %v8824_v8 = vld [vmem:[#allocation37_spill] sm:$0xff] }
 0x331   : > { %4079 = vst [vmem:[%s8077_s16] sm:$0xff] %v3746_v2  ;;  %v8081_v7 = vpop.f32.mrf.mxu2  ;;  %v3653_v0 = vadd.f32 %v7838_v61, %v3212_v51  ;;  %v4716_v34 = vor.u32 %v4897_v42, %v4715_v37  ;;  %v8829_v42 = vld [vmem:[#allocation29_spill] sm:$0xff] }
 0x332   : > { %v2933_v62 = vsel %vm2932_vm14, %v5120_v30, %v2929_v38  ;;  %v3698_v30 = vpop.f32.mrf.mxu3  ;;  %v3073_v36 = vmul.f32 %v3025_v13, %v1009_v18  ;;  %v8822_v38 = vld [vmem:[#allocation32_spill] sm:$0xff]  ;;  %v4894_v13 = vld [vmem:[#allocation8 + $0x190] sm:$0xf0] }
 0x333   : > { %v2938_v5 = vsel %vm2935_vm15, %v2937_v9, %v2933_v62  ;;  %v3699_v1 = vadd.f32 %v3698_v30, %v3650_v17  ;;  %4036 = vmatpush.bf16.msrb.mxu2 %v4716_v34  ;;  %v3215_v20 = vadd.f32 %v8029_v56, %v8822_v38  ;;  %v8825_v17 = vld [vmem:[#allocation70_spill] sm:$0xff]  ;;  %v8830_v38 = vld [vmem:[#allocation44_spill] sm:$0xff] }
 0x334   : > { %v2939_v44 = vmul.f32 %v2938_v5, %v2914_v57  ;;  %v8823_v5 = vld [vmem:[#allocation15_spill] sm:$0xff] }
 0x335   : > { %v3748_v3 = vadd.f32 %v3747_v53, %v3699_v1  ;;  %v3655_v61 = vadd.f32 %v7870_v21, %v3215_v20  ;;  %v3218_v23 = vadd.f32 %v8029_v56, %v8823_v5  ;;  %v8826_v1 = vld [vmem:[#allocation16_spill] sm:$0xff] }
 0x336   : > { %v4499_v29 = vclamps-f32 %v2939_v44, 1.0 }
 0x337   : > { %4082 = vst [vmem:[%s8077_s16 + $0x18] sm:$0xff] %v3748_v3  ;;  %v3752_v45 = vpop.f32.mrf.mxu0  ;;  %v3658_v44 = vadd.f32 %v7907_v16, %v3218_v23 }
 0x338   : > { %v3028_v33 = vadd.f32 1.0, %v4499_v29  ;;  %v4703_v29 = vld [vmem:[#allocation8 + $0x188] sm:$0xf] }
 0x339   : > { %v8092_v53 = vpop.f32.mrf.mxu2  ;;  %v4704_v30 = vor.u32 %v4894_v13, %v4703_v29  ;;  %v8833_v13 = vld [vmem:[#allocation19_spill] sm:$0xff] }
 0x33a   : > { %v3076_v19 = vmul.f32 %v3028_v33, %v1012_v22  ;;  %v3701_v4 = vpop.f32.mrf.mxu3 }
 0x33b   : > { %v3702_v35 = vadd.f32 %v3701_v4, %v3653_v0  ;;  %4037 = vmatpush.bf16.msrb.mxu2 %v4704_v30  ;;  %v8834_v30 = vld [vmem:[#allocation76_spill] sm:$0xff] }
 0x33c   : > { %v3100_v55 = vpack.c.bf16 %v3076_v19, %v3073_v36  ;;  %v3221_v36 = vadd.f32 %v8029_v56, %v8826_v1 }
 0x33d   : > { %v3751_v43 = vadd.f32 %v3750_v6, %v3702_v35 }
 0x33e   : > { %3940 = vmatmul.bf16.vlgmr.msrb.gmra.mxu0 %v8821_v14  ;;  %3730 = vmatmul.bf16.gmra.mxu3 %v3100_v55  ;;  %v3660_v16 = vadd.f32 %v7948_v10, %v3221_v36  ;;  %v8827_v14 = vld [vmem:[#allocation17_spill] sm:$0xff]  ;;  %v8124_v10 = vperm.slane %v8010_v41, 1 }
 0x33f   : > { %3877 = vmatmul.bf16.gmra.mxu2 %v3100_v55  ;;  %4024 = vmatmul.bf16.gmra.mxu1 %v3100_v55  ;;  %4085 = vst [vmem:[%s8077_s16 + $0x30] sm:$0xff] %v3751_v43  ;;  %v3755_v57 = vpop.f32.mrf.mxu0  ;;  %v3224_v0 = vadd.f32 %v8029_v56, %v8827_v14 }
 0x340   : > { %v3207_v20 = vadd.f32 %v8124_v10, %v8830_v38 }
 0x341   : > { %v8098_v54 = vpop.f32.mrf.mxu2  ;;  %v3663_v37 = vadd.f32 %v7982_v40, %v3224_v0 }
 0x342   : > { %v3703_v9 = vpop.f32.mrf.mxu3  ;;  %v3795_v40 = vadd.f32 %v7800_v49, %v3207_v20  ;;  %v8839_v20 = vld [vmem:[#allocation33_spill] sm:$0xff] }
 0x343   : > { %v3704_v62 = vadd.f32 %v3703_v9, %v3655_v61  ;;  %v8831_v61 = vld [vmem:[#allocation18_spill] sm:$0xff] }
 0x345   : > { %v3753_v2 = vadd.f32 %v3752_v45, %v3704_v62  ;;  %v8828_v45 = vld [vmem:[#allocation23_spill] sm:$0xff] }
 0x347   : > { %4088 = vst [vmem:[%s8077_s16 + $0x48] sm:$0xff] %v3753_v2  ;;  %v3757_v18 = vpop.f32.mrf.mxu0 }
 0x349   : > { %v8106_v6 = vpop.f32.mrf.mxu2 }
 0x34a   : > { %v3706_v21 = vpop.f32.mrf.mxu3 }
 0x34b   : > { %v3707_v22 = vadd.f32 %v3706_v21, %v3658_v44  ;;  %v3230_v21 = vadd.f32 %v8029_v56, %v8833_v13 }
 0x34d   : > { %v3756_v33 = vadd.f32 %v3755_v57, %v3707_v22  ;;  %v3227_v57 = vadd.f32 %v8029_v56, %v8831_v61 }
 0x34e   : > { %3945 = vmatmul.bf16.gmra.mxu0 %v8824_v8  ;;  %3891 = vmatmul.bf16.vlgmr.msrb.gmra.mxu3 %v8825_v17 }
 0x34f   : > { %4091 = vst [vmem:[%s8077_s16 + $0x60] sm:$0xff] %v3756_v33  ;;  %4038 = vmatmul.bf16.vlgmr.msrb.gmra.mxu2 %v8825_v17  ;;  %v3760_v51 = vpop.f32.mrf.mxu0  ;;  %v3665_v62 = vadd.f32 %v8020_v47, %v3227_v57  ;;  %v8832_v17 = vld [vmem:[#allocation53_spill] sm:$0xff]  ;;  %v3668_v47 = vadd.f32 %v8050_v15, %v3230_v21  ;;  %v3814_v57 = vpop.f32.mrf.mxu1 }
 0x350   : > { %v3210_v29 = vadd.f32 %v8124_v10, %v8832_v17 }
 0x351   : > { %v8113_v3 = vpop.f32.mrf.mxu2 }
 0x352   : > { %v3708_v19 = vpop.f32.mrf.mxu3  ;;  %v3797_v49 = vadd.f32 %v7836_v26, %v3210_v29 }
 0x353   : > { %v3709_v50 = vadd.f32 %v3708_v19, %v3660_v16 }
 0x355   : > { %v3758_v55 = vadd.f32 %v3757_v18, %v3709_v50  ;;  %v8835_v18 = vld [vmem:[#allocation72_spill] sm:$0xff]  ;;  %v8836_v50 = vld [vmem:[#allocation21_spill] sm:$0xff] }
 0x357   : > { %4094 = vst [vmem:[%s8077_s16 + $0x78] sm:$0xff] %v3758_v55  ;;  %v3762_v9 = vpop.f32.mrf.mxu0  ;;  %v8837_v55 = vld [vmem:[#allocation26_spill] sm:$0xff] }
 0x358   : > { %v3233_v14 = vadd.f32 %v8029_v56, %v8837_v55 }
 0x359   : > { %v8121_v34 = vpop.f32.mrf.mxu2 }
 0x35a   : > { %v3711_v4 = vpop.f32.mrf.mxu3  ;;  %v3670_v15 = vadd.f32 %v8069_v31, %v3233_v14 }
 0x35b   : > { %v3712_v35 = vadd.f32 %v3711_v4, %v3663_v37 }
 0x35d   : > { %v3761_v43 = vadd.f32 %v3760_v51, %v3712_v35  ;;  %v3213_v51 = vadd.f32 %v8124_v10, %v8836_v50 }
 0x35e   : > { %3950 = vmatmul.bf16.gmra.mxu0 %v8828_v45  ;;  %3896 = vmatmul.bf16.gmra.mxu3 %v8829_v42 }
 0x35f   : > { %4097 = vst [vmem:[%s8077_s16 + $0x90] sm:$0xff] %v3761_v43  ;;  %4043 = vmatmul.bf16.gmra.mxu2 %v8829_v42  ;;  %v3765_v22 = vpop.f32.mrf.mxu0  ;;  %v3800_v26 = vadd.f32 %v7878_v24, %v3213_v51  ;;  %v8838_v43 = vld [vmem:[#allocation62_spill] sm:$0xff] }
 0x360   : > { %v3216_v38 = vadd.f32 %v8124_v10, %v8838_v43  ;;  %v8848_v43 = vld [vmem:[#allocation28_spill] sm:$0xff] }
 0x361   : > { %v3843_v5 = vpop.f32.mrf.mxu2 }
 0x362   : > { %v3713_v2 = vpop.f32.mrf.mxu3  ;;  %v8134_v8 = vadd.f32 %v3843_v5, %v3795_v40  ;;  %v3802_v61 = vadd.f32 %v7925_v28, %v3216_v38  ;;  %v8841_v40 = vld [vmem:[#allocation24_spill] sm:$0xff]  ;;  %v8842_v5 = vld [vmem:[#allocation27_spill] sm:$0xff]  ;;  %v3242_v38 = vadd.f32 %v8029_v56, %v8848_v43 }
 0x363   : > { %v3714_v23 = vadd.f32 %v3713_v2, %v3665_v62  ;;  %v3236_v62 = vadd.f32 %v8029_v56, %v8841_v40  ;;  %v8856_v43 = vld [vmem:[#allocation47_spill] sm:$0xff] }
 0x365   : > { %v3763_v44 = vadd.f32 %v3762_v9, %v3714_v23  ;;  %v8840_v9 = vld [vmem:[#allocation49_spill] sm:$0xff]  ;;  %v3673_v2 = vadd.f32 %v8081_v7, %v3236_v62  ;;  %v3219_v23 = vadd.f32 %v8124_v10, %v8842_v5 }
 0x367   : > { %4100 = vst [vmem:[%s8077_s16 + $0xa8] sm:$0xff] %v3763_v44  ;;  %v3767_v4 = vpop.f32.mrf.mxu0  ;;  %v3805_v29 = vadd.f32 %v7992_v39, %v3219_v23  ;;  %v8850_v23 = vld [vmem:[#allocation41_spill] sm:$0xff] }
 0x369   : > { %v3845_v1 = vpop.f32.mrf.mxu2 }
 0x36a   : > { %v3716_v33 = vpop.f32.mrf.mxu3  ;;  %v8145_v16 = vadd.f32 %v3845_v1, %v3797_v49 }
 0x36b   : > { %v3717_v36 = vadd.f32 %v3716_v33, %v3668_v47  ;;  %v8843_v47 = vld [vmem:[#allocation38_spill] sm:$0xff] }
 0x36d   : > { %v3766_v19 = vadd.f32 %v3765_v22, %v3717_v36  ;;  %v8844_v22 = vld [vmem:[#allocation65_spill] sm:$0xff]  ;;  %v8845_v36 = vld [vmem:[#allocation46_spill] sm:$0xff] }
 0x36e   : > { %3955 = vmatmul.bf16.gmra.mxu0 %v8834_v30  ;;  %3901 = vmatmul.bf16.gmra.mxu3 %v8835_v18  ;;  %v3816_v30 = vpop.f32.mrf.mxu1  ;;  %v3222_v33 = vadd.f32 %v8124_v10, %v8844_v22 }
 0x36f   : > { %4103 = vst [vmem:[%s8077_s16 + $0xc0] sm:$0xff] %v3766_v19  ;;  %4048 = vmatmul.bf16.gmra.mxu2 %v8835_v18  ;;  %v3239_v18 = vadd.f32 %v8029_v56, %v8843_v47 }
 0x370   : > { %v3807_v39 = vadd.f32 %v8041_v59, %v3222_v33  ;;  %v8853_v33 = vld [vmem:[#allocation89_spill] sm:$0xff] }
 0x371   : > { %v3848_v45 = vpop.f32.mrf.mxu2  ;;  %v3675_v7 = vadd.f32 %v8092_v53, %v3239_v18 }
 0x372   : > { %v3718_v0 = vpop.f32.mrf.mxu3  ;;  %v8155_v42 = vadd.f32 %v3848_v45, %v3800_v26 }
 0x373   : > { %v3719_v37 = vadd.f32 %v3718_v0, %v3670_v15  ;;  %v3770_v44 = vpop.f32.mrf.mxu0  ;;  %v8846_v15 = vld [vmem:[#allocation36_spill] sm:$0xff] }
 0x374   : > { %v3225_v53 = vadd.f32 %v8124_v10, %v8846_v15  ;;  %v8855_v15 = vld [vmem:[#allocation34_spill] sm:$0xff] }
 0x375   : > { %v3768_v35 = vadd.f32 %v3767_v4, %v3719_v37  ;;  %v8847_v4 = vld [vmem:[#allocation51_spill] sm:$0xff] }
 0x376   : > { %v3819_v26 = vpop.f32.mrf.mxu1  ;;  %v3810_v0 = vadd.f32 %v8075_v52, %v3225_v53  ;;  %v3248_v53 = vadd.f32 %v8029_v56, %v8855_v15 }
 0x377   : > { %4106 = vst [vmem:[%s8077_s16 + $0xd8] sm:$0xff] %v3768_v35 }
 0x379   : > { %v3850_v24 = vpop.f32.mrf.mxu2 }
 0x37a   : > { %v8163_v31 = vadd.f32 %v3850_v24, %v3802_v61 }
 0x37b   : > { %v3772_v50 = vpop.f32.mrf.mxu0 }
 0x37e   : > { %3960 = vmatmul.bf16.gmra.mxu0 %v8839_v20  ;;  %3906 = vmatmul.bf16.gmra.mxu3 %v8840_v9  ;;  %v3821_v59 = vpop.f32.mrf.mxu1  ;;  %v8849_v20 = vld [vmem:[#allocation74_spill] sm:$0xff] }
 0x37f   : > { %4053 = vmatmul.bf16.gmra.mxu2 %v8840_v9  ;;  %v3228_v61 = vadd.f32 %v8124_v10, %v8849_v20 }
 0x381   : > { %v3853_v21 = vpop.f32.mrf.mxu2  ;;  %v3812_v52 = vadd.f32 %v8090_v12, %v3228_v61 }
 0x382   : > { %v8172_v49 = vadd.f32 %v3853_v21, %v3805_v29  ;;  %v8852_v21 = vld [vmem:[#allocation43_spill] sm:$0xff] }
 0x384   : > { %v3721_v17 = vpop.f32.mrf.mxu3 }
 0x385   : > { %v3722_v28 = vadd.f32 %v3721_v17, %v3673_v2 }
 0x386   : > { %v3824_v40 = vpop.f32.mrf.mxu1 }
 0x387   : > { %v3771_v13 = vadd.f32 %v3770_v44, %v3722_v28  ;;  %v3245_v44 = vadd.f32 %v8029_v56, %v8850_v23  ;;  %v8851_v28 = vld [vmem:[#allocation88_spill] sm:$0xff] }
 0x389   : > { %4109 = vst [vmem:[%s8077_s16 + $0xf0] sm:$0xff] %v3771_v13  ;;  %v3855_v55 = vpop.f32.mrf.mxu2  ;;  %v3680_v29 = vadd.f32 %v8106_v6, %v3245_v44  ;;  %v8858_v44 = vld [vmem:[#allocation94_spill] sm:$0xff] }
 0x38a   : > { %v8183_v14 = vadd.f32 %v3855_v55, %v3807_v39 }
 0x38c   : > { %v3723_v1 = vpop.f32.mrf.mxu3 }
 0x38d   : > { %v3724_v19 = vadd.f32 %v3723_v1, %v3675_v7  ;;  %v3234_v1 = vadd.f32 %v8124_v10, %v8853_v33 }
 0x38e   : > { %3965 = vmatmul.bf16.gmra.mxu0 %v8845_v36  ;;  %3911 = vmatmul.bf16.gmra.mxu3 %v7742_v32  ;;  %v3775_v35 = vpop.f32.mrf.mxu0  ;;  %v3826_v22 = vpop.f32.mrf.mxu1 }
 0x38f   : > { %v3773_v51 = vadd.f32 %v3772_v50, %v3724_v19  ;;  %4058 = vmatmul.bf16.gmra.mxu2 %v7742_v32  ;;  %v3678_v32 = vadd.f32 %v8098_v54, %v3242_v38  ;;  %v3231_v54 = vadd.f32 %v8124_v10, %v8851_v28  ;;  %v3817_v6 = vadd.f32 %v3816_v30, %v3234_v1  ;;  %v8854_v50 = vld [vmem:[#allocation71_spill] sm:$0xff] }
 0x390   : > { %v3240_v38 = vadd.f32 %v8124_v10, %v8856_v43  ;;  %v3249_v1 = vadd.f32 %v8124_v10, %v8818_v27 }
 0x391   : > { %4112 = vst [vmem:[%s8077_s16 + $0x108] sm:$0xff] %v3773_v51  ;;  %v3858_v45 = vpop.f32.mrf.mxu2  ;;  %v3815_v13 = vadd.f32 %v3814_v57, %v3231_v54  ;;  %v3237_v51 = vadd.f32 %v8124_v10, %v8854_v50 }
 0x392   : > { %v8190_v37 = vadd.f32 %v3858_v45, %v3810_v0 }
 0x393   : > { %v3820_v55 = vadd.f32 %v3819_v26, %v3237_v51  ;;  %v3822_v26 = vadd.f32 %v3821_v59, %v3240_v38  ;;  %v3252_v51 = vadd.f32 %v8124_v10, %v8819_v25 }
 0x396   : > { %v3777_v17 = vpop.f32.mrf.mxu0  ;;  %v3829_v39 = vpop.f32.mrf.mxu1 }
 0x399   : > { %v3860_v62 = vpop.f32.mrf.mxu2 }
 0x39a   : > { %v8201_v5 = vadd.f32 %v3860_v62, %v3812_v52 }
 0x39e   : > { %3970 = vmatmul.bf16.gmra.mxu0 %v8847_v4  ;;  %3916 = vmatmul.bf16.gmra.mxu3 %v7860_v58  ;;  %v3831_v20 = vpop.f32.mrf.mxu1 }
 0x39f   : > { %4063 = vmatmul.bf16.gmra.mxu2 %v7860_v58 }
 0x3a1   : > { %v3863_v47 = vpop.f32.mrf.mxu2 }
 0x3a2   : > { %v8211_v7 = vadd.f32 %v3863_v47, %v3815_v13 }
 0x3a5   : > { %v3726_v9 = vpop.f32.mrf.mxu3 }
 0x3a6   : > { %v3727_v24 = vadd.f32 %v3726_v9, %v3678_v32  ;;  %v8857_v32 = vld [vmem:[#allocation45_spill] sm:$0xff] }
 0x3a7   : > { %v3251_v9 = vadd.f32 %v8029_v56, %v8857_v32 }
 0x3a8   : > { %v3776_v2 = vadd.f32 %v3775_v35, %v3727_v24 }
 0x3a9   : > { %v3865_v19 = vpop.f32.mrf.mxu2 }
 0x3aa   : > { %4115 = vst [vmem:[%s8077_s16 + $0x120] sm:$0xff] %v3776_v2  ;;  %v8217_v57 = vadd.f32 %v3865_v19, %v3817_v6  ;;  %v3830_v6 = vadd.f32 %v3829_v39, %v3249_v1  ;;  %v8859_v39 = vld [vmem:[#allocation40_spill] sm:$0xff] }
 0x3ab   : > { %v3780_v36 = vpop.f32.mrf.mxu0 }
 0x3ad   : > { %v3728_v58 = vpop.f32.mrf.mxu3 }
 0x3ae   : > { %v3729_v12 = vadd.f32 %v3728_v58, %v3680_v29  ;;  %3975 = vmatmul.bf16.gmra.mxu0 %v8852_v21  ;;  %3921 = vmatmul.bf16.gmra.mxu3 %v7959_v63 }
 0x3af   : > { %4068 = vmatmul.bf16.gmra.mxu2 %v7959_v63  ;;  %v3683_v63 = vadd.f32 %v8113_v3, %v3248_v53  ;;  %v3685_v3 = vadd.f32 %v8121_v34, %v3251_v9  ;;  %v3246_v34 = vadd.f32 %v8124_v10, %v8804_v46 }
 0x3b0   : > { %v3778_v18 = vadd.f32 %v3777_v17, %v3729_v12  ;;  %v3243_v17 = vadd.f32 %v8124_v10, %v8858_v44  ;;  %v8860_v10 = vld [vmem:[#allocation52_spill] sm:$0xff] }
 0x3b1   : > { %v3868_v45 = vpop.f32.mrf.mxu2  ;;  %v3827_v12 = vadd.f32 %v3826_v22, %v3246_v34 }
 0x3b2   : > { %4118 = vst [vmem:[%s8077_s16 + $0x138] sm:$0xff] %v3778_v18  ;;  %v8224_v4 = vadd.f32 %v3868_v45, %v3820_v55  ;;  %v3825_v54 = vadd.f32 %v3824_v40, %v3243_v17  ;;  %v8257_v55 = vperm.slane %v8010_v41, 2 }
 0x3b3   : > { %v3782_v0 = vpop.f32.mrf.mxu0 }
 0x3b4   : > { %v3208_v53 = vadd.f32 %v8257_v55, %v8859_v39 }
 0x3b9   : > { %v3870_v52 = vpop.f32.mrf.mxu2 }
 0x3ba   : > { %v8233_v24 = vadd.f32 %v3870_v52, %v3822_v26  ;;  %v8861_v52 = vld [vmem:[#allocation59_spill] sm:$0xff] }
 0x3bb   : > { %v3941_v62 = vpop.f32.mrf.mxu0 }
 0x3bc   : > { %v3942_v45 = vadd.f32 %v3941_v62, %v3208_v53 }
 0x3be   : > { %3926 = vmatmul.bf16.gmra.mxu3 %v8061_v60 }
 0x3bf   : > { %4073 = vmatmul.bf16.gmra.mxu2 %v8061_v60  ;;  %v3990_v60 = vpop.f32.mrf.mxu1 }
 0x3c0   : > { %v3991_v25 = vadd.f32 %v3990_v60, %v3942_v45 }
 0x3c1   : > { %v3731_v30 = vpop.f32.mrf.mxu3  ;;  %v3873_v59 = vpop.f32.mrf.mxu2 }
 0x3c2   : > { %v3732_v35 = vadd.f32 %v3731_v30, %v3683_v63  ;;  %v8239_v56 = vadd.f32 %v3873_v59, %v3825_v54 }
 0x3c3   : > { %v3943_v58 = vpop.f32.mrf.mxu0 }
 0x3c4   : > { %v3781_v61 = vadd.f32 %v3780_v36, %v3732_v35  ;;  %v3211_v35 = vadd.f32 %v8257_v55, %v8860_v10 }
 0x3c6   : > { %4121 = vst [vmem:[%s8077_s16 + $0x150] sm:$0xff] %v3781_v61 }
 0x3c7   : > { %v3992_v40 = vpop.f32.mrf.mxu1 }
 0x3c9   : > { %v3733_v2 = vpop.f32.mrf.mxu3  ;;  %v3875_v21 = vpop.f32.mrf.mxu2 }
 0x3ca   : > { %v3734_v23 = vadd.f32 %v3733_v2, %v3685_v3  ;;  %v8245_v47 = vadd.f32 %v3875_v21, %v3827_v12  ;;  %v3214_v3 = vadd.f32 %v8257_v55, %v8861_v52 }
 0x3cb   : > { %v3946_v36 = vpop.f32.mrf.mxu0 }
 0x3cc   : > { %v3783_v28 = vadd.f32 %v3782_v0, %v3734_v23  ;;  %v3947_v2 = vadd.f32 %v3946_v36, %v3214_v3 }
 0x3ce   : > { %4124 = vst [vmem:[%s8077_s16 + $0x168] sm:$0xff] %v3783_v28 }
 0x3cf   : > { %v3995_v22 = vpop.f32.mrf.mxu1 }
 0x3d0   : > { %v3996_v28 = vadd.f32 %v3995_v22, %v3947_v2 }
 0x3d1   : > { %v3892_v29 = vpop.f32.mrf.mxu3 }
 0x3d2   : > { %v3893_v13 = vadd.f32 %v3892_v29, %v8134_v8  ;;  %v3878_v8 = vpop.f32.mrf.mxu2 }
 0x3d3   : > { %v8251_v19 = vadd.f32 %v3878_v8, %v3830_v6  ;;  %v3948_v27 = vpop.f32.mrf.mxu0 }
 0x3d4   : > { %4080 = vst [vmem:[%s8077_s16 + $0x8] sm:$0xff] %v3893_v13 }
 0x3d7   : > { %v3997_v30 = vpop.f32.mrf.mxu1 }
 0x3d9   : > { %v3894_v18 = vpop.f32.mrf.mxu3 }
 0x3da   : > { %v3895_v33 = vadd.f32 %v3894_v18, %v8145_v16  ;;  %v3832_v16 = vadd.f32 %v3831_v20, %v3252_v51  ;;  %v3880_v15 = vpop.f32.mrf.mxu2  ;;  %v3944_v20 = vadd.f32 %v3943_v58, %v3211_v35 }
 0x3db   : > { %v3951_v38 = vpop.f32.mrf.mxu0 }
 0x3dc   : > { %4083 = vst [vmem:[%s8077_s16 + $0x20] sm:$0xff] %v3895_v33  ;;  %v8262_v0 = vadd.f32 %v3880_v15, %v3832_v16  ;;  %v3993_v32 = vadd.f32 %v3992_v40, %v3944_v20  ;;  %v8866_v20 = vld [vmem:[#allocation73_spill] sm:$0xff] }
 0x3df   : > { %v4000_v9 = vpop.f32.mrf.mxu1 }
 0x3e1   : > { %v3897_v46 = vpop.f32.mrf.mxu3 }
 0x3e2   : > { %v3898_v50 = vadd.f32 %v3897_v46, %v8155_v42  ;;  %v4039_v41 = vpop.f32.mrf.mxu2 }
 0x3e3   : > { %v4040_v43 = vadd.f32 %v4039_v41, %v3991_v25  ;;  %v3953_v44 = vpop.f32.mrf.mxu0 }
 0x3e4   : > { %4086 = vst [vmem:[%s8077_s16 + $0x38] sm:$0xff] %v3898_v50  ;;  %v8864_v50 = vld [vmem:[#allocation64_spill] sm:$0xff] }
 0x3e5   : > { %4081 = vst [vmem:[%s8077_s16 + $0x10] sm:$0xff] %v4040_v43  ;;  %v3223_v51 = vadd.f32 %v8257_v55, %v8864_v50 }
 0x3e7   : > { %v4002_v29 = vpop.f32.mrf.mxu1 }
 0x3e9   : > { %v3899_v63 = vpop.f32.mrf.mxu3 }
 0x3ea   : > { %v3900_v42 = vadd.f32 %v3899_v63, %v8163_v31  ;;  %v4041_v31 = vpop.f32.mrf.mxu2 }
 0x3eb   : > { %v4042_v62 = vadd.f32 %v4041_v31, %v3993_v32  ;;  %v3956_v12 = vpop.f32.mrf.mxu0 }
 0x3ec   : > { %4089 = vst [vmem:[%s8077_s16 + $0x50] sm:$0xff] %v3900_v42 }
 0x3ed   : > { %4084 = vst [vmem:[%s8077_s16 + $0x28] sm:$0xff] %v4042_v62 }
 0x3ef   : > { %v4005_v6 = vpop.f32.mrf.mxu1 }
 0x3f1   : > { %v3902_v61 = vpop.f32.mrf.mxu3 }
 0x3f2   : > { %v3903_v26 = vadd.f32 %v3902_v61, %v8172_v49  ;;  %v4044_v54 = vpop.f32.mrf.mxu2  ;;  %v8862_v49 = vld [vmem:[#allocation60_spill] sm:$0xff]  ;;  %v3229_v61 = vadd.f32 %v8257_v55, %v8866_v20 }
 0x3f3   : > { %v3217_v60 = vadd.f32 %v8257_v55, %v8862_v49  ;;  %v4045_v59 = vadd.f32 %v4044_v54, %v3996_v28  ;;  %v3958_v22 = vpop.f32.mrf.mxu0 }
 0x3f4   : > { %4092 = vst [vmem:[%s8077_s16 + $0x68] sm:$0xff] %v3903_v26  ;;  %v3959_v32 = vadd.f32 %v3958_v22, %v3229_v61 }
 0x3f5   : > { %v3949_v58 = vadd.f32 %v3948_v27, %v3217_v60  ;;  %4087 = vst [vmem:[%s8077_s16 + $0x40] sm:$0xff] %v4045_v59  ;;  %v3954_v27 = vadd.f32 %v3953_v44, %v3223_v51 }
 0x3f7   : > { %v3998_v21 = vadd.f32 %v3997_v30, %v3949_v58  ;;  %v4007_v53 = vpop.f32.mrf.mxu1  ;;  %v4003_v45 = vadd.f32 %v4002_v29, %v3954_v27 }
 0x3f8   : > { %v4008_v3 = vadd.f32 %v4007_v53, %v3959_v32 }
 0x3f9   : > { %v3904_v23 = vpop.f32.mrf.mxu3 }
 0x3fa   : > { %v3905_v17 = vadd.f32 %v3904_v23, %v8183_v14  ;;  %v4046_v40 = vpop.f32.mrf.mxu2  ;;  %v8863_v14 = vld [vmem:[#allocation63_spill] sm:$0xff] }
 0x3fb   : > { %v3220_v18 = vadd.f32 %v8257_v55, %v8863_v14  ;;  %v4047_v33 = vadd.f32 %v4046_v40, %v3998_v21  ;;  %v3961_v25 = vpop.f32.mrf.mxu0 }
 0x3fc   : > { %4095 = vst [vmem:[%s8077_s16 + $0x80] sm:$0xff] %v3905_v17 }
 0x3fd   : > { %v3952_v1 = vadd.f32 %v3951_v38, %v3220_v18  ;;  %4090 = vst [vmem:[%s8077_s16 + $0x58] sm:$0xff] %v4047_v33  ;;  %v8869_v18 = vld [vmem:[#allocation39_spill] sm:$0xff] }
 0x3fe   : > { %v3238_v33 = vadd.f32 %v8257_v55, %v8869_v18 }
 0x3ff   : > { %v4001_v46 = vadd.f32 %v4000_v9, %v3952_v1  ;;  %v4010_v38 = vpop.f32.mrf.mxu1 }
 0x401   : > { %v3907_v13 = vpop.f32.mrf.mxu3 }
 0x402   : > { %v3908_v34 = vadd.f32 %v3907_v13, %v8190_v37  ;;  %v4049_v37 = vpop.f32.mrf.mxu2 }
 0x403   : > { %v4050_v16 = vadd.f32 %v4049_v37, %v4001_v46  ;;  %v3963_v31 = vpop.f32.mrf.mxu0 }
 0x404   : > { %4098 = vst [vmem:[%s8077_s16 + $0x98] sm:$0xff] %v3908_v34 }
 0x405   : > { %4093 = vst [vmem:[%s8077_s16 + $0x70] sm:$0xff] %v4050_v16 }
 0x407   : > { %v4012_v44 = vpop.f32.mrf.mxu1 }
 0x409   : > { %v3909_v36 = vpop.f32.mrf.mxu3 }
 0x40a   : > { %v3910_v8 = vadd.f32 %v3909_v36, %v8201_v5  ;;  %v4051_v63 = vpop.f32.mrf.mxu2  ;;  %v8865_v5 = vld [vmem:[#allocation69_spill] sm:$0xff] }
 0x40b   : > { %v3226_v42 = vadd.f32 %v8257_v55, %v8865_v5  ;;  %v4052_v30 = vadd.f32 %v4051_v63, %v4003_v45  ;;  %v3966_v49 = vpop.f32.mrf.mxu0  ;;  %v8871_v63 = vld [vmem:[#allocation93_spill] sm:$0xff] }
 0x40c   : > { %4101 = vst [vmem:[%s8077_s16 + $0xb0] sm:$0xff] %v3910_v8  ;;  %v3967_v36 = vadd.f32 %v3966_v49, %v3238_v33  ;;  %v3244_v5 = vadd.f32 %v8257_v55, %v8871_v63 }
 0x40d   : > { %v3957_v41 = vadd.f32 %v3956_v12, %v3226_v42  ;;  %4096 = vst [vmem:[%s8077_s16 + $0x88] sm:$0xff] %v4052_v30 }
 0x40f   : > { %v4006_v43 = vadd.f32 %v4005_v6, %v3957_v41  ;;  %v4015_v12 = vpop.f32.mrf.mxu1 }
 0x410   : > { %v4016_v22 = vadd.f32 %v4015_v12, %v3967_v36 }
 0x411   : > { %v3912_v15 = vpop.f32.mrf.mxu3 }
 0x412   : > { %v3913_v39 = vadd.f32 %v3912_v15, %v8211_v7  ;;  %v4054_v7 = vpop.f32.mrf.mxu2 }
 0x413   : > { %v4055_v26 = vadd.f32 %v4054_v7, %v4006_v43  ;;  %v3968_v14 = vpop.f32.mrf.mxu0  ;;  %v8872_v43 = vld [vmem:[#allocation95_spill] sm:$0xff] }
 0x414   : > { %4104 = vst [vmem:[%s8077_s16 + $0xc8] sm:$0xff] %v3913_v39 }
 0x415   : > { %4099 = vst [vmem:[%s8077_s16 + $0xa0] sm:$0xff] %v4055_v26 }
 0x417   : > { %v4017_v46 = vpop.f32.mrf.mxu1 }
 0x419   : > { %v3914_v10 = vpop.f32.mrf.mxu3 }
 0x41a   : > { %v3915_v35 = vadd.f32 %v3914_v10, %v8217_v57  ;;  %v4056_v62 = vpop.f32.mrf.mxu2  ;;  %v8867_v57 = vld [vmem:[#allocation77_spill] sm:$0xff] }
 0x41b   : > { %v3232_v2 = vadd.f32 %v8257_v55, %v8867_v57  ;;  %v4057_v23 = vadd.f32 %v4056_v62, %v4008_v3  ;;  %v3971_v16 = vpop.f32.mrf.mxu0 }
 0x41c   : > { %4107 = vst [vmem:[%s8077_s16 + $0xe0] sm:$0xff] %v3915_v35  ;;  %v3972_v30 = vadd.f32 %v3971_v16, %v3244_v5 }
 0x41d   : > { %v3962_v17 = vadd.f32 %v3961_v25, %v3232_v2  ;;  %4102 = vst [vmem:[%s8077_s16 + $0xb8] sm:$0xff] %v4057_v23  ;;  %v3253_v23 = vadd.f32 %v8257_v55, %v8814_v11 }
 0x41f   : > { %v4011_v60 = vadd.f32 %v4010_v38, %v3962_v17  ;;  %v4020_v45 = vpop.f32.mrf.mxu1  ;;  %v3247_v38 = vadd.f32 %v8257_v55, %v8872_v43 }
 0x420   : > { %v4021_v35 = vadd.f32 %v4020_v45, %v3972_v30 }
 0x421   : > { %v3917_v9 = vpop.f32.mrf.mxu3 }
 0x422   : > { %v3918_v52 = vadd.f32 %v3917_v9, %v8224_v4  ;;  %v4059_v59 = vpop.f32.mrf.mxu2  ;;  %v8868_v4 = vld [vmem:[#allocation55_spill] sm:$0xff] }
 0x423   : > { %v3235_v29 = vadd.f32 %v8257_v55, %v8868_v4  ;;  %v4060_v58 = vadd.f32 %v4059_v59, %v4011_v60  ;;  %v3973_v41 = vpop.f32.mrf.mxu0 }
 0x424   : > { %4110 = vst [vmem:[%s8077_s16 + $0xf8] sm:$0xff] %v3918_v52  ;;  %v3974_v61 = vadd.f32 %v3973_v41, %v3247_v38 }
 0x425   : > { %v3964_v13 = vadd.f32 %v3963_v31, %v3235_v29  ;;  %4105 = vst [vmem:[%s8077_s16 + $0xd0] sm:$0xff] %v4060_v58  ;;  %v3250_v31 = vadd.f32 %v8257_v55, %v8813_v48 }
 0x427   : > { %v4013_v40 = vadd.f32 %v4012_v44, %v3964_v13  ;;  %v4022_v20 = vpop.f32.mrf.mxu1 }
 0x428   : > { %v4023_v32 = vadd.f32 %v4022_v20, %v3974_v61 }
 0x429   : > { %v3919_v28 = vpop.f32.mrf.mxu3 }
 0x42a   : > { %v3920_v54 = vadd.f32 %v3919_v28, %v8233_v24  ;;  %v4061_v24 = vpop.f32.mrf.mxu2 }
 0x42b   : > { %v4062_v1 = vadd.f32 %v4061_v24, %v4013_v40  ;;  %v3976_v26 = vpop.f32.mrf.mxu0 }
 0x42c   : > { %4113 = vst [vmem:[%s8077_s16 + $0x110] sm:$0xff] %v3920_v54  ;;  %v3977_v52 = vadd.f32 %v3976_v26, %v3250_v31 }
 0x42d   : > { %4108 = vst [vmem:[%s8077_s16 + $0xe8] sm:$0xff] %v4062_v1 }
 0x42f   : > { %v4025_v3 = vpop.f32.mrf.mxu1 }
 0x430   : > { %v4026_v62 = vadd.f32 %v4025_v3, %v3977_v52 }
 0x431   : > { %v3922_v34 = vpop.f32.mrf.mxu3 }
 0x432   : > { %v3923_v21 = vadd.f32 %v3922_v34, %v8239_v56  ;;  %v4064_v37 = vpop.f32.mrf.mxu2  ;;  %v8870_v56 = vld [vmem:[#allocation92_spill] sm:$0xff] }
 0x433   : > { %v3241_v50 = vadd.f32 %v8257_v55, %v8870_v56  ;;  %v4065_v51 = vadd.f32 %v4064_v37, %v4016_v22  ;;  %v3978_v57 = vpop.f32.mrf.mxu0 }
 0x434   : > { %4116 = vst [vmem:[%s8077_s16 + $0x128] sm:$0xff] %v3923_v21  ;;  %v3979_v17 = vadd.f32 %v3978_v57, %v3253_v23 }
 0x435   : > { %v3969_v27 = vadd.f32 %v3968_v14, %v3241_v50  ;;  %4111 = vst [vmem:[%s8077_s16 + $0x100] sm:$0xff] %v4065_v51 }
 0x437   : > { %v4018_v53 = vadd.f32 %v4017_v46, %v3969_v27  ;;  %v4027_v48 = vpop.f32.mrf.mxu1 }
 0x438   : > { %v4028_v28 = vadd.f32 %v4027_v48, %v3979_v17 }
 0x439   : > { %v3924_v6 = vpop.f32.mrf.mxu3 }
 0x43a   : > { %v3925_v8 = vadd.f32 %v3924_v6, %v8245_v47  ;;  %v4066_v47 = vpop.f32.mrf.mxu2 }
 0x43b   : > { %v4067_v42 = vadd.f32 %v4066_v47, %v4018_v53 }
 0x43c   : > { %4119 = vst [vmem:[%s8077_s16 + $0x140] sm:$0xff] %v3925_v8 }
 0x43d   : > { %4114 = vst [vmem:[%s8077_s16 + $0x118] sm:$0xff] %v4067_v42 }
 0x441   : > { %v3927_v15 = vpop.f32.mrf.mxu3 }
 0x442   : > { %v3928_v39 = vadd.f32 %v3927_v15, %v8251_v19  ;;  %v4069_v19 = vpop.f32.mrf.mxu2 }
 0x443   : > { %v4070_v7 = vadd.f32 %v4069_v19, %v4021_v35 }
 0x444   : > { %4122 = vst [vmem:[%s8077_s16 + $0x158] sm:$0xff] %v3928_v39 }
 0x445   : > { %4117 = vst [vmem:[%s8077_s16 + $0x130] sm:$0xff] %v4070_v7 }
 0x449   : > { %v3929_v25 = vpop.f32.mrf.mxu3 }
 0x44a   : > { %v3930_v10 = vadd.f32 %v3929_v25, %v8262_v0  ;;  %v4071_v9 = vpop.f32.mrf.mxu2 }
 0x44b   : > { %v4072_v0 = vadd.f32 %v4071_v9, %v4023_v32 }
 0x44c   : > { %4125 = vst [vmem:[%s8077_s16 + $0x170] sm:$0xff] %v3930_v10 }
 0x44d   : > { %4120 = vst [vmem:[%s8077_s16 + $0x148] sm:$0xff] %v4072_v0 }
 0x452   : > { %v4074_v2 = vpop.f32.mrf.mxu2 }
 0x453   : > { %v4075_v44 = vadd.f32 %v4074_v2, %v4026_v62 }
 0x455   : > { %4123 = vst [vmem:[%s8077_s16 + $0x160] sm:$0xff] %v4075_v44 }
 0x45a   : > { %v4076_v54 = vpop.f32.mrf.mxu2 }
 0x45b   : > { %v4077_v49 = vadd.f32 %v4076_v54, %v4028_v28 }
 0x45d   : > { %4126 = vst [vmem:[%s8077_s16 + $0x178] sm:$0xff] %v4077_v49 }
 0x45e   : > { %5268 = shalt.err (!%p5265_p10)
}
 0x45f   : > { %s5324_s15 = smov 384   ;;  %s5325_s14 = smov 24  }
 0x460   : > { %4956 = dma.vmem_to_hbm [thread:$0]  (%p5439_p7), %s4142_s13, 6144, %s4144_s11, %s4128_s22, %s5324_s15, %s5324_s15, %s5325_s14  }
 0x461 PF: > { %s4158_s16 = sand.u32 1, %s5303_s18   ;;  %p8873_p12 = scmp.ge.s32.totalorder %s5315_s21, 2 }
 0x462   : > { %s4159_s17 = scalar_lea.sflag [#allocation4], %s4158_s16 }
 0x463   : > { %p4973_p13 = pnand %p8873_p12, %p5391_p6 }
 0x465   : > { %p4974_p0 = pneg %p4973_p13 }
 0x467   : > { %5298 = dma.done.wait (%p4974_p0), %s4159_s17, 6144  }
 0x468   : > { %5300 = vsyncadd (%p4974_p0), %s4159_s17, 4294961152  ;;  %p20_p3 = scmp.ge.s32.totalorder %s5423_s27, 4   ;;  %s8874_s18 = smov %s5307_s19 }
 0x469   : > { %s8875_s19 = smov %s5311_s20  ;;  %s8876_s20 = smov %s5435_s6 }
 0x46a   : > { %s8877_s21 = smov %s5423_s27  ;;  %22 = sbr.rel (!%p20_p3) target bundleno = 7 (0x7), region = 97 }
 0x46f   :  { %4165 = vsyncpa [#allocation3], 1 }
 0x470   :  { %4167 = vsyncpa [#allocation3 + $0x1], 1 }
 0x471   :  { %4168 = vsyncpa [#allocation6], 1 }
 0x472   :  { %4169 = vsyncpa [#allocation9], 1 }
 0x473   :  { %4170 = vsyncpa [#allocation4], 1 }
 0x474   :  { %4172 = vsyncpa [#allocation4 + $0x1], 1 }

</bundles_post_ra>
